<compile_context>
chip_gen: v7x
topology: tpu7x:2x2x1
jax: 0.10.0
libtpu: 0.0.40
codegen_flags: <defaults>
</compile_context>

<pallas_src>
import functools

import jax
import jax.numpy as jnp
from jax.experimental import pallas as pl
from jax.experimental.pallas import tpu as pltpu

# --- module constants (from models/unet.py) ---------------------------------
COMPRESSION_FACTOR = 4
FEATURE_VECTOR_SIZE = 256
IMAGE_DIMENSION = 128
N_COUNTIES = 67

DOWNSIZED = IMAGE_DIMENSION // 16                      # 8
OUTPUT_LAYER_SIZE = DOWNSIZED * DOWNSIZED * 64         # 4096
HIDDEN = FEATURE_VECTOR_SIZE * COMPRESSION_FACTOR      # 1024


# --- Pallas kernel: fused two-layer MLP with ReLU ----------------------------
def _decoder_mlp_kernel(x_ref, w1_ref, b1_ref, w2_ref, b2_ref, o_ref):
    """Shared body for both schedules.

    x_ref : (TM, 256)     bf16  row tile
    w1_ref: (256, 1024)   bf16  full (resident)
    b1_ref: (1, 1024)     f32   full
    w2_ref: (1024, TN)    bf16  fc2 weight tile (TN = 2048 or 4096)
    b2_ref: (1, TN)       f32
    o_ref : (TM, TN)      bf16  output tile
    """
    # fc1: bf16 MXU matmul, f32 accumulate; bias + ReLU in f32 (v5e-safe).
    h = jnp.dot(x_ref[...], w1_ref[...], preferred_element_type=jnp.float32)
    h = jnp.maximum(h + b1_ref[...], 0.0)
    # dropout1 (p=0.3) is identity in eval mode.
    h = h.astype(jnp.bfloat16)

    # fc2 tile: bf16 MXU matmul, f32 accumulate; bias + ReLU in f32.
    out = jnp.dot(h, w2_ref[...], preferred_element_type=jnp.float32)
    out = jnp.maximum(out + b2_ref[...], 0.0)
    o_ref[...] = out.astype(o_ref.dtype)


def prepare_decoder_params(w1, b1, w2, b2):
    """One-time parameter preparation (call once, reuse across forward calls).

    Weights are stored bf16 for the MXU; biases stay f32 for the epilogue.
    Weights are (in, out) so the kernel computes x @ W + b (same math as
    PyTorch's Linear, which stores (out, in)).
    """
    return (
        jnp.asarray(w1, jnp.bfloat16),
        jnp.asarray(b1, jnp.float32).reshape(1, HIDDEN),
        jnp.asarray(w2, jnp.bfloat16),
        jnp.asarray(b2, jnp.float32).reshape(1, OUTPUT_LAYER_SIZE),
    )


@functools.partial(jax.jit, static_argnames=("horizon", "out_dtype"))
def decoder_forward(inp, w1b, b1f, w2b, b2f, *, horizon, out_dtype=jnp.bfloat16):
    """inp: (N_COUNTIES, horizon, 256) float32; weights pre-cast via
    prepare_decoder_params.  Returns (N_COUNTIES, horizon, 64, 8, 8) out_dtype."""
    M = N_COUNTIES * horizon
    x = inp.reshape(M, FEATURE_VECTOR_SIZE).astype(jnp.bfloat16)

    flops = 2 * M * (FEATURE_VECTOR_SIZE * HIDDEN + HIDDEN * OUTPUT_LAYER_SIZE)
    out_bytes = M * OUTPUT_LAYER_SIZE * jnp.dtype(out_dtype).itemsize
    w_bytes = (FEATURE_VECTOR_SIZE * HIDDEN + HIDDEN * OUTPUT_LAYER_SIZE) * 2
    b_bytes = (HIDDEN + OUTPUT_LAYER_SIZE) * 4

    if M >= 1024:
        # --- large-horizon: W2-resident, 1-D grid over row tiles ------------
        TM = min(512, (M // 16) * 16)          # multiple of 16, <= M (no padding)
        grid = (pl.cdiv(M, TM),)               # ragged last row tile is masked
        in_specs = [
            pl.BlockSpec((TM, FEATURE_VECTOR_SIZE), lambda i: (i, 0)),        # x
            pl.BlockSpec((FEATURE_VECTOR_SIZE, HIDDEN), lambda i: (0, 0)),    # W1
            pl.BlockSpec((1, HIDDEN), lambda i: (0, 0)),                      # b1
            pl.BlockSpec((HIDDEN, OUTPUT_LAYER_SIZE), lambda i: (0, 0)),      # W2 full
            pl.BlockSpec((1, OUTPUT_LAYER_SIZE), lambda i: (0, 0)),           # b2
        ]
        out_spec = pl.BlockSpec((TM, OUTPUT_LAYER_SIZE), lambda i: (i, 0))
        dim_sem = ("parallel",)
        vmem_limit = 40 * 1024 * 1024          # ~26 MiB footprint; < 64 MiB (v7x)
        x_bytes = M * FEATURE_VECTOR_SIZE * 2  # x read once
    else:
        # --- small-horizon: 2-D grid, TN=2048 (2 W2 tiles -> 2 TCs on v7x) --
        TN = 2048
        TM = min(256, (M // 16) * 16)          # M >= 67, so TM >= 64
        grid = (OUTPUT_LAYER_SIZE // TN, pl.cdiv(M, TM))   # j outer: W2 streamed once
        in_specs = [
            pl.BlockSpec((TM, FEATURE_VECTOR_SIZE), lambda j, i: (i, 0)),     # x
            pl.BlockSpec((FEATURE_VECTOR_SIZE, HIDDEN), lambda j, i: (0, 0)), # W1
            pl.BlockSpec((1, HIDDEN), lambda j, i: (0, 0)),                   # b1
            pl.BlockSpec((HIDDEN, TN), lambda j, i: (0, j)),                  # W2 tile
            pl.BlockSpec((1, TN), lambda j, i: (0, j)),                       # b2 tile
        ]
        out_spec = pl.BlockSpec((TM, TN), lambda j, i: (i, j))
        dim_sem = ("parallel", "parallel")
        vmem_limit = 32 * 1024 * 1024          # ~12 MiB footprint
        x_bytes = (OUTPUT_LAYER_SIZE // TN) * M * FEATURE_VECTOR_SIZE * 2  # refetched per j

    out = pl.pallas_call(
        _decoder_mlp_kernel,
        out_shape=jax.ShapeDtypeStruct((M, OUTPUT_LAYER_SIZE), out_dtype),
        grid_spec=pltpu.PrefetchScalarGridSpec(
            num_scalar_prefetch=0,
            grid=grid,
            in_specs=in_specs,
            out_specs=out_spec,
        ),
        compiler_params=pltpu.CompilerParams(
            dimension_semantics=dim_sem,
            vmem_limit_bytes=vmem_limit,
        ),
        cost_estimate=pl.CostEstimate(
            flops=flops,
            transcendentals=0,
            bytes_accessed=x_bytes + w_bytes + b_bytes + out_bytes,
        ),
    )(x, w1b, b1f, w2b, b2f)

    return out.reshape(N_COUNTIES, horizon, 64, DOWNSIZED, DOWNSIZED)


def _reference_forward(inp, w1, b1, w2, b2, horizon):
    # bf16-matched reference (same dtype policy as the kernel, f32 accumulation,
    # but f32 final store).
    x = inp.reshape(N_COUNTIES * horizon, FEATURE_VECTOR_SIZE).astype(jnp.bfloat16)
    h = jnp.dot(x, w1.astype(jnp.bfloat16), preferred_element_type=jnp.float32)
    h = jnp.maximum(h + b1.reshape(1, -1), 0.0).astype(jnp.bfloat16)
    o = jnp.dot(h, w2.astype(jnp.bfloat16), preferred_element_type=jnp.float32)
    o = jnp.maximum(o + b2.reshape(1, -1), 0.0)
    return o.reshape(N_COUNTIES, horizon, 64, DOWNSIZED, DOWNSIZED)


if __name__ == "__main__":
    key = jax.random.PRNGKey(0)
    k_in, k_w1, k_b1, k_w2, k_b2 = jax.random.split(key, 5)

    w1 = jax.random.normal(k_w1, (FEATURE_VECTOR_SIZE, HIDDEN), jnp.float32) * (
        1.0 / jnp.sqrt(FEATURE_VECTOR_SIZE)
    )
    b1 = jax.random.normal(k_b1, (1, HIDDEN), jnp.float32) * 0.01
    w2 = jax.random.normal(k_w2, (HIDDEN, OUTPUT_LAYER_SIZE), jnp.float32) * (
        1.0 / jnp.sqrt(HIDDEN)
    )
    b2 = jax.random.normal(k_b2, (1, OUTPUT_LAYER_SIZE), jnp.float32) * 0.01

    # One-time bf16 parameter prep (no per-call weight converts).
    w1b, b1f, w2b, b2f = prepare_decoder_params(w1, b1, w2, b2)

    ok = True
    # horizon=2 exercises the small-M (TN=2048, 2-D grid) schedule;
    # horizon=16 (M=1072) exercises the W2-resident 1-D schedule.
    for horizon in (2, 16):
        inp = jax.random.normal(
            k_in, (N_COUNTIES, horizon, FEATURE_VECTOR_SIZE), jnp.float32
        )
        out = decoder_forward(inp, w1b, b1f, w2b, b2f, horizon=horizon)
        out = jax.block_until_ready(out)
        assert out.shape == (N_COUNTIES, horizon, 64, DOWNSIZED, DOWNSIZED), out.shape

        ref = _reference_forward(inp, w1, b1, w2, b2, horizon)
        ok = ok and bool(
            jnp.allclose(out.astype(jnp.float32), ref, atol=2e-2, rtol=2e-2)
        )

    assert ok, "mismatch vs reference"
    print("KERNEL_OK")
</pallas_src>

<mosaic_0001>
module attributes {stable_mosaic.version = 11 : i64} {
  func.func @_decoder_mlp_kernel(%arg0: i32, %arg1: i32, %arg2: memref<128x256xbf16, #tpu.memory_space<vmem>>, %arg3: memref<256x1024xbf16, #tpu.memory_space<vmem>>, %arg4: memref<1x1024xf32, #tpu.memory_space<vmem>>, %arg5: memref<1024x2048xbf16, #tpu.memory_space<vmem>>, %arg6: memref<1x2048xf32, #tpu.memory_space<vmem>>, %arg7: memref<128x2048xbf16, #tpu.memory_space<vmem>>) attributes {dimension_semantics = [#tpu.dimension_semantics<parallel>, #tpu.dimension_semantics<parallel>], iteration_bounds = array<i64: 2, 2>, scalar_prefetch = 0 : i64, scratch_operands = 0 : i64, tpu.core_type = #tpu.core_type<tc>, window_params = [{transform_indices = @transform_0, window_bounds = array<i64: 128, 256>}, {pipeline_mode = #tpu.pipeline_mode<synchronous>, transform_indices = @transform_1, window_bounds = array<i64: 256, 1024>}, {pipeline_mode = #tpu.pipeline_mode<synchronous>, transform_indices = @transform_2, window_bounds = array<i64: 1, 1024>}, {transform_indices = @transform_3, window_bounds = array<i64: 1024, 2048>}, {transform_indices = @transform_4, window_bounds = array<i64: 1, 2048>}, {transform_indices = @transform_5, window_bounds = array<i64: 128, 2048>}]} {
    %c0 = arith.constant 0 : index
    %c0_0 = arith.constant 0 : index
    %0 = vector.load %arg2[%c0, %c0_0] : memref<128x256xbf16, #tpu.memory_space<vmem>>, vector<128x256xbf16>
    %c0_1 = arith.constant 0 : index
    %c0_2 = arith.constant 0 : index
    %1 = vector.load %arg3[%c0_1, %c0_2] : memref<256x1024xbf16, #tpu.memory_space<vmem>>, vector<256x1024xbf16>
    %cst = arith.constant dense<0.000000e+00> : vector<128x1024xf32>
    %2 = tpu.matmul %0, %1, %cst {dimension_numbers = #tpu.dot_dimension_numbers<[1], [0], [0], [1], [0, 0, 1, 1], [], []>} : vector<128x256xbf16>, vector<256x1024xbf16>, vector<128x1024xf32> -> vector<128x1024xf32>
    %c0_3 = arith.constant 0 : index
    %c0_4 = arith.constant 0 : index
    %3 = vector.load %arg4[%c0_3, %c0_4] : memref<1x1024xf32, #tpu.memory_space<vmem>>, vector<1x1024xf32>
    %4 = vector.broadcast %3 : vector<1x1024xf32> to vector<128x1024xf32>
    %5 = arith.addf %2, %4 : vector<128x1024xf32>
    %cst_5 = arith.constant 0.000000e+00 : f32
    %6 = vector.broadcast %cst_5 : f32 to vector<128x1024xf32>
    %7 = arith.maximumf %5, %6 : vector<128x1024xf32>
    %8 = arith.truncf %7 : vector<128x1024xf32> to vector<128x1024xbf16>
    %c0_6 = arith.constant 0 : index
    %c0_7 = arith.constant 0 : index
    %9 = vector.load %arg5[%c0_6, %c0_7] : memref<1024x2048xbf16, #tpu.memory_space<vmem>>, vector<1024x2048xbf16>
    %cst_8 = arith.constant dense<0.000000e+00> : vector<128x2048xf32>
    %10 = tpu.matmul %8, %9, %cst_8 {dimension_numbers = #tpu.dot_dimension_numbers<[1], [0], [0], [1], [0, 0, 1, 1], [], []>} : vector<128x1024xbf16>, vector<1024x2048xbf16>, vector<128x2048xf32> -> vector<128x2048xf32>
    %c0_9 = arith.constant 0 : index
    %c0_10 = arith.constant 0 : index
    %11 = vector.load %arg6[%c0_9, %c0_10] : memref<1x2048xf32, #tpu.memory_space<vmem>>, vector<1x2048xf32>
    %12 = vector.broadcast %11 : vector<1x2048xf32> to vector<128x2048xf32>
    %13 = arith.addf %10, %12 : vector<128x2048xf32>
    %cst_11 = arith.constant 0.000000e+00 : f32
    %14 = vector.broadcast %cst_11 : f32 to vector<128x2048xf32>
    %15 = arith.maximumf %13, %14 : vector<128x2048xf32>
    %16 = arith.truncf %15 : vector<128x2048xf32> to vector<128x2048xbf16>
    %c0_12 = arith.constant 0 : index
    %c0_13 = arith.constant 0 : index
    %17 = vector.load %arg7[%c0_12, %c0_13] : memref<128x2048xbf16, #tpu.memory_space<vmem>>, vector<128x2048xbf16>
    tpu.vector_store %arg7[%c0_12, %c0_13], %16 {strides = array<i32>} : memref<128x2048xbf16, #tpu.memory_space<vmem>>, vector<128x2048xbf16>,
    return
  }
  func.func @transform_0(%arg0: i32, %arg1: i32) -> (i32, i32) {
    %c0_i32 = arith.constant 0 : i32
    %c0_i32_0 = arith.constant 0 : i32
    return %arg1, %c0_i32 : i32, i32
  }
  func.func @transform_1(%arg0: i32, %arg1: i32) -> (i32, i32) {
    %c0_i32 = arith.constant 0 : i32
    %c0_i32_0 = arith.constant 0 : i32
    %c0_i32_1 = arith.constant 0 : i32
    return %c0_i32, %c0_i32_0 : i32, i32
  }
  func.func @transform_2(%arg0: i32, %arg1: i32) -> (i32, i32) {
    %c0_i32 = arith.constant 0 : i32
    %c0_i32_0 = arith.constant 0 : i32
    %c0_i32_1 = arith.constant 0 : i32
    return %c0_i32, %c0_i32_0 : i32, i32
  }
  func.func @transform_3(%arg0: i32, %arg1: i32) -> (i32, i32) {
    %c0_i32 = arith.constant 0 : i32
    %c0_i32_0 = arith.constant 0 : i32
    return %c0_i32, %arg0 : i32, i32
  }
  func.func @transform_4(%arg0: i32, %arg1: i32) -> (i32, i32) {
    %c0_i32 = arith.constant 0 : i32
    %c0_i32_0 = arith.constant 0 : i32
    return %c0_i32, %arg0 : i32, i32
  }
  func.func @transform_5(%arg0: i32, %arg1: i32) -> (i32, i32) {
    %c0_i32 = arith.constant 0 : i32
    return %arg1, %arg0 : i32, i32
  }
}

</mosaic_0001>

<bundles_post_ra>
// kernel: decoder_forward.1
= control target key start
LH: loop header
LB: loop body
LE: loop exit
PB: predicated region body
PF: predicated region fallthrough
CT: control target
= control target key end

     0   :  { %s20385_s0 = inlined_call_operand.vmem [shape: bf16[134,256], index: 0, kind: input, shape index: {}]   ;;  %s20386_s1 = inlined_call_operand.hbm [shape: bf16[256,1024], index: 1, kind: input, shape index: {}]   ;;  %s20387_s2 = inlined_call_operand.hbm [shape: f32[1,1024], index: 2, kind: input, shape index: {}]   ;;  %s20388_s3 = inlined_call_operand.hbm [shape: bf16[1024,4096], index: 3, kind: input, shape index: {}]   ;;  %s20389_s4 = inlined_call_operand.hbm [shape: f32[1,4096], index: 4, kind: input, shape index: {}]   ;;  %s20390_s5 = inlined_call_operand.vmem [shape: bf16[134,4096], index: 5, kind: output, shape index: {}]  }
   0x1   :  { %20556 = sst [smem:[#allocation68_spill]] %s20386_s1 }
   0x2   :  { %20557 = sst [smem:[#allocation69_spill]] %s20388_s3 }
   0x3   :  { %20558 = sst [smem:[#allocation70_spill]] %s20390_s5 }
   0x4   :  { %10 = vsyncpa [#allocation3], 0 }
   0x5   :  { %11 = vsyncpa [#allocation5], 0  ;;  %s16306_s18 = smov 0   ;;  %s16308_s19 = smov 0  }
   0x6   :  { %s16310_s20 = smov 0   ;;  %s16312_s21 = smov 0  }
   0x7   :  { %s16314_s22 = smov 0   ;;  %s16316_s23 = smov 0  }
   0x8   :  { %s16318_s24 = smov 0   ;;  %s16320_s25 = smov 0  }
   0x9   :  { %s16322_s26 = smov 0   ;;  %s16324_s27 = smov 0  }
   0xa LB: > { %20559 = sst [smem:[#allocation12_spill]] %s16201_s19  ;;  %s16355_s28 = sadd.s32 4294967295, %s16233_s27   ;;  %s16233_s27 = sphi %s16324_s27, %s17_s27   ;;  %s16229_s26 = sphi %s16322_s26, %s20772_s26   ;;  %s16225_s25 = sphi %s16320_s25, %s20766_s25   ;;  %s16221_s24 = sphi %s16318_s24, %s20771_s24   ;;  %s16217_s23 = sphi %s16316_s23, %s20765_s23   ;;  %s16213_s22 = sphi %s16314_s22, %s20770_s22   ;;  %s16209_s21 = sphi %s16312_s21, %s20769_s21   ;;  %s16205_s20 = sphi %s16310_s20, %s20768_s20   ;;  %s16201_s19 = sphi %s16308_s19, %s20763_s19   ;;  %s16197_s18 = sphi %s16306_s18, %s20762_s18  }
   0xb   : > { %20560 = sst [smem:[#allocation13_spill]] %s16221_s24  ;;  %p111_p0 = scmp.ne.s32.totalorder %s16213_s22, %s16209_s21 }
   0xc   : > { %20561 = sst [smem:[#allocation14_spill]] %s16225_s25  ;;  %p112_p1 = scmp.eq.s32.totalorder %s16233_s27, 0 }
   0xd   : > { %20562 = sst [smem:[#allocation15_spill]] %s16233_s27  ;;  %p117_p2 = scmp.ne.s32.totalorder %s16209_s21, %s16205_s20 }
   0xe   : > { %p20391_p3 = scmp.eq.s32.totalorder %s16355_s28, 0  ;;  %p16363_p4 = por %p112_p1, %p111_p0 }
   0xf   : > { %p168_p6 = scmp.ne.s32.totalorder %s16201_s19, %s16197_s18  ;;  %p169_p7 = scmp.eq.s32.totalorder %s16355_s28, 3 }
  0x10   : > { %p16370_p5 = por %p20391_p3, %p117_p2  ;;  %p13294_p8 = scmp.ge.s32.totalorder %s16233_s27, 1 }
  0x11   : > { %p182_p9 = scmp.lt.s32.totalorder %s16233_s27, 5  ;;  %p16379_p10 = por %p169_p7, %p168_p6 }
  0x12   : > { %s20564_s7 = scalar_select %p16370_p5, 1, 0 }
  0x13   : > { %s20565_s8 = scalar_select %p16379_p10, 1, 0 }
  0x14   : > { %p16383_p11 = pnand %p13294_p8, %p182_p9  ;;  %s16267_s10 = smov [#allocation2]  }
  0x15   : > { %s194_s11 = sshll.u32 %s16267_s10, 4  ;;  %p15816_p13 = scmp.lt.s32.totalorder %s16233_s27, 4  ;;  %s195_s11 = int_to_ptr.vmem [resolvable:$true] %s194_s11 }
  0x16   : > { %s20566_s9 = scalar_select %p16383_p11, 1, 0 }
  0x17   : > { %p15800_p12 = pneg %p16383_p11  ;;  %p16398_p1 = pnand %p15816_p13, %p16363_p4 }
  0x18   : > { %s20569_s1 = sld [smem:[#allocation68_spill]] }
  0x19   : > { %p16392_p0 = pnand %p15800_p12, %p20391_p3 }
  0x1a   : > { %s20568_s13 = scalar_select %p16398_p1, 1, 0 }
  0x1b   : > { %p20400_p6 = pneg %p16392_p0 }
  0x1e   : > { %s15995_s16 = scalar_lea.hbm %s20569_s1, 16384 }
  0x1f   : > { %p15996_p2 = scmp.ne.s32.totalorder %s20569_s1, %s15995_s16  ;;  %p16002_p4 = scmp.lt.u32.totalorder %s15995_s16, %s20569_s1 }
  0x21   : > { %p15998_p7 = pnand %p20400_p6, %p15996_p2 }
  0x23   : > { %p15999_p8 = pneg %p15998_p7 }
  0x25   : > { %p16004_p9 = pnand %p16002_p4, %p15999_p8 }
  0x27   : > { %16007 = shalt.err (!%p16004_p9)
}
  0x28   : > { %s16008_s6 = scalar_lea.vmem %s195_s11, 16384  ;;  %p16016_p10 = scmp.lt.s32.totalorder %s195_s11, %s195_s11 }
  0x29   : > { %p16009_p12 = scmp.ne.s32.totalorder %s195_s11, %s16008_s6  ;;  %p16017_p5 = scmp.lt.s32.totalorder %s16008_s6, %s16008_s6 }
  0x2b   : > { %p16011_p13 = pnand %p16009_p12, %p20400_p6  ;;  %p16018_p11 = por %p16017_p5, %p16016_p10 }
  0x2d   : > { %p16012_p3 = pneg %p16011_p13 }
  0x2f   : > { %p16019_p1 = pnand %p16018_p11, %p16012_p3 }
  0x31   : > { %16022 = shalt.err (!%p16019_p1)
}
  0x32   : > { %s16268_s14 = smov 512   ;;  %s16269_s15 = smov 32  }
  0x33   : > { %15803 = dma.hbm_to_vmem [thread:$0]  (!%p16392_p0), %s20569_s1, 16384, %s195_s11, [#allocation3], %s16268_s14, %s16268_s14, %s16269_s15  }
  0x34   : > { %s26_s6 = sadd.s32 1, %s16225_s25  ;;  %s29_s20 = sadd.s32 1, %s16229_s26 }
  0x35   : > { %p27_p3 = scmp.ge.s32.totalorder %s26_s6, 2  ;;  %s239_s30 = sand.u32 1, %s16233_s27  }
  0x36   : > { %s20395_s10 = sand.u32 1, %s16213_s22   ;;  %s14629_s11 = sshll.u32 %s16229_s26, 10 }
  0x37   : > { %s20774_s6 = smov (%p27_p3, %s26_s6), 0  ;;  %s20776_s20 = smov (!%p27_p3, %s29_s20), %s16229_s26 }
  0x38   : > { %20570 = sst [smem:[#allocation16_spill]] %s20774_s6  ;;  %s153_s29 = ssub.s32 %s16225_s25, %s20774_s6 }
  0x39   : > { %s13298_s5 = sshll.u32 %s20395_s10, 13  ;;  %p31_p5 = scmp.ge.s32.totalorder %s20776_s20, 2 }
  0x3a   : > { %s243_s14 = scalar_lea.vmem [#allocation6], %s13298_s5  ;;  %s20572_s3 = sld [smem:[#allocation69_spill]] }
  0x3b   : > { %s250_s15 = sshll.u32 %s243_s14, 4  ;;  %s20778_s20 = smov (%p31_p5, %s20776_s20), 0  ;;  %s16443_s15 = int_to_ptr.vmem [resolvable:$true] %s250_s15 }
  0x3c   : > { %20571 = sst [smem:[#allocation17_spill]] %s20778_s20  ;;  %s101_s10 = ssub.s32 %s16229_s26, %s20778_s20 }
  0x3d   : > { %p102_p10 = scmp.eq.s32.totalorder %s101_s10, 0  ;;  %s155_s6 = sor.u32 %s153_s29, %s101_s10 }
  0x3e   : > { %p156_p11 = scmp.eq.s32.totalorder %s155_s6, 0  ;;  %s20573_s5 = sadd.s32 1, %s16213_s22 }
  0x3f   : > { %s16450_s14 = scalar_select %p102_p10, %s16213_s22, %s20573_s5  }
  0x40   : > { %s16441_s1 = scalar_lea.hbm %s20572_s3, %s14629_s11  ;;  %s20575_s25 = sadd.s32 1, %s16201_s19 }
  0x41   : > { %20574 = sst [smem:[#allocation18_spill]] %s16450_s14  ;;  %s16457_s16 = scalar_lea.sflag [#allocation3], %s239_s30 }
  0x42   : > { %s16455_s27 = scalar_select %p156_p11, %s16201_s19, %s20575_s25  }
  0x43   : > { %s16023_s11 = scalar_lea.hbm %s16441_s1, 131072  ;;  %p20577_p2 = scmp.ne.s32.totalorder %s20568_s13, 0 }
  0x44   : > { %20576 = sst [smem:[#allocation19_spill]] %s16455_s27  ;;  %p16024_p1 = scmp.ne.s32.totalorder %s16441_s1, %s16023_s11 }
  0x45   : > { %p20402_p7 = pneg %p20577_p2  ;;  %s16028_s29 = scalar_lea.hbm %s20572_s3, 262144 }
  0x46   : > { %p16029_p9 = scmp.lt.u32.totalorder %s16441_s1, %s20572_s3  ;;  %p16030_p12 = scmp.lt.u32.totalorder %s16028_s29, %s16023_s11 }
  0x47   : > { %p16026_p8 = pnand %p20402_p7, %p16024_p1  ;;  %p16032_p3 = scmp.lt.u32.totalorder %s16023_s11, %s16441_s1 }
  0x48   : > { %p16031_p13 = por %p16030_p12, %p16029_p9 }
  0x49   : > { %p16027_p4 = pneg %p16026_p8 }
  0x4a   : > { %p16033_p5 = por %p16032_p3, %p16031_p13 }
  0x4c   : > { %p16034_p10 = pnand %p16033_p5, %p16027_p4 }
  0x4e   : > { %16037 = shalt.err (!%p16034_p10)
}
  0x4f   : > { %s16038_s25 = scalar_lea.vmem %s16443_s15, 131072  ;;  %s16270_s20 = smov [#allocation6]  }
  0x50   : > { %p16039_p11 = scmp.ne.s32.totalorder %s16443_s15, %s16038_s25  ;;  %s16043_s30 = sshll.u32 %s16270_s20, 4  ;;  %s16044_s30 = int_to_ptr.vmem [resolvable:$false] %s16043_s30 }
  0x51   : > { %s16045_s5 = scalar_lea.vmem %s16044_s30, 262144  ;;  %p16046_p6 = scmp.lt.s32.totalorder %s16443_s15, %s16044_s30 }
  0x52   : > { %p16041_p1 = pnand %p16039_p11, %p20402_p7  ;;  %p16047_p9 = scmp.lt.s32.totalorder %s16045_s5, %s16038_s25 }
  0x54   : > { %p16042_p8 = pneg %p16041_p1  ;;  %p16048_p12 = por %p16047_p9, %p16046_p6 }
  0x56   : > { %p16049_p13 = pnand %p16048_p12, %p16042_p8 }
  0x58   : > { %16052 = shalt.err (!%p16049_p13)
}
  0x59   : > { %s16271_s11 = smov 2048   ;;  %s16272_s17 = smov 1024  }
  0x5a   : > { %s16273_s29 = smov 64   ;;  %s16274_s6 = smov [#allocation4]  }
  0x5b   : > { %15810 = dma.hbm_to_vmem [thread:$0]  (!%p20577_p2), %s16441_s1, 131072, %s16443_s15, %s16457_s16, %s16271_s11, %s16272_s17, %s16273_s29  }
  0x5c   : > { %s208_s10 = sshll.u32 %s16274_s6, 4  ;;  %s20578_s20 = sand.u32 1, %s16213_s22   ;;  %s209_s10 = int_to_ptr.vmem [resolvable:$true] %s208_s10 }
  0x5d   : > { %s13301_s3 = sshll.u32 %s20578_s20, 4  ;;  %s16053_s5 = scalar_lea.hbm %s20387_s2, 128 }
  0x5e   : > { %p16054_p6 = scmp.ne.s32.totalorder %s20387_s2, %s16053_s5  ;;  %p20579_p4 = pneg %p16392_p0 }
  0x5f   : > { %p16060_p10 = scmp.lt.u32.totalorder %s16053_s5, %s20387_s2 }
  0x60   : > { %p16056_p3 = pnand %p16054_p6, %p20579_p4 }
  0x62   : > { %p16057_p5 = pneg %p16056_p3 }
  0x64   : > { %p16062_p11 = pnand %p16060_p10, %p16057_p5 }
  0x66   : > { %16065 = shalt.err (!%p16062_p11)
}
  0x67   : > { %s16066_s1 = scalar_lea.vmem %s209_s10, 128  ;;  %p20580_p8 = pmov %p20579_p4 }
  0x68   : > { %p16067_p1 = scmp.ne.s32.totalorder %s209_s10, %s16066_s1  ;;  %p16074_p13 = scmp.lt.s32.totalorder %s209_s10, %s209_s10 }
  0x69   : > { %p16075_p7 = scmp.lt.s32.totalorder %s16066_s1, %s16066_s1 }
  0x6a   : > { %p16069_p9 = pnand %p16067_p1, %p20580_p8 }
  0x6b   : > { %p16076_p2 = por %p16075_p7, %p16074_p13 }
  0x6c   : > { %p16070_p12 = pneg %p16069_p9 }
  0x6e   : > { %p16077_p4 = pnand %p16076_p2, %p16070_p12 }
  0x70   : > { %16080 = shalt.err (!%p16077_p4)
}
  0x71   : > { %15806 = dma.hbm_to_vmem [thread:$0]  (!%p16392_p0), %s20387_s2, 128, %s209_s10, [#allocation5]  }
  0x72   : > { %s14630_s19 = sshll.u32 %s16229_s26, 8  ;;  %s264_s24 = scalar_lea.vmem [#allocation7], %s13301_s3 }
  0x73   : > { %s272_s14 = sshll.u32 %s264_s24, 4  ;;  %s270_s29 = scalar_lea.hbm %s20389_s4, %s14630_s19  ;;  %s273_s14 = int_to_ptr.vmem [resolvable:$true] %s272_s14 }
  0x74   : > { %s16081_s6 = scalar_lea.hbm %s270_s29, 256  ;;  %p20581_p2 = scmp.ne.s32.totalorder %s20568_s13, 0 }
  0x75   : > { %p16082_p7 = scmp.ne.s32.totalorder %s270_s29, %s16081_s6  ;;  %s16086_s25 = scalar_lea.hbm %s20389_s4, 512 }
  0x76   : > { %p20582_p6 = pneg %p20581_p2  ;;  %p16087_p0 = scmp.lt.u32.totalorder %s270_s29, %s20389_s4 }
  0x77   : > { %p16088_p10 = scmp.lt.u32.totalorder %s16086_s25, %s16081_s6  ;;  %p16090_p1 = scmp.lt.u32.totalorder %s16081_s6, %s270_s29 }
  0x78   : > { %p16084_p3 = pnand %p16082_p7, %p20582_p6 }
  0x79   : > { %p16089_p11 = por %p16088_p10, %p16087_p0 }
  0x7a   : > { %p16085_p5 = pneg %p16084_p3 }
  0x7b   : > { %p16091_p8 = por %p16090_p1, %p16089_p11 }
  0x7d   : > { %p16092_p9 = pnand %p16091_p8, %p16085_p5 }
  0x7f   : > { %16095 = shalt.err (!%p16092_p9)
}
  0x80   : > { %s16096_s3 = scalar_lea.vmem %s273_s14, 256  ;;  %p20583_p13 = pmov %p20582_p6 }
  0x81   : > { %p16097_p12 = scmp.ne.s32.totalorder %s273_s14, %s16096_s3  ;;  %s16275_s5 = smov [#allocation7]  }
  0x82   : > { %s16101_s1 = sshll.u32 %s16275_s5, 4  ;;  %s16102_s1 = int_to_ptr.vmem [resolvable:$false] %s16101_s1 }
  0x83   : > { %p16099_p4 = pnand %p16097_p12, %p20583_p13  ;;  %s16103_s27 = scalar_lea.vmem %s16102_s1, 512 }
  0x84   : > { %p16104_p6 = scmp.lt.s32.totalorder %s273_s14, %s16102_s1  ;;  %p16105_p3 = scmp.lt.s32.totalorder %s16103_s27, %s16096_s3 }
  0x85   : > { %p16100_p7 = pneg %p16099_p4 }
  0x86   : > { %p16106_p0 = por %p16105_p3, %p16104_p6 }
  0x88   : > { %p16107_p10 = pnand %p16106_p0, %p16100_p7 }
  0x8a   : > { %16110 = shalt.err (!%p16107_p10)
}
  0x8b   : > { %15813 = dma.hbm_to_vmem [thread:$0]  (!%p20581_p2), %s270_s29, 256, %s273_s14, %s16457_s16  }
  0x8c   : > { %p20584_p5 = scmp.ne.s32.totalorder %s20566_s9, 0 }
  0x8e   : > { %281 = sbr.rel (%p20584_p5) target bundleno = 1762 (0x6e2), region = 40 }
  0x95   : > { %p20585_p11 = scmp.eq.s32.totalorder %s16355_s28, 0 }
  0x97   : > { %16184 = dma.done.wait (%p20585_p11), [#allocation3], 16384   ;;  %p20586_p1 = pmov %p20585_p11 }
  0x99   : > { %16186 = vsyncadd (%p20586_p1), [#allocation3], 4294950912  ;;  %p20587_p8 = pmov %p20586_p1 }
  0x9a   : > { %p20588_p9 = pmov %p20586_p1 }
  0x9b   : > { %16188 = dma.done.wait (%p20587_p8), [#allocation5], 128  }
  0x9c   : > { %16190 = vsyncadd (%p20588_p9), [#allocation5], 4294967168  ;;  %s291_s13 = sand.u32 1, %s16355_s28   ;;  %s293_s16 = sand.u32 1, %s16209_s21  }
  0x9d   : > { %s13307_s9 = sshll.u32 %s293_s16, 13  ;;  %s292_s15 = scalar_lea.sflag [#allocation3], %s291_s13 }
  0x9e   : > { %s16540_s19 = scalar_lea.vmem [#allocation6], %s13307_s9  ;;  %p20589_p2 = scmp.ne.s32.totalorder %s20564_s7, 0 }
  0xa0   : > { %16192 = dma.done.wait (%p20589_p2), %s292_s15, 131328  }
  0xa1   : > { %16194 = vsyncadd (%p20589_p2), %s292_s15, 4294835968  ;;  %s16547_s24 = sshll.u32 %s16217_s23, 4  ;;  %v388_v0 = vld [vmem:[#allocation2] sm:$0xff]  ;;  %v389_v17 = vld [vmem:[#allocation2 + $0x8] sm:$0xff]  ;;  %s13308_s29 = sshll.u32 %s293_s16, 4 }
  0xa2   : > { %p352_p12 = scmp.lt.s32.totalorder %s16547_s24, 16  ;;  %v392_v1 = vld [vmem:[#allocation2 + $0x20] sm:$0xff]  ;;  %v393_v18 = vld [vmem:[#allocation2 + $0x28] sm:$0xff]  ;;  %s18138_s6 = scalar_lea.vmem [#allocation7], %s13308_s29 }
  0xa3   : > { %v396_v2 = vld [vmem:[#allocation2 + $0x40] sm:$0xff]  ;;  %v13330_v3 = vcombine.high %v388_v0, %v392_v1  ;;  %v13329_v4 = vcombine.low %v388_v0, %v392_v1  ;;  %v13332_v21 = vcombine.high %v389_v17, %v393_v18  ;;  %v13331_v22 = vcombine.low %v389_v17, %v393_v18  ;;  %v397_v24 = vld [vmem:[#allocation2 + $0x48] sm:$0xff]  ;;  %s343_s12 = sand.u32 1, %s16197_s18   ;;  %p20750_p13 = scmp.ne.s32.totalorder %s20565_s8, 0 }
  0xa4   : > { %v400_v5 = vld [vmem:[#allocation2 + $0x60] sm:$0xff]  ;;  %s353_s28 = scalar_select %p352_p12, %s16547_s24, 16  ;;  %v401_v26 = vld [vmem:[#allocation2 + $0x68] sm:$0xff] }
  0xa5   : > { %v13338_v6 = vcombine.high %v396_v2, %v400_v5  ;;  %v404_v7 = vld [vmem:[#allocation2 + $0x80] sm:$0xff]  ;;  %1278 = vmatprep.subr.bf16.mxu0 %v13330_v3  ;;  %v13337_v9 = vcombine.low %v396_v2, %v400_v5  ;;  %v405_v27 = vld [vmem:[#allocation2 + $0x88] sm:$0xff]  ;;  %1391 = vmatprep.subr.bf16.mxu1 %v13332_v21  ;;  %v13340_v30 = vcombine.high %v397_v24, %v401_v26  ;;  %s18194_s18 = sshll.u32 %s343_s12, 10  ;;  %s20751_s25 = sld [smem:[#allocation13_spill]] (%p20750_p13) }
  0xa6   : > { %v408_v8 = vld [vmem:[#allocation2 + $0xa0] sm:$0xff]  ;;  %1279 = vmatpush1.bf16.msra.mxu0 %v13329_v4  ;;  %s14631_s7 = sshll.u32 %s353_s28, 3  ;;  %v409_v28 = vld [vmem:[#allocation2 + $0xa8] sm:$0xff]  ;;  %1392 = vmatpush1.bf16.msra.mxu1 %v13331_v22  ;;  %v13339_v31 = vcombine.low %v397_v24, %v401_v26  ;;  %s18241_s20 = scalar_lea.vmem [#allocation8], %s18194_s18  }
  0xa7   : > { %1280 = vmatprep.subr.bf16.mxu0 %v13338_v6  ;;  %v13346_v10 = vcombine.high %v404_v7, %v408_v8  ;;  %v412_v11 = vld [vmem:[#allocation2 + $0xc0] sm:$0xff]  ;;  %v13345_v13 = vcombine.low %v404_v7, %v408_v8  ;;  %s16554_s17 = scalar_lea.vmem %s20385_s0, %s14631_s7  ;;  %1393 = vmatprep.subr.bf16.mxu1 %v13340_v30  ;;  %v13348_v33 = vcombine.high %v405_v27, %v409_v28  ;;  %v413_v35 = vld [vmem:[#allocation2 + $0xc8] sm:$0xff]  ;;  %s12927_s10 = ssub.s32 (%p20750_p13), 17, %s16547_s24 }
  0xa8   : > { %v416_v12 = vld [vmem:[#allocation2 + $0xe0] sm:$0xff]  ;;  %v417_v36 = vld [vmem:[#allocation2 + $0xe8] sm:$0xff]  ;;  %v13347_v39 = vcombine.low %v405_v27, %v409_v28  ;;  %p12928_p4 = scmp.lt.s32.totalorder (%p20750_p13), %s12927_s10, 16  ;;  %s14761_s3 = sshll.u32 (%p20750_p13), %s16217_s23, 9 }
  0xa9   : > { %v13354_v14 = vcombine.high %v412_v11, %v416_v12  ;;  %v420_v15 = vld [vmem:[#allocation2 + $0x100] sm:$0xff]  ;;  %v13353_v19 = vcombine.low %v412_v11, %v416_v12  ;;  %v13356_v41 = vcombine.high %v413_v35, %v417_v36  ;;  %v421_v44 = vld [vmem:[#allocation2 + $0x108] sm:$0xff]  ;;  %v13355_v47 = vcombine.low %v413_v35, %v417_v36  ;;  %s20752_s9 = sld [smem:[#allocation70_spill]] (%p20750_p13) }
  0xaa   : > { %1281 = vmatpush1.bf16.msra.mxu0 %v13337_v9  ;;  %v424_v16 = vld [vmem:[#allocation2 + $0x120] sm:$0xff]  ;;  %1394 = vmatpush1.bf16.msra.mxu1 %v13339_v31  ;;  %v425_v45 = vld [vmem:[#allocation2 + $0x128] sm:$0xff] }
  0xab   : > { %1282 = vmatprep.subr.bf16.mxu0 %v13346_v10  ;;  %v428_v20 = vld [vmem:[#allocation2 + $0x140] sm:$0xff]  ;;  %v13362_v25 = vcombine.high %v420_v15, %v424_v16  ;;  %v13361_v32 = vcombine.low %v420_v15, %v424_v16  ;;  %1395 = vmatprep.subr.bf16.mxu1 %v13348_v33  ;;  %v13364_v49 = vcombine.high %v421_v44, %v425_v45  ;;  %v429_v51 = vld [vmem:[#allocation2 + $0x148] sm:$0xff]  ;;  %s14611_s30 = sshll.u32 (%p20750_p13), %s20751_s25, 4 }
  0xac   : > { %v16557_v23 = vld [vmem:[%s16554_s17 + $0x4] ss:$8 sps:$4 sm:$0xff]   ;;  %v13363_v55 = vcombine.low %v421_v44, %v425_v45  ;;  %s12934_s5 = sadd.s32 (%p20750_p13), %s14761_s3, %s14611_s30 }
  0xad   : > { %v432_v29 = vld [vmem:[#allocation2 + $0x160] sm:$0xff]  ;;  %1310 = vmatprep.mubr.bf16.mxu0 %v16557_v23  ;;  %1423 = vmatprep.mubr.bf16.mxu1 %v16557_v23  ;;  %v433_v52 = vld [vmem:[#allocation2 + $0x168] sm:$0xff]  ;;  %s14616_s1 = sshll.u32 (%p20750_p13), %s12934_s5, 2 }
  0xae   : > { %1283 = vmatpush1.bf16.msra.mxu0 %v13345_v13  ;;  %v13370_v34 = vcombine.high %v428_v20, %v432_v29  ;;  %v436_v37 = vld [vmem:[#allocation2 + $0x180] sm:$0xff]  ;;  %v13369_v40 = vcombine.low %v428_v20, %v432_v29  ;;  %1396 = vmatpush1.bf16.msra.mxu1 %v13347_v39  ;;  %v13372_v57 = vcombine.high %v429_v51, %v433_v52  ;;  %v437_v60 = vld [vmem:[#allocation2 + $0x188] sm:$0xff] }
  0xaf   : > { %1284 = vmatprep.subr.bf16.mxu0 %v13354_v14  ;;  %v440_v38 = vld [vmem:[#allocation2 + $0x1a0] sm:$0xff]  ;;  %1397 = vmatprep.subr.bf16.mxu1 %v13356_v41  ;;  %v441_v61 = vld [vmem:[#allocation2 + $0x1a8] sm:$0xff]  ;;  %v13371_v63 = vcombine.low %v429_v51, %v433_v52  ;;  %s20136_s15 = scalar_lea.vmem (%p20750_p13), %s20752_s9, %s14616_s1  }
  0xb0   : > { %v13378_v42 = vcombine.high %v436_v37, %v440_v38  ;;  %v444_v43 = vld [vmem:[#allocation2 + $0x1c0] sm:$0xff]  ;;  %v13377_v48 = vcombine.low %v436_v37, %v440_v38  ;;  %v13380_v1 = vcombine.high %v437_v60, %v441_v61  ;;  %v445_v3 = vld [vmem:[#allocation2 + $0x1c8] sm:$0xff]  ;;  %v13379_v7 = vcombine.low %v437_v60, %v441_v61 }
  0xb1   : > { %v448_v46 = vld [vmem:[#allocation2 + $0x1e0] sm:$0xff]  ;;  %v449_v4 = vld [vmem:[#allocation2 + $0x1e8] sm:$0xff] }
  0xb2   : > { %1285 = vmatpush1.bf16.msra.mxu0 %v13353_v19  ;;  %v13386_v50 = vcombine.high %v444_v43, %v448_v46  ;;  %v452_v53 = vld [vmem:[#allocation2 + $0x200] sm:$0xff]  ;;  %1398 = vmatpush1.bf16.msra.mxu1 %v13355_v47  ;;  %v13385_v56 = vcombine.low %v444_v43, %v448_v46  ;;  %v13388_v9 = vcombine.high %v445_v3, %v449_v4  ;;  %v453_v11 = vld [vmem:[#allocation2 + $0x208] sm:$0xff] }
  0xb3   : > { %1286 = vmatprep.subr.bf16.mxu0 %v13362_v25  ;;  %v456_v54 = vld [vmem:[#allocation2 + $0x220] sm:$0xff]  ;;  %1399 = vmatprep.subr.bf16.mxu1 %v13364_v49  ;;  %v457_v12 = vld [vmem:[#allocation2 + $0x228] sm:$0xff]  ;;  %v13387_v15 = vcombine.low %v445_v3, %v449_v4 }
  0xb4   : > { %v13394_v58 = vcombine.high %v452_v53, %v456_v54  ;;  %v460_v59 = vld [vmem:[#allocation2 + $0x240] sm:$0xff]  ;;  %v13393_v0 = vcombine.low %v452_v53, %v456_v54  ;;  %v13396_v17 = vcombine.high %v453_v11, %v457_v12  ;;  %v461_v19 = vld [vmem:[#allocation2 + $0x248] sm:$0xff]  ;;  %v13395_v24 = vcombine.low %v453_v11, %v457_v12  ;;  %v390_v54 = vld [vmem:[#allocation2 + $0x10] sm:$0xff] }
  0xb5   : > { %v464_v62 = vld [vmem:[#allocation2 + $0x260] sm:$0xff]  ;;  %v465_v20 = vld [vmem:[#allocation2 + $0x268] sm:$0xff] }
  0xb6   : > { %1287 = vmatpush1.bf16.msra.mxu0 %v13361_v32  ;;  %1400 = vmatpush1.bf16.msra.mxu1 %v13363_v55  ;;  %v13402_v2 = vcombine.high %v460_v59, %v464_v62  ;;  %v468_v5 = vld [vmem:[#allocation2 + $0x280] sm:$0xff]  ;;  %v13401_v8 = vcombine.low %v460_v59, %v464_v62  ;;  %v13404_v26 = vcombine.high %v461_v19, %v465_v20  ;;  %v469_v28 = vld [vmem:[#allocation2 + $0x288] sm:$0xff]  ;;  %v394_v55 = vld [vmem:[#allocation2 + $0x30] sm:$0xff] }
  0xb7   : > { %1288 = vmatprep.subr.bf16.mxu0 %v13370_v34  ;;  %1401 = vmatprep.subr.bf16.mxu1 %v13372_v57  ;;  %v472_v6 = vld [vmem:[#allocation2 + $0x2a0] sm:$0xff]  ;;  %v473_v29 = vld [vmem:[#allocation2 + $0x2a8] sm:$0xff]  ;;  %v13403_v32 = vcombine.low %v461_v19, %v465_v20  ;;  %v13334_v61 = vcombine.high %v390_v54, %v394_v55  ;;  %v418_v19 = vld [vmem:[#allocation2 + $0xf0] sm:$0xff] }
  0xb8   : > { %v13410_v10 = vcombine.high %v468_v5, %v472_v6  ;;  %v476_v13 = vld [vmem:[#allocation2 + $0x2c0] sm:$0xff]  ;;  %v13409_v16 = vcombine.low %v468_v5, %v472_v6  ;;  %v13412_v34 = vcombine.high %v469_v28, %v473_v29  ;;  %v477_v36 = vld [vmem:[#allocation2 + $0x2c8] sm:$0xff]  ;;  %v13333_v6 = vcombine.low %v390_v54, %v394_v55  ;;  %v446_v54 = vld [vmem:[#allocation2 + $0x1d0] sm:$0xff] }
  0xb9   : > { %v480_v14 = vld [vmem:[#allocation2 + $0x2e0] sm:$0xff]  ;;  %v481_v37 = vld [vmem:[#allocation2 + $0x2e8] sm:$0xff]  ;;  %v450_v55 = vld [vmem:[#allocation2 + $0x1f0] sm:$0xff] }
  0xba   : > { %1289 = vmatpush1.bf16.msra.mxu0 %v13369_v40  ;;  %1402 = vmatpush1.bf16.msra.mxu1 %v13371_v63  ;;  %v13418_v18 = vcombine.high %v476_v13, %v480_v14  ;;  %v484_v21 = vld [vmem:[#allocation2 + $0x300] sm:$0xff]  ;;  %v13417_v25 = vcombine.low %v476_v13, %v480_v14  ;;  %v13411_v40 = vcombine.low %v469_v28, %v473_v29  ;;  %v485_v44 = vld [vmem:[#allocation2 + $0x308] sm:$0xff]  ;;  %v391_v13 = vld [vmem:[#allocation2 + $0x18] sm:$0xff] }
  0xbb   : > { %1290 = vmatprep.subr.bf16.mxu0 %v13378_v42  ;;  %1403 = vmatprep.subr.bf16.mxu1 %v13380_v1  ;;  %v488_v22 = vld [vmem:[#allocation2 + $0x320] sm:$0xff]  ;;  %v13420_v42 = vcombine.high %v477_v36, %v481_v37  ;;  %v489_v45 = vld [vmem:[#allocation2 + $0x328] sm:$0xff]  ;;  %v402_v1 = vld [vmem:[#allocation2 + $0x70] sm:$0xff] }
  0xbc   : > { %v13426_v27 = vcombine.high %v484_v21, %v488_v22  ;;  %v492_v30 = vld [vmem:[#allocation2 + $0x340] sm:$0xff]  ;;  %v13425_v33 = vcombine.low %v484_v21, %v488_v22  ;;  %v493_v52 = vld [vmem:[#allocation2 + $0x348] sm:$0xff]  ;;  %v395_v14 = vld [vmem:[#allocation2 + $0x38] sm:$0xff] }
  0xbd   : > { %v496_v31 = vld [vmem:[#allocation2 + $0x360] sm:$0xff]  ;;  %v497_v53 = vld [vmem:[#allocation2 + $0x368] sm:$0xff]  ;;  %v13336_v21 = vcombine.high %v391_v13, %v395_v14  ;;  %v426_v28 = vld [vmem:[#allocation2 + $0x130] sm:$0xff]  ;;  %v13335_v29 = vcombine.low %v391_v13, %v395_v14 }
  0xbe   : > { %1291 = vmatpush1.bf16.msra.mxu0 %v13377_v48  ;;  %1404 = vmatpush1.bf16.msra.mxu1 %v13379_v7  ;;  %v13434_v35 = vcombine.high %v492_v30, %v496_v31  ;;  %v500_v38 = vld [vmem:[#allocation2 + $0x380] sm:$0xff]  ;;  %v13433_v41 = vcombine.low %v492_v30, %v496_v31  ;;  %v13419_v48 = vcombine.low %v477_v36, %v481_v37  ;;  %v501_v59 = vld [vmem:[#allocation2 + $0x388] sm:$0xff]  ;;  %v430_v36 = vld [vmem:[#allocation2 + $0x150] sm:$0xff] }
  0xbf   : > { %1292 = vmatprep.subr.bf16.mxu0 %v13386_v50  ;;  %1405 = vmatprep.subr.bf16.mxu1 %v13388_v9  ;;  %v504_v39 = vld [vmem:[#allocation2 + $0x3a0] sm:$0xff]  ;;  %v13428_v50 = vcombine.high %v485_v44, %v489_v45  ;;  %v505_v60 = vld [vmem:[#allocation2 + $0x3a8] sm:$0xff]  ;;  %v13435_v63 = vcombine.low %v493_v52, %v497_v53  ;;  %v406_v9 = vld [vmem:[#allocation2 + $0x90] sm:$0xff] }
  0xc0   : > { %v13442_v43 = vcombine.high %v500_v38, %v504_v39  ;;  %v508_v46 = vld [vmem:[#allocation2 + $0x3c0] sm:$0xff]  ;;  %v13441_v49 = vcombine.low %v500_v38, %v504_v39  ;;  %v13444_v3 = vcombine.high %v501_v59, %v505_v60  ;;  %v509_v4 = vld [vmem:[#allocation2 + $0x3c8] sm:$0xff]  ;;  %v434_v37 = vld [vmem:[#allocation2 + $0x170] sm:$0xff] }
  0xc1   : > { %v512_v47 = vld [vmem:[#allocation2 + $0x3e0] sm:$0xff]  ;;  %v513_v5 = vld [vmem:[#allocation2 + $0x3e8] sm:$0xff]  ;;  %v16583_v39 = vld [vmem:[%s16554_s17 + $0x34] ss:$8 sps:$4 sm:$0xff]  }
  0xc2   : > { %1293 = vmatpush1.bf16.msra.mxu0 %v13385_v56  ;;  %1406 = vmatpush1.bf16.msra.mxu1 %v13387_v15  ;;  %v13450_v51 = vcombine.high %v508_v46, %v512_v47  ;;  %v13427_v56 = vcombine.low %v485_v44, %v489_v45  ;;  %v13449_v57 = vcombine.low %v508_v46, %v512_v47  ;;  %v16562_v62 = vld [vmem:[%s16554_s17] ss:$8 sps:$4 sm:$0xff]   ;;  %v16573_v20 = vld [vmem:[%s16554_s17 + $0x24] ss:$8 sps:$4 sm:$0xff]   ;;  %v438_v45 = vld [vmem:[#allocation2 + $0x190] sm:$0xff] }
  0xc3   : > { %1294 = vmatprep.subr.bf16.mxu0 %v13394_v58  ;;  %1407 = vmatprep.subr.bf16.mxu1 %v13396_v17  ;;  %v13436_v58 = vcombine.high %v493_v52, %v497_v53  ;;  %v13452_v11 = vcombine.high %v509_v4, %v513_v5  ;;  %v13451_v17 = vcombine.low %v509_v4, %v513_v5  ;;  %v442_v46 = vld [vmem:[#allocation2 + $0x1b0] sm:$0xff] }
  0xc4   : > { %v13374_v44 = vcombine.high %v430_v36, %v434_v37  ;;  %v13382_v52 = vcombine.high %v438_v45, %v442_v46  ;;  %v16589_v53 = vld [vmem:[%s16554_s17 + $0x30] ss:$8 sps:$4 sm:$0xff]   ;;  %v13389_v5 = vcombine.low %v446_v54, %v450_v55  ;;  %v16603_v13 = vld [vmem:[%s16554_s17 + $0x54] ss:$8 sps:$4 sm:$0xff]  }
  0xc6   : > { %1295 = vmatpush1.bf16.msra.mxu0 %v13393_v0  ;;  %1408 = vmatpush1.bf16.msra.mxu1 %v13395_v24  ;;  %v398_v0 = vld [vmem:[#allocation2 + $0x50] sm:$0xff]  ;;  %v399_v24 = vld [vmem:[#allocation2 + $0x58] sm:$0xff] }
  0xc7   : > { %1296 = vmatprep.subr.bf16.mxu0 %v13402_v2  ;;  %1409 = vmatprep.subr.bf16.mxu1 %v13404_v26  ;;  %v16565_v2 = vld [vmem:[%s16554_s17 + $0x14] ss:$8 sps:$4 sm:$0xff]   ;;  %v13342_v7 = vcombine.high %v398_v0, %v402_v1  ;;  %v13341_v12 = vcombine.low %v398_v0, %v402_v1 }
  0xc8   : > { %v454_v0 = vld [vmem:[#allocation2 + $0x210] sm:$0xff] }
  0xc9   : > { %v458_v1 = vld [vmem:[#allocation2 + $0x230] sm:$0xff] }
  0xca   : > { %1297 = vmatpush1.bf16.msra.mxu0 %v13401_v8  ;;  %1410 = vmatpush1.bf16.msra.mxu1 %v13403_v32  ;;  %v13443_v8 = vcombine.low %v501_v59, %v505_v60  ;;  %v407_v32 = vld [vmem:[#allocation2 + $0x98] sm:$0xff]  ;;  %v13381_v59 = vcombine.low %v438_v45, %v442_v46 }
  0xcb   : > { %1298 = vmatprep.subr.bf16.mxu0 %v13410_v10  ;;  %1411 = vmatprep.subr.bf16.mxu1 %v13412_v34  ;;  %v410_v10 = vld [vmem:[#allocation2 + $0xb0] sm:$0xff]  ;;  %v431_v60 = vld [vmem:[#allocation2 + $0x158] sm:$0xff] }
  0xcc   : > { %v13350_v15 = vcombine.high %v406_v9, %v410_v10  ;;  %v13349_v22 = vcombine.low %v406_v9, %v410_v10  ;;  %v16599_v9 = vld [vmem:[%s16554_s17 + $0x40] ss:$8 sps:$4 sm:$0xff]   ;;  %v462_v10 = vld [vmem:[#allocation2 + $0x250] sm:$0xff] }
  0xce   : > { %1299 = vmatpush1.bf16.msra.mxu0 %v13409_v16  ;;  %1412 = vmatpush1.bf16.msra.mxu1 %v13411_v40  ;;  %v16570_v16 = vld [vmem:[%s16554_s17 + $0x10] ss:$8 sps:$4 sm:$0xff]  }
  0xcf   : > { %1300 = vmatprep.subr.bf16.mxu0 %v13418_v18  ;;  %1413 = vmatprep.subr.bf16.mxu1 %v13420_v42  ;;  %v414_v18 = vld [vmem:[#allocation2 + $0xd0] sm:$0xff]  ;;  %v415_v42 = vld [vmem:[#allocation2 + $0xd8] sm:$0xff] }
  0xd0   : > { %v13358_v26 = vcombine.high %v414_v18, %v418_v19  ;;  %v13357_v31 = vcombine.low %v414_v18, %v418_v19  ;;  %v451_v18 = vld [vmem:[#allocation2 + $0x1f8] sm:$0xff] }
  0xd2   : > { %1301 = vmatpush1.bf16.msra.mxu0 %v13417_v25  ;;  %1414 = vmatpush1.bf16.msra.mxu1 %v13419_v48  ;;  %v403_v25 = vld [vmem:[#allocation2 + $0x78] sm:$0xff] }
  0xd3   : > { %1302 = vmatprep.subr.bf16.mxu0 %v13426_v27  ;;  %1415 = vmatprep.subr.bf16.mxu1 %v13428_v50  ;;  %v422_v27 = vld [vmem:[#allocation2 + $0x110] sm:$0xff]  ;;  %v13344_v30 = vcombine.high %v399_v24, %v403_v25  ;;  %v13343_v38 = vcombine.low %v399_v24, %v403_v25  ;;  %v423_v50 = vld [vmem:[#allocation2 + $0x118] sm:$0xff] }
  0xd4   : > { %v13366_v34 = vcombine.high %v422_v27, %v426_v28 }
  0xd6   : > { %1303 = vmatpush1.bf16.msra.mxu0 %v13425_v33  ;;  %1416 = vmatpush1.bf16.msra.mxu1 %v13427_v56  ;;  %v411_v33 = vld [vmem:[#allocation2 + $0xb8] sm:$0xff] }
  0xd7   : > { %1304 = vmatprep.subr.bf16.mxu0 %v13434_v35  ;;  %1417 = vmatprep.subr.bf16.mxu1 %v13436_v58  ;;  %v16579_v35 = vld [vmem:[%s16554_s17 + $0x20] ss:$8 sps:$4 sm:$0xff]   ;;  %v13352_v40 = vcombine.high %v407_v32, %v411_v33  ;;  %v13351_v47 = vcombine.low %v407_v32, %v411_v33  ;;  %v482_v32 = vld [vmem:[#allocation2 + $0x2f0] sm:$0xff] }
  0xda   : > { %1305 = vmatpush1.bf16.msra.mxu0 %v13433_v41  ;;  %1418 = vmatpush1.bf16.msra.mxu1 %v13435_v63  ;;  %v13365_v41 = vcombine.low %v422_v27, %v426_v28  ;;  %v13390_v63 = vcombine.high %v446_v54, %v450_v55  ;;  %v455_v27 = vld [vmem:[#allocation2 + $0x218] sm:$0xff] }
  0xdb   : > { %1306 = vmatprep.subr.bf16.mxu0 %v13442_v43  ;;  %1419 = vmatprep.subr.bf16.mxu1 %v13444_v3  ;;  %v419_v43 = vld [vmem:[#allocation2 + $0xf8] sm:$0xff] }
  0xdc   : > { %v13360_v48 = vcombine.high %v415_v42, %v419_v43  ;;  %v13359_v56 = vcombine.low %v415_v42, %v419_v43  ;;  %v459_v28 = vld [vmem:[#allocation2 + $0x238] sm:$0xff]  ;;  %v486_v42 = vld [vmem:[#allocation2 + $0x310] sm:$0xff] }
  0xdd   : > { %v490_v43 = vld [vmem:[#allocation2 + $0x330] sm:$0xff] }
  0xde   : > { %1307 = vmatpush1.bf16.msra.mxu0 %v13441_v49  ;;  %1420 = vmatpush1.bf16.msra.mxu1 %v13443_v8  ;;  %v13373_v49 = vcombine.low %v430_v36, %v434_v37  ;;  %v13398_v8 = vcombine.high %v454_v0, %v458_v1  ;;  %v13400_v36 = vcombine.high %v455_v27, %v459_v28  ;;  %v16623_v55 = vld [vmem:[%s16554_s17 + $0x74] ss:$8 sps:$4 sm:$0xff]  }
  0xdf   : > { %1308 = vmatprep.subr.bf16.mxu0 %v13450_v51  ;;  %1421 = vmatprep.subr.bf16.mxu1 %v13452_v11  ;;  %v427_v51 = vld [vmem:[#allocation2 + $0x138] sm:$0xff]  ;;  %v466_v11 = vld [vmem:[#allocation2 + $0x270] sm:$0xff] }
  0xe0   : > { %v13368_v58 = vcombine.high %v423_v50, %v427_v51  ;;  %v13367_v3 = vcombine.low %v423_v50, %v427_v51  ;;  %v13406_v19 = vcombine.high %v462_v10, %v466_v11  ;;  %v16619_v50 = vld [vmem:[%s16554_s17 + $0x60] ss:$8 sps:$4 sm:$0xff]   ;;  %v494_v51 = vld [vmem:[#allocation2 + $0x350] sm:$0xff] }
  0xe2   : > { %1309 = vmatpush1.bf16.msra.mxu0 %v13449_v57  ;;  %1422 = vmatpush1.bf16.msra.mxu1 %v13451_v17  ;;  %v16593_v57 = vld [vmem:[%s16554_s17 + $0x44] ss:$8 sps:$4 sm:$0xff]   ;;  %v447_v17 = vld [vmem:[#allocation2 + $0x1d8] sm:$0xff] }
  0xe3   : > { %1504 = vmatprep.subr.bf16.mxu0 %v13334_v61  ;;  %1617 = vmatprep.subr.bf16.mxu1 %v13336_v21  ;;  %v435_v61 = vld [vmem:[#allocation2 + $0x178] sm:$0xff]  ;;  %v470_v21 = vld [vmem:[#allocation2 + $0x290] sm:$0xff]  ;;  %v13392_v25 = vcombine.high %v447_v17, %v451_v18  ;;  %v13391_v33 = vcombine.low %v447_v17, %v451_v18 }
  0xe4   : > { %v13376_v4 = vcombine.high %v431_v60, %v435_v61  ;;  %v495_v17 = vld [vmem:[#allocation2 + $0x358] sm:$0xff] }
  0xe5   : > { %1311 = vmatmul.mubr.bf16.vlgmr.msra.gmra.mrb[0].mxu0 %v16562_v62  ;;  %1424 = vmatmul.mubr.bf16.vlgmr.msra.gmra.mrb[0].mxu1 %v16562_v62  ;;  %v499_v18 = vld [vmem:[#allocation2 + $0x378] sm:$0xff] }
  0xe6   : > { %1320 = vmatprep.mubr.bf16.mxu0 %v16565_v2  ;;  %1505 = vmatpush1.bf16.msra.mxu0 %v13333_v6  ;;  %v439_v6 = vld [vmem:[#allocation2 + $0x198] sm:$0xff] }
  0xe7   : > { %1506 = vmatprep.subr.bf16.mxu0 %v13342_v7  ;;  %1433 = vmatprep.mubr.bf16.mxu1 %v16565_v2  ;;  %v443_v7 = vld [vmem:[#allocation2 + $0x1b8] sm:$0xff] }
  0xe8   : > { %1618 = vmatpush1.bf16.msra.mxu1 %v13335_v29  ;;  %v13384_v14 = vcombine.high %v439_v6, %v443_v7  ;;  %v13383_v24 = vcombine.low %v439_v6, %v443_v7  ;;  %v491_v6 = vld [vmem:[#allocation2 + $0x338] sm:$0xff] }
  0xe9   : > { %1619 = vmatprep.subr.bf16.mxu1 %v13344_v30  ;;  %v16609_v30 = vld [vmem:[%s16554_s17 + $0x50] ss:$8 sps:$4 sm:$0xff]  }
  0xea   : > { %1507 = vmatpush1.bf16.msra.mxu0 %v13341_v12  ;;  %v13375_v12 = vcombine.low %v431_v60, %v435_v61  ;;  %v483_v60 = vld [vmem:[#allocation2 + $0x2f8] sm:$0xff] }
  0xeb   : > { %1508 = vmatprep.subr.bf16.mxu0 %v13350_v15  ;;  %v13397_v15 = vcombine.low %v454_v0, %v458_v1  ;;  %v506_v0 = vld [vmem:[#allocation2 + $0x3b0] sm:$0xff] }
  0xec   : > { %1620 = vmatpush1.bf16.msra.mxu1 %v13343_v38  ;;  %v463_v38 = vld [vmem:[#allocation2 + $0x258] sm:$0xff] }
  0xed   : > { %1321 = vmatmul.mubr.bf16.gmra.mrb[4].mxu0 %v16570_v16  ;;  %1621 = vmatprep.subr.bf16.mxu1 %v13352_v40  ;;  %v467_v40 = vld [vmem:[#allocation2 + $0x278] sm:$0xff] }
  0xee   : > { %1330 = vmatprep.mubr.bf16.mxu0 %v16573_v20  ;;  %1509 = vmatpush1.bf16.msra.mxu0 %v13349_v22  ;;  %v474_v22 = vld [vmem:[#allocation2 + $0x2b0] sm:$0xff]  ;;  %v13408_v45 = vcombine.high %v463_v38, %v467_v40  ;;  %v13407_v54 = vcombine.low %v463_v38, %v467_v40  ;;  %v515_v38 = vld [vmem:[#allocation2 + $0x3f8] sm:$0xff] }
  0xef   : > { %1510 = vmatprep.subr.bf16.mxu0 %v13358_v26  ;;  %1434 = vmatmul.mubr.bf16.gmra.mrb[4].mxu1 %v16570_v16  ;;  %v13405_v26 = vcombine.low %v462_v10, %v466_v11  ;;  %v13414_v29 = vcombine.high %v470_v21, %v474_v22  ;;  %v13413_v37 = vcombine.low %v470_v21, %v474_v22  ;;  %v510_v10 = vld [vmem:[#allocation2 + $0x3d0] sm:$0xff]  ;;  %v1922_v22 = vld [vmem:[%s16540_s19] sm:$0xff] }
  0xf0   : > { %1443 = vmatprep.mubr.bf16.mxu1 %v16573_v20  ;;  %1622 = vmatpush1.bf16.msra.mxu1 %v13351_v47  ;;  %v471_v47 = vld [vmem:[#allocation2 + $0x298] sm:$0xff]  ;;  %v514_v11 = vld [vmem:[#allocation2 + $0x3f0] sm:$0xff] }
  0xf1   : > { %1623 = vmatprep.subr.bf16.mxu1 %v13360_v48  ;;  %v475_v48 = vld [vmem:[#allocation2 + $0x2b8] sm:$0xff] }
  0xf2   : > { %1511 = vmatpush1.bf16.msra.mxu0 %v13357_v31  ;;  %v478_v31 = vld [vmem:[#allocation2 + $0x2d0] sm:$0xff]  ;;  %v13415_v1 = vcombine.low %v471_v47, %v475_v48 }
  0xf3   : > { %1512 = vmatprep.subr.bf16.mxu0 %v13366_v34  ;;  %v16613_v34 = vld [vmem:[%s16554_s17 + $0x64] ss:$8 sps:$4 sm:$0xff]   ;;  %v13421_v46 = vcombine.low %v478_v31, %v482_v32 }
  0xf4   : > { %1624 = vmatpush1.bf16.msra.mxu1 %v13359_v56  ;;  %v13416_v56 = vcombine.high %v471_v47, %v475_v48  ;;  %v1931_v47 = vld [vmem:[%s16540_s19 + $0x48] sm:$0xff] }
  0xf5   : > { %1331 = vmatmul.mubr.bf16.gmra.mrb[8].mxu0 %v16579_v35  ;;  %1625 = vmatprep.subr.bf16.mxu1 %v13368_v58  ;;  %v13429_v58 = vcombine.low %v486_v42, %v490_v43 }
  0xf6   : > { %1340 = vmatprep.mubr.bf16.mxu0 %v16583_v39  ;;  %1513 = vmatpush1.bf16.msra.mxu0 %v13365_v41  ;;  %v13422_v41 = vcombine.high %v478_v31, %v482_v32  ;;  %v13439_v31 = vcombine.low %v495_v17, %v499_v18  ;;  %v1938_v32 = vld [vmem:[%s16540_s19 + $0x80] sm:$0xff] }
  0xf7   : > { %1514 = vmatprep.subr.bf16.mxu0 %v13374_v44  ;;  %1444 = vmatmul.mubr.bf16.gmra.mrb[8].mxu1 %v16579_v35  ;;  %v13399_v44 = vcombine.low %v455_v27, %v459_v28  ;;  %v503_v27 = vld [vmem:[#allocation2 + $0x398] sm:$0xff] }
  0xf8   : > { %1453 = vmatprep.mubr.bf16.mxu1 %v16583_v39  ;;  %1626 = vmatpush1.bf16.msra.mxu1 %v13367_v3  ;;  %v507_v28 = vld [vmem:[#allocation2 + $0x3b8] sm:$0xff] }
  0xf9   : > { %1627 = vmatprep.subr.bf16.mxu1 %v13376_v4 }
  0xfa   : > { %1515 = vmatpush1.bf16.msra.mxu0 %v13373_v49  ;;  %v13430_v49 = vcombine.high %v486_v42, %v490_v43  ;;  %v13447_v42 = vcombine.low %v503_v27, %v507_v28  ;;  %v1954_v43 = vld [vmem:[%s16540_s19 + $0x100] sm:$0xff] }
  0xfb   : > { %1516 = vmatprep.subr.bf16.mxu0 %v13382_v52  ;;  %v498_v52 = vld [vmem:[#allocation2 + $0x370] sm:$0xff] }
  0xfc   : > { %1628 = vmatpush1.bf16.msra.mxu1 %v13375_v12  ;;  %v13438_v61 = vcombine.high %v494_v51, %v498_v52  ;;  %v13437_v4 = vcombine.low %v494_v51, %v498_v52  ;;  %v1970_v52 = vld [vmem:[%s16540_s19 + $0x180] sm:$0xff] }
  0xfd   : > { %1341 = vmatmul.mubr.bf16.gmra.mrb[12].mxu0 %v16589_v53  ;;  %1629 = vmatprep.subr.bf16.mxu1 %v13384_v14 }
  0xfe   : > { %1350 = vmatprep.mubr.bf16.mxu0 %v16593_v57  ;;  %1517 = vmatpush1.bf16.msra.mxu0 %v13381_v59  ;;  %v479_v59 = vld [vmem:[#allocation2 + $0x2d8] sm:$0xff] }
  0xff   : > { %1518 = vmatprep.subr.bf16.mxu0 %v13390_v63  ;;  %1454 = vmatmul.mubr.bf16.gmra.mrb[12].mxu1 %v16589_v53  ;;  %v502_v63 = vld [vmem:[#allocation2 + $0x390] sm:$0xff]  ;;  %v13424_v3 = vcombine.high %v479_v59, %v483_v60  ;;  %v13423_v12 = vcombine.low %v479_v59, %v483_v60 }
 0x100   : > { %1463 = vmatprep.mubr.bf16.mxu1 %v16593_v57  ;;  %1630 = vmatpush1.bf16.msra.mxu1 %v13383_v24  ;;  %v13446_v7 = vcombine.high %v502_v63, %v506_v0  ;;  %v1930_v24 = vld [vmem:[%s16540_s19 + $0x40] sm:$0xff]  ;;  %v1947_v59 = vld [vmem:[%s16540_s19 + $0xc8] sm:$0xff] }
 0x101   : > { %1631 = vmatprep.subr.bf16.mxu1 %v13392_v25  ;;  %v13440_v25 = vcombine.high %v495_v17, %v499_v18  ;;  %v13457_v40 = vcombine.low %v1922_v22, %v1930_v24 }
 0x102   : > { %1519 = vmatpush1.bf16.msra.mxu0 %v13389_v5  ;;  %v487_v5 = vld [vmem:[#allocation2 + $0x318] sm:$0xff] }
 0x103   : > { %1520 = vmatprep.subr.bf16.mxu0 %v13398_v8  ;;  %v16629_v8 = vld [vmem:[%s16554_s17 + $0x70] ss:$8 sps:$4 sm:$0xff]   ;;  %v13432_v14 = vcombine.high %v487_v5, %v491_v6  ;;  %v13431_v21 = vcombine.low %v487_v5, %v491_v6 }
 0x104   : > { %1632 = vmatpush1.bf16.msra.mxu1 %v13391_v33  ;;  %v1946_v33 = vld [vmem:[%s16540_s19 + $0xc0] sm:$0xff] }
 0x105   : > { %1351 = vmatmul.mubr.bf16.gmra.mrb[16].mxu0 %v16599_v9  ;;  %1633 = vmatprep.subr.bf16.mxu1 %v13400_v36  ;;  %v13448_v36 = vcombine.high %v503_v27, %v507_v28  ;;  %v13473_v48 = vcombine.low %v1938_v32, %v1946_v33  ;;  %v2034_v28 = vld [vmem:[%s16540_s19 + $0x380] sm:$0xff] }
 0x106   : > { %1360 = vmatprep.mubr.bf16.mxu0 %v16603_v13  ;;  %1521 = vmatpush1.bf16.msra.mxu0 %v13397_v15  ;;  %v13445_v15 = vcombine.low %v502_v63, %v506_v0  ;;  %v1986_v0 = vld [vmem:[%s16540_s19 + $0x200] sm:$0xff] }
 0x107   : > { %1522 = vmatprep.subr.bf16.mxu0 %v13406_v19  ;;  %1464 = vmatmul.mubr.bf16.gmra.mrb[16].mxu1 %v16599_v9  ;;  %v13454_v19 = vcombine.high %v510_v10, %v514_v11 }
 0x108   : > { %1473 = vmatprep.mubr.bf16.mxu1 %v16603_v13  ;;  %1634 = vmatpush1.bf16.msra.mxu1 %v13399_v44  ;;  %v1962_v44 = vld [vmem:[%s16540_s19 + $0x140] sm:$0xff] }
 0x109   : > { %1635 = vmatprep.subr.bf16.mxu1 %v13408_v45  ;;  %v13489_v60 = vcombine.low %v1954_v43, %v1962_v44 }
 0x10a   : > { %1523 = vmatpush1.bf16.msra.mxu0 %v13405_v26  ;;  %v13453_v26 = vcombine.low %v510_v10, %v514_v11  ;;  %v2002_v10 = vld [vmem:[%s16540_s19 + $0x280] sm:$0xff] }
 0x10b   : > { %1524 = vmatprep.subr.bf16.mxu0 %v13414_v29  ;;  %v13458_v29 = vcombine.high %v1922_v22, %v1930_v24  ;;  %v2010_v11 = vld [vmem:[%s16540_s19 + $0x2c0] sm:$0xff]  ;;  %v1987_v22 = vld [vmem:[%s16540_s19 + $0x208] sm:$0xff] }
 0x10c   : > { %1636 = vmatpush1.bf16.msra.mxu1 %v13407_v54  ;;  %v1978_v54 = vld [vmem:[%s16540_s19 + $0x1c0] sm:$0xff]  ;;  %v1995_v24 = vld [vmem:[%s16540_s19 + $0x248] sm:$0xff] }
 0x10d   : > { %1361 = vmatmul.mubr.bf16.gmra.mrb[20].mxu0 %v16609_v30  ;;  %1637 = vmatprep.subr.bf16.mxu1 %v13416_v56  ;;  %v13505_v5 = vcombine.low %v1970_v52, %v1978_v54 }
 0x10e   : > { %1370 = vmatprep.mubr.bf16.mxu0 %v16613_v34  ;;  %1525 = vmatpush1.bf16.msra.mxu0 %v13413_v37  ;;  %v511_v37 = vld [vmem:[#allocation2 + $0x3d8] sm:$0xff] }
 0x10f   : > { %1526 = vmatprep.subr.bf16.mxu0 %v13422_v41  ;;  %1474 = vmatmul.mubr.bf16.gmra.mrb[20].mxu1 %v16609_v30  ;;  %v13474_v41 = vcombine.high %v1938_v32, %v1946_v33  ;;  %v13456_v45 = vcombine.high %v511_v37, %v515_v38  ;;  %v13455_v51 = vcombine.low %v511_v37, %v515_v38  ;;  %v2003_v32 = vld [vmem:[%s16540_s19 + $0x288] sm:$0xff]  ;;  %v2050_v38 = vld [vmem:[%s16540_s19 + $0x400] sm:$0xff] }
 0x110   : > { %1483 = vmatprep.mubr.bf16.mxu1 %v16613_v34  ;;  %1638 = vmatpush1.bf16.msra.mxu1 %v13415_v1  ;;  %v1994_v1 = vld [vmem:[%s16540_s19 + $0x240] sm:$0xff]  ;;  %v2011_v33 = vld [vmem:[%s16540_s19 + $0x2c8] sm:$0xff]  ;;  %v13523_v37 = vcombine.low %v1987_v22, %v1995_v24 }
 0x111   : > { %1639 = vmatprep.subr.bf16.mxu1 %v13424_v3  ;;  %v1955_v3 = vld [vmem:[%s16540_s19 + $0x108] sm:$0xff]  ;;  %v13522_v6 = vcombine.high %v1986_v0, %v1994_v1  ;;  %v13521_v17 = vcombine.low %v1986_v0, %v1994_v1  ;;  %v2090_v0 = vld [vmem:[%s16540_s19 + $0x540] sm:$0xff] }
 0x112   : > { %1527 = vmatpush1.bf16.msra.mxu0 %v13421_v46  ;;  %v1923_v46 = vld [vmem:[%s16540_s19 + $0x8] sm:$0xff] }
 0x113   : > { %1528 = vmatprep.subr.bf16.mxu0 %v13430_v49  ;;  %v13490_v49 = vcombine.high %v1954_v43, %v1962_v44  ;;  %v13460_v56 = vcombine.high %v1923_v46, %v1931_v47  ;;  %v13459_v63 = vcombine.low %v1923_v46, %v1931_v47  ;;  %v16687_v46 = vld [vmem:[%s16540_s19 + $0x840] sm:$0xff]  ;;  %v16690_v47 = vld [vmem:[%s16540_s19 + $0x808] sm:$0xff] }
 0x114   : > { %1640 = vmatpush1.bf16.msra.mxu1 %v13423_v12 }
 0x115   : > { %1371 = vmatmul.mubr.bf16.gmra.mrb[24].mxu0 %v16619_v50  ;;  %1641 = vmatprep.subr.bf16.mxu1 %v13432_v14  ;;  %v1971_v14 = vld [vmem:[%s16540_s19 + $0x188] sm:$0xff] }
 0x116   : > { %1380 = vmatprep.mubr.bf16.mxu0 %v16623_v55  ;;  %1529 = vmatpush1.bf16.msra.mxu0 %v13429_v58  ;;  %v1939_v58 = vld [vmem:[%s16540_s19 + $0x88] sm:$0xff] }
 0x117   : > { %1530 = vmatprep.subr.bf16.mxu0 %v13438_v61  ;;  %1484 = vmatmul.mubr.bf16.gmra.mrb[24].mxu1 %v16619_v50  ;;  %v13506_v61 = vcombine.high %v1970_v52, %v1978_v54  ;;  %v16696_v52 = vld [vmem:[%s16540_s19 + $0x848] sm:$0xff] }
 0x118   : > { %1493 = vmatprep.mubr.bf16.mxu1 %v16623_v55  ;;  %1642 = vmatpush1.bf16.msra.mxu1 %v13431_v21  ;;  %v2026_v21 = vld [vmem:[%s16540_s19 + $0x340] sm:$0xff] }
 0x119   : > { %1643 = vmatprep.subr.bf16.mxu1 %v13440_v25  ;;  %v13537_v25 = vcombine.low %v2002_v10, %v2010_v11 }
 0x11a   : > { %1531 = vmatpush1.bf16.msra.mxu0 %v13437_v4  ;;  %v1963_v4 = vld [vmem:[%s16540_s19 + $0x148] sm:$0xff] }
 0x11b   : > { %1532 = vmatprep.subr.bf16.mxu0 %v13446_v7  ;;  %v13475_v7 = vcombine.low %v1939_v58, %v1947_v59  ;;  %v13492_v12 = vcombine.high %v1955_v3, %v1963_v4  ;;  %v13491_v18 = vcombine.low %v1955_v3, %v1963_v4  ;;  %v2059_v3 = vld [vmem:[%s16540_s19 + $0x448] sm:$0xff] }
 0x11c   : > { %1644 = vmatpush1.bf16.msra.mxu1 %v13439_v31  ;;  %v13524_v31 = vcombine.high %v1987_v22, %v1995_v24 }
 0x11d   : > { %1381 = vmatmul.mubr.bf16.gmra.mrb[28].mxu0 %v16629_v8  ;;  %1645 = vmatprep.subr.bf16.mxu1 %v13448_v36 }
 0x11e   : > { %1536 = vmatprep.mubr.bf16.mxu0 %v16557_v23  ;;  %1533 = vmatpush1.bf16.msra.mxu0 %v13445_v15  ;;  %v1979_v15 = vld [vmem:[%s16540_s19 + $0x1c8] sm:$0xff] }
 0x11f   : > { %1534 = vmatprep.subr.bf16.mxu0 %v13454_v19  ;;  %1494 = vmatmul.mubr.bf16.gmra.mrb[28].mxu1 %v16629_v8  ;;  %v2018_v19 = vld [vmem:[%s16540_s19 + $0x300] sm:$0xff]  ;;  %v13507_v27 = vcombine.low %v1971_v14, %v1979_v15 }
 0x120   : > { %1646 = vmatpush1.bf16.msra.mxu1 %v13447_v42  ;;  %1649 = vmatprep.mubr.bf16.mxu1 %v16557_v23  ;;  %v13476_v23 = vcombine.high %v1939_v58, %v1947_v59  ;;  %v13553_v36 = vcombine.low %v2018_v19, %v2026_v21  ;;  %v2027_v42 = vld [vmem:[%s16540_s19 + $0x348] sm:$0xff] }
 0x121   : > { %1647 = vmatprep.subr.bf16.mxu1 %v13456_v45  ;;  %v16684_v45 = vld [vmem:[%s16540_s19 + $0x800] sm:$0xff]  ;;  %v2035_v58 = vld [vmem:[%s16540_s19 + $0x388] sm:$0xff] }
 0x122   : > { %1535 = vmatpush1.bf16.msra.mxu0 %v13453_v26  ;;  %v13554_v26 = vcombine.high %v2018_v19, %v2026_v21  ;;  %v13713_v54 = vcombine.low %v16684_v45, %v16687_v46  ;;  %v2043_v59 = vld [vmem:[%s16540_s19 + $0x3c8] sm:$0xff] }
 0x123   : > { %8150 = vmatprep.subr.bf16.mxu0 %v13458_v29  ;;  %v2042_v29 = vld [vmem:[%s16540_s19 + $0x3c0] sm:$0xff]  ;;  %v13572_v1 = vcombine.high %v2035_v58, %v2043_v59  ;;  %v2083_v19 = vld [vmem:[%s16540_s19 + $0x508] sm:$0xff] }
 0x124   : > { %1648 = vmatpush1.bf16.msra.mxu1 %v13455_v51  ;;  %v13569_v43 = vcombine.low %v2034_v28, %v2042_v29  ;;  %v2074_v51 = vld [vmem:[%s16540_s19 + $0x4c0] sm:$0xff]  ;;  %v2091_v21 = vld [vmem:[%s16540_s19 + $0x548] sm:$0xff] }
 0x125   : > { %1537 = vmatmul.mubr.bf16.vlgmr.msra.gmra.mrb[32].mxu0 %v16562_v62  ;;  %8602 = vmatprep.subr.bf16.mxu1 %v13460_v56  ;;  %v13715_v56 = vcombine.low %v16690_v47, %v16696_v52 }
 0x126   : > { %1546 = vmatprep.mubr.bf16.mxu0 %v16565_v2  ;;  %8151 = vmatpush1.bf16.msra.mxu0 %v13457_v40  ;;  %v2058_v40 = vld [vmem:[%s16540_s19 + $0x440] sm:$0xff] }
 0x127   : > { %8152 = vmatprep.subr.bf16.mxu0 %v13474_v41  ;;  %1650 = vmatmul.mubr.bf16.vlgmr.msra.gmra.mrb[32].mxu1 %v16562_v62  ;;  %v13538_v62 = vcombine.high %v2002_v10, %v2010_v11  ;;  %v2019_v41 = vld [vmem:[%s16540_s19 + $0x308] sm:$0xff]  ;;  %v13586_v44 = vcombine.high %v2050_v38, %v2058_v40  ;;  %v2106_v10 = vld [vmem:[%s16540_s19 + $0x5c0] sm:$0xff] }
 0x128   : > { %8603 = vmatpush1.bf16.msra.mxu1 %v13459_v63  ;;  %1659 = vmatprep.mubr.bf16.mxu1 %v16565_v2  ;;  %v13508_v2 = vcombine.high %v1971_v14, %v1979_v15  ;;  %v2082_v63 = vld [vmem:[%s16540_s19 + $0x500] sm:$0xff]  ;;  %v2075_v14 = vld [vmem:[%s16540_s19 + $0x4c8] sm:$0xff] }
 0x129   : > { %8604 = vmatprep.subr.bf16.mxu1 %v13476_v23  ;;  %v2051_v23 = vld [vmem:[%s16540_s19 + $0x408] sm:$0xff]  ;;  %v13617_v15 = vcombine.low %v2082_v63, %v2090_v0 }
 0x12a   : > { %8153 = vmatpush1.bf16.msra.mxu0 %v13473_v48  ;;  %v13539_v48 = vcombine.low %v2003_v32, %v2011_v33  ;;  %v13588_v11 = vcombine.high %v2051_v23, %v2059_v3 }
 0x12b   : > { %8154 = vmatprep.subr.bf16.mxu0 %v13490_v49  ;;  %v2066_v49 = vld [vmem:[%s16540_s19 + $0x480] sm:$0xff] }
 0x12c   : > { %8605 = vmatpush1.bf16.msra.mxu1 %v13475_v7  ;;  %v13601_v4 = vcombine.low %v2066_v49, %v2074_v51  ;;  %v2098_v7 = vld [vmem:[%s16540_s19 + $0x580] sm:$0xff] }
 0x12d   : > { %1547 = vmatmul.mubr.bf16.gmra.mrb[36].mxu0 %v16570_v16  ;;  %8606 = vmatprep.subr.bf16.mxu1 %v13492_v12  ;;  %v2067_v12 = vld [vmem:[%s16540_s19 + $0x488] sm:$0xff] }
 0x12e   : > { %1556 = vmatprep.mubr.bf16.mxu0 %v16573_v20  ;;  %8155 = vmatpush1.bf16.msra.mxu0 %v13489_v60  ;;  %v13602_v60 = vcombine.high %v2066_v49, %v2074_v51  ;;  %v13603_v24 = vcombine.low %v2067_v12, %v2075_v14 }
 0x12f   : > { %8156 = vmatprep.subr.bf16.mxu0 %v13506_v61  ;;  %1660 = vmatmul.mubr.bf16.gmra.mrb[36].mxu1 %v16570_v16  ;;  %v13570_v16 = vcombine.high %v2034_v28, %v2042_v29  ;;  %v13555_v61 = vcombine.low %v2019_v41, %v2027_v42  ;;  %v2099_v28 = vld [vmem:[%s16540_s19 + $0x588] sm:$0xff] }
 0x130   : > { %8607 = vmatpush1.bf16.msra.mxu1 %v13491_v18  ;;  %1669 = vmatprep.mubr.bf16.mxu1 %v16573_v20  ;;  %v13540_v20 = vcombine.high %v2003_v32, %v2011_v33  ;;  %v2122_v18 = vld [vmem:[%s16540_s19 + $0x640] sm:$0xff]  ;;  %v2107_v29 = vld [vmem:[%s16540_s19 + $0x5c8] sm:$0xff]  ;;  %v13619_v32 = vcombine.low %v2083_v19, %v2091_v21 }
 0x131   : > { %8608 = vmatprep.subr.bf16.mxu1 %v13508_v2  ;;  %v13633_v2 = vcombine.low %v2098_v7, %v2106_v10  ;;  %v2146_v33 = vld [vmem:[%s16540_s19 + $0x700] sm:$0xff] }
 0x132   : > { %8157 = vmatpush1.bf16.msra.mxu0 %v13505_v5  ;;  %v13618_v5 = vcombine.high %v2082_v63, %v2090_v0  ;;  %v2163_v63 = vld [vmem:[%s16540_s19 + $0x788] sm:$0xff] }
 0x133   : > { %8158 = vmatprep.subr.bf16.mxu0 %v13522_v6  ;;  %v13571_v6 = vcombine.low %v2035_v58, %v2043_v59  ;;  %v2155_v58 = vld [vmem:[%s16540_s19 + $0x748] sm:$0xff] }
 0x134   : > { %8609 = vmatpush1.bf16.msra.mxu1 %v13507_v27  ;;  %v13620_v27 = vcombine.high %v2083_v19, %v2091_v21  ;;  %v2171_v0 = vld [vmem:[%s16540_s19 + $0x7c8] sm:$0xff] }
 0x135   : > { %1557 = vmatmul.mubr.bf16.gmra.mrb[40].mxu0 %v16579_v35  ;;  %8610 = vmatprep.subr.bf16.mxu1 %v13524_v31 }
 0x136   : > { %1566 = vmatprep.mubr.bf16.mxu0 %v16583_v39  ;;  %8159 = vmatpush1.bf16.msra.mxu0 %v13521_v17  ;;  %v13587_v17 = vcombine.low %v2051_v23, %v2059_v3  ;;  %v13700_v23 = vcombine.high %v2163_v63, %v2171_v0  ;;  %v13716_v3 = vcombine.high %v16690_v47, %v16696_v52 }
 0x137   : > { %8160 = vmatprep.subr.bf16.mxu0 %v13538_v62  ;;  %1670 = vmatmul.mubr.bf16.gmra.mrb[40].mxu1 %v16579_v35  ;;  %v13556_v35 = vcombine.high %v2019_v41, %v2027_v42  ;;  %v2114_v62 = vld [vmem:[%s16540_s19 + $0x600] sm:$0xff] }
 0x138   : > { %8611 = vmatpush1.bf16.msra.mxu1 %v13523_v37  ;;  %1679 = vmatprep.mubr.bf16.mxu1 %v16583_v39  ;;  %v13585_v39 = vcombine.low %v2050_v38, %v2058_v40  ;;  %v13650_v22 = vcombine.high %v2114_v62, %v2122_v18  ;;  %v13649_v31 = vcombine.low %v2114_v62, %v2122_v18  ;;  %v2123_v37 = vld [vmem:[%s16540_s19 + $0x648] sm:$0xff]  ;;  %v2162_v41 = vld [vmem:[%s16540_s19 + $0x780] sm:$0xff] }
 0x139   : > { %8612 = vmatprep.subr.bf16.mxu1 %v13540_v20  ;;  %v13635_v20 = vcombine.low %v2099_v28, %v2107_v29  ;;  %v2170_v42 = vld [vmem:[%s16540_s19 + $0x7c0] sm:$0xff] }
 0x13a   : > { %8161 = vmatpush1.bf16.msra.mxu0 %v13537_v25  ;;  %v2130_v25 = vld [vmem:[%s16540_s19 + $0x680] sm:$0xff]  ;;  %v13698_v51 = vcombine.high %v2162_v41, %v2170_v42  ;;  %v13697_v59 = vcombine.low %v2162_v41, %v2170_v42  ;;  %v16807_v42 = vld [vmem:[%s16540_s19 + $0x908] sm:$0xff] }
 0x13b   : > { %8162 = vmatprep.subr.bf16.mxu0 %v13554_v26  ;;  %v2138_v26 = vld [vmem:[%s16540_s19 + $0x6c0] sm:$0xff] }
 0x13c   : > { %8613 = vmatpush1.bf16.msra.mxu1 %v13539_v48  ;;  %v13665_v38 = vcombine.low %v2130_v25, %v2138_v26  ;;  %v2139_v48 = vld [vmem:[%s16540_s19 + $0x6c8] sm:$0xff] }
 0x13d   : > { %1567 = vmatmul.mubr.bf16.gmra.mrb[44].mxu0 %v16589_v53  ;;  %8614 = vmatprep.subr.bf16.mxu1 %v13556_v35  ;;  %v2147_v35 = vld [vmem:[%s16540_s19 + $0x708] sm:$0xff] }
 0x13e   : > { %1576 = vmatprep.mubr.bf16.mxu0 %v16593_v57  ;;  %8163 = vmatpush1.bf16.msra.mxu0 %v13553_v36  ;;  %v2154_v36 = vld [vmem:[%s16540_s19 + $0x740] sm:$0xff] }
 0x13f   : > { %8164 = vmatprep.subr.bf16.mxu0 %v13570_v16  ;;  %1680 = vmatmul.mubr.bf16.gmra.mrb[44].mxu1 %v16589_v53  ;;  %v13634_v53 = vcombine.high %v2098_v7, %v2106_v10  ;;  %v2115_v16 = vld [vmem:[%s16540_s19 + $0x608] sm:$0xff]  ;;  %v13682_v40 = vcombine.high %v2146_v33, %v2154_v36  ;;  %v13681_v49 = vcombine.low %v2146_v33, %v2154_v36 }
 0x140   : > { %8615 = vmatpush1.bf16.msra.mxu1 %v13555_v61  ;;  %1689 = vmatprep.mubr.bf16.mxu1 %v16593_v57  ;;  %v13604_v57 = vcombine.high %v2067_v12, %v2075_v14  ;;  %v13684_v61 = vcombine.high %v2147_v35, %v2155_v58 }
 0x141   : > { %8616 = vmatprep.subr.bf16.mxu1 %v13572_v1  ;;  %v13683_v1 = vcombine.low %v2147_v35, %v2155_v58 }
 0x142   : > { %8165 = vmatpush1.bf16.msra.mxu0 %v13569_v43  ;;  %v13652_v43 = vcombine.high %v2115_v16, %v2123_v37 }
 0x143   : > { %8166 = vmatprep.subr.bf16.mxu0 %v13586_v44  ;;  %v2131_v44 = vld [vmem:[%s16540_s19 + $0x688] sm:$0xff] }
 0x144   : > { %8617 = vmatpush1.bf16.msra.mxu1 %v13571_v6  ;;  %v16757_v6 = vld [vmem:[#allocation4] sm:$0xff] }
 0x145   : > { %1577 = vmatmul.mubr.bf16.gmra.mrb[48].mxu0 %v16599_v9  ;;  %8618 = vmatprep.subr.bf16.mxu1 %v13588_v11 }
 0x146   : > { %1586 = vmatprep.mubr.bf16.mxu0 %v16603_v13  ;;  %8167 = vmatpush1.bf16.msra.mxu0 %v13585_v39  ;;  %v13714_v39 = vcombine.high %v16684_v45, %v16687_v46  ;;  %v16828_v46 = vld [vmem:[%s16540_s19 + $0x980] sm:$0xff] }
 0x147   : > { %8168 = vmatprep.subr.bf16.mxu0 %v13602_v60  ;;  %1690 = vmatmul.mubr.bf16.gmra.mrb[48].mxu1 %v16599_v9  ;;  %v13666_v9 = vcombine.high %v2130_v25, %v2138_v26  ;;  %v13667_v60 = vcombine.low %v2131_v44, %v2139_v48  ;;  %v2202_v26 = vld [vmem:[%s16540_s19 + $0x8c0] sm:$0xff] }
 0x148   : > { %8619 = vmatpush1.bf16.msra.mxu1 %v13587_v17  ;;  %1699 = vmatprep.mubr.bf16.mxu1 %v16603_v13  ;;  %v13636_v13 = vcombine.high %v2099_v28, %v2107_v29  ;;  %v2203_v28 = vld [vmem:[%s16540_s19 + $0x8c8] sm:$0xff] }
 0x149   : > { %8620 = vmatprep.subr.bf16.mxu1 %v13604_v57 }
 0x14a   : > { %8169 = vmatpush1.bf16.msra.mxu0 %v13601_v4 }
 0x14b   : > { %8170 = vmatprep.subr.bf16.mxu0 %v13618_v5 }
 0x14c   : > { %8621 = vmatpush1.bf16.msra.mxu1 %v13603_v24 }
 0x14d   : > { %1587 = vmatmul.mubr.bf16.gmra.mrb[52].mxu0 %v16609_v30  ;;  %8622 = vmatprep.subr.bf16.mxu1 %v13620_v27  ;;  %v2195_v27 = vld [vmem:[%s16540_s19 + $0x888] sm:$0xff] }
 0x14e   : > { %1596 = vmatprep.mubr.bf16.mxu0 %v16613_v34  ;;  %8171 = vmatpush1.bf16.msra.mxu0 %v13617_v15 }
 0x14f   : > { %8172 = vmatprep.subr.bf16.mxu0 %v13634_v53  ;;  %1700 = vmatmul.mubr.bf16.gmra.mrb[52].mxu1 %v16609_v30  ;;  %v13651_v30 = vcombine.low %v2115_v16, %v2123_v37  ;;  %v13732_v16 = vcombine.high %v2195_v27, %v2203_v28  ;;  %v16794_v37 = vld [vmem:[%s16540_s19 + $0x900] sm:$0xff] }
 0x150   : > { %8623 = vmatpush1.bf16.msra.mxu1 %v13619_v32  ;;  %1709 = vmatprep.mubr.bf16.mxu1 %v16613_v34  ;;  %v13668_v34 = vcombine.high %v2131_v44, %v2139_v48 }
 0x151   : > { %8624 = vmatprep.subr.bf16.mxu1 %v13636_v13 }
 0x152   : > { %8173 = vmatpush1.bf16.msra.mxu0 %v13633_v2  ;;  %v2194_v2 = vld [vmem:[%s16540_s19 + $0x880] sm:$0xff] }
 0x153   : > { %8174 = vmatprep.subr.bf16.mxu0 %v13650_v22  ;;  %v13730_v13 = vcombine.high %v2194_v2, %v2202_v26 }
 0x154   : > { %8625 = vmatpush1.bf16.msra.mxu1 %v13635_v20 }
 0x155   : > { %1597 = vmatmul.mubr.bf16.gmra.mrb[56].mxu0 %v16619_v50  ;;  %8626 = vmatprep.subr.bf16.mxu1 %v13652_v43  ;;  %v16810_v43 = vld [vmem:[%s16540_s19 + $0x948] sm:$0xff] }
 0x156   : > { %1606 = vmatprep.mubr.bf16.mxu0 %v16623_v55  ;;  %8175 = vmatpush1.bf16.msra.mxu0 %v13649_v31  ;;  %v13748_v45 = vcombine.high %v16807_v42, %v16810_v43 }
 0x157   : > { %8176 = vmatprep.subr.bf16.mxu0 %v13666_v9  ;;  %1710 = vmatmul.mubr.bf16.gmra.mrb[56].mxu1 %v16619_v50  ;;  %v13699_v50 = vcombine.low %v2163_v63, %v2171_v0  ;;  %v16835_v63 = vld [vmem:[%s16540_s19 + $0x988] sm:$0xff] }
 0x158   : > { %8627 = vmatpush1.bf16.msra.mxu1 %v13651_v30  ;;  %1719 = vmatprep.mubr.bf16.mxu1 %v16623_v55  ;;  %v518_v55 = vlaneseq  ;;  %v16838_v0 = vld [vmem:[%s16540_s19 + $0x9c8] sm:$0xff] }
 0x159   : > { %8628 = vmatprep.subr.bf16.mxu1 %v13668_v34 }
 0x15a   : > { %8177 = vmatpush1.bf16.msra.mxu0 %v13665_v38  ;;  %v16752_v4 = vshrl.u32 %v518_v55, 7  ;;  %v16797_v38 = vld [vmem:[%s16540_s19 + $0x940] sm:$0xff] }
 0x15b   : > { %8178 = vmatprep.subr.bf16.mxu0 %v13682_v40  ;;  %v13746_v35 = vcombine.high %v16794_v37, %v16797_v38 }
 0x15c   : > { %8629 = vmatpush1.bf16.msra.mxu1 %v13667_v60  ;;  %v16755_v5 = vsub.s32 0, %v16752_v4  ;;  %v16760_v7 = vsub.s32 1, %v16752_v4  ;;  %v16775_v57 = vsub.s32 2, %v16752_v4  ;;  %v16779_v22 = vsub.s32 3, %v16752_v4 }
 0x15d   : > { %1607 = vmatmul.mubr.bf16.gmra.mrb[60].mxu0 %v16629_v8  ;;  %8630 = vmatprep.subr.bf16.mxu1 %v13684_v61 }
 0x15e   : > { %8179 = vmatpush1.bf16.msra.mxu0 %v13681_v49  ;;  %20590 = vst [vmem:[#allocation20_spill] sm:$0xff] %v16755_v5  ;;  %20591 = vst [vmem:[#allocation21_spill] sm:$0xff] %v16760_v7  ;;  %v16768_v10 = vrot.slane %v16757_v6, %v16760_v7  ;;  %v16790_v32 = vrot.slane %v16757_v6, %v16775_v57  ;;  %v16801_v40 = vrot.slane %v16757_v6, %v16779_v22 }
 0x15f   : > { %8180 = vmatprep.subr.bf16.mxu0 %v13698_v51  ;;  %1720 = vmatmul.mubr.bf16.gmra.mrb[60].mxu1 %v16629_v8  ;;  %v16764_v8 = vrot.slane %v16757_v6, %v16755_v5  ;;  %20592 = vst [vmem:[#allocation22_spill] sm:$0xff] %v16775_v57  ;;  %20593 = vst [vmem:[#allocation23_spill] sm:$0xff] %v16779_v22  ;;  %v13729_v49 = vcombine.low %v2194_v2, %v2202_v26  ;;  %v16856_v2 = vld [vmem:[%s16540_s19 + $0xa00] sm:$0xff]  ;;  %v17261_v22 = vsub.s32 6, %v16752_v4 }
 0x160   : > { %8631 = vmatpush1.bf16.msra.mxu1 %v13683_v1  ;;  %v13731_v51 = vcombine.low %v2195_v27, %v2203_v28 }
 0x161   : > { %8632 = vmatprep.subr.bf16.mxu1 %v13700_v23  ;;  %20623 = vst [vmem:[#allocation53_spill] sm:$0xff] %v17261_v22 }
 0x162   : > { %8181 = vmatpush1.bf16.msra.mxu0 %v13697_v59 }
 0x163   : > { %8263 = vmatprep.subr.bf16.mxu0 %v13714_v39 }
 0x164   : > { %8633 = vmatpush1.bf16.msra.mxu1 %v13699_v50 }
 0x165   : > { %8715 = vmatprep.subr.bf16.mxu1 %v13716_v3 }
 0x1b8   : > { %v1312_v11 = vpop.f32.mrb[0].mxu0  ;;  %v1425_v30 = vpop.f32.mrb[0].mxu1 }
 0x1b9   : > { %v1313_v12 = vadd.f32 %v1312_v11, %v16764_v8  ;;  %v1314_v14 = vpop.f32.mrb[1].mxu0  ;;  %v1426_v58 = vadd.f32 %v1425_v30, %v16790_v32  ;;  %v1427_v59 = vpop.f32.mrb[1].mxu1  ;;  %v16888_v30 = vld [vmem:[%s16540_s19 + $0xa80] sm:$0xff] }
 0x1ba   : > { %v1315_v15 = vadd.f32 %v1314_v14, %v16768_v10  ;;  %v1316_v53 = vpop.f32.mrb[2].mxu0  ;;  %v1428_v47 = vadd.f32 %v1427_v59, %v16801_v40  ;;  %v1429_v52 = vpop.f32.mrb[2].mxu1 }
 0x1bb   : > { %v1317_v17 = vadd.f32 %v1316_v53, %v16764_v8  ;;  %v1318_v62 = vpop.f32.mrb[3].mxu0  ;;  %v1730_v19 = vmax.f32 %v1313_v12, 0.0  ;;  %v1732_v1 = vmax.f32 %v1426_v58, 0.0  ;;  %v1430_v23 = vadd.f32 %v1429_v52, %v16790_v32  ;;  %v1431_v50 = vpop.f32.mrb[3].mxu1 }
 0x1bc   : > { %v1319_v18 = vadd.f32 %v1318_v62, %v16768_v10  ;;  %v1731_v24 = vmax.f32 %v1315_v15, 0.0  ;;  %v1733_v55 = vmax.f32 %v1428_v47, 0.0  ;;  %v1432_v11 = vadd.f32 %v1431_v50, %v16801_v40 }
 0x1bd   : > { %v1738_v21 = vmax.f32 %v1317_v17, 0.0  ;;  %v13745_v15 = vcombine.low %v16794_v37, %v16797_v38  ;;  %v13747_v53 = vcombine.low %v16807_v42, %v16810_v43  ;;  %v1740_v17 = vmax.f32 %v1430_v23, 0.0 }
 0x1be   : > { %v1739_v25 = vmax.f32 %v1319_v18, 0.0  ;;  %v13763_v37 = vcombine.low %v16835_v63, %v16838_v0 }
 0x1bf   : > { %v16784_v29 = vpack.c.bf16 %v1738_v21, %v1730_v19  ;;  %v13764_v21 = vcombine.high %v16835_v63, %v16838_v0 }
 0x1c0   : > { %v16786_v31 = vpack.c.bf16 %v1739_v25, %v1731_v24  ;;  %v1322_v9 = vpop.f32.mrb[4].mxu0  ;;  %v16859_v24 = vld [vmem:[%s16540_s19 + $0xa40] sm:$0xff]  ;;  %v1741_v25 = vmax.f32 %v1432_v11, 0.0 }
 0x1c1   : > { %v1323_v33 = vadd.f32 %v1322_v9, %v16764_v8  ;;  %v1324_v36 = vpop.f32.mrb[5].mxu0  ;;  %v16867_v9 = vld [vmem:[%s16540_s19 + $0xa08] sm:$0xff]  ;;  %v13778_v42 = vcombine.high %v16856_v2, %v16859_v24 }
 0x1c2   : > { %v1325_v20 = vadd.f32 %v1324_v36, %v16768_v10  ;;  %v1326_v41 = vpop.f32.mrb[6].mxu0  ;;  %8182 = vmatprep.mubr.bf16.mxu0 %v16786_v31  ;;  %8634 = vmatprep.mubr.bf16.mxu1 %v16786_v31  ;;  %v16872_v36 = vpack.c.bf16 %v1740_v17, %v1732_v1  ;;  %v16879_v38 = vpack.c.bf16 %v1741_v25, %v1733_v55  ;;  %v16919_v17 = vld [vmem:[%s16540_s19 + $0xb40] sm:$0xff] }
 0x1c3   : > { %v1327_v44 = vadd.f32 %v1326_v41, %v16764_v8  ;;  %v1328_v48 = vpop.f32.mrb[7].mxu0  ;;  %8183 = vmatmul.mubr.bf16.vlgmr.msra.gmra.mrb[64].mxu0 %v16784_v29  ;;  %8635 = vmatmul.mubr.bf16.vlgmr.msra.gmra.mrb[64].mxu1 %v16784_v29  ;;  %v1746_v39 = vmax.f32 %v1323_v33, 0.0  ;;  %v16870_v33 = vld [vmem:[%s16540_s19 + $0xa48] sm:$0xff]  ;;  %v13777_v1 = vcombine.low %v16856_v2, %v16859_v24 }
 0x1c4   : > { %v1329_v34 = vadd.f32 %v1328_v48, %v16768_v10  ;;  %8264 = vmatpush1.bf16.msra.mxu0 %v13713_v54  ;;  %8716 = vmatpush1.bf16.msra.mxu1 %v13715_v56  ;;  %v16831_v54 = vld [vmem:[%s16540_s19 + $0x9c0] sm:$0xff]  ;;  %v1747_v56 = vmax.f32 %v1325_v20, 0.0  ;;  %20595 = vst [vmem:[#allocation25_spill] sm:$0xff] %v16872_v36  ;;  %20596 = vst [vmem:[#allocation26_spill] sm:$0xff] %v16879_v38  ;;  %v1435_v20 = vpop.f32.mrb[4].mxu1  ;;  %v13779_v23 = vcombine.low %v16867_v9, %v16870_v33  ;;  %v16927_v2 = vld [vmem:[%s16540_s19 + $0xb08] sm:$0xff] }
 0x1c5   : > { %v1754_v60 = vmax.f32 %v1327_v44, 0.0  ;;  %8265 = vmatprep.subr.bf16.mxu0 %v13730_v13  ;;  %8717 = vmatprep.subr.bf16.mxu1 %v13732_v16  ;;  %v13762_v19 = vcombine.high %v16828_v46, %v16831_v54  ;;  %v13761_v28 = vcombine.low %v16828_v46, %v16831_v54  ;;  %v1436_v43 = vadd.f32 %v1435_v20, %v16790_v32  ;;  %v1437_v44 = vpop.f32.mrb[5].mxu1  ;;  %v16930_v24 = vld [vmem:[%s16540_s19 + $0xb48] sm:$0xff] }
 0x1c6   : > { %v1755_v61 = vmax.f32 %v1329_v34, 0.0  ;;  %v16891_v34 = vld [vmem:[%s16540_s19 + $0xac0] sm:$0xff]  ;;  %v1439_v58 = vpop.f32.mrb[6].mxu1 }
 0x1c7   : > { %v16841_v3 = vpack.c.bf16 %v1754_v60, %v1746_v39  ;;  %v16895_v60 = vld [vmem:[%s16540_s19 + $0xa88] sm:$0xff]  ;;  %v1748_v46 = vmax.f32 %v1436_v43, 0.0  ;;  %v1440_v54 = vadd.f32 %v1439_v58, %v16790_v32  ;;  %v1441_v47 = vpop.f32.mrb[7].mxu1  ;;  %v13812_v43 = vcombine.high %v16927_v2, %v16930_v24 }
 0x1c8   : > { %v16844_v12 = vpack.c.bf16 %v1755_v61, %v1747_v56  ;;  %8266 = vmatpush1.bf16.msra.mxu0 %v13729_v49  ;;  %8718 = vmatpush1.bf16.msra.mxu1 %v13731_v51  ;;  %v1332_v14 = vpop.f32.mrb[8].mxu0  ;;  %v13780_v51 = vcombine.high %v16867_v9, %v16870_v33  ;;  %v1442_v61 = vadd.f32 %v1441_v47, %v16801_v40  ;;  %v16958_v58 = vld [vmem:[%s16540_s19 + $0xbc8] sm:$0xff] }
 0x1c9   : > { %20594 = vst [vmem:[#allocation24_spill] sm:$0xff] %v16841_v3  ;;  %v1333_v62 = vadd.f32 %v1332_v14, %v16764_v8  ;;  %v1334_v18 = vpop.f32.mrb[9].mxu0  ;;  %8267 = vmatprep.subr.bf16.mxu0 %v13746_v35  ;;  %8719 = vmatprep.subr.bf16.mxu1 %v13748_v45  ;;  %v1438_v35 = vadd.f32 %v1437_v44, %v16801_v40  ;;  %v16898_v45 = vld [vmem:[%s16540_s19 + $0xac8] sm:$0xff]  ;;  %v1756_v50 = vmax.f32 %v1440_v54, 0.0  ;;  %v16948_v44 = vld [vmem:[%s16540_s19 + $0xb80] sm:$0xff] }
 0x1ca   : > { %v1335_v26 = vadd.f32 %v1334_v18, %v16768_v10  ;;  %v1336_v27 = vpop.f32.mrb[10].mxu0  ;;  %8192 = vmatprep.mubr.bf16.mxu0 %v16844_v12  ;;  %8644 = vmatprep.mubr.bf16.mxu1 %v16844_v12  ;;  %v13794_v14 = vcombine.high %v16888_v30, %v16891_v34  ;;  %v1445_v33 = vpop.f32.mrb[8].mxu1 }
 0x1cb   : > { %v1337_v13 = vadd.f32 %v1336_v27, %v16764_v8  ;;  %v1338_v16 = vpop.f32.mrb[11].mxu0  ;;  %8193 = vmatmul.mubr.bf16.gmra.mrb[68].mxu0 %v16841_v3  ;;  %8645 = vmatmul.mubr.bf16.gmra.mrb[68].mxu1 %v16841_v3  ;;  %v1762_v48 = vmax.f32 %v1333_v62, 0.0  ;;  %v1749_v56 = vmax.f32 %v1438_v35, 0.0  ;;  %v1757_v62 = vmax.f32 %v1442_v61, 0.0  ;;  %v1447_v20 = vpop.f32.mrb[9].mxu1  ;;  %v16955_v35 = vld [vmem:[%s16540_s19 + $0xb88] sm:$0xff] }
 0x1cc   : > { %v1339_v41 = vadd.f32 %v1338_v16, %v16768_v10  ;;  %8268 = vmatpush1.bf16.msra.mxu0 %v13745_v15  ;;  %8720 = vmatpush1.bf16.msra.mxu1 %v13747_v53  ;;  %v1763_v59 = vmax.f32 %v1335_v26, 0.0  ;;  %v13796_v15 = vcombine.high %v16895_v60, %v16898_v45  ;;  %v16916_v53 = vld [vmem:[%s16540_s19 + $0xb00] sm:$0xff]  ;;  %v16932_v25 = vpack.c.bf16 %v1756_v50, %v1748_v46  ;;  %v2699_v3 = vld [vmem:[%s16540_s19 + $0x1848] sm:$0xff] }
 0x1cd   : > { %v1770_v49 = vmax.f32 %v1337_v13, 0.0  ;;  %8269 = vmatprep.subr.bf16.mxu0 %v13762_v19  ;;  %8721 = vmatprep.subr.bf16.mxu1 %v13764_v21  ;;  %v13793_v21 = vcombine.low %v16888_v30, %v16891_v34  ;;  %v16939_v9 = vpack.c.bf16 %v1757_v62, %v1749_v56  ;;  %v13810_v16 = vcombine.high %v16916_v53, %v16919_v17 }
 0x1ce   : > { %v1771_v39 = vmax.f32 %v1339_v41, 0.0  ;;  %20599 = vst [vmem:[#allocation29_spill] sm:$0xff] %v16932_v25  ;;  %v13809_v61 = vcombine.low %v16916_v53, %v16919_v17 }
 0x1cf   : > { %v16901_v52 = vpack.c.bf16 %v1770_v49, %v1762_v48  ;;  %20600 = vst [vmem:[#allocation30_spill] sm:$0xff] %v16939_v9  ;;  %v16951_v48 = vld [vmem:[%s16540_s19 + $0xbc0] sm:$0xff]  ;;  %v1448_v49 = vadd.f32 %v1447_v20, %v16801_v40 }
 0x1d0   : > { %v16904_v63 = vpack.c.bf16 %v1771_v39, %v1763_v59  ;;  %8270 = vmatpush1.bf16.msra.mxu0 %v13761_v28  ;;  %8722 = vmatpush1.bf16.msra.mxu1 %v13763_v37  ;;  %v1342_v0 = vpop.f32.mrb[12].mxu0  ;;  %v13795_v28 = vcombine.low %v16895_v60, %v16898_v45  ;;  %v1446_v37 = vadd.f32 %v1445_v33, %v16790_v32 }
 0x1d1   : > { %20597 = vst [vmem:[#allocation27_spill] sm:$0xff] %v16901_v52  ;;  %v1343_v55 = vadd.f32 %v1342_v0, %v16764_v8  ;;  %v1344_v11 = vpop.f32.mrb[13].mxu0  ;;  %8271 = vmatprep.subr.bf16.mxu0 %v13778_v42  ;;  %8723 = vmatprep.subr.bf16.mxu1 %v13780_v51  ;;  %v1449_v51 = vpop.f32.mrb[10].mxu1  ;;  %v1765_v46 = vmax.f32 %v1448_v49, 0.0  ;;  %v13811_v0 = vcombine.low %v16927_v2, %v16930_v24 }
 0x1d2   : > { %20598 = vst [vmem:[#allocation28_spill] sm:$0xff] %v16904_v63  ;;  %v1345_v18 = vadd.f32 %v1344_v11, %v16768_v10  ;;  %v1346_v19 = vpop.f32.mrb[14].mxu0  ;;  %8202 = vmatprep.mubr.bf16.mxu0 %v16904_v63  ;;  %8654 = vmatprep.mubr.bf16.mxu1 %v16904_v63  ;;  %v1764_v59 = vmax.f32 %v1446_v37, 0.0  ;;  %v1450_v39 = vadd.f32 %v1449_v51, %v16790_v32  ;;  %v1451_v60 = vpop.f32.mrb[11].mxu1  ;;  %v2698_v63 = vld [vmem:[%s16540_s19 + $0x1840] sm:$0xff] }
 0x1d3   : > { %v1347_v26 = vadd.f32 %v1346_v19, %v16764_v8  ;;  %v1348_v27 = vpop.f32.mrb[15].mxu0  ;;  %8203 = vmatmul.mubr.bf16.gmra.mrb[72].mxu0 %v16901_v52  ;;  %8655 = vmatmul.mubr.bf16.gmra.mrb[72].mxu1 %v16901_v52  ;;  %v1778_v41 = vmax.f32 %v1343_v55, 0.0  ;;  %v1452_v54 = vadd.f32 %v1451_v60, %v16801_v40  ;;  %v13826_v55 = vcombine.high %v16948_v44, %v16951_v48  ;;  %v16987_v19 = vld [vmem:[%s16540_s19 + $0xc08] sm:$0xff]  ;;  %v1455_v33 = vpop.f32.mrb[12].mxu1 }
 0x1d4   : > { %v1349_v13 = vadd.f32 %v1348_v27, %v16768_v10  ;;  %8272 = vmatpush1.bf16.msra.mxu0 %v13777_v1  ;;  %8724 = vmatpush1.bf16.msra.mxu1 %v13779_v23  ;;  %v1779_v30 = vmax.f32 %v1345_v18, 0.0  ;;  %v1772_v1 = vmax.f32 %v1450_v39, 0.0  ;;  %v13828_v11 = vcombine.high %v16955_v35, %v16958_v58  ;;  %v1457_v20 = vpop.f32.mrb[13].mxu1 }
 0x1d5   : > { %v1786_v42 = vmax.f32 %v1347_v26, 0.0  ;;  %8273 = vmatprep.subr.bf16.mxu0 %v13794_v14  ;;  %8725 = vmatprep.subr.bf16.mxu1 %v13796_v15  ;;  %v16976_v14 = vld [vmem:[%s16540_s19 + $0xc00] sm:$0xff]  ;;  %v1773_v53 = vmax.f32 %v1452_v54, 0.0  ;;  %v13825_v18 = vcombine.low %v16948_v44, %v16951_v48  ;;  %v13827_v27 = vcombine.low %v16955_v35, %v16958_v58  ;;  %v1459_v51 = vpop.f32.mrb[14].mxu1  ;;  %v17015_v35 = vld [vmem:[%s16540_s19 + $0xc88] sm:$0xff] }
 0x1d6   : > { %v1787_v34 = vmax.f32 %v1349_v13, 0.0  ;;  %v16979_v15 = vld [vmem:[%s16540_s19 + $0xc40] sm:$0xff]  ;;  %v16992_v2 = vpack.c.bf16 %v1772_v1, %v1764_v59  ;;  %v1456_v37 = vadd.f32 %v1455_v33, %v16790_v32  ;;  %v1458_v49 = vadd.f32 %v1457_v20, %v16801_v40  ;;  %v17018_v58 = vld [vmem:[%s16540_s19 + $0xcc8] sm:$0xff]  ;;  %v1461_v60 = vpop.f32.mrb[15].mxu1 }
 0x1d7   : > { %v16961_v45 = vpack.c.bf16 %v1786_v42, %v1778_v41  ;;  %v17008_v44 = vld [vmem:[%s16540_s19 + $0xc80] sm:$0xff]  ;;  %v1460_v39 = vadd.f32 %v1459_v51, %v16790_v32  ;;  %v13841_v54 = vcombine.low %v16976_v14, %v16979_v15 }
 0x1d8   : > { %v16964_v47 = vpack.c.bf16 %v1787_v34, %v1779_v30  ;;  %8274 = vmatpush1.bf16.msra.mxu0 %v13793_v21  ;;  %8726 = vmatpush1.bf16.msra.mxu1 %v13795_v28  ;;  %v1352_v56 = vpop.f32.mrb[16].mxu0  ;;  %v16990_v21 = vld [vmem:[%s16540_s19 + $0xc48] sm:$0xff]  ;;  %20603 = vst [vmem:[#allocation33_spill] sm:$0xff] %v16992_v2  ;;  %v16999_v28 = vpack.c.bf16 %v1773_v53, %v1765_v46  ;;  %v17011_v48 = vld [vmem:[%s16540_s19 + $0xcc0] sm:$0xff]  ;;  %v1780_v59 = vmax.f32 %v1456_v37, 0.0 }
 0x1d9   : > { %20601 = vst [vmem:[#allocation31_spill] sm:$0xff] %v16961_v45  ;;  %v1353_v23 = vadd.f32 %v1352_v56, %v16764_v8  ;;  %v1354_v50 = vpop.f32.mrb[17].mxu0  ;;  %8275 = vmatprep.subr.bf16.mxu0 %v13810_v16  ;;  %8727 = vmatprep.subr.bf16.mxu1 %v13812_v43  ;;  %v13842_v16 = vcombine.high %v16976_v14, %v16979_v15  ;;  %v1781_v56 = vmax.f32 %v1458_v49, 0.0  ;;  %v1788_v14 = vmax.f32 %v1460_v39, 0.0 }
 0x1da   : > { %20602 = vst [vmem:[#allocation32_spill] sm:$0xff] %v16964_v47  ;;  %v1355_v17 = vadd.f32 %v1354_v50, %v16768_v10  ;;  %v1356_v62 = vpop.f32.mrb[18].mxu0  ;;  %8212 = vmatprep.mubr.bf16.mxu0 %v16964_v47  ;;  %8664 = vmatprep.mubr.bf16.mxu1 %v16964_v47  ;;  %20604 = vst [vmem:[#allocation34_spill] sm:$0xff] %v16999_v28  ;;  %v13844_v43 = vcombine.high %v16987_v19, %v16990_v21 }
 0x1db   : > { %v1357_v24 = vadd.f32 %v1356_v62, %v16764_v8  ;;  %v1358_v26 = vpop.f32.mrb[19].mxu0  ;;  %8213 = vmatmul.mubr.bf16.gmra.mrb[76].mxu0 %v16961_v45  ;;  %8665 = vmatmul.mubr.bf16.gmra.mrb[76].mxu1 %v16961_v45  ;;  %v1794_v41 = vmax.f32 %v1353_v23, 0.0  ;;  %v13843_v23 = vcombine.low %v16987_v19, %v16990_v21  ;;  %v13858_v50 = vcombine.high %v17008_v44, %v17011_v48 }
 0x1dc   : > { %v1359_v13 = vadd.f32 %v1358_v26, %v16768_v10  ;;  %8276 = vmatpush1.bf16.msra.mxu0 %v13809_v61  ;;  %8728 = vmatpush1.bf16.msra.mxu1 %v13811_v0  ;;  %v1795_v30 = vmax.f32 %v1355_v17, 0.0  ;;  %v1462_v61 = vadd.f32 %v1461_v60, %v16801_v40  ;;  %v13857_v17 = vcombine.low %v17008_v44, %v17011_v48  ;;  %v17049_v26 = vld [vmem:[%s16540_s19 + $0xd08] sm:$0xff] }
 0x1dd   : > { %v1802_v42 = vmax.f32 %v1357_v24, 0.0  ;;  %8277 = vmatprep.subr.bf16.mxu0 %v13826_v55  ;;  %8729 = vmatprep.subr.bf16.mxu1 %v13828_v11  ;;  %v17033_v55 = vld [vmem:[%s16540_s19 + $0xd00] sm:$0xff]  ;;  %v13860_v62 = vcombine.high %v17015_v35, %v17018_v58  ;;  %v13859_v24 = vcombine.low %v17015_v35, %v17018_v58  ;;  %v17054_v33 = vpack.c.bf16 %v1788_v14, %v1780_v59 }
 0x1de   : > { %v1803_v34 = vmax.f32 %v1359_v13, 0.0  ;;  %v17036_v11 = vld [vmem:[%s16540_s19 + $0xd40] sm:$0xff] }
 0x1df   : > { %v17021_v46 = vpack.c.bf16 %v1802_v42, %v1794_v41  ;;  %20607 = vst [vmem:[#allocation37_spill] sm:$0xff] %v17054_v33  ;;  %v13874_v37 = vcombine.high %v17033_v55, %v17036_v11  ;;  %v1465_v41 = vpop.f32.mrb[16].mxu1  ;;  %v17073_v35 = vld [vmem:[%s16540_s19 + $0xdc0] sm:$0xff] }
 0x1e0   : > { %v17026_v0 = vpack.c.bf16 %v1803_v34, %v1795_v30  ;;  %8278 = vmatpush1.bf16.msra.mxu0 %v13825_v18  ;;  %8730 = vmatpush1.bf16.msra.mxu1 %v13827_v27  ;;  %v1362_v1 = vpop.f32.mrb[20].mxu0  ;;  %v1789_v18 = vmax.f32 %v1462_v61, 0.0  ;;  %v17052_v27 = vld [vmem:[%s16540_s19 + $0xd48] sm:$0xff]  ;;  %v1466_v44 = vadd.f32 %v1465_v41, %v16790_v32  ;;  %v1467_v48 = vpop.f32.mrb[17].mxu1  ;;  %v17070_v34 = vld [vmem:[%s16540_s19 + $0xd80] sm:$0xff] }
 0x1e1   : > { %20605 = vst [vmem:[#allocation35_spill] sm:$0xff] %v17021_v46  ;;  %v1363_v15 = vadd.f32 %v1362_v1, %v16764_v8  ;;  %v1364_v53 = vpop.f32.mrb[21].mxu0  ;;  %8279 = vmatprep.subr.bf16.mxu0 %v13842_v16  ;;  %8731 = vmatprep.subr.bf16.mxu1 %v13844_v43  ;;  %v13873_v43 = vcombine.low %v17033_v55, %v17036_v11  ;;  %v1469_v59 = vpop.f32.mrb[18].mxu1  ;;  %v17088_v11 = vld [vmem:[%s16540_s19 + $0xe00] sm:$0xff]  ;;  %v17109_v41 = vld [vmem:[%s16540_s19 + $0xe48] sm:$0xff] }
 0x1e2   : > { %20606 = vst [vmem:[#allocation36_spill] sm:$0xff] %v17026_v0  ;;  %v1365_v19 = vadd.f32 %v1364_v53, %v16768_v10  ;;  %v1366_v21 = vpop.f32.mrb[22].mxu0  ;;  %8222 = vmatprep.mubr.bf16.mxu0 %v17026_v0  ;;  %8674 = vmatprep.mubr.bf16.mxu1 %v17026_v0  ;;  %v17061_v20 = vpack.c.bf16 %v1789_v18, %v1781_v56  ;;  %v17080_v56 = vld [vmem:[%s16540_s19 + $0xdc8] sm:$0xff]  ;;  %v1796_v61 = vmax.f32 %v1466_v44, 0.0  ;;  %v17091_v14 = vld [vmem:[%s16540_s19 + $0xe40] sm:$0xff] }
 0x1e3   : > { %v1367_v13 = vadd.f32 %v1366_v21, %v16764_v8  ;;  %v1368_v16 = vpop.f32.mrb[23].mxu0  ;;  %8223 = vmatmul.mubr.bf16.gmra.mrb[80].mxu0 %v17021_v46  ;;  %8675 = vmatmul.mubr.bf16.gmra.mrb[80].mxu1 %v17021_v46  ;;  %v1810_v49 = vmax.f32 %v1363_v15, 0.0  ;;  %v13876_v30 = vcombine.high %v17049_v26, %v17052_v27  ;;  %v1468_v58 = vadd.f32 %v1467_v48, %v16801_v40 }
 0x1e4   : > { %20608 = vst [vmem:[#allocation38_spill] sm:$0xff] %v17061_v20  ;;  %v1369_v42 = vadd.f32 %v1368_v16, %v16768_v10  ;;  %8280 = vmatpush1.bf16.msra.mxu0 %v13841_v54  ;;  %8732 = vmatpush1.bf16.msra.mxu1 %v13843_v23  ;;  %v1811_v39 = vmax.f32 %v1365_v19, 0.0  ;;  %v17077_v54 = vld [vmem:[%s16540_s19 + $0xd88] sm:$0xff]  ;;  %v1470_v1 = vadd.f32 %v1469_v59, %v16790_v32  ;;  %v1471_v23 = vpop.f32.mrb[19].mxu1 }
 0x1e5   : > { %v1818_v51 = vmax.f32 %v1367_v13, 0.0  ;;  %8281 = vmatprep.subr.bf16.mxu0 %v13858_v50  ;;  %8733 = vmatprep.subr.bf16.mxu1 %v13860_v62  ;;  %v13875_v55 = vcombine.low %v17049_v26, %v17052_v27  ;;  %v1797_v15 = vmax.f32 %v1468_v58, 0.0  ;;  %v1472_v53 = vadd.f32 %v1471_v23, %v16801_v40  ;;  %v1475_v58 = vpop.f32.mrb[20].mxu1 }
 0x1e6   : > { %v1819_v60 = vmax.f32 %v1369_v42, 0.0  ;;  %v13889_v19 = vcombine.low %v17070_v34, %v17073_v35  ;;  %v13890_v21 = vcombine.high %v17070_v34, %v17073_v35  ;;  %v1804_v26 = vmax.f32 %v1470_v1, 0.0 }
 0x1e7   : > { %v17083_v50 = vpack.c.bf16 %v1818_v51, %v1810_v49  ;;  %v13891_v16 = vcombine.low %v17077_v54, %v17080_v56  ;;  %v1805_v42 = vmax.f32 %v1472_v53, 0.0  ;;  %v13905_v34 = vcombine.low %v17088_v11, %v17091_v14 }
 0x1e8   : > { %v17094_v62 = vpack.c.bf16 %v1819_v60, %v1811_v39  ;;  %8282 = vmatpush1.bf16.msra.mxu0 %v13857_v17  ;;  %8734 = vmatpush1.bf16.msra.mxu1 %v13859_v24  ;;  %v1372_v18 = vpop.f32.mrb[24].mxu0  ;;  %v13892_v17 = vcombine.high %v17077_v54, %v17080_v56  ;;  %v17106_v24 = vld [vmem:[%s16540_s19 + $0xe08] sm:$0xff]  ;;  %v17116_v49 = vpack.c.bf16 %v1804_v26, %v1796_v61  ;;  %v17129_v60 = vld [vmem:[%s16540_s19 + $0xe80] sm:$0xff]  ;;  %v1477_v61 = vpop.f32.mrb[21].mxu1 }
 0x1e9   : > { %20609 = vst [vmem:[#allocation39_spill] sm:$0xff] %v17083_v50  ;;  %v1373_v27 = vadd.f32 %v1372_v18, %v16764_v8  ;;  %v1374_v13 = vpop.f32.mrb[25].mxu0  ;;  %8283 = vmatprep.subr.bf16.mxu0 %v13874_v37  ;;  %8735 = vmatprep.subr.bf16.mxu1 %v13876_v30  ;;  %v13906_v37 = vcombine.high %v17088_v11, %v17091_v14  ;;  %v17132_v54 = vld [vmem:[%s16540_s19 + $0xec0] sm:$0xff]  ;;  %v17141_v11 = vld [vmem:[%s16540_s19 + $0xec8] sm:$0xff] }
 0x1ea   : > { %20610 = vst [vmem:[#allocation40_spill] sm:$0xff] %v17094_v62  ;;  %v1375_v44 = vadd.f32 %v1374_v13, %v16768_v10  ;;  %v1376_v48 = vpop.f32.mrb[26].mxu0  ;;  %8232 = vmatprep.mubr.bf16.mxu0 %v17094_v62  ;;  %8684 = vmatprep.mubr.bf16.mxu1 %v17094_v62  ;;  %20611 = vst [vmem:[#allocation41_spill] sm:$0xff] %v17116_v49  ;;  %v17123_v35 = vpack.c.bf16 %v1805_v42, %v1797_v15  ;;  %v1479_v15 = vpop.f32.mrb[22].mxu1 }
 0x1eb   : > { %v1377_v51 = vadd.f32 %v1376_v48, %v16764_v8  ;;  %v1378_v30 = vpop.f32.mrb[27].mxu0  ;;  %8233 = vmatmul.mubr.bf16.gmra.mrb[84].mxu0 %v17083_v50  ;;  %8685 = vmatmul.mubr.bf16.gmra.mrb[84].mxu1 %v17083_v50  ;;  %v13907_v39 = vcombine.low %v17106_v24, %v17109_v41  ;;  %v1476_v56 = vadd.f32 %v1475_v58, %v16790_v32  ;;  %v1826_v1 = vmax.f32 %v1373_v27, 0.0  ;;  %v1481_v13 = vpop.f32.mrb[23].mxu1 }
 0x1ec   : > { %20612 = vst [vmem:[#allocation42_spill] sm:$0xff] %v17123_v35  ;;  %v1379_v59 = vadd.f32 %v1378_v30, %v16768_v10  ;;  %8284 = vmatpush1.bf16.msra.mxu0 %v13873_v43  ;;  %8736 = vmatpush1.bf16.msra.mxu1 %v13875_v55  ;;  %v13908_v43 = vcombine.high %v17106_v24, %v17109_v41  ;;  %v17138_v55 = vld [vmem:[%s16540_s19 + $0xe88] sm:$0xff]  ;;  %v1827_v53 = vmax.f32 %v1375_v44, 0.0  ;;  %v17153_v24 = vld [vmem:[%s16540_s19 + $0xf40] sm:$0xff] }
 0x1ed   : > { %v1834_v23 = vmax.f32 %v1377_v51, 0.0  ;;  %8285 = vmatprep.subr.bf16.mxu0 %v13890_v21  ;;  %8737 = vmatprep.subr.bf16.mxu1 %v13892_v17  ;;  %v1478_v14 = vadd.f32 %v1477_v61, %v16801_v40  ;;  %v1812_v26 = vmax.f32 %v1476_v56, 0.0  ;;  %v1480_v27 = vadd.f32 %v1479_v15, %v16790_v32  ;;  %v17150_v17 = vld [vmem:[%s16540_s19 + $0xf00] sm:$0xff] }
 0x1ee   : > { %v1835_v18 = vmax.f32 %v1379_v59, 0.0  ;;  %v13922_v21 = vcombine.high %v17129_v60, %v17132_v54  ;;  %v1482_v48 = vadd.f32 %v1481_v13, %v16801_v40  ;;  %v13921_v30 = vcombine.low %v17129_v60, %v17132_v54 }
 0x1ef   : > { %v17145_v42 = vpack.c.bf16 %v1834_v23, %v1826_v1  ;;  %v1813_v41 = vmax.f32 %v1478_v14, 0.0  ;;  %v13923_v58 = vcombine.low %v17138_v55, %v17141_v11  ;;  %v1820_v59 = vmax.f32 %v1480_v27, 0.0  ;;  %v17166_v23 = vld [vmem:[%s16540_s19 + $0xf08] sm:$0xff] }
 0x1f0   : > { %v17156_v44 = vpack.c.bf16 %v1835_v18, %v1827_v53  ;;  %8286 = vmatpush1.bf16.msra.mxu0 %v13889_v19  ;;  %8738 = vmatpush1.bf16.msra.mxu1 %v13891_v16  ;;  %v1382_v51 = vpop.f32.mrb[28].mxu0  ;;  %v13924_v1 = vcombine.high %v17138_v55, %v17141_v11  ;;  %v17169_v19 = vld [vmem:[%s16540_s19 + $0xf48] sm:$0xff]  ;;  %v1821_v16 = vmax.f32 %v1482_v48, 0.0  ;;  %v17172_v14 = vsub.s32 4, %v16752_v4  ;;  %v1485_v18 = vpop.f32.mrb[24].mxu1 }
 0x1f1   : > { %20613 = vst [vmem:[#allocation43_spill] sm:$0xff] %v17145_v42  ;;  %v1383_v56 = vadd.f32 %v1382_v51, %v16764_v8  ;;  %v1384_v61 = vpop.f32.mrb[29].mxu0  ;;  %8287 = vmatprep.subr.bf16.mxu0 %v13906_v37  ;;  %8739 = vmatprep.subr.bf16.mxu1 %v13908_v43  ;;  %v13938_v37 = vcombine.high %v17150_v17, %v17153_v24  ;;  %v17189_v27 = vsub.s32 5, %v16752_v4  ;;  %v1487_v48 = vpop.f32.mrb[25].mxu1 }
 0x1f2   : > { %20614 = vst [vmem:[#allocation44_spill] sm:$0xff] %v17156_v44  ;;  %20615 = vst [vmem:[#allocation45_spill] sm:$0xff] %v17172_v14  ;;  %v1385_v60 = vadd.f32 %v1384_v61, %v16768_v10  ;;  %v1386_v54 = vpop.f32.mrb[30].mxu0  ;;  %8242 = vmatprep.mubr.bf16.mxu0 %v17156_v44  ;;  %8694 = vmatprep.mubr.bf16.mxu1 %v17156_v44  ;;  %v17179_v43 = vpack.c.bf16 %v1820_v59, %v1812_v26 }
 0x1f3   : > { %v1387_v55 = vadd.f32 %v1386_v54, %v16764_v8  ;;  %v1388_v11 = vpop.f32.mrb[31].mxu0  ;;  %8243 = vmatmul.mubr.bf16.gmra.mrb[88].mxu0 %v17145_v42  ;;  %8695 = vmatmul.mubr.bf16.gmra.mrb[88].mxu1 %v17145_v42  ;;  %v13937_v15 = vcombine.low %v17150_v17, %v17153_v24  ;;  %v17186_v53 = vpack.c.bf16 %v1821_v16, %v1813_v41  ;;  %v1842_v51 = vmax.f32 %v1383_v56, 0.0  ;;  %v17196_v24 = vld [vmem:[%s16540_s19 + $0xf80] sm:$0xff]  ;;  %v17207_v16 = vld [vmem:[%s16540_s19 + $0xf88] sm:$0xff] }
 0x1f4   : > { %20616 = vst [vmem:[#allocation46_spill] sm:$0xff] %v17179_v43  ;;  %20618 = vst [vmem:[#allocation48_spill] sm:$0xff] %v17189_v27  ;;  %v1389_v26 = vadd.f32 %v1388_v11, %v16768_v10  ;;  %8288 = vmatpush1.bf16.msra.mxu0 %v13905_v34  ;;  %8740 = vmatpush1.bf16.msra.mxu1 %v13907_v39  ;;  %v13940_v8 = vcombine.high %v17166_v23, %v17169_v19  ;;  %v17199_v41 = vld [vmem:[%s16540_s19 + $0xfc0] sm:$0xff]  ;;  %v1489_v34 = vpop.f32.mrb[26].mxu1  ;;  %v1843_v59 = vmax.f32 %v1385_v60, 0.0  ;;  %v17210_v56 = vld [vmem:[%s16540_s19 + $0xfc8] sm:$0xff] }
 0x1f5   : > { %20617 = vst [vmem:[#allocation47_spill] sm:$0xff] %v17186_v53  ;;  %v1486_v13 = vadd.f32 %v1485_v18, %v16790_v32  ;;  %v1850_v17 = vmax.f32 %v1387_v55, 0.0  ;;  %8289 = vmatprep.subr.bf16.mxu0 %v13922_v21  ;;  %8741 = vmatprep.subr.bf16.mxu1 %v13924_v1  ;;  %v1488_v10 = vadd.f32 %v1487_v48, %v16801_v40  ;;  %v1491_v54 = vpop.f32.mrb[27].mxu1  ;;  %v17216_v11 = vld [vmem:[%s16540_s19 + $0x1000] sm:$0xff] }
 0x1f6   : > { %v17204_v39 = vrot.slane %v16757_v6, %v17172_v14  ;;  %v1851_v61 = vmax.f32 %v1389_v26, 0.0  ;;  %v1490_v1 = vadd.f32 %v1489_v34, %v16790_v32  ;;  %v17219_v18 = vld [vmem:[%s16540_s19 + $0x1040] sm:$0xff]  ;;  %v1492_v60 = vadd.f32 %v1491_v54, %v16801_v40  ;;  %v17236_v34 = vld [vmem:[%s16540_s19 + $0x1048] sm:$0xff] }
 0x1f7   : > { %v1828_v21 = vmax.f32 %v1486_v13, 0.0  ;;  %v17213_v55 = vpack.c.bf16 %v1850_v17, %v1842_v51  ;;  %v1829_v48 = vmax.f32 %v1488_v10, 0.0  ;;  %v17224_v26 = vrot.slane %v16757_v6, %v17189_v27  ;;  %v17233_v17 = vld [vmem:[%s16540_s19 + $0x1008] sm:$0xff] }
 0x1f8   : > { %v17226_v14 = vpack.c.bf16 %v1851_v61, %v1843_v59  ;;  %8290 = vmatpush1.bf16.msra.mxu0 %v13921_v30  ;;  %8742 = vmatpush1.bf16.msra.mxu1 %v13923_v58  ;;  %v13939_v13 = vcombine.low %v17166_v23, %v17169_v19  ;;  %v13953_v51 = vcombine.low %v17196_v24, %v17199_v41  ;;  %v1836_v10 = vmax.f32 %v1490_v1, 0.0  ;;  %v1538_v19 = vpop.f32.mrb[32].mxu0 }
 0x1f9   : > { %20619 = vst [vmem:[#allocation49_spill] sm:$0xff] %v17213_v55  ;;  %8291 = vmatprep.subr.bf16.mxu0 %v13938_v37  ;;  %8743 = vmatprep.subr.bf16.mxu1 %v13940_v8  ;;  %v13954_v54 = vcombine.high %v17196_v24, %v17199_v41  ;;  %v13955_v30 = vcombine.low %v17207_v16, %v17210_v56  ;;  %v1837_v23 = vmax.f32 %v1492_v60, 0.0  ;;  %v1540_v24 = vpop.f32.mrb[33].mxu0 }
 0x1fa   : > { %20620 = vst [vmem:[#allocation50_spill] sm:$0xff] %v17226_v14  ;;  %v13956_v58 = vcombine.high %v17207_v16, %v17210_v56  ;;  %8252 = vmatprep.mubr.bf16.mxu0 %v17226_v14  ;;  %8704 = vmatprep.mubr.bf16.mxu1 %v17226_v14  ;;  %v13970_v59 = vcombine.high %v17216_v11, %v17219_v18  ;;  %v1495_v16 = vpop.f32.mrb[28].mxu1  ;;  %v1542_v1 = vpop.f32.mrb[34].mxu0 }
 0x1fb   : > { %v17248_v37 = vpack.c.bf16 %v1836_v10, %v1828_v21  ;;  %v1539_v8 = vadd.f32 %v1538_v19, %v17204_v39  ;;  %8253 = vmatmul.mubr.bf16.gmra.mrb[92].mxu0 %v17213_v55  ;;  %8705 = vmatmul.mubr.bf16.gmra.mrb[92].mxu1 %v17213_v55  ;;  %v13972_v41 = vcombine.high %v17233_v17, %v17236_v34  ;;  %v1497_v60 = vpop.f32.mrb[29].mxu1  ;;  %v1544_v27 = vpop.f32.mrb[35].mxu0 }
 0x1fc   : > { %v17255_v61 = vpack.c.bf16 %v1837_v23, %v1829_v48  ;;  %v1541_v56 = vadd.f32 %v1540_v24, %v17224_v26  ;;  %8292 = vmatpush1.bf16.msra.mxu0 %v13937_v15  ;;  %8744 = vmatpush1.bf16.msra.mxu1 %v13939_v13  ;;  %v1496_v21 = vadd.f32 %v1495_v16, %v16790_v32  ;;  %v17264_v48 = vld [vmem:[%s16540_s19 + $0x1080] sm:$0xff]  ;;  %v1499_v13 = vpop.f32.mrb[30].mxu1  ;;  %v17272_v16 = vsub.s32 7, %v16752_v4 }
 0x1fd   : > { %20621 = vst [vmem:[#allocation51_spill] sm:$0xff] %v17248_v37  ;;  %v1734_v10 = vmax.f32 %v1539_v8, 0.0  ;;  %v1543_v19 = vadd.f32 %v1542_v1, %v17204_v39  ;;  %8293 = vmatprep.subr.bf16.mxu0 %v13954_v54  ;;  %8745 = vmatprep.subr.bf16.mxu1 %v13956_v58  ;;  %v17267_v23 = vld [vmem:[%s16540_s19 + $0x10c0] sm:$0xff]  ;;  %v1498_v15 = vadd.f32 %v1497_v60, %v16801_v40  ;;  %v17279_v58 = vld [vmem:[%s16540_s19 + $0x1088] sm:$0xff] }
 0x1fe   : > { %20622 = vst [vmem:[#allocation52_spill] sm:$0xff] %v17255_v61  ;;  %v1735_v24 = vmax.f32 %v1541_v56, 0.0  ;;  %v1545_v8 = vadd.f32 %v1544_v27, %v17224_v26  ;;  %20624 = vst [vmem:[#allocation54_spill] sm:$0xff] %v17272_v16  ;;  %8295 = vmatprep.mubr.bf16.mxu0 %v16879_v38  ;;  %8747 = vmatprep.mubr.bf16.mxu1 %v16879_v38  ;;  %v13969_v54 = vcombine.low %v17216_v11, %v17219_v18  ;;  %v17282_v1 = vld [vmem:[%s16540_s19 + $0x10c8] sm:$0xff]  ;;  %v1501_v56 = vpop.f32.mrb[31].mxu1 }
 0x1ff   : > { %v1844_v7 = vmax.f32 %v1496_v21, 0.0  ;;  %v1500_v60 = vadd.f32 %v1499_v13, %v16790_v32  ;;  %v1742_v27 = vmax.f32 %v1543_v19, 0.0  ;;  %v13971_v4 = vcombine.low %v17233_v17, %v17236_v34  ;;  %v17299_v17 = vld [vmem:[%s16540_s19 + $0x1100] sm:$0xff] }
 0x200   : > { %v1845_v57 = vmax.f32 %v1498_v15, 0.0  ;;  %v1502_v5 = vadd.f32 %v1501_v56, %v16801_v40  ;;  %v1743_v38 = vmax.f32 %v1545_v8, 0.0  ;;  %8294 = vmatpush1.bf16.msra.mxu0 %v13953_v51  ;;  %8746 = vmatpush1.bf16.msra.mxu1 %v13955_v30  ;;  %v13986_v11 = vcombine.high %v17264_v48, %v17267_v23  ;;  %v17302_v51 = vld [vmem:[%s16540_s19 + $0x1140] sm:$0xff]  ;;  %v1548_v19 = vpop.f32.mrb[36].mxu0 }
 0x201   : > { %v1852_v18 = vmax.f32 %v1500_v60, 0.0  ;;  %v17290_v32 = vpack.c.bf16 %v1742_v27, %v1734_v10  ;;  %v17294_v21 = vrot.slane %v16757_v6, %v17261_v22  ;;  %8376 = vmatprep.subr.bf16.mxu0 %v13970_v59  ;;  %8828 = vmatprep.subr.bf16.mxu1 %v13972_v41  ;;  %v13988_v40 = vcombine.high %v17279_v58, %v17282_v1  ;;  %v17313_v59 = vld [vmem:[%s16540_s19 + $0x1108] sm:$0xff]  ;;  %v1550_v60 = vpop.f32.mrb[37].mxu0 }
 0x202   : > { %v1853_v34 = vmax.f32 %v1502_v5, 0.0  ;;  %v17304_v30 = vpack.c.bf16 %v1743_v38, %v1735_v24  ;;  %v17308_v10 = vrot.slane %v16757_v6, %v17272_v16  ;;  %v13985_v15 = vcombine.low %v17264_v48, %v17267_v23  ;;  %v17316_v41 = vld [vmem:[%s16540_s19 + $0x1148] sm:$0xff]  ;;  %v1552_v48 = vpop.f32.mrb[38].mxu0  ;;  %v1651_v23 = vpop.f32.mrb[32].mxu1 }
 0x203   : > { %20625 = vst [vmem:[#allocation55_spill] sm:$0xff] %v17290_v32  ;;  %v17318_v13 = vpack.c.bf16 %v1852_v18, %v1844_v7  ;;  %v1549_v8 = vadd.f32 %v1548_v19, %v17204_v39  ;;  %8296 = vmatmul.mubr.bf16.vlgmr.msra.gmra.mrb[64].mxu0 %v16872_v36  ;;  %8748 = vmatmul.mubr.bf16.vlgmr.msra.gmra.mrb[64].mxu1 %v16872_v36  ;;  %v1554_v27 = vpop.f32.mrb[39].mxu0 }
 0x204   : > { %20626 = vst [vmem:[#allocation56_spill] sm:$0xff] %v17304_v30  ;;  %v13987_v5 = vcombine.low %v17279_v58, %v17282_v1  ;;  %v17325_v6 = vpack.c.bf16 %v1853_v34, %v1845_v57  ;;  %v1551_v38 = vadd.f32 %v1550_v60, %v17224_v26  ;;  %8377 = vmatpush1.bf16.msra.mxu0 %v13969_v54  ;;  %v1653_v57 = vpop.f32.mrb[33].mxu1  ;;  %v17335_v54 = vld [vmem:[%s16540_s19 + $0x1180] sm:$0xff]  ;;  %v17345_v60 = vld [vmem:[%s16540_s19 + $0x1188] sm:$0xff] }
 0x205   : > { %20627 = vst [vmem:[#allocation57_spill] sm:$0xff] %v17318_v13  ;;  %8829 = vmatpush1.bf16.msra.mxu1 %v13971_v4  ;;  %v14002_v7 = vcombine.high %v17299_v17, %v17302_v51  ;;  %v1750_v24 = vmax.f32 %v1549_v8, 0.0  ;;  %v1553_v56 = vadd.f32 %v1552_v48, %v17204_v39  ;;  %v1652_v58 = vadd.f32 %v1651_v23, %v17294_v21  ;;  %v1655_v19 = vpop.f32.mrb[34].mxu1  ;;  %v17342_v8 = vld [vmem:[%s16540_s19 + $0x11c0] sm:$0xff] }
 0x206   : > { %20628 = vst [vmem:[#allocation58_spill] sm:$0xff] %v17325_v6  ;;  %8378 = vmatprep.subr.bf16.mxu0 %v13986_v11  ;;  %8830 = vmatprep.subr.bf16.mxu1 %v13988_v40  ;;  %v14004_v1 = vcombine.high %v17313_v59, %v17316_v41  ;;  %v1751_v4 = vmax.f32 %v1551_v38, 0.0  ;;  %v1555_v18 = vadd.f32 %v1554_v27, %v17224_v26  ;;  %v17348_v11 = vld [vmem:[%s16540_s19 + $0x11c8] sm:$0xff]  ;;  %v1657_v23 = vpop.f32.mrb[35].mxu1 }
 0x207   : > { %v1654_v34 = vadd.f32 %v1653_v57, %v17308_v10  ;;  %8305 = vmatprep.mubr.bf16.mxu0 %v16939_v9  ;;  %8757 = vmatprep.mubr.bf16.mxu1 %v16939_v9  ;;  %v1758_v40 = vmax.f32 %v1553_v56, 0.0  ;;  %v1736_v48 = vmax.f32 %v1652_v58, 0.0  ;;  %v1656_v38 = vadd.f32 %v1655_v19, %v17294_v21 }
 0x208   : > { %v1759_v27 = vmax.f32 %v1555_v18, 0.0  ;;  %v1658_v16 = vadd.f32 %v1657_v23, %v17308_v10  ;;  %8379 = vmatpush1.bf16.msra.mxu0 %v13985_v15  ;;  %v14001_v22 = vcombine.low %v17299_v17, %v17302_v51  ;;  %v14003_v56 = vcombine.low %v17313_v59, %v17316_v41  ;;  %v1558_v17 = vpop.f32.mrb[40].mxu0  ;;  %v17373_v41 = vld [vmem:[%s16540_s19 + $0x1208] sm:$0xff] }
 0x209   : > { %v1737_v57 = vmax.f32 %v1654_v34, 0.0  ;;  %8831 = vmatpush1.bf16.msra.mxu1 %v13987_v5  ;;  %v17356_v58 = vpack.c.bf16 %v1758_v40, %v1750_v24  ;;  %v1744_v9 = vmax.f32 %v1656_v38, 0.0  ;;  %8380 = vmatprep.subr.bf16.mxu0 %v14002_v7  ;;  %v14018_v18 = vcombine.high %v17335_v54, %v17342_v8  ;;  %v17363_v34 = vld [vmem:[%s16540_s19 + $0x1200] sm:$0xff]  ;;  %v17376_v7 = vld [vmem:[%s16540_s19 + $0x1248] sm:$0xff]  ;;  %v1661_v38 = vpop.f32.mrb[36].mxu1 }
 0x20a   : > { %8832 = vmatprep.subr.bf16.mxu1 %v14004_v1  ;;  %v14020_v15 = vcombine.high %v17345_v60, %v17348_v11  ;;  %v17366_v5 = vld [vmem:[%s16540_s19 + $0x1240] sm:$0xff]  ;;  %v17368_v19 = vpack.c.bf16 %v1759_v27, %v1751_v4  ;;  %v1745_v51 = vmax.f32 %v1658_v16, 0.0  ;;  %v14017_v59 = vcombine.low %v17335_v54, %v17342_v8  ;;  %v1560_v1 = vpop.f32.mrb[41].mxu0 }
 0x20b   : > { %20629 = vst [vmem:[#allocation59_spill] sm:$0xff] %v17356_v58  ;;  %v1559_v24 = vadd.f32 %v1558_v17, %v17204_v39  ;;  %v17379_v40 = vpack.c.bf16 %v1744_v9, %v1736_v48  ;;  %8306 = vmatmul.mubr.bf16.gmra.mrb[68].mxu0 %v16932_v25  ;;  %8758 = vmatmul.mubr.bf16.gmra.mrb[68].mxu1 %v16932_v25  ;;  %v1562_v54 = vpop.f32.mrb[42].mxu0 }
 0x20c   : > { %20630 = vst [vmem:[#allocation60_spill] sm:$0xff] %v17368_v19  ;;  %v14019_v4 = vcombine.low %v17345_v60, %v17348_v11  ;;  %v1561_v16 = vadd.f32 %v1560_v1, %v17224_v26  ;;  %v17386_v8 = vpack.c.bf16 %v1745_v51, %v1737_v57  ;;  %8381 = vmatpush1.bf16.msra.mxu0 %v14001_v22  ;;  %v1564_v27 = vpop.f32.mrb[43].mxu0  ;;  %v1663_v11 = vpop.f32.mrb[37].mxu1  ;;  %v17395_v22 = vld [vmem:[%s16540_s19 + $0x1280] sm:$0xff] }
 0x20d   : > { %8833 = vmatpush1.bf16.msra.mxu1 %v14003_v56  ;;  %v14034_v9 = vcombine.high %v17363_v34, %v17366_v5  ;;  %v1766_v48 = vmax.f32 %v1559_v24, 0.0  ;;  %v1563_v23 = vadd.f32 %v1562_v54, %v17204_v39  ;;  %v1662_v60 = vadd.f32 %v1661_v38, %v17294_v21  ;;  %8382 = vmatprep.subr.bf16.mxu0 %v14018_v18  ;;  %v1665_v24 = vpop.f32.mrb[38].mxu1  ;;  %v17402_v1 = vld [vmem:[%s16540_s19 + $0x12c0] sm:$0xff]  ;;  %v17405_v54 = vld [vmem:[%s16540_s19 + $0x1288] sm:$0xff] }
 0x20e   : > { %8834 = vmatprep.subr.bf16.mxu1 %v14020_v15  ;;  %v14036_v57 = vcombine.high %v17373_v41, %v17376_v7  ;;  %v1767_v56 = vmax.f32 %v1561_v16, 0.0  ;;  %v1565_v17 = vadd.f32 %v1564_v27, %v17224_v26  ;;  %v1664_v51 = vadd.f32 %v1663_v11, %v17308_v10  ;;  %8315 = vmatprep.mubr.bf16.mxu0 %v16999_v28  ;;  %v17408_v18 = vld [vmem:[%s16540_s19 + $0x12c8] sm:$0xff]  ;;  %v1667_v27 = vpop.f32.mrb[39].mxu1 }
 0x20f   : > { %8767 = vmatprep.mubr.bf16.mxu1 %v16999_v28  ;;  %v1774_v15 = vmax.f32 %v1563_v23, 0.0  ;;  %v1752_v38 = vmax.f32 %v1662_v60, 0.0  ;;  %v1666_v16 = vadd.f32 %v1665_v24, %v17294_v21  ;;  %v1668_v36 = vadd.f32 %v1667_v27, %v17308_v10 }
 0x210   : > { %v1775_v25 = vmax.f32 %v1565_v17, 0.0  ;;  %v1753_v11 = vmax.f32 %v1664_v51, 0.0  ;;  %8383 = vmatpush1.bf16.msra.mxu0 %v14017_v59  ;;  %v14033_v28 = vcombine.low %v17363_v34, %v17366_v5  ;;  %v14035_v23 = vcombine.low %v17373_v41, %v17376_v7  ;;  %v17423_v51 = vld [vmem:[%s16540_s19 + $0x1300] sm:$0xff]  ;;  %v1568_v34 = vpop.f32.mrb[44].mxu0  ;;  %v17433_v7 = vld [vmem:[%s16540_s19 + $0x1308] sm:$0xff] }
 0x211   : > { %8835 = vmatpush1.bf16.msra.mxu1 %v14019_v4  ;;  %v17416_v60 = vpack.c.bf16 %v1774_v15, %v1766_v48  ;;  %v1760_v55 = vmax.f32 %v1666_v16, 0.0  ;;  %8384 = vmatprep.subr.bf16.mxu0 %v14034_v9  ;;  %v14050_v17 = vcombine.high %v17395_v22, %v17402_v1  ;;  %v14052_v59 = vcombine.high %v17405_v54, %v17408_v18  ;;  %v17426_v4 = vld [vmem:[%s16540_s19 + $0x1340] sm:$0xff]  ;;  %v17436_v9 = vld [vmem:[%s16540_s19 + $0x1348] sm:$0xff] }
 0x212   : > { %8836 = vmatprep.subr.bf16.mxu1 %v14036_v57  ;;  %v17428_v24 = vpack.c.bf16 %v1775_v25, %v1767_v56  ;;  %v1761_v5 = vmax.f32 %v1668_v36, 0.0  ;;  %v14049_v41 = vcombine.low %v17395_v22, %v17402_v1  ;;  %v1569_v48 = vadd.f32 %v1568_v34, %v17204_v39  ;;  %v1570_v57 = vpop.f32.mrb[45].mxu0  ;;  %v1671_v1 = vpop.f32.mrb[40].mxu1 }
 0x213   : > { %20631 = vst [vmem:[#allocation61_spill] sm:$0xff] %v17416_v60  ;;  %v17439_v15 = vpack.c.bf16 %v1760_v55, %v1752_v38  ;;  %8316 = vmatmul.mubr.bf16.gmra.mrb[72].mxu0 %v16992_v2  ;;  %8768 = vmatmul.mubr.bf16.gmra.mrb[72].mxu1 %v16992_v2  ;;  %v14051_v25 = vcombine.low %v17405_v54, %v17408_v18  ;;  %v1572_v22 = vpop.f32.mrb[46].mxu0  ;;  %v1673_v18 = vpop.f32.mrb[41].mxu1 }
 0x214   : > { %20632 = vst [vmem:[#allocation62_spill] sm:$0xff] %v17428_v24  ;;  %v1571_v36 = vadd.f32 %v1570_v57, %v17224_v26  ;;  %v17446_v56 = vpack.c.bf16 %v1761_v5, %v1753_v11  ;;  %8385 = vmatpush1.bf16.msra.mxu0 %v14033_v28  ;;  %v14066_v55 = vcombine.high %v17423_v51, %v17426_v4  ;;  %v1782_v38 = vmax.f32 %v1569_v48, 0.0  ;;  %v1574_v27 = vpop.f32.mrb[47].mxu0  ;;  %v17455_v28 = vld [vmem:[%s16540_s19 + $0x1380] sm:$0xff]  ;;  %v1675_v48 = vpop.f32.mrb[42].mxu1 }
 0x215   : > { %20633 = vst [vmem:[#allocation63_spill] sm:$0xff] %v17439_v15  ;;  %8837 = vmatpush1.bf16.msra.mxu1 %v14035_v23  ;;  %v1573_v16 = vadd.f32 %v1572_v22, %v17204_v39  ;;  %v1672_v54 = vadd.f32 %v1671_v1, %v17294_v21  ;;  %8386 = vmatprep.subr.bf16.mxu0 %v14050_v17  ;;  %v17462_v57 = vld [vmem:[%s16540_s19 + $0x13c0] sm:$0xff]  ;;  %v17465_v22 = vld [vmem:[%s16540_s19 + $0x1388] sm:$0xff] }
 0x216   : > { %8838 = vmatprep.subr.bf16.mxu1 %v14052_v59  ;;  %v14068_v11 = vcombine.high %v17433_v7, %v17436_v9  ;;  %v1783_v23 = vmax.f32 %v1571_v36, 0.0  ;;  %v1575_v34 = vadd.f32 %v1574_v27, %v17224_v26  ;;  %v1674_v5 = vadd.f32 %v1673_v18, %v17308_v10  ;;  %8325 = vmatprep.mubr.bf16.mxu0 %v17061_v20  ;;  %v17468_v17 = vld [vmem:[%s16540_s19 + $0x13c8] sm:$0xff]  ;;  %v1677_v27 = vpop.f32.mrb[43].mxu1 }
 0x217   : > { %8777 = vmatprep.mubr.bf16.mxu1 %v17061_v20  ;;  %v1790_v59 = vmax.f32 %v1573_v16, 0.0  ;;  %v1768_v1 = vmax.f32 %v1672_v54, 0.0  ;;  %v1676_v36 = vadd.f32 %v1675_v48, %v17294_v21  ;;  %v1678_v14 = vadd.f32 %v1677_v27, %v17308_v10 }
 0x218   : > { %v1791_v2 = vmax.f32 %v1575_v34, 0.0  ;;  %v1769_v18 = vmax.f32 %v1674_v5, 0.0  ;;  %8387 = vmatpush1.bf16.msra.mxu0 %v14049_v41  ;;  %v14065_v20 = vcombine.low %v17423_v51, %v17426_v4  ;;  %v14067_v16 = vcombine.low %v17433_v7, %v17436_v9  ;;  %v17483_v5 = vld [vmem:[%s16540_s19 + $0x1400] sm:$0xff]  ;;  %v1578_v51 = vpop.f32.mrb[48].mxu0  ;;  %v17493_v9 = vld [vmem:[%s16540_s19 + $0x1408] sm:$0xff] }
 0x219   : > { %8839 = vmatpush1.bf16.msra.mxu1 %v14051_v25  ;;  %v17476_v54 = vpack.c.bf16 %v1790_v59, %v1782_v38  ;;  %v1776_v42 = vmax.f32 %v1676_v36, 0.0  ;;  %8388 = vmatprep.subr.bf16.mxu0 %v14066_v55  ;;  %v14082_v34 = vcombine.high %v17455_v28, %v17462_v57  ;;  %v14084_v41 = vcombine.high %v17465_v22, %v17468_v17  ;;  %v17486_v25 = vld [vmem:[%s16540_s19 + $0x1440] sm:$0xff]  ;;  %v17496_v55 = vld [vmem:[%s16540_s19 + $0x1448] sm:$0xff] }
 0x21a   : > { %8840 = vmatprep.subr.bf16.mxu1 %v14068_v11  ;;  %v17488_v48 = vpack.c.bf16 %v1791_v2, %v1783_v23  ;;  %v1777_v4 = vmax.f32 %v1678_v14, 0.0  ;;  %v14081_v7 = vcombine.low %v17455_v28, %v17462_v57  ;;  %v1579_v38 = vadd.f32 %v1578_v51, %v17204_v39  ;;  %v1580_v11 = vpop.f32.mrb[49].mxu0  ;;  %v1681_v57 = vpop.f32.mrb[44].mxu1 }
 0x21b   : > { %20634 = vst [vmem:[#allocation64_spill] sm:$0xff] %v17476_v54  ;;  %v17499_v59 = vpack.c.bf16 %v1776_v42, %v1768_v1  ;;  %8326 = vmatmul.mubr.bf16.gmra.mrb[76].mxu0 %v17054_v33  ;;  %8778 = vmatmul.mubr.bf16.gmra.mrb[76].mxu1 %v17054_v33  ;;  %v14083_v2 = vcombine.low %v17465_v22, %v17468_v17  ;;  %v1582_v28 = vpop.f32.mrb[50].mxu0  ;;  %v1683_v17 = vpop.f32.mrb[45].mxu1 }
 0x21c   : > { %20635 = vst [vmem:[#allocation65_spill] sm:$0xff] %v17488_v48  ;;  %v1581_v14 = vadd.f32 %v1580_v11, %v17224_v26  ;;  %v17506_v23 = vpack.c.bf16 %v1777_v4, %v1769_v18  ;;  %8389 = vmatpush1.bf16.msra.mxu0 %v14065_v20  ;;  %v14098_v42 = vcombine.high %v17483_v5, %v17486_v25  ;;  %v1798_v1 = vmax.f32 %v1579_v38, 0.0  ;;  %v1584_v27 = vpop.f32.mrb[51].mxu0  ;;  %v17515_v20 = vld [vmem:[%s16540_s19 + $0x1480] sm:$0xff]  ;;  %v1685_v38 = vpop.f32.mrb[46].mxu1 }
 0x21d   : > { %8841 = vmatpush1.bf16.msra.mxu1 %v14067_v16  ;;  %v1583_v36 = vadd.f32 %v1582_v28, %v17204_v39  ;;  %v1682_v22 = vadd.f32 %v1681_v57, %v17294_v21  ;;  %8390 = vmatprep.subr.bf16.mxu0 %v14082_v34  ;;  %v14100_v18 = vcombine.high %v17493_v9, %v17496_v55  ;;  %v17522_v11 = vld [vmem:[%s16540_s19 + $0x14c0] sm:$0xff]  ;;  %v17525_v28 = vld [vmem:[%s16540_s19 + $0x1488] sm:$0xff] }
 0x21e   : > { %20636 = vst [vmem:[#allocation66_spill] sm:$0xff] %v17506_v23  ;;  %8842 = vmatprep.subr.bf16.mxu1 %v14084_v41  ;;  %v1799_v16 = vmax.f32 %v1581_v14, 0.0  ;;  %v1585_v51 = vadd.f32 %v1584_v27, %v17224_v26  ;;  %v1684_v4 = vadd.f32 %v1683_v17, %v17308_v10  ;;  %8335 = vmatprep.mubr.bf16.mxu0 %v17123_v35  ;;  %v17528_v34 = vld [vmem:[%s16540_s19 + $0x14c8] sm:$0xff]  ;;  %v1687_v27 = vpop.f32.mrb[47].mxu1 }
 0x21f   : > { %8787 = vmatprep.mubr.bf16.mxu1 %v17123_v35  ;;  %v1806_v41 = vmax.f32 %v1583_v36, 0.0  ;;  %v1784_v57 = vmax.f32 %v1682_v22, 0.0  ;;  %v1686_v14 = vadd.f32 %v1685_v38, %v17294_v21  ;;  %v1688_v44 = vadd.f32 %v1687_v27, %v17308_v10 }
 0x220   : > { %v1807_v33 = vmax.f32 %v1585_v51, 0.0  ;;  %v1785_v17 = vmax.f32 %v1684_v4, 0.0  ;;  %8391 = vmatpush1.bf16.msra.mxu0 %v14081_v7  ;;  %v14097_v35 = vcombine.low %v17483_v5, %v17486_v25  ;;  %v14099_v36 = vcombine.low %v17493_v9, %v17496_v55  ;;  %v17543_v4 = vld [vmem:[%s16540_s19 + $0x1500] sm:$0xff]  ;;  %v1588_v5 = vpop.f32.mrb[52].mxu0  ;;  %v17553_v55 = vld [vmem:[%s16540_s19 + $0x1508] sm:$0xff] }
 0x221   : > { %8843 = vmatpush1.bf16.msra.mxu1 %v14083_v2  ;;  %v17536_v22 = vpack.c.bf16 %v1806_v41, %v1798_v1  ;;  %v1792_v50 = vmax.f32 %v1686_v14, 0.0  ;;  %8392 = vmatprep.subr.bf16.mxu0 %v14098_v42  ;;  %v14114_v51 = vcombine.high %v17515_v20, %v17522_v11  ;;  %v14116_v7 = vcombine.high %v17525_v28, %v17528_v34  ;;  %v17546_v2 = vld [vmem:[%s16540_s19 + $0x1540] sm:$0xff]  ;;  %v17556_v42 = vld [vmem:[%s16540_s19 + $0x1548] sm:$0xff] }
 0x222   : > { %8844 = vmatprep.subr.bf16.mxu1 %v14100_v18  ;;  %v17548_v38 = vpack.c.bf16 %v1807_v33, %v1799_v16  ;;  %v1793_v25 = vmax.f32 %v1688_v44, 0.0  ;;  %v14113_v9 = vcombine.low %v17515_v20, %v17522_v11  ;;  %v1589_v1 = vadd.f32 %v1588_v5, %v17204_v39  ;;  %v1590_v18 = vpop.f32.mrb[53].mxu0  ;;  %v1691_v11 = vpop.f32.mrb[48].mxu1 }
 0x223   : > { %v17559_v41 = vpack.c.bf16 %v1792_v50, %v1784_v57  ;;  %8336 = vmatmul.mubr.bf16.gmra.mrb[80].mxu0 %v17116_v49  ;;  %8788 = vmatmul.mubr.bf16.gmra.mrb[80].mxu1 %v17116_v49  ;;  %v14115_v33 = vcombine.low %v17525_v28, %v17528_v34  ;;  %v1591_v44 = vadd.f32 %v1590_v18, %v17224_v26  ;;  %v1592_v20 = vpop.f32.mrb[54].mxu0  ;;  %v1693_v34 = vpop.f32.mrb[49].mxu1  ;;  %v17582_v18 = vld [vmem:[%s16540_s19 + $0x15c0] sm:$0xff] }
 0x224   : > { %20637 = vst [vmem:[#allocation67_spill] sm:$0xff] %v17548_v38  ;;  %v17566_v16 = vpack.c.bf16 %v1793_v25, %v1785_v17  ;;  %8393 = vmatpush1.bf16.msra.mxu0 %v14097_v35  ;;  %v14130_v50 = vcombine.high %v17543_v4, %v17546_v2  ;;  %v1814_v57 = vmax.f32 %v1589_v1, 0.0  ;;  %v1593_v14 = vadd.f32 %v1592_v20, %v17204_v39  ;;  %v1594_v27 = vpop.f32.mrb[55].mxu0  ;;  %v17575_v35 = vld [vmem:[%s16540_s19 + $0x1580] sm:$0xff]  ;;  %v1695_v1 = vpop.f32.mrb[50].mxu1  ;;  %v17585_v20 = vld [vmem:[%s16540_s19 + $0x1588] sm:$0xff] }
 0x225   : > { %8845 = vmatpush1.bf16.msra.mxu1 %v14099_v36  ;;  %v1692_v28 = vadd.f32 %v1691_v11, %v17294_v21  ;;  %8394 = vmatprep.subr.bf16.mxu0 %v14114_v51  ;;  %v14132_v17 = vcombine.high %v17553_v55, %v17556_v42  ;;  %v1815_v36 = vmax.f32 %v1591_v44, 0.0  ;;  %v1595_v5 = vadd.f32 %v1594_v27, %v17224_v26  ;;  %v17588_v51 = vld [vmem:[%s16540_s19 + $0x15c8] sm:$0xff]  ;;  %v1697_v27 = vpop.f32.mrb[51].mxu1 }
 0x226   : > { %8846 = vmatprep.subr.bf16.mxu1 %v14116_v7  ;;  %v1694_v25 = vadd.f32 %v1693_v34, %v17308_v10  ;;  %8345 = vmatprep.mubr.bf16.mxu0 %v17186_v53  ;;  %v1822_v7 = vmax.f32 %v1593_v14, 0.0  ;;  %v1696_v44 = vadd.f32 %v1695_v1, %v17294_v21  ;;  %v1698_v62 = vadd.f32 %v1697_v27, %v17308_v10 }
 0x227   : > { %8797 = vmatprep.mubr.bf16.mxu1 %v17186_v53  ;;  %v1800_v11 = vmax.f32 %v1692_v28, 0.0  ;;  %v1823_v49 = vmax.f32 %v1595_v5, 0.0  ;;  %v14129_v53 = vcombine.low %v17543_v4, %v17546_v2  ;;  %v14131_v14 = vcombine.low %v17553_v55, %v17556_v42  ;;  %v17613_v42 = vld [vmem:[%s16540_s19 + $0x1608] sm:$0xff] }
 0x228   : > { %v1801_v34 = vmax.f32 %v1694_v25, 0.0  ;;  %8395 = vmatpush1.bf16.msra.mxu0 %v14113_v9  ;;  %v17596_v28 = vpack.c.bf16 %v1822_v7, %v1814_v57  ;;  %v1808_v46 = vmax.f32 %v1696_v44, 0.0  ;;  %v14146_v5 = vcombine.high %v17575_v35, %v17582_v18  ;;  %v17603_v25 = vld [vmem:[%s16540_s19 + $0x1600] sm:$0xff]  ;;  %v1598_v4 = vpop.f32.mrb[56].mxu0 }
 0x229   : > { %8847 = vmatpush1.bf16.msra.mxu1 %v14115_v33  ;;  %8396 = vmatprep.subr.bf16.mxu0 %v14130_v50  ;;  %v14148_v9 = vcombine.high %v17585_v20, %v17588_v51  ;;  %v17606_v33 = vld [vmem:[%s16540_s19 + $0x1640] sm:$0xff]  ;;  %v17608_v1 = vpack.c.bf16 %v1823_v49, %v1815_v36  ;;  %v1809_v2 = vmax.f32 %v1698_v62, 0.0  ;;  %v14145_v55 = vcombine.low %v17575_v35, %v17582_v18  ;;  %v17616_v50 = vld [vmem:[%s16540_s19 + $0x1648] sm:$0xff]  ;;  %v1701_v18 = vpop.f32.mrb[52].mxu1 }
 0x22a   : > { %8848 = vmatprep.subr.bf16.mxu1 %v14132_v17  ;;  %v1599_v57 = vadd.f32 %v1598_v4, %v17204_v39  ;;  %v1600_v17 = vpop.f32.mrb[57].mxu0  ;;  %v17619_v7 = vpack.c.bf16 %v1808_v46, %v1800_v11  ;;  %v14147_v49 = vcombine.low %v17585_v20, %v17588_v51  ;;  %v14162_v46 = vcombine.high %v17603_v25, %v17606_v33  ;;  %v1703_v51 = vpop.f32.mrb[53].mxu1 }
 0x22b   : > { %8346 = vmatmul.mubr.bf16.gmra.mrb[84].mxu0 %v17179_v43  ;;  %8798 = vmatmul.mubr.bf16.gmra.mrb[84].mxu1 %v17179_v43  ;;  %v1601_v62 = vadd.f32 %v1600_v17, %v17224_v26  ;;  %v1602_v35 = vpop.f32.mrb[58].mxu0  ;;  %v17626_v36 = vpack.c.bf16 %v1809_v2, %v1801_v34  ;;  %v1702_v20 = vadd.f32 %v1701_v18, %v17294_v21  ;;  %v17642_v17 = vld [vmem:[%s16540_s19 + $0x16c0] sm:$0xff] }
 0x22c   : > { %8397 = vmatpush1.bf16.msra.mxu0 %v14129_v53  ;;  %v1830_v11 = vmax.f32 %v1599_v57, 0.0  ;;  %v1603_v44 = vadd.f32 %v1602_v35, %v17204_v39  ;;  %v1604_v27 = vpop.f32.mrb[59].mxu0  ;;  %v14164_v34 = vcombine.high %v17613_v42, %v17616_v50  ;;  %v17635_v53 = vld [vmem:[%s16540_s19 + $0x1680] sm:$0xff]  ;;  %v1704_v2 = vadd.f32 %v1703_v51, %v17308_v10  ;;  %v1705_v57 = vpop.f32.mrb[54].mxu1  ;;  %8355 = vmatprep.mubr.bf16.mxu0 %v17255_v61  ;;  %v17645_v35 = vld [vmem:[%s16540_s19 + $0x1688] sm:$0xff] }
 0x22d   : > { %8849 = vmatpush1.bf16.msra.mxu1 %v14131_v14  ;;  %8398 = vmatprep.subr.bf16.mxu0 %v14146_v5  ;;  %v1831_v14 = vmax.f32 %v1601_v62, 0.0  ;;  %v1605_v4 = vadd.f32 %v1604_v27, %v17224_v26  ;;  %v17648_v5 = vld [vmem:[%s16540_s19 + $0x16c8] sm:$0xff]  ;;  %v1816_v18 = vmax.f32 %v1702_v20, 0.0  ;;  %v1706_v62 = vadd.f32 %v1705_v57, %v17294_v21  ;;  %v1707_v27 = vpop.f32.mrb[55].mxu1 }
 0x22e   : > { %8850 = vmatprep.subr.bf16.mxu1 %v14148_v9  ;;  %8807 = vmatprep.mubr.bf16.mxu1 %v17255_v61  ;;  %v1838_v9 = vmax.f32 %v1603_v44, 0.0  ;;  %v1817_v51 = vmax.f32 %v1704_v2, 0.0  ;;  %v1708_v0 = vadd.f32 %v1707_v27, %v17308_v10  ;;  %v14161_v61 = vcombine.low %v17603_v25, %v17606_v33  ;;  %v17663_v2 = vld [vmem:[%s16540_s19 + $0x1700] sm:$0xff] }
 0x22f   : > { %v1839_v43 = vmax.f32 %v1605_v4, 0.0  ;;  %v14163_v44 = vcombine.low %v17613_v42, %v17616_v50  ;;  %v1824_v45 = vmax.f32 %v1706_v62, 0.0  ;;  %v14178_v4 = vcombine.high %v17635_v53, %v17642_v17  ;;  %v2659_v50 = vld [vmem:[%s16540_s19 + $0x1708] sm:$0xff] }
 0x230   : > { %8399 = vmatpush1.bf16.msra.mxu0 %v14145_v55  ;;  %v17656_v20 = vpack.c.bf16 %v1838_v9, %v1830_v11  ;;  %v14180_v55 = vcombine.high %v17645_v35, %v17648_v5  ;;  %v1608_v25 = vpop.f32.mrb[60].mxu0  ;;  %v1825_v33 = vmax.f32 %v1708_v0, 0.0  ;;  %v14177_v42 = vcombine.low %v17635_v53, %v17642_v17  ;;  %v1711_v53 = vpop.f32.mrb[56].mxu1 }
 0x231   : > { %8851 = vmatpush1.bf16.msra.mxu1 %v14147_v49  ;;  %8400 = vmatprep.subr.bf16.mxu0 %v14162_v46  ;;  %v17666_v49 = vld [vmem:[%s16540_s19 + $0x1740] sm:$0xff]  ;;  %v17668_v57 = vpack.c.bf16 %v1839_v43, %v1831_v14  ;;  %v2667_v46 = vld [vmem:[%s16540_s19 + $0x1748] sm:$0xff]  ;;  %v1609_v11 = vadd.f32 %v1608_v25, %v17204_v39  ;;  %v17675_v9 = vpack.c.bf16 %v1824_v45, %v1816_v18 }
 0x232   : > { %8852 = vmatprep.subr.bf16.mxu1 %v14164_v34  ;;  %v1610_v34 = vpop.f32.mrb[61].mxu0  ;;  %v14179_v43 = vcombine.low %v17645_v35, %v17648_v5  ;;  %v17682_v62 = vpack.c.bf16 %v1825_v33, %v1817_v51  ;;  %v14194_v45 = vcombine.high %v17663_v2, %v17666_v49  ;;  %v1712_v35 = vadd.f32 %v1711_v53, %v17294_v21  ;;  %v1713_v5 = vpop.f32.mrb[57].mxu1  ;;  %v2674_v25 = vld [vmem:[%s16540_s19 + $0x1780] sm:$0xff] }
 0x233   : > { %8356 = vmatmul.mubr.bf16.gmra.mrb[88].mxu0 %v17248_v37  ;;  %8808 = vmatmul.mubr.bf16.gmra.mrb[88].mxu1 %v17248_v37  ;;  %v1611_v0 = vadd.f32 %v1610_v34, %v17224_v26  ;;  %v1612_v14 = vpop.f32.mrb[62].mxu0  ;;  %v1846_v17 = vmax.f32 %v1609_v11, 0.0  ;;  %v14196_v51 = vcombine.high %v2659_v50, %v2667_v46  ;;  %v1715_v34 = vpop.f32.mrb[58].mxu1  ;;  %v2675_v11 = vld [vmem:[%s16540_s19 + $0x1788] sm:$0xff] }
 0x234   : > { %8401 = vmatpush1.bf16.msra.mxu0 %v14161_v61  ;;  %v1613_v18 = vadd.f32 %v1612_v14, %v17204_v39  ;;  %v1614_v27 = vpop.f32.mrb[63].mxu0  ;;  %8365 = vmatprep.mubr.bf16.mxu0 %v17325_v6  ;;  %v2682_v39 = vld [vmem:[%s16540_s19 + $0x17c0] sm:$0xff]  ;;  %v2683_v14 = vld [vmem:[%s16540_s19 + $0x17c8] sm:$0xff]  ;;  %v1832_v53 = vmax.f32 %v1712_v35, 0.0 }
 0x235   : > { %8853 = vmatpush1.bf16.msra.mxu1 %v14163_v44  ;;  %8402 = vmatprep.subr.bf16.mxu0 %v14178_v4  ;;  %v1847_v33 = vmax.f32 %v1611_v0, 0.0  ;;  %v1615_v61 = vadd.f32 %v1614_v27, %v17224_v26  ;;  %v1714_v44 = vadd.f32 %v1713_v5, %v17308_v10  ;;  %v1716_v4 = vadd.f32 %v1715_v34, %v17294_v21 }
 0x236   : > { %8854 = vmatprep.subr.bf16.mxu1 %v14180_v55  ;;  %8817 = vmatprep.mubr.bf16.mxu1 %v17325_v6  ;;  %v1854_v37 = vmax.f32 %v1613_v18, 0.0  ;;  %v1717_v55 = vpop.f32.mrb[59].mxu1  ;;  %v14193_v27 = vcombine.low %v17663_v2, %v17666_v49  ;;  %v14195_v5 = vcombine.low %v2659_v50, %v2667_v46  ;;  %v14210_v35 = vcombine.high %v2674_v25, %v2682_v39 }
 0x237   : > { %v1855_v47 = vmax.f32 %v1615_v61, 0.0  ;;  %v1833_v0 = vmax.f32 %v1714_v44, 0.0  ;;  %v1718_v26 = vadd.f32 %v1717_v55, %v17308_v10  ;;  %v1840_v18 = vmax.f32 %v1716_v4, 0.0  ;;  %v2690_v61 = vld [vmem:[%s16540_s19 + $0x1800] sm:$0xff]  ;;  %v2691_v55 = vld [vmem:[%s16540_s19 + $0x1808] sm:$0xff]  ;;  %v1721_v2 = vpop.f32.mrb[60].mxu1 }
 0x238   : > { %8403 = vmatpush1.bf16.msra.mxu0 %v14177_v42  ;;  %v17700_v6 = vpack.c.bf16 %v1854_v37, %v1846_v17  ;;  %v14212_v34 = vcombine.high %v2675_v11, %v2683_v14  ;;  %v14211_v49 = vcombine.low %v2675_v11, %v2683_v14  ;;  %v1722_v50 = vadd.f32 %v1721_v2, %v17294_v21  ;;  %v1723_v46 = vpop.f32.mrb[61].mxu1  ;;  %v2706_v17 = vld [vmem:[%s16540_s19 + $0x1880] sm:$0xff]  ;;  %v2707_v4 = vld [vmem:[%s16540_s19 + $0x1888] sm:$0xff] }
 0x239   : > { %8855 = vmatpush1.bf16.msra.mxu1 %v14179_v43  ;;  %8404 = vmatprep.subr.bf16.mxu0 %v14194_v45  ;;  %v17703_v52 = vpack.c.bf16 %v1855_v47, %v1847_v33  ;;  %v1841_v44 = vmax.f32 %v1718_v26, 0.0  ;;  %v17708_v42 = vpack.c.bf16 %v1840_v18, %v1832_v53  ;;  %v14209_v47 = vcombine.low %v2674_v25, %v2682_v39  ;;  %v1725_v33 = vpop.f32.mrb[62].mxu1  ;;  %v2714_v53 = vld [vmem:[%s16540_s19 + $0x18c0] sm:$0xff]  ;;  %v2715_v25 = vld [vmem:[%s16540_s19 + $0x18c8] sm:$0xff] }
 0x23a   : > { %8856 = vmatprep.subr.bf16.mxu1 %v14196_v51  ;;  %v14226_v43 = vcombine.high %v2690_v61, %v2698_v63  ;;  %v14228_v45 = vcombine.high %v2691_v55, %v2699_v3  ;;  %v1724_v51 = vadd.f32 %v1723_v46, %v17308_v10  ;;  %v1848_v39 = vmax.f32 %v1722_v50, 0.0  ;;  %v1727_v14 = vpop.f32.mrb[63].mxu1  ;;  %v2730_v50 = vld [vmem:[%s16540_s19 + $0x1940] sm:$0xff]  ;;  %v2731_v46 = vld [vmem:[%s16540_s19 + $0x1948] sm:$0xff] }
 0x23b   : > { %8366 = vmatmul.mubr.bf16.gmra.mrb[92].mxu0 %v17318_v13  ;;  %8818 = vmatmul.mubr.bf16.gmra.mrb[92].mxu1 %v17318_v13  ;;  %v17712_v37 = vpack.c.bf16 %v1841_v44, %v1833_v0  ;;  %v1726_v11 = vadd.f32 %v1725_v33, %v17294_v21  ;;  %v1728_v26 = vadd.f32 %v1727_v14, %v17308_v10  ;;  %v2722_v44 = vld [vmem:[%s16540_s19 + $0x1900] sm:$0xff]  ;;  %v2723_v21 = vld [vmem:[%s16540_s19 + $0x1908] sm:$0xff] }
 0x23c   : > { %8405 = vmatpush1.bf16.msra.mxu0 %v14193_v27  ;;  %8408 = vmatprep.mubr.bf16.mxu0 %v17304_v30  ;;  %v1849_v0 = vmax.f32 %v1724_v51, 0.0  ;;  %v14225_v27 = vcombine.low %v2690_v61, %v2698_v63  ;;  %v14241_v63 = vcombine.low %v2706_v17, %v2714_v53  ;;  %v14243_v10 = vcombine.low %v2707_v4, %v2715_v25  ;;  %v2763_v14 = vld [vmem:[%s16540_s19 + $0x1a48] sm:$0xff] }
 0x23d   : > { %8857 = vmatpush1.bf16.msra.mxu1 %v14195_v5  ;;  %8406 = vmatprep.subr.bf16.mxu0 %v14210_v35  ;;  %v14227_v5 = vcombine.low %v2691_v55, %v2699_v3  ;;  %v1856_v18 = vmax.f32 %v1726_v11, 0.0  ;;  %v14242_v35 = vcombine.high %v2706_v17, %v2714_v53  ;;  %v1857_v2 = vmax.f32 %v1728_v26, 0.0  ;;  %v2755_v11 = vld [vmem:[%s16540_s19 + $0x1a08] sm:$0xff] }
 0x23e   : > { %8858 = vmatprep.subr.bf16.mxu1 %v14212_v34  ;;  %8860 = vmatprep.mubr.bf16.mxu1 %v17304_v30  ;;  %v14244_v34 = vcombine.high %v2707_v4, %v2715_v25  ;;  %v14258_v61 = vcombine.high %v2722_v44, %v2730_v50  ;;  %v14260_v55 = vcombine.high %v2723_v21, %v2731_v46  ;;  %v2754_v25 = vld [vmem:[%s16540_s19 + $0x1a00] sm:$0xff] }
 0x23f   : > { %v17728_v33 = vpack.c.bf16 %v1856_v18, %v1848_v39  ;;  %v17732_v3 = vpack.c.bf16 %v1857_v2, %v1849_v0  ;;  %v14257_v17 = vcombine.low %v2722_v44, %v2730_v50  ;;  %v14259_v51 = vcombine.low %v2723_v21, %v2731_v46  ;;  %v2762_v39 = vld [vmem:[%s16540_s19 + $0x1a40] sm:$0xff]  ;;  %v2779_v44 = vld [vmem:[%s16540_s19 + $0x1ac8] sm:$0xff] }
 0x240   : > { %8407 = vmatpush1.bf16.msra.mxu0 %v14209_v47  ;;  %v2738_v47 = vld [vmem:[%s16540_s19 + $0x1980] sm:$0xff]  ;;  %v14289_v2 = vcombine.low %v2754_v25, %v2762_v39  ;;  %v14291_v50 = vcombine.low %v2755_v11, %v2763_v14 }
 0x241   : > { %8859 = vmatpush1.bf16.msra.mxu1 %v14211_v49  ;;  %8489 = vmatprep.subr.bf16.mxu0 %v14226_v43  ;;  %v2746_v49 = vld [vmem:[%s16540_s19 + $0x19c0] sm:$0xff]  ;;  %v2739_v43 = vld [vmem:[%s16540_s19 + $0x1988] sm:$0xff] }
 0x242   : > { %8941 = vmatprep.subr.bf16.mxu1 %v14228_v45  ;;  %v2747_v45 = vld [vmem:[%s16540_s19 + $0x19c8] sm:$0xff]  ;;  %v14274_v53 = vcombine.high %v2738_v47, %v2746_v49  ;;  %v14273_v0 = vcombine.low %v2738_v47, %v2746_v49  ;;  %v2770_v18 = vld [vmem:[%s16540_s19 + $0x1a80] sm:$0xff] }
 0x243   : > { %8409 = vmatmul.mubr.bf16.vlgmr.msra.gmra.mrb[64].mxu0 %v17290_v32  ;;  %v14276_v4 = vcombine.high %v2739_v43, %v2747_v45  ;;  %v14275_v26 = vcombine.low %v2739_v43, %v2747_v45 }
 0x244   : > { %8861 = vmatmul.mubr.bf16.vlgmr.msra.gmra.mrb[64].mxu1 %v17290_v32  ;;  %8490 = vmatpush1.bf16.msra.mxu0 %v14225_v27  ;;  %v14290_v27 = vcombine.high %v2754_v25, %v2762_v39 }
 0x245   : > { %8942 = vmatpush1.bf16.msra.mxu1 %v14227_v5  ;;  %8491 = vmatprep.subr.bf16.mxu0 %v14242_v35  ;;  %v14292_v5 = vcombine.high %v2755_v11, %v2763_v14  ;;  %v2778_v35 = vld [vmem:[%s16540_s19 + $0x1ac0] sm:$0xff] }
 0x246   : > { %8943 = vmatprep.subr.bf16.mxu1 %v14244_v34  ;;  %8418 = vmatprep.mubr.bf16.mxu0 %v17368_v19  ;;  %v2771_v34 = vld [vmem:[%s16540_s19 + $0x1a88] sm:$0xff]  ;;  %v14306_v21 = vcombine.high %v2770_v18, %v2778_v35  ;;  %v14305_v47 = vcombine.low %v2770_v18, %v2778_v35 }
 0x247   : > { %8870 = vmatprep.mubr.bf16.mxu1 %v17368_v19  ;;  %v14308_v46 = vcombine.high %v2771_v34, %v2779_v44  ;;  %v14307_v49 = vcombine.low %v2771_v34, %v2779_v44 }
 0x248   : > { %8492 = vmatpush1.bf16.msra.mxu0 %v14241_v63  ;;  %v2786_v63 = vld [vmem:[%s16540_s19 + $0x1b00] sm:$0xff] }
 0x249   : > { %8944 = vmatpush1.bf16.msra.mxu1 %v14243_v10  ;;  %8493 = vmatprep.subr.bf16.mxu0 %v14258_v61  ;;  %v2794_v10 = vld [vmem:[%s16540_s19 + $0x1b40] sm:$0xff]  ;;  %v2787_v61 = vld [vmem:[%s16540_s19 + $0x1b08] sm:$0xff] }
 0x24a   : > { %8945 = vmatprep.subr.bf16.mxu1 %v14260_v55  ;;  %v2795_v55 = vld [vmem:[%s16540_s19 + $0x1b48] sm:$0xff]  ;;  %v14322_v43 = vcombine.high %v2786_v63, %v2794_v10  ;;  %v14321_v25 = vcombine.low %v2786_v63, %v2794_v10 }
 0x24b   : > { %8419 = vmatmul.mubr.bf16.gmra.mrb[68].mxu0 %v17356_v58  ;;  %v14324_v45 = vcombine.high %v2787_v61, %v2795_v55  ;;  %v14323_v39 = vcombine.low %v2787_v61, %v2795_v55 }
 0x24c   : > { %8871 = vmatmul.mubr.bf16.gmra.mrb[68].mxu1 %v17356_v58  ;;  %8494 = vmatpush1.bf16.msra.mxu0 %v14257_v17  ;;  %v2802_v17 = vld [vmem:[%s16540_s19 + $0x1b80] sm:$0xff] }
 0x24d   : > { %8946 = vmatpush1.bf16.msra.mxu1 %v14259_v51  ;;  %8495 = vmatprep.subr.bf16.mxu0 %v14274_v53  ;;  %v2810_v51 = vld [vmem:[%s16540_s19 + $0x1bc0] sm:$0xff]  ;;  %v2803_v53 = vld [vmem:[%s16540_s19 + $0x1b88] sm:$0xff] }
 0x24e   : > { %8947 = vmatprep.subr.bf16.mxu1 %v14276_v4  ;;  %8428 = vmatprep.mubr.bf16.mxu0 %v17428_v24  ;;  %v2811_v4 = vld [vmem:[%s16540_s19 + $0x1bc8] sm:$0xff]  ;;  %v14338_v11 = vcombine.high %v2802_v17, %v2810_v51  ;;  %v14337_v18 = vcombine.low %v2802_v17, %v2810_v51 }
 0x24f   : > { %8880 = vmatprep.mubr.bf16.mxu1 %v17428_v24  ;;  %v14340_v14 = vcombine.high %v2803_v53, %v2811_v4  ;;  %v14339_v35 = vcombine.low %v2803_v53, %v2811_v4 }
 0x250   : > { %8496 = vmatpush1.bf16.msra.mxu0 %v14273_v0  ;;  %v2818_v0 = vld [vmem:[%s16540_s19 + $0x1c00] sm:$0xff] }
 0x251   : > { %8948 = vmatpush1.bf16.msra.mxu1 %v14275_v26  ;;  %8497 = vmatprep.subr.bf16.mxu0 %v14290_v27  ;;  %v2826_v26 = vld [vmem:[%s16540_s19 + $0x1c40] sm:$0xff]  ;;  %v2819_v27 = vld [vmem:[%s16540_s19 + $0x1c08] sm:$0xff] }
 0x252   : > { %8949 = vmatprep.subr.bf16.mxu1 %v14292_v5  ;;  %v2827_v5 = vld [vmem:[%s16540_s19 + $0x1c48] sm:$0xff]  ;;  %v14354_v34 = vcombine.high %v2818_v0, %v2826_v26  ;;  %v14353_v63 = vcombine.low %v2818_v0, %v2826_v26 }
 0x253   : > { %8429 = vmatmul.mubr.bf16.gmra.mrb[72].mxu0 %v17416_v60  ;;  %v14356_v44 = vcombine.high %v2819_v27, %v2827_v5  ;;  %v14355_v10 = vcombine.low %v2819_v27, %v2827_v5 }
 0x254   : > { %8881 = vmatmul.mubr.bf16.gmra.mrb[72].mxu1 %v17416_v60  ;;  %8498 = vmatpush1.bf16.msra.mxu0 %v14289_v2  ;;  %v2834_v2 = vld [vmem:[%s16540_s19 + $0x1c80] sm:$0xff] }
 0x255   : > { %8950 = vmatpush1.bf16.msra.mxu1 %v14291_v50  ;;  %8499 = vmatprep.subr.bf16.mxu0 %v14306_v21  ;;  %v2842_v50 = vld [vmem:[%s16540_s19 + $0x1cc0] sm:$0xff]  ;;  %v2835_v21 = vld [vmem:[%s16540_s19 + $0x1c88] sm:$0xff] }
 0x256   : > { %8951 = vmatprep.subr.bf16.mxu1 %v14308_v46  ;;  %8438 = vmatprep.mubr.bf16.mxu0 %v17488_v48  ;;  %v2843_v46 = vld [vmem:[%s16540_s19 + $0x1cc8] sm:$0xff]  ;;  %v14370_v61 = vcombine.high %v2834_v2, %v2842_v50  ;;  %v14369_v17 = vcombine.low %v2834_v2, %v2842_v50 }
 0x257   : > { %8890 = vmatprep.mubr.bf16.mxu1 %v17488_v48  ;;  %v14372_v55 = vcombine.high %v2835_v21, %v2843_v46  ;;  %v14371_v51 = vcombine.low %v2835_v21, %v2843_v46 }
 0x258   : > { %8500 = vmatpush1.bf16.msra.mxu0 %v14305_v47  ;;  %v2850_v47 = vld [vmem:[%s16540_s19 + $0x1d00] sm:$0xff] }
 0x259   : > { %8952 = vmatpush1.bf16.msra.mxu1 %v14307_v49  ;;  %8501 = vmatprep.subr.bf16.mxu0 %v14322_v43  ;;  %v2858_v49 = vld [vmem:[%s16540_s19 + $0x1d40] sm:$0xff]  ;;  %v2851_v43 = vld [vmem:[%s16540_s19 + $0x1d08] sm:$0xff] }
 0x25a   : > { %8953 = vmatprep.subr.bf16.mxu1 %v14324_v45  ;;  %v2859_v45 = vld [vmem:[%s16540_s19 + $0x1d48] sm:$0xff]  ;;  %v14386_v53 = vcombine.high %v2850_v47, %v2858_v49  ;;  %v14385_v0 = vcombine.low %v2850_v47, %v2858_v49 }
 0x25b   : > { %8439 = vmatmul.mubr.bf16.gmra.mrb[76].mxu0 %v17476_v54  ;;  %v14388_v4 = vcombine.high %v2851_v43, %v2859_v45  ;;  %v14387_v26 = vcombine.low %v2851_v43, %v2859_v45 }
 0x25c   : > { %8891 = vmatmul.mubr.bf16.gmra.mrb[76].mxu1 %v17476_v54  ;;  %8502 = vmatpush1.bf16.msra.mxu0 %v14321_v25  ;;  %v2866_v25 = vld [vmem:[%s16540_s19 + $0x1d80] sm:$0xff] }
 0x25d   : > { %8954 = vmatpush1.bf16.msra.mxu1 %v14323_v39  ;;  %8503 = vmatprep.subr.bf16.mxu0 %v14338_v11  ;;  %v2874_v39 = vld [vmem:[%s16540_s19 + $0x1dc0] sm:$0xff]  ;;  %v2867_v11 = vld [vmem:[%s16540_s19 + $0x1d88] sm:$0xff] }
 0x25e   : > { %8955 = vmatprep.subr.bf16.mxu1 %v14340_v14  ;;  %8448 = vmatprep.mubr.bf16.mxu0 %v17548_v38  ;;  %v2875_v14 = vld [vmem:[%s16540_s19 + $0x1dc8] sm:$0xff]  ;;  %v14402_v27 = vcombine.high %v2866_v25, %v2874_v39  ;;  %v14401_v2 = vcombine.low %v2866_v25, %v2874_v39 }
 0x25f   : > { %8900 = vmatprep.mubr.bf16.mxu1 %v17548_v38  ;;  %v14404_v5 = vcombine.high %v2867_v11, %v2875_v14  ;;  %v14403_v50 = vcombine.low %v2867_v11, %v2875_v14 }
 0x260   : > { %8504 = vmatpush1.bf16.msra.mxu0 %v14337_v18  ;;  %v2882_v18 = vld [vmem:[%s16540_s19 + $0x1e00] sm:$0xff] }
 0x261   : > { %8956 = vmatpush1.bf16.msra.mxu1 %v14339_v35  ;;  %8505 = vmatprep.subr.bf16.mxu0 %v14354_v34  ;;  %v2890_v35 = vld [vmem:[%s16540_s19 + $0x1e40] sm:$0xff]  ;;  %v2883_v34 = vld [vmem:[%s16540_s19 + $0x1e08] sm:$0xff] }
 0x262   : > { %8957 = vmatprep.subr.bf16.mxu1 %v14356_v44  ;;  %v2891_v44 = vld [vmem:[%s16540_s19 + $0x1e48] sm:$0xff]  ;;  %v14418_v21 = vcombine.high %v2882_v18, %v2890_v35  ;;  %v14417_v47 = vcombine.low %v2882_v18, %v2890_v35 }
 0x263   : > { %8449 = vmatmul.mubr.bf16.gmra.mrb[80].mxu0 %v17536_v22  ;;  %v14420_v46 = vcombine.high %v2883_v34, %v2891_v44  ;;  %v14419_v49 = vcombine.low %v2883_v34, %v2891_v44  ;;  %v1924_v34 = vld [vmem:[%s16540_s19 + $0x10] sm:$0xff] }
 0x264   : > { %8901 = vmatmul.mubr.bf16.gmra.mrb[80].mxu1 %v17536_v22  ;;  %8506 = vmatpush1.bf16.msra.mxu0 %v14353_v63  ;;  %v2898_v63 = vld [vmem:[%s16540_s19 + $0x1e80] sm:$0xff] }
 0x265   : > { %8958 = vmatpush1.bf16.msra.mxu1 %v14355_v10  ;;  %8507 = vmatprep.subr.bf16.mxu0 %v14370_v61  ;;  %v2906_v10 = vld [vmem:[%s16540_s19 + $0x1ec0] sm:$0xff]  ;;  %v2899_v61 = vld [vmem:[%s16540_s19 + $0x1e88] sm:$0xff] }
 0x266   : > { %8959 = vmatprep.subr.bf16.mxu1 %v14372_v55  ;;  %8458 = vmatprep.mubr.bf16.mxu0 %v17608_v1  ;;  %v2907_v55 = vld [vmem:[%s16540_s19 + $0x1ec8] sm:$0xff]  ;;  %v14434_v43 = vcombine.high %v2898_v63, %v2906_v10  ;;  %v14433_v25 = vcombine.low %v2898_v63, %v2906_v10 }
 0x267   : > { %8910 = vmatprep.mubr.bf16.mxu1 %v17608_v1  ;;  %v14436_v45 = vcombine.high %v2899_v61, %v2907_v55  ;;  %v14435_v39 = vcombine.low %v2899_v61, %v2907_v55 }
 0x268   : > { %8508 = vmatpush1.bf16.msra.mxu0 %v14369_v17  ;;  %v2914_v17 = vld [vmem:[%s16540_s19 + $0x1f00] sm:$0xff] }
 0x269   : > { %8960 = vmatpush1.bf16.msra.mxu1 %v14371_v51  ;;  %8509 = vmatprep.subr.bf16.mxu0 %v14386_v53  ;;  %v2922_v51 = vld [vmem:[%s16540_s19 + $0x1f40] sm:$0xff]  ;;  %v2915_v53 = vld [vmem:[%s16540_s19 + $0x1f08] sm:$0xff] }
 0x26a   : > { %8961 = vmatprep.subr.bf16.mxu1 %v14388_v4  ;;  %v2923_v4 = vld [vmem:[%s16540_s19 + $0x1f48] sm:$0xff]  ;;  %v14450_v11 = vcombine.high %v2914_v17, %v2922_v51  ;;  %v14449_v18 = vcombine.low %v2914_v17, %v2922_v51 }
 0x26b   : > { %8459 = vmatmul.mubr.bf16.gmra.mrb[84].mxu0 %v17596_v28  ;;  %v14452_v14 = vcombine.high %v2915_v53, %v2923_v4  ;;  %v14451_v35 = vcombine.low %v2915_v53, %v2923_v4  ;;  %v1956_v53 = vld [vmem:[%s16540_s19 + $0x110] sm:$0xff] }
 0x26c   : > { %8911 = vmatmul.mubr.bf16.gmra.mrb[84].mxu1 %v17596_v28  ;;  %8510 = vmatpush1.bf16.msra.mxu0 %v14385_v0  ;;  %v2930_v0 = vld [vmem:[%s16540_s19 + $0x1f80] sm:$0xff] }
 0x26d   : > { %8962 = vmatpush1.bf16.msra.mxu1 %v14387_v26  ;;  %8511 = vmatprep.subr.bf16.mxu0 %v14402_v27  ;;  %v2938_v26 = vld [vmem:[%s16540_s19 + $0x1fc0] sm:$0xff]  ;;  %v2931_v27 = vld [vmem:[%s16540_s19 + $0x1f88] sm:$0xff] }
 0x26e   : > { %8963 = vmatprep.subr.bf16.mxu1 %v14404_v5  ;;  %8468 = vmatprep.mubr.bf16.mxu0 %v17668_v57  ;;  %v2939_v5 = vld [vmem:[%s16540_s19 + $0x1fc8] sm:$0xff]  ;;  %v14466_v44 = vcombine.high %v2930_v0, %v2938_v26  ;;  %v14465_v63 = vcombine.low %v2930_v0, %v2938_v26 }
 0x26f   : > { %8920 = vmatprep.mubr.bf16.mxu1 %v17668_v57  ;;  %v14467_v10 = vcombine.low %v2931_v27, %v2939_v5 }
 0x270   : > { %8512 = vmatpush1.bf16.msra.mxu0 %v14401_v2  ;;  %v14468_v2 = vcombine.high %v2931_v27, %v2939_v5 }
 0x271   : > { %8964 = vmatpush1.bf16.msra.mxu1 %v14403_v50  ;;  %8513 = vmatprep.subr.bf16.mxu0 %v14418_v21  ;;  %v1932_v50 = vld [vmem:[%s16540_s19 + $0x50] sm:$0xff]  ;;  %v1925_v21 = vld [vmem:[%s16540_s19 + $0x18] sm:$0xff] }
 0x272   : > { %8965 = vmatprep.subr.bf16.mxu1 %v14420_v46  ;;  %v1933_v46 = vld [vmem:[%s16540_s19 + $0x58] sm:$0xff]  ;;  %v13462_v61 = vcombine.high %v1924_v34, %v1932_v50  ;;  %v13461_v17 = vcombine.low %v1924_v34, %v1932_v50 }
 0x273   : > { %8469 = vmatmul.mubr.bf16.gmra.mrb[88].mxu0 %v17656_v20  ;;  %v13464_v55 = vcombine.high %v1925_v21, %v1933_v46  ;;  %v13463_v51 = vcombine.low %v1925_v21, %v1933_v46  ;;  %v1973_v34 = vld [vmem:[%s16540_s19 + $0x198] sm:$0xff]  ;;  %v1988_v21 = vld [vmem:[%s16540_s19 + $0x210] sm:$0xff] }
 0x274   : > { %8921 = vmatmul.mubr.bf16.gmra.mrb[88].mxu1 %v17656_v20  ;;  %8514 = vmatpush1.bf16.msra.mxu0 %v14417_v47  ;;  %v1940_v47 = vld [vmem:[%s16540_s19 + $0x90] sm:$0xff] }
 0x275   : > { %8966 = vmatpush1.bf16.msra.mxu1 %v14419_v49  ;;  %8515 = vmatprep.subr.bf16.mxu0 %v14434_v43  ;;  %v1948_v49 = vld [vmem:[%s16540_s19 + $0xd0] sm:$0xff]  ;;  %v1941_v43 = vld [vmem:[%s16540_s19 + $0x98] sm:$0xff] }
 0x276   : > { %8967 = vmatprep.subr.bf16.mxu1 %v14436_v45  ;;  %8478 = vmatprep.mubr.bf16.mxu0 %v17703_v52  ;;  %v1949_v45 = vld [vmem:[%s16540_s19 + $0xd8] sm:$0xff]  ;;  %v13478_v4 = vcombine.high %v1940_v47, %v1948_v49  ;;  %v13477_v0 = vcombine.low %v1940_v47, %v1948_v49 }
 0x277   : > { %8930 = vmatprep.mubr.bf16.mxu1 %v17703_v52  ;;  %v13479_v26 = vcombine.low %v1941_v43, %v1949_v45 }
 0x278   : > { %8516 = vmatpush1.bf16.msra.mxu0 %v14433_v25  ;;  %v13480_v25 = vcombine.high %v1941_v43, %v1949_v45 }
 0x279   : > { %8968 = vmatpush1.bf16.msra.mxu1 %v14435_v39  ;;  %8517 = vmatprep.subr.bf16.mxu0 %v14450_v11  ;;  %v1964_v39 = vld [vmem:[%s16540_s19 + $0x150] sm:$0xff]  ;;  %v1957_v11 = vld [vmem:[%s16540_s19 + $0x118] sm:$0xff] }
 0x27a   : > { %8969 = vmatprep.subr.bf16.mxu1 %v14452_v14  ;;  %v1965_v14 = vld [vmem:[%s16540_s19 + $0x158] sm:$0xff]  ;;  %v13494_v27 = vcombine.high %v1956_v53, %v1964_v39 }
 0x27b   : > { %8479 = vmatmul.mubr.bf16.gmra.mrb[92].mxu0 %v17700_v6  ;;  %v13496_v5 = vcombine.high %v1957_v11, %v1965_v14  ;;  %v13495_v50 = vcombine.low %v1957_v11, %v1965_v14  ;;  %v2020_v11 = vld [vmem:[%s16540_s19 + $0x310] sm:$0xff] }
 0x27c   : > { %8931 = vmatmul.mubr.bf16.gmra.mrb[92].mxu1 %v17700_v6  ;;  %8518 = vmatpush1.bf16.msra.mxu0 %v14449_v18  ;;  %v1972_v18 = vld [vmem:[%s16540_s19 + $0x190] sm:$0xff] }
 0x27d   : > { %8970 = vmatpush1.bf16.msra.mxu1 %v14451_v35  ;;  %8521 = vmatprep.mubr.bf16.mxu0 %v17386_v8  ;;  %v1980_v35 = vld [vmem:[%s16540_s19 + $0x1d0] sm:$0xff] }
 0x27e   : > { %8973 = vmatprep.mubr.bf16.mxu1 %v17386_v8  ;;  %8519 = vmatprep.subr.bf16.mxu0 %v14466_v44  ;;  %v1981_v44 = vld [vmem:[%s16540_s19 + $0x1d8] sm:$0xff]  ;;  %v13510_v46 = vcombine.high %v1972_v18, %v1980_v35  ;;  %v13509_v47 = vcombine.low %v1972_v18, %v1980_v35 }
 0x27f   : > { %8971 = vmatprep.subr.bf16.mxu1 %v14468_v2  ;;  %v13493_v2 = vcombine.low %v1956_v53, %v1964_v39  ;;  %v13511_v49 = vcombine.low %v1973_v34, %v1981_v44  ;;  %v2005_v53 = vld [vmem:[%s16540_s19 + $0x298] sm:$0xff] }
 0x280   : > { %8520 = vmatpush1.bf16.msra.mxu0 %v14465_v63  ;;  %v13512_v63 = vcombine.high %v1973_v34, %v1981_v44 }
 0x281   : > { %8972 = vmatpush1.bf16.msra.mxu1 %v14467_v10  ;;  %9054 = vmatprep.subr.bf16.mxu0 %v13462_v61  ;;  %v1996_v10 = vld [vmem:[%s16540_s19 + $0x250] sm:$0xff]  ;;  %v1989_v61 = vld [vmem:[%s16540_s19 + $0x218] sm:$0xff] }
 0x282   : > { %9506 = vmatprep.subr.bf16.mxu1 %v13464_v55  ;;  %v1997_v55 = vld [vmem:[%s16540_s19 + $0x258] sm:$0xff]  ;;  %v13526_v43 = vcombine.high %v1988_v21, %v1996_v10 }
 0x283   : > { %8522 = vmatmul.mubr.bf16.vlgmr.msra.gmra.mrb[64].mxu0 %v17379_v40  ;;  %v13528_v45 = vcombine.high %v1989_v61, %v1997_v55  ;;  %v13527_v39 = vcombine.low %v1989_v61, %v1997_v55  ;;  %v2052_v61 = vld [vmem:[%s16540_s19 + $0x410] sm:$0xff] }
 0x284   : > { %8974 = vmatmul.mubr.bf16.vlgmr.msra.gmra.mrb[64].mxu1 %v17379_v40  ;;  %9055 = vmatpush1.bf16.msra.mxu0 %v13461_v17  ;;  %v2004_v17 = vld [vmem:[%s16540_s19 + $0x290] sm:$0xff] }
 0x285   : > { %9507 = vmatpush1.bf16.msra.mxu1 %v13463_v51  ;;  %8531 = vmatprep.mubr.bf16.mxu0 %v17446_v56  ;;  %v2012_v51 = vld [vmem:[%s16540_s19 + $0x2d0] sm:$0xff] }
 0x286   : > { %8983 = vmatprep.mubr.bf16.mxu1 %v17446_v56  ;;  %9056 = vmatprep.subr.bf16.mxu0 %v13478_v4  ;;  %v2013_v4 = vld [vmem:[%s16540_s19 + $0x2d8] sm:$0xff]  ;;  %v13542_v14 = vcombine.high %v2004_v17, %v2012_v51  ;;  %v13541_v18 = vcombine.low %v2004_v17, %v2012_v51 }
 0x287   : > { %9508 = vmatprep.subr.bf16.mxu1 %v13480_v25  ;;  %v13525_v25 = vcombine.low %v1988_v21, %v1996_v10  ;;  %v13543_v35 = vcombine.low %v2005_v53, %v2013_v4  ;;  %v2037_v21 = vld [vmem:[%s16540_s19 + $0x398] sm:$0xff] }
 0x288   : > { %9057 = vmatpush1.bf16.msra.mxu0 %v13477_v0  ;;  %v13544_v0 = vcombine.high %v2005_v53, %v2013_v4 }
 0x289   : > { %9509 = vmatpush1.bf16.msra.mxu1 %v13479_v26  ;;  %9058 = vmatprep.subr.bf16.mxu0 %v13494_v27  ;;  %v2028_v26 = vld [vmem:[%s16540_s19 + $0x350] sm:$0xff]  ;;  %v2021_v27 = vld [vmem:[%s16540_s19 + $0x318] sm:$0xff] }
 0x28a   : > { %9510 = vmatprep.subr.bf16.mxu1 %v13496_v5  ;;  %v2029_v5 = vld [vmem:[%s16540_s19 + $0x358] sm:$0xff]  ;;  %v13558_v34 = vcombine.high %v2020_v11, %v2028_v26 }
 0x28b   : > { %8532 = vmatmul.mubr.bf16.gmra.mrb[68].mxu0 %v17439_v15  ;;  %v13560_v44 = vcombine.high %v2021_v27, %v2029_v5  ;;  %v13559_v10 = vcombine.low %v2021_v27, %v2029_v5  ;;  %v2084_v27 = vld [vmem:[%s16540_s19 + $0x510] sm:$0xff] }
 0x28c   : > { %8984 = vmatmul.mubr.bf16.gmra.mrb[68].mxu1 %v17439_v15  ;;  %9059 = vmatpush1.bf16.msra.mxu0 %v13493_v2  ;;  %v2036_v2 = vld [vmem:[%s16540_s19 + $0x390] sm:$0xff] }
 0x28d   : > { %9511 = vmatpush1.bf16.msra.mxu1 %v13495_v50  ;;  %8541 = vmatprep.mubr.bf16.mxu0 %v17506_v23  ;;  %v2044_v50 = vld [vmem:[%s16540_s19 + $0x3d0] sm:$0xff] }
 0x28e   : > { %8993 = vmatprep.mubr.bf16.mxu1 %v17506_v23  ;;  %9060 = vmatprep.subr.bf16.mxu0 %v13510_v46  ;;  %v2045_v46 = vld [vmem:[%s16540_s19 + $0x3d8] sm:$0xff]  ;;  %v13574_v55 = vcombine.high %v2036_v2, %v2044_v50  ;;  %v13573_v17 = vcombine.low %v2036_v2, %v2044_v50 }
 0x28f   : > { %9512 = vmatprep.subr.bf16.mxu1 %v13512_v63  ;;  %v13557_v63 = vcombine.low %v2020_v11, %v2028_v26  ;;  %v13575_v51 = vcombine.low %v2037_v21, %v2045_v46  ;;  %v2069_v11 = vld [vmem:[%s16540_s19 + $0x498] sm:$0xff] }
 0x290   : > { %9061 = vmatpush1.bf16.msra.mxu0 %v13509_v47  ;;  %v13576_v47 = vcombine.high %v2037_v21, %v2045_v46 }
 0x291   : > { %9513 = vmatpush1.bf16.msra.mxu1 %v13511_v49  ;;  %9062 = vmatprep.subr.bf16.mxu0 %v13526_v43  ;;  %v2060_v49 = vld [vmem:[%s16540_s19 + $0x450] sm:$0xff]  ;;  %v2053_v43 = vld [vmem:[%s16540_s19 + $0x418] sm:$0xff] }
 0x292   : > { %9514 = vmatprep.subr.bf16.mxu1 %v13528_v45  ;;  %v2061_v45 = vld [vmem:[%s16540_s19 + $0x458] sm:$0xff]  ;;  %v13590_v53 = vcombine.high %v2052_v61, %v2060_v49 }
 0x293   : > { %8542 = vmatmul.mubr.bf16.gmra.mrb[72].mxu0 %v17499_v59  ;;  %v13592_v4 = vcombine.high %v2053_v43, %v2061_v45  ;;  %v13591_v26 = vcombine.low %v2053_v43, %v2061_v45  ;;  %v2116_v43 = vld [vmem:[%s16540_s19 + $0x610] sm:$0xff] }
 0x294   : > { %8994 = vmatmul.mubr.bf16.gmra.mrb[72].mxu1 %v17499_v59  ;;  %9063 = vmatpush1.bf16.msra.mxu0 %v13525_v25  ;;  %v2068_v25 = vld [vmem:[%s16540_s19 + $0x490] sm:$0xff] }
 0x295   : > { %9515 = vmatpush1.bf16.msra.mxu1 %v13527_v39  ;;  %8551 = vmatprep.mubr.bf16.mxu0 %v17566_v16  ;;  %v2076_v39 = vld [vmem:[%s16540_s19 + $0x4d0] sm:$0xff] }
 0x296   : > { %9003 = vmatprep.mubr.bf16.mxu1 %v17566_v16  ;;  %9064 = vmatprep.subr.bf16.mxu0 %v13542_v14  ;;  %v2077_v14 = vld [vmem:[%s16540_s19 + $0x4d8] sm:$0xff]  ;;  %v13606_v5 = vcombine.high %v2068_v25, %v2076_v39  ;;  %v13605_v2 = vcombine.low %v2068_v25, %v2076_v39 }
 0x297   : > { %9516 = vmatprep.subr.bf16.mxu1 %v13544_v0  ;;  %v13589_v0 = vcombine.low %v2052_v61, %v2060_v49  ;;  %v13607_v50 = vcombine.low %v2069_v11, %v2077_v14  ;;  %v2101_v61 = vld [vmem:[%s16540_s19 + $0x598] sm:$0xff] }
 0x298   : > { %9065 = vmatpush1.bf16.msra.mxu0 %v13541_v18  ;;  %v13608_v18 = vcombine.high %v2069_v11, %v2077_v14 }
 0x299   : > { %9517 = vmatpush1.bf16.msra.mxu1 %v13543_v35  ;;  %9066 = vmatprep.subr.bf16.mxu0 %v13558_v34  ;;  %v2092_v35 = vld [vmem:[%s16540_s19 + $0x550] sm:$0xff]  ;;  %v2085_v34 = vld [vmem:[%s16540_s19 + $0x518] sm:$0xff] }
 0x29a   : > { %9518 = vmatprep.subr.bf16.mxu1 %v13560_v44  ;;  %v2093_v44 = vld [vmem:[%s16540_s19 + $0x558] sm:$0xff]  ;;  %v13622_v21 = vcombine.high %v2084_v27, %v2092_v35 }
 0x29b   : > { %8552 = vmatmul.mubr.bf16.gmra.mrb[76].mxu0 %v17559_v41  ;;  %v13624_v46 = vcombine.high %v2085_v34, %v2093_v44  ;;  %v13623_v49 = vcombine.low %v2085_v34, %v2093_v44  ;;  %v2148_v34 = vld [vmem:[%s16540_s19 + $0x710] sm:$0xff] }
 0x29c   : > { %9004 = vmatmul.mubr.bf16.gmra.mrb[76].mxu1 %v17559_v41  ;;  %9067 = vmatpush1.bf16.msra.mxu0 %v13557_v63  ;;  %v2100_v63 = vld [vmem:[%s16540_s19 + $0x590] sm:$0xff] }
 0x29d   : > { %9519 = vmatpush1.bf16.msra.mxu1 %v13559_v10  ;;  %8561 = vmatprep.mubr.bf16.mxu0 %v17626_v36  ;;  %v2108_v10 = vld [vmem:[%s16540_s19 + $0x5d0] sm:$0xff] }
 0x29e   : > { %9013 = vmatprep.mubr.bf16.mxu1 %v17626_v36  ;;  %9068 = vmatprep.subr.bf16.mxu0 %v13574_v55  ;;  %v2109_v55 = vld [vmem:[%s16540_s19 + $0x5d8] sm:$0xff]  ;;  %v13638_v45 = vcombine.high %v2100_v63, %v2108_v10  ;;  %v13637_v25 = vcombine.low %v2100_v63, %v2108_v10 }
 0x29f   : > { %9520 = vmatprep.subr.bf16.mxu1 %v13576_v47  ;;  %v13621_v47 = vcombine.low %v2084_v27, %v2092_v35  ;;  %v13639_v39 = vcombine.low %v2101_v61, %v2109_v55  ;;  %v2133_v27 = vld [vmem:[%s16540_s19 + $0x698] sm:$0xff] }
 0x2a0   : > { %9069 = vmatpush1.bf16.msra.mxu0 %v13573_v17  ;;  %v13640_v17 = vcombine.high %v2101_v61, %v2109_v55 }
 0x2a1   : > { %9521 = vmatpush1.bf16.msra.mxu1 %v13575_v51  ;;  %9070 = vmatprep.subr.bf16.mxu0 %v13590_v53  ;;  %v2124_v51 = vld [vmem:[%s16540_s19 + $0x650] sm:$0xff]  ;;  %v2117_v53 = vld [vmem:[%s16540_s19 + $0x618] sm:$0xff] }
 0x2a2   : > { %9522 = vmatprep.subr.bf16.mxu1 %v13592_v4  ;;  %v2125_v4 = vld [vmem:[%s16540_s19 + $0x658] sm:$0xff]  ;;  %v13654_v11 = vcombine.high %v2116_v43, %v2124_v51 }
 0x2a3   : > { %8562 = vmatmul.mubr.bf16.gmra.mrb[80].mxu0 %v17619_v7  ;;  %v13656_v14 = vcombine.high %v2117_v53, %v2125_v4  ;;  %v13655_v35 = vcombine.low %v2117_v53, %v2125_v4  ;;  %v2180_v53 = vld [vmem:[%s16540_s19 + $0x810] sm:$0xff] }
 0x2a4   : > { %9014 = vmatmul.mubr.bf16.gmra.mrb[80].mxu1 %v17619_v7  ;;  %9071 = vmatpush1.bf16.msra.mxu0 %v13589_v0  ;;  %v2132_v0 = vld [vmem:[%s16540_s19 + $0x690] sm:$0xff] }
 0x2a5   : > { %9523 = vmatpush1.bf16.msra.mxu1 %v13591_v26  ;;  %8571 = vmatprep.mubr.bf16.mxu0 %v17682_v62  ;;  %v2140_v26 = vld [vmem:[%s16540_s19 + $0x6d0] sm:$0xff] }
 0x2a6   : > { %9023 = vmatprep.mubr.bf16.mxu1 %v17682_v62  ;;  %9072 = vmatprep.subr.bf16.mxu0 %v13606_v5  ;;  %v2141_v5 = vld [vmem:[%s16540_s19 + $0x6d8] sm:$0xff]  ;;  %v13670_v44 = vcombine.high %v2132_v0, %v2140_v26  ;;  %v13669_v63 = vcombine.low %v2132_v0, %v2140_v26 }
 0x2a7   : > { %9524 = vmatprep.subr.bf16.mxu1 %v13608_v18  ;;  %v13653_v18 = vcombine.low %v2116_v43, %v2124_v51  ;;  %v13671_v10 = vcombine.low %v2133_v27, %v2141_v5  ;;  %v2165_v43 = vld [vmem:[%s16540_s19 + $0x798] sm:$0xff] }
 0x2a8   : > { %9073 = vmatpush1.bf16.msra.mxu0 %v13605_v2  ;;  %v13672_v2 = vcombine.high %v2133_v27, %v2141_v5 }
 0x2a9   : > { %9525 = vmatpush1.bf16.msra.mxu1 %v13607_v50  ;;  %9074 = vmatprep.subr.bf16.mxu0 %v13622_v21  ;;  %v2156_v50 = vld [vmem:[%s16540_s19 + $0x750] sm:$0xff]  ;;  %v2149_v21 = vld [vmem:[%s16540_s19 + $0x718] sm:$0xff] }
 0x2aa   : > { %9526 = vmatprep.subr.bf16.mxu1 %v13624_v46  ;;  %v2157_v46 = vld [vmem:[%s16540_s19 + $0x758] sm:$0xff]  ;;  %v13686_v61 = vcombine.high %v2148_v34, %v2156_v50 }
 0x2ab   : > { %8572 = vmatmul.mubr.bf16.gmra.mrb[84].mxu0 %v17675_v9  ;;  %v13688_v55 = vcombine.high %v2149_v21, %v2157_v46  ;;  %v13687_v51 = vcombine.low %v2149_v21, %v2157_v46  ;;  %v2212_v21 = vld [vmem:[%s16540_s19 + $0x910] sm:$0xff] }
 0x2ac   : > { %9024 = vmatmul.mubr.bf16.gmra.mrb[84].mxu1 %v17675_v9  ;;  %9075 = vmatpush1.bf16.msra.mxu0 %v13621_v47  ;;  %v2164_v47 = vld [vmem:[%s16540_s19 + $0x790] sm:$0xff] }
 0x2ad   : > { %9527 = vmatpush1.bf16.msra.mxu1 %v13623_v49  ;;  %8581 = vmatprep.mubr.bf16.mxu0 %v17712_v37  ;;  %v2172_v49 = vld [vmem:[%s16540_s19 + $0x7d0] sm:$0xff] }
 0x2ae   : > { %9033 = vmatprep.mubr.bf16.mxu1 %v17712_v37  ;;  %9076 = vmatprep.subr.bf16.mxu0 %v13638_v45  ;;  %v2173_v45 = vld [vmem:[%s16540_s19 + $0x7d8] sm:$0xff]  ;;  %v13702_v4 = vcombine.high %v2164_v47, %v2172_v49  ;;  %v13701_v0 = vcombine.low %v2164_v47, %v2172_v49 }
 0x2af   : > { %9528 = vmatprep.subr.bf16.mxu1 %v13640_v17  ;;  %v13685_v17 = vcombine.low %v2148_v34, %v2156_v50  ;;  %v13703_v26 = vcombine.low %v2165_v43, %v2173_v45  ;;  %v2197_v34 = vld [vmem:[%s16540_s19 + $0x898] sm:$0xff] }
 0x2b0   : > { %9077 = vmatpush1.bf16.msra.mxu0 %v13637_v25  ;;  %v13704_v25 = vcombine.high %v2165_v43, %v2173_v45 }
 0x2b1   : > { %9529 = vmatpush1.bf16.msra.mxu1 %v13639_v39  ;;  %9078 = vmatprep.subr.bf16.mxu0 %v13654_v11  ;;  %v2188_v39 = vld [vmem:[%s16540_s19 + $0x850] sm:$0xff]  ;;  %v2181_v11 = vld [vmem:[%s16540_s19 + $0x818] sm:$0xff] }
 0x2b2   : > { %9530 = vmatprep.subr.bf16.mxu1 %v13656_v14  ;;  %v2189_v14 = vld [vmem:[%s16540_s19 + $0x858] sm:$0xff]  ;;  %v13718_v27 = vcombine.high %v2180_v53, %v2188_v39 }
 0x2b3   : > { %8582 = vmatmul.mubr.bf16.gmra.mrb[88].mxu0 %v17708_v42  ;;  %v13720_v5 = vcombine.high %v2181_v11, %v2189_v14  ;;  %v13719_v50 = vcombine.low %v2181_v11, %v2189_v14  ;;  %v2244_v11 = vld [vmem:[%s16540_s19 + $0xa10] sm:$0xff] }
 0x2b4   : > { %9034 = vmatmul.mubr.bf16.gmra.mrb[88].mxu1 %v17708_v42  ;;  %9079 = vmatpush1.bf16.msra.mxu0 %v13653_v18  ;;  %v2196_v18 = vld [vmem:[%s16540_s19 + $0x890] sm:$0xff] }
 0x2b5   : > { %9531 = vmatpush1.bf16.msra.mxu1 %v13655_v35  ;;  %8591 = vmatprep.mubr.bf16.mxu0 %v17732_v3  ;;  %v2204_v35 = vld [vmem:[%s16540_s19 + $0x8d0] sm:$0xff] }
 0x2b6   : > { %9043 = vmatprep.mubr.bf16.mxu1 %v17732_v3  ;;  %9080 = vmatprep.subr.bf16.mxu0 %v13670_v44  ;;  %v2205_v44 = vld [vmem:[%s16540_s19 + $0x8d8] sm:$0xff]  ;;  %v13734_v46 = vcombine.high %v2196_v18, %v2204_v35  ;;  %v13733_v47 = vcombine.low %v2196_v18, %v2204_v35  ;;  %v20638_v18 = vld [vmem:[#allocation24_spill] sm:$0xff] }
 0x2b7   : > { %9532 = vmatprep.subr.bf16.mxu1 %v13672_v2  ;;  %v13717_v2 = vcombine.low %v2180_v53, %v2188_v39  ;;  %v13735_v49 = vcombine.low %v2197_v34, %v2205_v44  ;;  %v2229_v53 = vld [vmem:[%s16540_s19 + $0x998] sm:$0xff] }
 0x2b8   : > { %9081 = vmatpush1.bf16.msra.mxu0 %v13669_v63  ;;  %v13736_v63 = vcombine.high %v2197_v34, %v2205_v44  ;;  %v20639_v44 = vld [vmem:[#allocation28_spill] sm:$0xff] }
 0x2b9   : > { %9533 = vmatpush1.bf16.msra.mxu1 %v13671_v10  ;;  %9082 = vmatprep.subr.bf16.mxu0 %v13686_v61  ;;  %v2220_v10 = vld [vmem:[%s16540_s19 + $0x950] sm:$0xff]  ;;  %v2213_v61 = vld [vmem:[%s16540_s19 + $0x918] sm:$0xff] }
 0x2ba   : > { %9534 = vmatprep.subr.bf16.mxu1 %v13688_v55  ;;  %v2221_v55 = vld [vmem:[%s16540_s19 + $0x958] sm:$0xff]  ;;  %v13750_v43 = vcombine.high %v2212_v21, %v2220_v10 }
 0x2bb   : > { %8592 = vmatmul.mubr.bf16.gmra.mrb[92].mxu0 %v17728_v33  ;;  %v13752_v45 = vcombine.high %v2213_v61, %v2221_v55  ;;  %v13751_v39 = vcombine.low %v2213_v61, %v2221_v55 }
 0x2bc   : > { %9044 = vmatmul.mubr.bf16.gmra.mrb[92].mxu1 %v17728_v33  ;;  %9083 = vmatpush1.bf16.msra.mxu0 %v13685_v17  ;;  %v2228_v17 = vld [vmem:[%s16540_s19 + $0x990] sm:$0xff] }
 0x2bd   : > { %9535 = vmatpush1.bf16.msra.mxu1 %v13687_v51  ;;  %9086 = vmatprep.mubr.bf16.mxu0 %v16786_v31  ;;  %v2236_v51 = vld [vmem:[%s16540_s19 + $0x9d0] sm:$0xff] }
 0x2be   : > { %9538 = vmatprep.mubr.bf16.mxu1 %v16786_v31  ;;  %9084 = vmatprep.subr.bf16.mxu0 %v13702_v4  ;;  %v2237_v4 = vld [vmem:[%s16540_s19 + $0x9d8] sm:$0xff]  ;;  %v13766_v14 = vcombine.high %v2228_v17, %v2236_v51  ;;  %v13765_v35 = vcombine.low %v2228_v17, %v2236_v51 }
 0x2bf   : > { %9536 = vmatprep.subr.bf16.mxu1 %v13704_v25  ;;  %v13749_v25 = vcombine.low %v2212_v21, %v2220_v10  ;;  %v13767_v34 = vcombine.low %v2229_v53, %v2237_v4  ;;  %v2260_v21 = vld [vmem:[%s16540_s19 + $0xa90] sm:$0xff]  ;;  %v2269_v10 = vld [vmem:[%s16540_s19 + $0xad8] sm:$0xff] }
 0x2c0   : > { %9085 = vmatpush1.bf16.msra.mxu0 %v13701_v0  ;;  %v13768_v0 = vcombine.high %v2229_v53, %v2237_v4  ;;  %v2277_v17 = vld [vmem:[%s16540_s19 + $0xb18] sm:$0xff] }
 0x2c1   : > { %9537 = vmatpush1.bf16.msra.mxu1 %v13703_v26  ;;  %9167 = vmatprep.subr.bf16.mxu0 %v13718_v27  ;;  %v2252_v26 = vld [vmem:[%s16540_s19 + $0xa50] sm:$0xff]  ;;  %v2245_v27 = vld [vmem:[%s16540_s19 + $0xa18] sm:$0xff] }
 0x2c2   : > { %9619 = vmatprep.subr.bf16.mxu1 %v13720_v5  ;;  %v2253_v5 = vld [vmem:[%s16540_s19 + $0xa58] sm:$0xff]  ;;  %v13781_v61 = vcombine.low %v2244_v11, %v2252_v26 }
 0x2c3   : > { %9087 = vmatmul.mubr.bf16.vlgmr.msra.gmra.mrb[96].mxu0 %v16784_v29  ;;  %v13783_v55 = vcombine.low %v2245_v27, %v2253_v5  ;;  %v2285_v51 = vld [vmem:[%s16540_s19 + $0xb58] sm:$0xff] }
 0x2c4   : > { %9539 = vmatmul.mubr.bf16.vlgmr.msra.gmra.mrb[96].mxu1 %v16784_v29  ;;  %9168 = vmatpush1.bf16.msra.mxu0 %v13717_v2  ;;  %v13782_v2 = vcombine.high %v2244_v11, %v2252_v26  ;;  %v20640_v53 = vld [vmem:[#allocation27_spill] sm:$0xff]  ;;  %v2300_v26 = vld [vmem:[%s16540_s19 + $0xbd0] sm:$0xff] }
 0x2c5   : > { %9620 = vmatpush1.bf16.msra.mxu1 %v13719_v50  ;;  %9096 = vmatprep.mubr.bf16.mxu0 %v16844_v12  ;;  %v13784_v50 = vcombine.high %v2245_v27, %v2253_v5  ;;  %v2293_v27 = vld [vmem:[%s16540_s19 + $0xb98] sm:$0xff] }
 0x2c6   : > { %9548 = vmatprep.mubr.bf16.mxu1 %v16844_v12  ;;  %9169 = vmatprep.subr.bf16.mxu0 %v13734_v46  ;;  %v2268_v46 = vld [vmem:[%s16540_s19 + $0xad0] sm:$0xff]  ;;  %v2301_v5 = vld [vmem:[%s16540_s19 + $0xbd8] sm:$0xff] }
 0x2c7   : > { %9621 = vmatprep.subr.bf16.mxu1 %v13736_v63  ;;  %v2261_v63 = vld [vmem:[%s16540_s19 + $0xa98] sm:$0xff]  ;;  %v13797_v4 = vcombine.low %v2260_v21, %v2268_v46 }
 0x2c8   : > { %9170 = vmatpush1.bf16.msra.mxu0 %v13733_v47  ;;  %v2276_v47 = vld [vmem:[%s16540_s19 + $0xb10] sm:$0xff] }
 0x2c9   : > { %9622 = vmatpush1.bf16.msra.mxu1 %v13735_v49  ;;  %9171 = vmatprep.subr.bf16.mxu0 %v13750_v43  ;;  %v13798_v49 = vcombine.high %v2260_v21, %v2268_v46  ;;  %v13800_v43 = vcombine.high %v2261_v63, %v2269_v10  ;;  %v13832_v21 = vcombine.high %v2293_v27, %v2301_v5  ;;  %v2316_v46 = vld [vmem:[%s16540_s19 + $0xc50] sm:$0xff] }
 0x2ca   : > { %9623 = vmatprep.subr.bf16.mxu1 %v13752_v45  ;;  %v2284_v45 = vld [vmem:[%s16540_s19 + $0xb50] sm:$0xff] }
 0x2cb   : > { %9097 = vmatmul.mubr.bf16.gmra.mrb[100].mxu0 %v20638_v18  ;;  %v13814_v11 = vcombine.high %v2276_v47, %v2284_v45 }
 0x2cc   : > { %9549 = vmatmul.mubr.bf16.gmra.mrb[100].mxu1 %v20638_v18  ;;  %9172 = vmatpush1.bf16.msra.mxu0 %v13749_v25  ;;  %v13799_v25 = vcombine.low %v2261_v63, %v2269_v10  ;;  %v2309_v63 = vld [vmem:[%s16540_s19 + $0xc18] sm:$0xff] }
 0x2cd   : > { %9624 = vmatpush1.bf16.msra.mxu1 %v13751_v39  ;;  %9106 = vmatprep.mubr.bf16.mxu0 %v20639_v44  ;;  %v20641_v39 = vld [vmem:[#allocation32_spill] sm:$0xff]  ;;  %v2317_v10 = vld [vmem:[%s16540_s19 + $0xc58] sm:$0xff] }
 0x2ce   : > { %9558 = vmatprep.mubr.bf16.mxu1 %v20639_v44  ;;  %9173 = vmatprep.subr.bf16.mxu0 %v13766_v14  ;;  %v13816_v14 = vcombine.high %v2277_v17, %v2285_v51 }
 0x2cf   : > { %9625 = vmatprep.subr.bf16.mxu1 %v13768_v0  ;;  %v2292_v0 = vld [vmem:[%s16540_s19 + $0xb90] sm:$0xff] }
 0x2d0   : > { %9174 = vmatpush1.bf16.msra.mxu0 %v13765_v35  ;;  %v13813_v35 = vcombine.low %v2276_v47, %v2284_v45  ;;  %v13831_v47 = vcombine.low %v2293_v27, %v2301_v5  ;;  %v13848_v45 = vcombine.high %v2309_v63, %v2317_v10  ;;  %v2348_v5 = vld [vmem:[%s16540_s19 + $0xd50] sm:$0xff] }
 0x2d1   : > { %9626 = vmatpush1.bf16.msra.mxu1 %v13767_v34  ;;  %9175 = vmatprep.subr.bf16.mxu0 %v13782_v2  ;;  %v13815_v34 = vcombine.low %v2277_v17, %v2285_v51  ;;  %v2308_v2 = vld [vmem:[%s16540_s19 + $0xc10] sm:$0xff] }
 0x2d2   : > { %9627 = vmatprep.subr.bf16.mxu1 %v13784_v50  ;;  %v13830_v50 = vcombine.high %v2292_v0, %v2300_v26  ;;  %v2324_v17 = vld [vmem:[%s16540_s19 + $0xc90] sm:$0xff] }
 0x2d3   : > { %9107 = vmatmul.mubr.bf16.gmra.mrb[104].mxu0 %v20640_v53  ;;  %v2332_v51 = vld [vmem:[%s16540_s19 + $0xcd0] sm:$0xff] }
 0x2d4   : > { %9559 = vmatmul.mubr.bf16.gmra.mrb[104].mxu1 %v20640_v53  ;;  %9176 = vmatpush1.bf16.msra.mxu0 %v13781_v61  ;;  %v20642_v61 = vld [vmem:[#allocation31_spill] sm:$0xff] }
 0x2d5   : > { %9628 = vmatpush1.bf16.msra.mxu1 %v13783_v55  ;;  %9116 = vmatprep.mubr.bf16.mxu0 %v20641_v39  ;;  %v13829_v55 = vcombine.low %v2292_v0, %v2300_v26  ;;  %v2340_v0 = vld [vmem:[%s16540_s19 + $0xd10] sm:$0xff]  ;;  %v13862_v26 = vcombine.high %v2324_v17, %v2332_v51 }
 0x2d6   : > { %9568 = vmatprep.mubr.bf16.mxu1 %v20641_v39  ;;  %9177 = vmatprep.subr.bf16.mxu0 %v13798_v49  ;;  %v20643_v49 = vld [vmem:[#allocation36_spill] sm:$0xff] }
 0x2d7   : > { %9629 = vmatprep.subr.bf16.mxu1 %v13800_v43  ;;  %v13846_v43 = vcombine.high %v2308_v2, %v2316_v46 }
 0x2d8   : > { %9178 = vmatpush1.bf16.msra.mxu0 %v13797_v4  ;;  %v2325_v4 = vld [vmem:[%s16540_s19 + $0xc98] sm:$0xff] }
 0x2d9   : > { %9630 = vmatpush1.bf16.msra.mxu1 %v13799_v25  ;;  %9179 = vmatprep.subr.bf16.mxu0 %v13814_v11  ;;  %v2333_v25 = vld [vmem:[%s16540_s19 + $0xcd8] sm:$0xff]  ;;  %v13845_v11 = vcombine.low %v2308_v2, %v2316_v46  ;;  %v13861_v2 = vcombine.low %v2324_v17, %v2332_v51  ;;  %v20645_v46 = vld [vmem:[#allocation40_spill] sm:$0xff]  ;;  %v13877_v17 = vcombine.low %v2340_v0, %v2348_v5 }
 0x2da   : > { %9631 = vmatprep.subr.bf16.mxu1 %v13816_v14  ;;  %v13847_v14 = vcombine.low %v2309_v63, %v2317_v10  ;;  %v13864_v27 = vcombine.high %v2325_v4, %v2333_v25  ;;  %v13878_v63 = vcombine.high %v2340_v0, %v2348_v5 }
 0x2db   : > { %9117 = vmatmul.mubr.bf16.gmra.mrb[108].mxu0 %v20642_v61 }
 0x2dc   : > { %9569 = vmatmul.mubr.bf16.gmra.mrb[108].mxu1 %v20642_v61  ;;  %9180 = vmatpush1.bf16.msra.mxu0 %v13813_v35  ;;  %v2341_v35 = vld [vmem:[%s16540_s19 + $0xd18] sm:$0xff]  ;;  %v18208_v61 = vld [vmem:[%s16540_s19 + $0x1c50] sm:$0xff] }
 0x2dd   : > { %9632 = vmatpush1.bf16.msra.mxu1 %v13815_v34  ;;  %9126 = vmatprep.mubr.bf16.mxu0 %v20643_v49  ;;  %v2349_v34 = vld [vmem:[%s16540_s19 + $0xd58] sm:$0xff] }
 0x2de   : > { %9578 = vmatprep.mubr.bf16.mxu1 %v20643_v49  ;;  %9181 = vmatprep.subr.bf16.mxu0 %v13830_v50  ;;  %v20644_v50 = vld [vmem:[#allocation35_spill] sm:$0xff]  ;;  %v13880_v10 = vcombine.high %v2341_v35, %v2349_v34  ;;  %v13879_v51 = vcombine.low %v2341_v35, %v2349_v34  ;;  %v20647_v35 = vld [vmem:[#allocation44_spill] sm:$0xff] }
 0x2df   : > { %9633 = vmatprep.subr.bf16.mxu1 %v13832_v21  ;;  %v13863_v21 = vcombine.low %v2325_v4, %v2333_v25  ;;  %v2372_v4 = vld [vmem:[%s16540_s19 + $0xe10] sm:$0xff] }
 0x2e0   : > { %9182 = vmatpush1.bf16.msra.mxu0 %v13829_v55  ;;  %v2356_v55 = vld [vmem:[%s16540_s19 + $0xd90] sm:$0xff] }
 0x2e1   : > { %9634 = vmatpush1.bf16.msra.mxu1 %v13831_v47  ;;  %9183 = vmatprep.subr.bf16.mxu0 %v13846_v43  ;;  %v2364_v47 = vld [vmem:[%s16540_s19 + $0xdd0] sm:$0xff]  ;;  %v2357_v43 = vld [vmem:[%s16540_s19 + $0xd98] sm:$0xff] }
 0x2e2   : > { %9635 = vmatprep.subr.bf16.mxu1 %v13848_v45  ;;  %v2365_v45 = vld [vmem:[%s16540_s19 + $0xdd8] sm:$0xff]  ;;  %v13894_v25 = vcombine.high %v2356_v55, %v2364_v47  ;;  %v13893_v0 = vcombine.low %v2356_v55, %v2364_v47 }
 0x2e3   : > { %9127 = vmatmul.mubr.bf16.gmra.mrb[112].mxu0 %v20644_v50  ;;  %v13895_v5 = vcombine.low %v2357_v43, %v2365_v45 }
 0x2e4   : > { %9579 = vmatmul.mubr.bf16.gmra.mrb[112].mxu1 %v20644_v50  ;;  %9184 = vmatpush1.bf16.msra.mxu0 %v13845_v11  ;;  %v13896_v11 = vcombine.high %v2357_v43, %v2365_v45  ;;  %v2404_v43 = vld [vmem:[%s16540_s19 + $0xf10] sm:$0xff] }
 0x2e5   : > { %9636 = vmatpush1.bf16.msra.mxu1 %v13847_v14  ;;  %9136 = vmatprep.mubr.bf16.mxu0 %v20645_v46  ;;  %v2380_v14 = vld [vmem:[%s16540_s19 + $0xe50] sm:$0xff] }
 0x2e6   : > { %9588 = vmatprep.mubr.bf16.mxu1 %v20645_v46  ;;  %9185 = vmatprep.subr.bf16.mxu0 %v13862_v26  ;;  %v2373_v26 = vld [vmem:[%s16540_s19 + $0xe18] sm:$0xff]  ;;  %v13910_v34 = vcombine.high %v2372_v4, %v2380_v14  ;;  %v13909_v55 = vcombine.low %v2372_v4, %v2380_v14 }
 0x2e7   : > { %9637 = vmatprep.subr.bf16.mxu1 %v13864_v27  ;;  %v2381_v27 = vld [vmem:[%s16540_s19 + $0xe58] sm:$0xff] }
 0x2e8   : > { %9186 = vmatpush1.bf16.msra.mxu0 %v13861_v2  ;;  %v20646_v46 = vld [vmem:[#allocation39_spill] sm:$0xff]  ;;  %v13912_v2 = vcombine.high %v2373_v26, %v2381_v27  ;;  %v13911_v47 = vcombine.low %v2373_v26, %v2381_v27  ;;  %v20649_v26 = vld [vmem:[#allocation50_spill] sm:$0xff] }
 0x2e9   : > { %9638 = vmatpush1.bf16.msra.mxu1 %v13863_v21  ;;  %9187 = vmatprep.subr.bf16.mxu0 %v13878_v63  ;;  %v2388_v21 = vld [vmem:[%s16540_s19 + $0xe90] sm:$0xff] }
 0x2ea   : > { %9639 = vmatprep.subr.bf16.mxu1 %v13880_v10  ;;  %v2396_v63 = vld [vmem:[%s16540_s19 + $0xed0] sm:$0xff]  ;;  %v2389_v10 = vld [vmem:[%s16540_s19 + $0xe98] sm:$0xff] }
 0x2eb   : > { %9137 = vmatmul.mubr.bf16.gmra.mrb[116].mxu0 %v20646_v46  ;;  %v13926_v45 = vcombine.high %v2388_v21, %v2396_v63  ;;  %v13925_v4 = vcombine.low %v2388_v21, %v2396_v63  ;;  %v2436_v63 = vld [vmem:[%s16540_s19 + $0x1010] sm:$0xff] }
 0x2ec   : > { %9589 = vmatmul.mubr.bf16.gmra.mrb[116].mxu1 %v20646_v46  ;;  %9188 = vmatpush1.bf16.msra.mxu0 %v13877_v17  ;;  %v2397_v46 = vld [vmem:[%s16540_s19 + $0xed8] sm:$0xff] }
 0x2ed   : > { %9640 = vmatpush1.bf16.msra.mxu1 %v13879_v51  ;;  %9146 = vmatprep.mubr.bf16.mxu0 %v20647_v35  ;;  %v13928_v17 = vcombine.high %v2389_v10, %v2397_v46  ;;  %v2412_v51 = vld [vmem:[%s16540_s19 + $0xf50] sm:$0xff]  ;;  %v13927_v14 = vcombine.low %v2389_v10, %v2397_v46 }
 0x2ee   : > { %9598 = vmatprep.mubr.bf16.mxu1 %v20647_v35  ;;  %9189 = vmatprep.subr.bf16.mxu0 %v13894_v25  ;;  %v2405_v25 = vld [vmem:[%s16540_s19 + $0xf18] sm:$0xff]  ;;  %v13942_v27 = vcombine.high %v2404_v43, %v2412_v51  ;;  %v13941_v21 = vcombine.low %v2404_v43, %v2412_v51 }
 0x2ef   : > { %9641 = vmatprep.subr.bf16.mxu1 %v13896_v11  ;;  %v2413_v11 = vld [vmem:[%s16540_s19 + $0xf58] sm:$0xff] }
 0x2f0   : > { %9190 = vmatpush1.bf16.msra.mxu0 %v13893_v0  ;;  %v20648_v35 = vld [vmem:[#allocation43_spill] sm:$0xff]  ;;  %v13944_v0 = vcombine.high %v2405_v25, %v2413_v11  ;;  %v13943_v46 = vcombine.low %v2405_v25, %v2413_v11  ;;  %v20651_v25 = vld [vmem:[#allocation26_spill] sm:$0xff] }
 0x2f1   : > { %9642 = vmatpush1.bf16.msra.mxu1 %v13895_v5  ;;  %9191 = vmatprep.subr.bf16.mxu0 %v13910_v34  ;;  %v2420_v5 = vld [vmem:[%s16540_s19 + $0xf90] sm:$0xff] }
 0x2f2   : > { %9643 = vmatprep.subr.bf16.mxu1 %v13912_v2  ;;  %v2428_v34 = vld [vmem:[%s16540_s19 + $0xfd0] sm:$0xff]  ;;  %v2421_v2 = vld [vmem:[%s16540_s19 + $0xf98] sm:$0xff] }
 0x2f3   : > { %9147 = vmatmul.mubr.bf16.gmra.mrb[120].mxu0 %v20648_v35  ;;  %v13958_v10 = vcombine.high %v2420_v5, %v2428_v34  ;;  %v13957_v43 = vcombine.low %v2420_v5, %v2428_v34  ;;  %v2468_v34 = vld [vmem:[%s16540_s19 + $0x1110] sm:$0xff] }
 0x2f4   : > { %9599 = vmatmul.mubr.bf16.gmra.mrb[120].mxu1 %v20648_v35  ;;  %9192 = vmatpush1.bf16.msra.mxu0 %v13909_v55  ;;  %v2429_v35 = vld [vmem:[%s16540_s19 + $0xfd8] sm:$0xff] }
 0x2f5   : > { %9644 = vmatpush1.bf16.msra.mxu1 %v13911_v47  ;;  %9156 = vmatprep.mubr.bf16.mxu0 %v20649_v26  ;;  %v13960_v55 = vcombine.high %v2421_v2, %v2429_v35  ;;  %v2444_v47 = vld [vmem:[%s16540_s19 + $0x1050] sm:$0xff]  ;;  %v13959_v51 = vcombine.low %v2421_v2, %v2429_v35 }
 0x2f6   : > { %9608 = vmatprep.mubr.bf16.mxu1 %v20649_v26  ;;  %9193 = vmatprep.subr.bf16.mxu0 %v13926_v45  ;;  %v2437_v45 = vld [vmem:[%s16540_s19 + $0x1018] sm:$0xff]  ;;  %v20650_v26 = vld [vmem:[#allocation49_spill] sm:$0xff]  ;;  %v13974_v11 = vcombine.high %v2436_v63, %v2444_v47  ;;  %v13973_v5 = vcombine.low %v2436_v63, %v2444_v47 }
 0x2f7   : > { %9645 = vmatprep.subr.bf16.mxu1 %v13928_v17  ;;  %v2445_v17 = vld [vmem:[%s16540_s19 + $0x1058] sm:$0xff] }
 0x2f8   : > { %9194 = vmatpush1.bf16.msra.mxu0 %v13925_v4  ;;  %v13976_v4 = vcombine.high %v2437_v45, %v2445_v17  ;;  %v13975_v35 = vcombine.low %v2437_v45, %v2445_v17  ;;  %v20653_v45 = vld [vmem:[#allocation30_spill] sm:$0xff] }
 0x2f9   : > { %9646 = vmatpush1.bf16.msra.mxu1 %v13927_v14  ;;  %9195 = vmatprep.subr.bf16.mxu0 %v13942_v27  ;;  %v2452_v14 = vld [vmem:[%s16540_s19 + $0x1090] sm:$0xff] }
 0x2fa   : > { %9647 = vmatprep.subr.bf16.mxu1 %v13944_v0  ;;  %v2460_v27 = vld [vmem:[%s16540_s19 + $0x10d0] sm:$0xff]  ;;  %v2453_v0 = vld [vmem:[%s16540_s19 + $0x1098] sm:$0xff] }
 0x2fb   : > { %9157 = vmatmul.mubr.bf16.gmra.mrb[124].mxu0 %v20650_v26  ;;  %v13990_v2 = vcombine.high %v2452_v14, %v2460_v27  ;;  %v13989_v63 = vcombine.low %v2452_v14, %v2460_v27  ;;  %v2500_v27 = vld [vmem:[%s16540_s19 + $0x1210] sm:$0xff] }
 0x2fc   : > { %9609 = vmatmul.mubr.bf16.gmra.mrb[124].mxu1 %v20650_v26  ;;  %9196 = vmatpush1.bf16.msra.mxu0 %v13941_v21  ;;  %v2461_v26 = vld [vmem:[%s16540_s19 + $0x10d8] sm:$0xff] }
 0x2fd   : > { %9648 = vmatpush1.bf16.msra.mxu1 %v13943_v46  ;;  %9199 = vmatprep.mubr.bf16.mxu0 %v20651_v25  ;;  %v13992_v21 = vcombine.high %v2453_v0, %v2461_v26  ;;  %v2476_v46 = vld [vmem:[%s16540_s19 + $0x1150] sm:$0xff]  ;;  %v13991_v47 = vcombine.low %v2453_v0, %v2461_v26 }
 0x2fe   : > { %9651 = vmatprep.mubr.bf16.mxu1 %v20651_v25  ;;  %9197 = vmatprep.subr.bf16.mxu0 %v13958_v10  ;;  %v2469_v10 = vld [vmem:[%s16540_s19 + $0x1118] sm:$0xff]  ;;  %v20652_v25 = vld [vmem:[#allocation25_spill] sm:$0xff]  ;;  %v14006_v17 = vcombine.high %v2468_v34, %v2476_v46  ;;  %v14005_v14 = vcombine.low %v2468_v34, %v2476_v46 }
 0x2ff   : > { %9649 = vmatprep.subr.bf16.mxu1 %v13960_v55  ;;  %v2477_v55 = vld [vmem:[%s16540_s19 + $0x1158] sm:$0xff] }
 0x300   : > { %9198 = vmatpush1.bf16.msra.mxu0 %v13957_v43  ;;  %v14008_v43 = vcombine.high %v2469_v10, %v2477_v55  ;;  %v14007_v26 = vcombine.low %v2469_v10, %v2477_v55  ;;  %v20655_v10 = vld [vmem:[#allocation34_spill] sm:$0xff] }
 0x301   : > { %9650 = vmatpush1.bf16.msra.mxu1 %v13959_v51  ;;  %9280 = vmatprep.subr.bf16.mxu0 %v13974_v11  ;;  %v2484_v51 = vld [vmem:[%s16540_s19 + $0x1190] sm:$0xff] }
 0x302   : > { %9732 = vmatprep.subr.bf16.mxu1 %v13976_v4  ;;  %v2492_v11 = vld [vmem:[%s16540_s19 + $0x11d0] sm:$0xff]  ;;  %v2485_v4 = vld [vmem:[%s16540_s19 + $0x1198] sm:$0xff] }
 0x303   : > { %9200 = vmatmul.mubr.bf16.vlgmr.msra.gmra.mrb[96].mxu0 %v20652_v25  ;;  %v14022_v0 = vcombine.high %v2484_v51, %v2492_v11  ;;  %v14021_v34 = vcombine.low %v2484_v51, %v2492_v11  ;;  %v2532_v11 = vld [vmem:[%s16540_s19 + $0x1310] sm:$0xff] }
 0x304   : > { %9652 = vmatmul.mubr.bf16.vlgmr.msra.gmra.mrb[96].mxu1 %v20652_v25  ;;  %9281 = vmatpush1.bf16.msra.mxu0 %v13973_v5  ;;  %v2493_v25 = vld [vmem:[%s16540_s19 + $0x11d8] sm:$0xff] }
 0x305   : > { %9733 = vmatpush1.bf16.msra.mxu1 %v13975_v35  ;;  %9209 = vmatprep.mubr.bf16.mxu0 %v20653_v45  ;;  %v14024_v5 = vcombine.high %v2485_v4, %v2493_v25  ;;  %v2508_v35 = vld [vmem:[%s16540_s19 + $0x1250] sm:$0xff]  ;;  %v14023_v46 = vcombine.low %v2485_v4, %v2493_v25 }
 0x306   : > { %9661 = vmatprep.mubr.bf16.mxu1 %v20653_v45  ;;  %9282 = vmatprep.subr.bf16.mxu0 %v13990_v2  ;;  %v2501_v2 = vld [vmem:[%s16540_s19 + $0x1218] sm:$0xff]  ;;  %v20654_v45 = vld [vmem:[#allocation29_spill] sm:$0xff]  ;;  %v14038_v55 = vcombine.high %v2500_v27, %v2508_v35  ;;  %v14037_v51 = vcombine.low %v2500_v27, %v2508_v35 }
 0x307   : > { %9734 = vmatprep.subr.bf16.mxu1 %v13992_v21  ;;  %v2509_v21 = vld [vmem:[%s16540_s19 + $0x1258] sm:$0xff] }
 0x308   : > { %9283 = vmatpush1.bf16.msra.mxu0 %v13989_v63  ;;  %v14040_v63 = vcombine.high %v2501_v2, %v2509_v21  ;;  %v14039_v25 = vcombine.low %v2501_v2, %v2509_v21  ;;  %v20657_v2 = vld [vmem:[#allocation38_spill] sm:$0xff] }
 0x309   : > { %9735 = vmatpush1.bf16.msra.mxu1 %v13991_v47  ;;  %9284 = vmatprep.subr.bf16.mxu0 %v14006_v17  ;;  %v2516_v47 = vld [vmem:[%s16540_s19 + $0x1290] sm:$0xff] }
 0x30a   : > { %9736 = vmatprep.subr.bf16.mxu1 %v14008_v43  ;;  %v2524_v17 = vld [vmem:[%s16540_s19 + $0x12d0] sm:$0xff]  ;;  %v2517_v43 = vld [vmem:[%s16540_s19 + $0x1298] sm:$0xff] }
 0x30b   : > { %9210 = vmatmul.mubr.bf16.gmra.mrb[100].mxu0 %v20654_v45  ;;  %v14054_v4 = vcombine.high %v2516_v47, %v2524_v17  ;;  %v14053_v27 = vcombine.low %v2516_v47, %v2524_v17  ;;  %v2564_v17 = vld [vmem:[%s16540_s19 + $0x1410] sm:$0xff] }
 0x30c   : > { %9662 = vmatmul.mubr.bf16.gmra.mrb[100].mxu1 %v20654_v45  ;;  %9285 = vmatpush1.bf16.msra.mxu0 %v14005_v14  ;;  %v2525_v45 = vld [vmem:[%s16540_s19 + $0x12d8] sm:$0xff] }
 0x30d   : > { %9737 = vmatpush1.bf16.msra.mxu1 %v14007_v26  ;;  %9219 = vmatprep.mubr.bf16.mxu0 %v20655_v10  ;;  %v14056_v14 = vcombine.high %v2517_v43, %v2525_v45  ;;  %v2540_v26 = vld [vmem:[%s16540_s19 + $0x1350] sm:$0xff]  ;;  %v14055_v35 = vcombine.low %v2517_v43, %v2525_v45 }
 0x30e   : > { %9671 = vmatprep.mubr.bf16.mxu1 %v20655_v10  ;;  %9286 = vmatprep.subr.bf16.mxu0 %v14022_v0  ;;  %v2533_v0 = vld [vmem:[%s16540_s19 + $0x1318] sm:$0xff]  ;;  %v20656_v10 = vld [vmem:[#allocation33_spill] sm:$0xff]  ;;  %v14070_v21 = vcombine.high %v2532_v11, %v2540_v26  ;;  %v14069_v47 = vcombine.low %v2532_v11, %v2540_v26 }
 0x30f   : > { %9738 = vmatprep.subr.bf16.mxu1 %v14024_v5  ;;  %v2541_v5 = vld [vmem:[%s16540_s19 + $0x1358] sm:$0xff] }
 0x310   : > { %9287 = vmatpush1.bf16.msra.mxu0 %v14021_v34  ;;  %v14072_v34 = vcombine.high %v2533_v0, %v2541_v5  ;;  %v14071_v45 = vcombine.low %v2533_v0, %v2541_v5  ;;  %v20659_v0 = vld [vmem:[#allocation42_spill] sm:$0xff] }
 0x311   : > { %9739 = vmatpush1.bf16.msra.mxu1 %v14023_v46  ;;  %9288 = vmatprep.subr.bf16.mxu0 %v14038_v55  ;;  %v2548_v46 = vld [vmem:[%s16540_s19 + $0x1390] sm:$0xff] }
 0x312   : > { %9740 = vmatprep.subr.bf16.mxu1 %v14040_v63  ;;  %v2556_v55 = vld [vmem:[%s16540_s19 + $0x13d0] sm:$0xff]  ;;  %v2549_v63 = vld [vmem:[%s16540_s19 + $0x1398] sm:$0xff] }
 0x313   : > { %9220 = vmatmul.mubr.bf16.gmra.mrb[104].mxu0 %v20656_v10  ;;  %v14086_v43 = vcombine.high %v2548_v46, %v2556_v55  ;;  %v14085_v11 = vcombine.low %v2548_v46, %v2556_v55  ;;  %v2596_v55 = vld [vmem:[%s16540_s19 + $0x1510] sm:$0xff] }
 0x314   : > { %9672 = vmatmul.mubr.bf16.gmra.mrb[104].mxu1 %v20656_v10  ;;  %9289 = vmatpush1.bf16.msra.mxu0 %v14037_v51  ;;  %v2557_v10 = vld [vmem:[%s16540_s19 + $0x13d8] sm:$0xff] }
 0x315   : > { %9741 = vmatpush1.bf16.msra.mxu1 %v14039_v25  ;;  %9229 = vmatprep.mubr.bf16.mxu0 %v20657_v2  ;;  %v14088_v51 = vcombine.high %v2549_v63, %v2557_v10  ;;  %v2572_v25 = vld [vmem:[%s16540_s19 + $0x1450] sm:$0xff]  ;;  %v14087_v26 = vcombine.low %v2549_v63, %v2557_v10 }
 0x316   : > { %9681 = vmatprep.mubr.bf16.mxu1 %v20657_v2  ;;  %9290 = vmatprep.subr.bf16.mxu0 %v14054_v4  ;;  %v2565_v4 = vld [vmem:[%s16540_s19 + $0x1418] sm:$0xff]  ;;  %v20658_v2 = vld [vmem:[#allocation37_spill] sm:$0xff]  ;;  %v14102_v5 = vcombine.high %v2564_v17, %v2572_v25  ;;  %v14101_v46 = vcombine.low %v2564_v17, %v2572_v25 }
 0x317   : > { %9742 = vmatprep.subr.bf16.mxu1 %v14056_v14  ;;  %v2573_v14 = vld [vmem:[%s16540_s19 + $0x1458] sm:$0xff] }
 0x318   : > { %9291 = vmatpush1.bf16.msra.mxu0 %v14053_v27  ;;  %v14104_v27 = vcombine.high %v2565_v4, %v2573_v14  ;;  %v14103_v10 = vcombine.low %v2565_v4, %v2573_v14  ;;  %v20661_v4 = vld [vmem:[#allocation47_spill] sm:$0xff] }
 0x319   : > { %9743 = vmatpush1.bf16.msra.mxu1 %v14055_v35  ;;  %9292 = vmatprep.subr.bf16.mxu0 %v14070_v21  ;;  %v2580_v35 = vld [vmem:[%s16540_s19 + $0x1490] sm:$0xff] }
 0x31a   : > { %9744 = vmatprep.subr.bf16.mxu1 %v14072_v34  ;;  %v2588_v21 = vld [vmem:[%s16540_s19 + $0x14d0] sm:$0xff]  ;;  %v2581_v34 = vld [vmem:[%s16540_s19 + $0x1498] sm:$0xff] }
 0x31b   : > { %9230 = vmatmul.mubr.bf16.gmra.mrb[108].mxu0 %v20658_v2  ;;  %v14118_v63 = vcombine.high %v2580_v35, %v2588_v21  ;;  %v14117_v17 = vcombine.low %v2580_v35, %v2588_v21  ;;  %v2628_v21 = vld [vmem:[%s16540_s19 + $0x1610] sm:$0xff] }
 0x31c   : > { %9682 = vmatmul.mubr.bf16.gmra.mrb[108].mxu1 %v20658_v2  ;;  %9293 = vmatpush1.bf16.msra.mxu0 %v14069_v47  ;;  %v2589_v2 = vld [vmem:[%s16540_s19 + $0x14d8] sm:$0xff] }
 0x31d   : > { %9745 = vmatpush1.bf16.msra.mxu1 %v14071_v45  ;;  %9239 = vmatprep.mubr.bf16.mxu0 %v20659_v0  ;;  %v14120_v47 = vcombine.high %v2581_v34, %v2589_v2  ;;  %v2604_v45 = vld [vmem:[%s16540_s19 + $0x1550] sm:$0xff]  ;;  %v14119_v25 = vcombine.low %v2581_v34, %v2589_v2 }
 0x31e   : > { %9691 = vmatprep.mubr.bf16.mxu1 %v20659_v0  ;;  %9294 = vmatprep.subr.bf16.mxu0 %v14086_v43  ;;  %v2597_v43 = vld [vmem:[%s16540_s19 + $0x1518] sm:$0xff]  ;;  %v20660_v0 = vld [vmem:[#allocation41_spill] sm:$0xff]  ;;  %v14134_v14 = vcombine.high %v2596_v55, %v2604_v45  ;;  %v14133_v35 = vcombine.low %v2596_v55, %v2604_v45 }
 0x31f   : > { %9746 = vmatprep.subr.bf16.mxu1 %v14088_v51  ;;  %v2605_v51 = vld [vmem:[%s16540_s19 + $0x1558] sm:$0xff] }
 0x320   : > { %9295 = vmatpush1.bf16.msra.mxu0 %v14085_v11  ;;  %v14136_v11 = vcombine.high %v2597_v43, %v2605_v51  ;;  %v14135_v2 = vcombine.low %v2597_v43, %v2605_v51  ;;  %v20663_v43 = vld [vmem:[#allocation52_spill] sm:$0xff] }
 0x321   : > { %9747 = vmatpush1.bf16.msra.mxu1 %v14087_v26  ;;  %9296 = vmatprep.subr.bf16.mxu0 %v14102_v5  ;;  %v2612_v26 = vld [vmem:[%s16540_s19 + $0x1590] sm:$0xff] }
 0x322   : > { %9748 = vmatprep.subr.bf16.mxu1 %v14104_v27  ;;  %v2620_v5 = vld [vmem:[%s16540_s19 + $0x15d0] sm:$0xff]  ;;  %v2613_v27 = vld [vmem:[%s16540_s19 + $0x1598] sm:$0xff] }
 0x323   : > { %9240 = vmatmul.mubr.bf16.gmra.mrb[112].mxu0 %v20660_v0  ;;  %v14150_v34 = vcombine.high %v2612_v26, %v2620_v5  ;;  %v14149_v55 = vcombine.low %v2612_v26, %v2620_v5  ;;  %v2660_v5 = vld [vmem:[%s16540_s19 + $0x1710] sm:$0xff] }
 0x324   : > { %9692 = vmatmul.mubr.bf16.gmra.mrb[112].mxu1 %v20660_v0  ;;  %9297 = vmatpush1.bf16.msra.mxu0 %v14101_v46  ;;  %v2621_v0 = vld [vmem:[%s16540_s19 + $0x15d8] sm:$0xff] }
 0x325   : > { %9749 = vmatpush1.bf16.msra.mxu1 %v14103_v10  ;;  %9249 = vmatprep.mubr.bf16.mxu0 %v20661_v4  ;;  %v14152_v46 = vcombine.high %v2613_v27, %v2621_v0  ;;  %v2636_v10 = vld [vmem:[%s16540_s19 + $0x1650] sm:$0xff]  ;;  %v14151_v45 = vcombine.low %v2613_v27, %v2621_v0 }
 0x326   : > { %9701 = vmatprep.mubr.bf16.mxu1 %v20661_v4  ;;  %9298 = vmatprep.subr.bf16.mxu0 %v14118_v63  ;;  %v2629_v63 = vld [vmem:[%s16540_s19 + $0x1618] sm:$0xff]  ;;  %v20662_v4 = vld [vmem:[#allocation46_spill] sm:$0xff]  ;;  %v14166_v51 = vcombine.high %v2628_v21, %v2636_v10  ;;  %v14165_v26 = vcombine.low %v2628_v21, %v2636_v10 }
 0x327   : > { %9750 = vmatprep.subr.bf16.mxu1 %v14120_v47  ;;  %v2637_v47 = vld [vmem:[%s16540_s19 + $0x1658] sm:$0xff] }
 0x328   : > { %9299 = vmatpush1.bf16.msra.mxu0 %v14117_v17  ;;  %v14168_v17 = vcombine.high %v2629_v63, %v2637_v47  ;;  %v14167_v0 = vcombine.low %v2629_v63, %v2637_v47  ;;  %v20665_v63 = vld [vmem:[#allocation58_spill] sm:$0xff] }
 0x329   : > { %9751 = vmatpush1.bf16.msra.mxu1 %v14119_v25  ;;  %9300 = vmatprep.subr.bf16.mxu0 %v14134_v14  ;;  %v2644_v25 = vld [vmem:[%s16540_s19 + $0x1690] sm:$0xff] }
 0x32a   : > { %9752 = vmatprep.subr.bf16.mxu1 %v14136_v11  ;;  %v2652_v14 = vld [vmem:[%s16540_s19 + $0x16d0] sm:$0xff]  ;;  %v2645_v11 = vld [vmem:[%s16540_s19 + $0x1698] sm:$0xff] }
 0x32b   : > { %9250 = vmatmul.mubr.bf16.gmra.mrb[116].mxu0 %v20662_v4  ;;  %v14182_v27 = vcombine.high %v2644_v25, %v2652_v14  ;;  %v14181_v21 = vcombine.low %v2644_v25, %v2652_v14  ;;  %v2692_v14 = vld [vmem:[%s16540_s19 + $0x1810] sm:$0xff] }
 0x32c   : > { %9702 = vmatmul.mubr.bf16.gmra.mrb[116].mxu1 %v20662_v4  ;;  %9301 = vmatpush1.bf16.msra.mxu0 %v14133_v35  ;;  %v2653_v4 = vld [vmem:[%s16540_s19 + $0x16d8] sm:$0xff] }
 0x32d   : > { %9753 = vmatpush1.bf16.msra.mxu1 %v14135_v2  ;;  %9259 = vmatprep.mubr.bf16.mxu0 %v20663_v43  ;;  %v14184_v35 = vcombine.high %v2645_v11, %v2653_v4  ;;  %v2668_v2 = vld [vmem:[%s16540_s19 + $0x1750] sm:$0xff]  ;;  %v14183_v10 = vcombine.low %v2645_v11, %v2653_v4 }
 0x32e   : > { %9711 = vmatprep.mubr.bf16.mxu1 %v20663_v43  ;;  %9302 = vmatprep.subr.bf16.mxu0 %v14150_v34  ;;  %v2661_v34 = vld [vmem:[%s16540_s19 + $0x1718] sm:$0xff]  ;;  %v14198_v47 = vcombine.high %v2660_v5, %v2668_v2  ;;  %v14197_v25 = vcombine.low %v2660_v5, %v2668_v2 }
 0x32f   : > { %9754 = vmatprep.subr.bf16.mxu1 %v14152_v46  ;;  %v2669_v46 = vld [vmem:[%s16540_s19 + $0x1758] sm:$0xff] }
 0x330   : > { %9303 = vmatpush1.bf16.msra.mxu0 %v14149_v55  ;;  %v20664_v43 = vld [vmem:[#allocation51_spill] sm:$0xff]  ;;  %v14200_v55 = vcombine.high %v2661_v34, %v2669_v46  ;;  %v14199_v4 = vcombine.low %v2661_v34, %v2669_v46 }
 0x331   : > { %9755 = vmatpush1.bf16.msra.mxu1 %v14151_v45  ;;  %9304 = vmatprep.subr.bf16.mxu0 %v14166_v51  ;;  %v2676_v45 = vld [vmem:[%s16540_s19 + $0x1790] sm:$0xff] }
 0x332   : > { %9756 = vmatprep.subr.bf16.mxu1 %v14168_v17  ;;  %v2684_v51 = vld [vmem:[%s16540_s19 + $0x17d0] sm:$0xff]  ;;  %v2677_v17 = vld [vmem:[%s16540_s19 + $0x1798] sm:$0xff] }
 0x333   : > { %9260 = vmatmul.mubr.bf16.gmra.mrb[120].mxu0 %v20664_v43  ;;  %v14214_v11 = vcombine.high %v2676_v45, %v2684_v51  ;;  %v14213_v5 = vcombine.low %v2676_v45, %v2684_v51  ;;  %v2724_v51 = vld [vmem:[%s16540_s19 + $0x1910] sm:$0xff] }
 0x334   : > { %9712 = vmatmul.mubr.bf16.gmra.mrb[120].mxu1 %v20664_v43  ;;  %9305 = vmatpush1.bf16.msra.mxu0 %v14165_v26  ;;  %v2685_v43 = vld [vmem:[%s16540_s19 + $0x17d8] sm:$0xff] }
 0x335   : > { %9757 = vmatpush1.bf16.msra.mxu1 %v14167_v0  ;;  %9269 = vmatprep.mubr.bf16.mxu0 %v20665_v63  ;;  %v14216_v26 = vcombine.high %v2677_v17, %v2685_v43  ;;  %v2700_v0 = vld [vmem:[%s16540_s19 + $0x1850] sm:$0xff]  ;;  %v14215_v2 = vcombine.low %v2677_v17, %v2685_v43 }
 0x336   : > { %9721 = vmatprep.mubr.bf16.mxu1 %v20665_v63  ;;  %9306 = vmatprep.subr.bf16.mxu0 %v14182_v27  ;;  %v2693_v27 = vld [vmem:[%s16540_s19 + $0x1818] sm:$0xff]  ;;  %v14230_v34 = vcombine.high %v2692_v14, %v2700_v0  ;;  %v14229_v45 = vcombine.low %v2692_v14, %v2700_v0 }
 0x337   : > { %9758 = vmatprep.subr.bf16.mxu1 %v14184_v35  ;;  %v2701_v35 = vld [vmem:[%s16540_s19 + $0x1858] sm:$0xff] }
 0x338   : > { %9307 = vmatpush1.bf16.msra.mxu0 %v14181_v21  ;;  %v14232_v46 = vcombine.high %v2693_v27, %v2701_v35  ;;  %v2708_v21 = vld [vmem:[%s16540_s19 + $0x1890] sm:$0xff]  ;;  %v14231_v43 = vcombine.low %v2693_v27, %v2701_v35 }
 0x339   : > { %9759 = vmatpush1.bf16.msra.mxu1 %v14183_v10  ;;  %9308 = vmatprep.subr.bf16.mxu0 %v14198_v47  ;;  %v2716_v10 = vld [vmem:[%s16540_s19 + $0x18d0] sm:$0xff]  ;;  %v2709_v47 = vld [vmem:[%s16540_s19 + $0x1898] sm:$0xff] }
 0x33a   : > { %9760 = vmatprep.subr.bf16.mxu1 %v14200_v55  ;;  %v2717_v55 = vld [vmem:[%s16540_s19 + $0x18d8] sm:$0xff]  ;;  %v14246_v17 = vcombine.high %v2708_v21, %v2716_v10  ;;  %v14245_v14 = vcombine.low %v2708_v21, %v2716_v10 }
 0x33b   : > { %9270 = vmatmul.mubr.bf16.gmra.mrb[124].mxu0 %v17318_v13  ;;  %v14247_v0 = vcombine.low %v2709_v47, %v2717_v55 }
 0x33c   : > { %9722 = vmatmul.mubr.bf16.gmra.mrb[124].mxu1 %v17318_v13  ;;  %9309 = vmatpush1.bf16.msra.mxu0 %v14197_v25  ;;  %v14248_v25 = vcombine.high %v2709_v47, %v2717_v55  ;;  %v2756_v47 = vld [vmem:[%s16540_s19 + $0x1a10] sm:$0xff] }
 0x33d   : > { %9761 = vmatpush1.bf16.msra.mxu1 %v14199_v4  ;;  %9312 = vmatprep.mubr.bf16.mxu0 %v17304_v30  ;;  %v2732_v4 = vld [vmem:[%s16540_s19 + $0x1950] sm:$0xff] }
 0x33e   : > { %9764 = vmatprep.mubr.bf16.mxu1 %v17304_v30  ;;  %9310 = vmatprep.subr.bf16.mxu0 %v14214_v11  ;;  %v2725_v11 = vld [vmem:[%s16540_s19 + $0x1918] sm:$0xff]  ;;  %v14262_v27 = vcombine.high %v2724_v51, %v2732_v4  ;;  %v14261_v21 = vcombine.low %v2724_v51, %v2732_v4 }
 0x33f   : > { %9762 = vmatprep.subr.bf16.mxu1 %v14216_v26  ;;  %v2733_v26 = vld [vmem:[%s16540_s19 + $0x1958] sm:$0xff] }
 0x340   : > { %9311 = vmatpush1.bf16.msra.mxu0 %v14213_v5  ;;  %v14264_v35 = vcombine.high %v2725_v11, %v2733_v26  ;;  %v2740_v5 = vld [vmem:[%s16540_s19 + $0x1990] sm:$0xff]  ;;  %v14263_v10 = vcombine.low %v2725_v11, %v2733_v26 }
 0x341   : > { %9763 = vmatpush1.bf16.msra.mxu1 %v14215_v2  ;;  %9393 = vmatprep.subr.bf16.mxu0 %v14230_v34  ;;  %v2748_v2 = vld [vmem:[%s16540_s19 + $0x19d0] sm:$0xff]  ;;  %v2741_v34 = vld [vmem:[%s16540_s19 + $0x1998] sm:$0xff] }
 0x342   : > { %9845 = vmatprep.subr.bf16.mxu1 %v14232_v46  ;;  %v2749_v46 = vld [vmem:[%s16540_s19 + $0x19d8] sm:$0xff]  ;;  %v14278_v55 = vcombine.high %v2740_v5, %v2748_v2  ;;  %v14277_v51 = vcombine.low %v2740_v5, %v2748_v2 }
 0x343   : > { %9313 = vmatmul.mubr.bf16.vlgmr.msra.gmra.mrb[96].mxu0 %v17290_v32  ;;  %v14279_v4 = vcombine.low %v2741_v34, %v2749_v46 }
 0x344   : > { %9765 = vmatmul.mubr.bf16.vlgmr.msra.gmra.mrb[96].mxu1 %v17290_v32  ;;  %9394 = vmatpush1.bf16.msra.mxu0 %v14229_v45  ;;  %v14280_v45 = vcombine.high %v2741_v34, %v2749_v46  ;;  %v2946_v34 = vld [vmem:[%s18138_s6] sm:$0xff] }
 0x345   : > { %9846 = vmatpush1.bf16.msra.mxu1 %v14231_v43  ;;  %9322 = vmatprep.mubr.bf16.mxu0 %v17368_v19  ;;  %v2764_v43 = vld [vmem:[%s16540_s19 + $0x1a50] sm:$0xff] }
 0x346   : > { %9774 = vmatprep.mubr.bf16.mxu1 %v17368_v19  ;;  %9395 = vmatprep.subr.bf16.mxu0 %v14246_v17  ;;  %v2757_v17 = vld [vmem:[%s16540_s19 + $0x1a18] sm:$0xff]  ;;  %v14294_v11 = vcombine.high %v2756_v47, %v2764_v43  ;;  %v14293_v5 = vcombine.low %v2756_v47, %v2764_v43  ;;  %v18142_v46 = vld [vmem:[%s16540_s19 + $0x1b10] sm:$0xff]  ;;  %v20666_v47 = vld [vmem:[#allocation20_spill] sm:$0xff] }
 0x347   : > { %9847 = vmatprep.subr.bf16.mxu1 %v14248_v25  ;;  %v2765_v25 = vld [vmem:[%s16540_s19 + $0x1a58] sm:$0xff]  ;;  %v18156_v43 = vrot.slane %v2946_v34, %v20666_v47  ;;  %v18168_v32 = vld [vmem:[%s16540_s19 + $0x1b90] sm:$0xff] }
 0x348   : > { %9396 = vmatpush1.bf16.msra.mxu0 %v14245_v14  ;;  %v14296_v26 = vcombine.high %v2757_v17, %v2765_v25  ;;  %v2772_v14 = vld [vmem:[%s16540_s19 + $0x1a90] sm:$0xff]  ;;  %v14295_v2 = vcombine.low %v2757_v17, %v2765_v25 }
 0x349   : > { %9848 = vmatpush1.bf16.msra.mxu1 %v14247_v0  ;;  %9397 = vmatprep.subr.bf16.mxu0 %v14262_v27  ;;  %v2780_v0 = vld [vmem:[%s16540_s19 + $0x1ad0] sm:$0xff]  ;;  %v2773_v27 = vld [vmem:[%s16540_s19 + $0x1a98] sm:$0xff] }
 0x34a   : > { %9849 = vmatprep.subr.bf16.mxu1 %v14264_v35  ;;  %v2781_v35 = vld [vmem:[%s16540_s19 + $0x1ad8] sm:$0xff]  ;;  %v20667_v17 = vld [vmem:[#allocation22_spill] sm:$0xff] }
 0x34b   : > { %9323 = vmatmul.mubr.bf16.gmra.mrb[100].mxu0 %v17356_v58  ;;  %v18159_v25 = vrot.slane %v2946_v34, %v20667_v17 }
 0x34c   : > { %9775 = vmatmul.mubr.bf16.gmra.mrb[100].mxu1 %v17356_v58  ;;  %9398 = vmatpush1.bf16.msra.mxu0 %v14261_v21  ;;  %v14310_v21 = vcombine.high %v2772_v14, %v2780_v0  ;;  %v20669_v58 = vld [vmem:[#allocation23_spill] sm:$0xff] }
 0x34d   : > { %9850 = vmatpush1.bf16.msra.mxu1 %v14263_v10  ;;  %9332 = vmatprep.mubr.bf16.mxu0 %v17428_v24  ;;  %v14312_v10 = vcombine.high %v2773_v27, %v2781_v35  ;;  %v18165_v19 = vrot.slane %v2946_v34, %v20669_v58 }
 0x34e   : > { %9784 = vmatprep.mubr.bf16.mxu1 %v17428_v24  ;;  %9399 = vmatprep.subr.bf16.mxu0 %v14278_v55  ;;  %v18145_v55 = vld [vmem:[%s16540_s19 + $0x1b50] sm:$0xff] }
 0x34f   : > { %9851 = vmatprep.subr.bf16.mxu1 %v14280_v45  ;;  %v18148_v45 = vld [vmem:[%s16540_s19 + $0x1b18] sm:$0xff] }
 0x350   : > { %9400 = vmatpush1.bf16.msra.mxu0 %v14277_v51  ;;  %v18151_v51 = vld [vmem:[%s16540_s19 + $0x1b58] sm:$0xff] }
 0x351   : > { %9852 = vmatpush1.bf16.msra.mxu1 %v14279_v4  ;;  %9401 = vmatprep.subr.bf16.mxu0 %v14294_v11  ;;  %v14309_v4 = vcombine.low %v2772_v14, %v2780_v0  ;;  %v14311_v11 = vcombine.low %v2773_v27, %v2781_v35  ;;  %v14326_v14 = vcombine.high %v18142_v46, %v18145_v55  ;;  %v18181_v27 = vld [vmem:[%s16540_s19 + $0x1b98] sm:$0xff] }
 0x352   : > { %9853 = vmatprep.subr.bf16.mxu1 %v14296_v26  ;;  %v20668_v26 = vld [vmem:[#allocation21_spill] sm:$0xff]  ;;  %v14328_v0 = vcombine.high %v18148_v45, %v18151_v51  ;;  %v18184_v35 = vld [vmem:[%s16540_s19 + $0x1bd8] sm:$0xff] }
 0x353   : > { %9333 = vmatmul.mubr.bf16.gmra.mrb[104].mxu0 %v17416_v60  ;;  %v18162_v24 = vrot.slane %v2946_v34, %v20668_v26  ;;  %v14325_v34 = vcombine.low %v18142_v46, %v18145_v55 }
 0x354   : > { %9785 = vmatmul.mubr.bf16.gmra.mrb[104].mxu1 %v17416_v60  ;;  %9402 = vmatpush1.bf16.msra.mxu0 %v14293_v5  ;;  %v18171_v60 = vld [vmem:[%s16540_s19 + $0x1bd0] sm:$0xff] }
 0x355   : > { %9854 = vmatpush1.bf16.msra.mxu1 %v14295_v2  ;;  %9342 = vmatprep.mubr.bf16.mxu0 %v17488_v48  ;;  %v14342_v30 = vcombine.high %v18168_v32, %v18171_v60 }
 0x356   : > { %9794 = vmatprep.mubr.bf16.mxu1 %v17488_v48  ;;  %v8523_v5 = vpop.f32.mrb[64].mxu0  ;;  %9403 = vmatprep.subr.bf16.mxu0 %v14310_v21  ;;  %v14327_v48 = vcombine.low %v18148_v45, %v18151_v51 }
 0x357   : > { %v8975_v2 = vpop.f32.mrb[64].mxu1  ;;  %9855 = vmatprep.subr.bf16.mxu1 %v14312_v10  ;;  %v14764_v58 = vadd.f32 %v8523_v5, %v18156_v43  ;;  %v8525_v17 = vpop.f32.mrb[65].mxu0  ;;  %v14344_v5 = vcombine.high %v18181_v27, %v18184_v35 }
 0x358   : > { %v14796_v26 = vadd.f32 %v8975_v2, %v18159_v25  ;;  %v8977_v47 = vpop.f32.mrb[65].mxu1  ;;  %v14765_v21 = vadd.f32 %v8525_v17, %v18162_v24  ;;  %9404 = vmatpush1.bf16.msra.mxu0 %v14309_v4  ;;  %v8527_v46 = vpop.f32.mrb[66].mxu0 }
 0x359   : > { %v14797_v10 = vadd.f32 %v8977_v47, %v18165_v19  ;;  %9856 = vmatpush1.bf16.msra.mxu1 %v14311_v11  ;;  %v8979_v55 = vpop.f32.mrb[66].mxu1  ;;  %v11766_v45 = vmax.f32 %v14764_v58, 0.0  ;;  %v14766_v2 = vadd.f32 %v8527_v46, %v18156_v43  ;;  %v8529_v63 = vpop.f32.mrb[67].mxu0  ;;  %9405 = vmatprep.subr.bf16.mxu0 %v14326_v14  ;;  %v18203_v47 = vld [vmem:[%s16540_s19 + $0x1c10] sm:$0xff]  ;;  %v18211_v58 = vld [vmem:[%s16540_s19 + $0x1c18] sm:$0xff]  ;;  %v14343_v14 = vcombine.low %v18181_v27, %v18184_v35 }
 0x35a   : > { %v11768_v51 = vmax.f32 %v14796_v26, 0.0  ;;  %v14798_v13 = vadd.f32 %v8979_v55, %v18159_v25  ;;  %v8981_v17 = vpop.f32.mrb[67].mxu1  ;;  %9857 = vmatprep.subr.bf16.mxu1 %v14328_v0  ;;  %v11767_v4 = vmax.f32 %v14765_v21, 0.0  ;;  %v14767_v50 = vadd.f32 %v8529_v63, %v18162_v24  ;;  %v18214_v26 = vld [vmem:[%s16540_s19 + $0x1c58] sm:$0xff] }
 0x35b   : > { %v11769_v11 = vmax.f32 %v14797_v10, 0.0  ;;  %v14799_v49 = vadd.f32 %v8981_v17, %v18165_v19  ;;  %v11782_v46 = vmax.f32 %v14766_v2, 0.0  ;;  %9343 = vmatmul.mubr.bf16.gmra.mrb[108].mxu0 %v17476_v54  ;;  %v14341_v63 = vcombine.low %v18168_v32, %v18171_v60  ;;  %v18226_v2 = vld [vmem:[%s16540_s19 + $0x1cd0] sm:$0xff]  ;;  %v18235_v27 = vld [vmem:[%s16540_s19 + $0x1c98] sm:$0xff] }
 0x35c   : > { %v11784_v55 = vmax.f32 %v14798_v13, 0.0  ;;  %9795 = vmatmul.mubr.bf16.gmra.mrb[108].mxu1 %v17476_v54  ;;  %v14632_v0 = vpack.c.bf16 %v11767_v4, %v11766_v45  ;;  %v11783_v10 = vmax.f32 %v14767_v50, 0.0  ;;  %9406 = vmatpush1.bf16.msra.mxu0 %v14325_v34  ;;  %v18223_v13 = vld [vmem:[%s16540_s19 + $0x1c90] sm:$0xff]  ;;  %v14358_v32 = vcombine.high %v18203_v47, %v18208_v61  ;;  %v18238_v50 = vld [vmem:[%s16540_s19 + $0x1cd8] sm:$0xff] }
 0x35d   : > { %v14633_v21 = vpack.c.bf16 %v11769_v11, %v11768_v51  ;;  %v11785_v17 = vmax.f32 %v14799_v49, 0.0  ;;  %9858 = vmatpush1.bf16.msra.mxu1 %v14327_v48  ;;  %9352 = vmatprep.mubr.bf16.mxu0 %v17548_v38  ;;  %v14360_v60 = vcombine.high %v18211_v58, %v18214_v26  ;;  %v14357_v45 = vcombine.low %v18203_v47, %v18208_v61 }
 0x35e   : > { %9804 = vmatprep.mubr.bf16.mxu1 %v17548_v38  ;;  %12790 = vst [vmem:[%s18241_s20] sm:$0xff] %v14632_v0  ;;  %v14640_v48 = vpack.c.bf16 %v11783_v10, %v11782_v46  ;;  %v8533_v35 = vpop.f32.mrb[68].mxu0  ;;  %9407 = vmatprep.subr.bf16.mxu0 %v14342_v30  ;;  %v14359_v0 = vcombine.low %v18211_v58, %v18214_v26 }
 0x35f   : > { %12791 = vst [vmem:[%s18241_s20 + $0x8] sm:$0xff] %v14633_v21  ;;  %v14641_v49 = vpack.c.bf16 %v11785_v17, %v11784_v55  ;;  %v8985_v34 = vpop.f32.mrb[68].mxu1  ;;  %9859 = vmatprep.subr.bf16.mxu1 %v14344_v5  ;;  %v14768_v51 = vadd.f32 %v8533_v35, %v18156_v43  ;;  %v8535_v11 = vpop.f32.mrb[69].mxu0  ;;  %v14374_v46 = vcombine.high %v18223_v13, %v18226_v2 }
 0x360   : > { %v14800_v4 = vadd.f32 %v8985_v34, %v18159_v25  ;;  %v8987_v38 = vpop.f32.mrb[69].mxu1  ;;  %12798 = vst [vmem:[%s18241_s20 + $0x40] sm:$0xff] %v14640_v48  ;;  %v14769_v30 = vadd.f32 %v8535_v11, %v18162_v24  ;;  %9408 = vmatpush1.bf16.msra.mxu0 %v14341_v63  ;;  %v8537_v61 = vpop.f32.mrb[70].mxu0  ;;  %v14376_v55 = vcombine.high %v18235_v27, %v18238_v50  ;;  %v18267_v34 = vld [vmem:[%s16540_s19 + $0x1d50] sm:$0xff] }
 0x361   : > { %12799 = vst [vmem:[%s18241_s20 + $0x48] sm:$0xff] %v14641_v49  ;;  %v14801_v5 = vadd.f32 %v8987_v38, %v18165_v19  ;;  %9860 = vmatpush1.bf16.msra.mxu1 %v14343_v14  ;;  %v8989_v47 = vpop.f32.mrb[70].mxu1  ;;  %v11798_v58 = vmax.f32 %v14768_v51, 0.0  ;;  %v14770_v21 = vadd.f32 %v8537_v61, %v18156_v43  ;;  %v8539_v17 = vpop.f32.mrb[71].mxu0  ;;  %9409 = vmatprep.subr.bf16.mxu0 %v14358_v32  ;;  %v18262_v38 = vld [vmem:[%s16540_s19 + $0x1d10] sm:$0xff]  ;;  %v18270_v51 = vld [vmem:[%s16540_s19 + $0x1d18] sm:$0xff] }
 0x362   : > { %v11800_v26 = vmax.f32 %v14800_v4, 0.0  ;;  %v14802_v10 = vadd.f32 %v8989_v47, %v18159_v25  ;;  %v8991_v48 = vpop.f32.mrb[71].mxu1  ;;  %9861 = vmatprep.subr.bf16.mxu1 %v14360_v60  ;;  %v11799_v63 = vmax.f32 %v14769_v30, 0.0  ;;  %v14771_v49 = vadd.f32 %v8539_v17, %v18162_v24  ;;  %v18273_v4 = vld [vmem:[%s16540_s19 + $0x1d58] sm:$0xff] }
 0x363   : > { %v11801_v14 = vmax.f32 %v14801_v5, 0.0  ;;  %v14803_v35 = vadd.f32 %v8991_v48, %v18165_v19  ;;  %v11814_v11 = vmax.f32 %v14770_v21, 0.0  ;;  %9353 = vmatmul.mubr.bf16.gmra.mrb[112].mxu0 %v17536_v22  ;;  %v14373_v32 = vcombine.low %v18223_v13, %v18226_v2  ;;  %v18282_v21 = vld [vmem:[%s16540_s19 + $0x1d90] sm:$0xff] }
 0x364   : > { %v11816_v61 = vmax.f32 %v14802_v10, 0.0  ;;  %9805 = vmatmul.mubr.bf16.gmra.mrb[112].mxu1 %v17536_v22  ;;  %v14375_v60 = vcombine.low %v18235_v27, %v18238_v50  ;;  %v14648_v30 = vpack.c.bf16 %v11799_v63, %v11798_v58  ;;  %v11815_v47 = vmax.f32 %v14771_v49, 0.0  ;;  %9410 = vmatpush1.bf16.msra.mxu0 %v14357_v45  ;;  %v18285_v10 = vld [vmem:[%s16540_s19 + $0x1dd0] sm:$0xff]  ;;  %v18294_v27 = vld [vmem:[%s16540_s19 + $0x1d98] sm:$0xff] }
 0x365   : > { %v14649_v5 = vpack.c.bf16 %v11801_v14, %v11800_v26  ;;  %v11817_v17 = vmax.f32 %v14803_v35, 0.0  ;;  %9862 = vmatpush1.bf16.msra.mxu1 %v14359_v0  ;;  %9362 = vmatprep.mubr.bf16.mxu0 %v17608_v1  ;;  %v14390_v13 = vcombine.high %v18262_v38, %v18267_v34  ;;  %v14392_v2 = vcombine.high %v18270_v51, %v18273_v4  ;;  %v18297_v50 = vld [vmem:[%s16540_s19 + $0x1dd8] sm:$0xff] }
 0x366   : > { %9814 = vmatprep.mubr.bf16.mxu1 %v17608_v1  ;;  %12806 = vst [vmem:[%s18241_s20 + $0x80] sm:$0xff] %v14648_v30  ;;  %v14656_v45 = vpack.c.bf16 %v11815_v47, %v11814_v11  ;;  %v8543_v58 = vpop.f32.mrb[72].mxu0  ;;  %9411 = vmatprep.subr.bf16.mxu0 %v14374_v46  ;;  %v14389_v48 = vcombine.low %v18262_v38, %v18267_v34 }
 0x367   : > { %12807 = vst [vmem:[%s18241_s20 + $0x88] sm:$0xff] %v14649_v5  ;;  %v14657_v0 = vpack.c.bf16 %v11817_v17, %v11816_v61  ;;  %v8995_v26 = vpop.f32.mrb[72].mxu1  ;;  %9863 = vmatprep.subr.bf16.mxu1 %v14376_v55  ;;  %v14772_v63 = vadd.f32 %v8543_v58, %v18156_v43  ;;  %v8545_v49 = vpop.f32.mrb[73].mxu0  ;;  %v14391_v30 = vcombine.low %v18270_v51, %v18273_v4 }
 0x368   : > { %v14804_v14 = vadd.f32 %v8995_v26, %v18159_v25  ;;  %v8997_v35 = vpop.f32.mrb[73].mxu1  ;;  %v14406_v11 = vcombine.high %v18282_v21, %v18285_v10  ;;  %12814 = vst [vmem:[%s18241_s20 + $0xc0] sm:$0xff] %v14656_v45  ;;  %v14773_v46 = vadd.f32 %v8545_v49, %v18162_v24  ;;  %9412 = vmatpush1.bf16.msra.mxu0 %v14373_v32  ;;  %v8547_v38 = vpop.f32.mrb[74].mxu0  ;;  %v18318_v32 = vld [vmem:[%s16540_s19 + $0x1e10] sm:$0xff] }
 0x369   : > { %12815 = vst [vmem:[%s18241_s20 + $0xc8] sm:$0xff] %v14657_v0  ;;  %v14805_v55 = vadd.f32 %v8997_v35, %v18165_v19  ;;  %9864 = vmatpush1.bf16.msra.mxu1 %v14375_v60  ;;  %v8999_v34 = vpop.f32.mrb[74].mxu1  ;;  %v14408_v61 = vcombine.high %v18294_v27, %v18297_v50  ;;  %v11830_v51 = vmax.f32 %v14772_v63, 0.0  ;;  %v14774_v5 = vadd.f32 %v8547_v38, %v18156_v43  ;;  %v8549_v17 = vpop.f32.mrb[75].mxu0  ;;  %v18323_v49 = vld [vmem:[%s16540_s19 + $0x1e50] sm:$0xff]  ;;  %v18326_v63 = vld [vmem:[%s16540_s19 + $0x1e18] sm:$0xff] }
 0x36a   : > { %v11832_v4 = vmax.f32 %v14804_v14, 0.0  ;;  %v14806_v47 = vadd.f32 %v8999_v34, %v18159_v25  ;;  %v9001_v45 = vpop.f32.mrb[75].mxu1  ;;  %9413 = vmatprep.subr.bf16.mxu0 %v14390_v13  ;;  %9865 = vmatprep.subr.bf16.mxu1 %v14392_v2  ;;  %v11831_v60 = vmax.f32 %v14773_v46, 0.0  ;;  %v14775_v58 = vadd.f32 %v8549_v17, %v18162_v24  ;;  %v18329_v14 = vld [vmem:[%s16540_s19 + $0x1e58] sm:$0xff] }
 0x36b   : > { %v11833_v0 = vmax.f32 %v14805_v55, 0.0  ;;  %v14807_v26 = vadd.f32 %v9001_v45, %v18165_v19  ;;  %v11846_v35 = vmax.f32 %v14774_v5, 0.0  ;;  %9363 = vmatmul.mubr.bf16.gmra.mrb[116].mxu0 %v17596_v28  ;;  %v14405_v13 = vcombine.low %v18282_v21, %v18285_v10  ;;  %v18338_v5 = vld [vmem:[%s16540_s19 + $0x1e90] sm:$0xff] }
 0x36c   : > { %v11848_v38 = vmax.f32 %v14806_v47, 0.0  ;;  %9815 = vmatmul.mubr.bf16.gmra.mrb[116].mxu1 %v17596_v28  ;;  %v14407_v2 = vcombine.low %v18294_v27, %v18297_v50  ;;  %v14664_v46 = vpack.c.bf16 %v11831_v60, %v11830_v51  ;;  %v11847_v34 = vmax.f32 %v14775_v58, 0.0  ;;  %9414 = vmatpush1.bf16.msra.mxu0 %v14389_v48  ;;  %v18341_v47 = vld [vmem:[%s16540_s19 + $0x1ed0] sm:$0xff]  ;;  %v18350_v27 = vld [vmem:[%s16540_s19 + $0x1e98] sm:$0xff] }
 0x36d   : > { %v14665_v55 = vpack.c.bf16 %v11833_v0, %v11832_v4  ;;  %v11849_v17 = vmax.f32 %v14807_v26, 0.0  ;;  %9866 = vmatpush1.bf16.msra.mxu1 %v14391_v30  ;;  %9372 = vmatprep.mubr.bf16.mxu0 %v17668_v57  ;;  %v14422_v21 = vcombine.high %v18318_v32, %v18323_v49  ;;  %v14424_v10 = vcombine.high %v18326_v63, %v18329_v14  ;;  %v18353_v50 = vld [vmem:[%s16540_s19 + $0x1ed8] sm:$0xff] }
 0x36e   : > { %9824 = vmatprep.mubr.bf16.mxu1 %v17668_v57  ;;  %12822 = vst [vmem:[%s18241_s20 + $0x100] sm:$0xff] %v14664_v46  ;;  %v14672_v48 = vpack.c.bf16 %v11847_v34, %v11846_v35  ;;  %v8553_v51 = vpop.f32.mrb[76].mxu0  ;;  %9415 = vmatprep.subr.bf16.mxu0 %v14406_v11  ;;  %v14421_v45 = vcombine.low %v18318_v32, %v18323_v49 }
 0x36f   : > { %12823 = vst [vmem:[%s18241_s20 + $0x108] sm:$0xff] %v14665_v55  ;;  %v14673_v30 = vpack.c.bf16 %v11849_v17, %v11848_v38  ;;  %v9005_v4 = vpop.f32.mrb[76].mxu1  ;;  %9867 = vmatprep.subr.bf16.mxu1 %v14408_v61  ;;  %v14776_v60 = vadd.f32 %v8553_v51, %v18156_v43  ;;  %v8555_v58 = vpop.f32.mrb[77].mxu0  ;;  %v14423_v46 = vcombine.low %v18326_v63, %v18329_v14 }
 0x370   : > { %v14808_v0 = vadd.f32 %v9005_v4, %v18159_v25  ;;  %v9007_v26 = vpop.f32.mrb[77].mxu1  ;;  %v14438_v35 = vcombine.high %v18338_v5, %v18341_v47  ;;  %12830 = vst [vmem:[%s18241_s20 + $0x140] sm:$0xff] %v14672_v48  ;;  %v14777_v11 = vadd.f32 %v8555_v58, %v18162_v24  ;;  %9416 = vmatpush1.bf16.msra.mxu0 %v14405_v13  ;;  %v8557_v32 = vpop.f32.mrb[78].mxu0  ;;  %v18374_v13 = vld [vmem:[%s16540_s19 + $0x1f10] sm:$0xff] }
 0x371   : > { %12831 = vst [vmem:[%s18241_s20 + $0x148] sm:$0xff] %v14673_v30  ;;  %v14809_v61 = vadd.f32 %v9007_v26, %v18165_v19  ;;  %9868 = vmatpush1.bf16.msra.mxu1 %v14407_v2  ;;  %v9009_v49 = vpop.f32.mrb[78].mxu1  ;;  %v14440_v38 = vcombine.high %v18350_v27, %v18353_v50  ;;  %v11862_v63 = vmax.f32 %v14776_v60, 0.0  ;;  %v14778_v55 = vadd.f32 %v8557_v32, %v18156_v43  ;;  %v8559_v17 = vpop.f32.mrb[79].mxu0  ;;  %v18379_v58 = vld [vmem:[%s16540_s19 + $0x1f50] sm:$0xff]  ;;  %v18382_v60 = vld [vmem:[%s16540_s19 + $0x1f18] sm:$0xff] }
 0x372   : > { %v11864_v14 = vmax.f32 %v14808_v0, 0.0  ;;  %v14810_v34 = vadd.f32 %v9009_v49, %v18159_v25  ;;  %v9011_v48 = vpop.f32.mrb[79].mxu1  ;;  %9417 = vmatprep.subr.bf16.mxu0 %v14422_v21  ;;  %9869 = vmatprep.subr.bf16.mxu1 %v14424_v10  ;;  %v11863_v2 = vmax.f32 %v14777_v11, 0.0  ;;  %v14779_v51 = vadd.f32 %v8559_v17, %v18162_v24  ;;  %v18385_v0 = vld [vmem:[%s16540_s19 + $0x1f58] sm:$0xff] }
 0x373   : > { %v11865_v30 = vmax.f32 %v14809_v61, 0.0  ;;  %v14811_v4 = vadd.f32 %v9011_v48, %v18165_v19  ;;  %v11878_v26 = vmax.f32 %v14778_v55, 0.0  ;;  %9373 = vmatmul.mubr.bf16.gmra.mrb[120].mxu0 %v17656_v20  ;;  %v14437_v21 = vcombine.low %v18338_v5, %v18341_v47  ;;  %v18394_v55 = vld [vmem:[%s16540_s19 + $0x1f90] sm:$0xff] }
 0x374   : > { %v11880_v32 = vmax.f32 %v14810_v34, 0.0  ;;  %9825 = vmatmul.mubr.bf16.gmra.mrb[120].mxu1 %v17656_v20  ;;  %v14439_v10 = vcombine.low %v18350_v27, %v18353_v50  ;;  %v14680_v11 = vpack.c.bf16 %v11863_v2, %v11862_v63  ;;  %v11879_v49 = vmax.f32 %v14779_v51, 0.0  ;;  %9418 = vmatpush1.bf16.msra.mxu0 %v14421_v45  ;;  %v18397_v34 = vld [vmem:[%s16540_s19 + $0x1fd0] sm:$0xff]  ;;  %v18406_v27 = vld [vmem:[%s16540_s19 + $0x1f98] sm:$0xff] }
 0x375   : > { %v14681_v61 = vpack.c.bf16 %v11865_v30, %v11864_v14  ;;  %v11881_v17 = vmax.f32 %v14811_v4, 0.0  ;;  %9870 = vmatpush1.bf16.msra.mxu1 %v14423_v46  ;;  %9382 = vmatprep.mubr.bf16.mxu0 %v17703_v52  ;;  %v14454_v5 = vcombine.high %v18374_v13, %v18379_v58  ;;  %v14456_v47 = vcombine.high %v18382_v60, %v18385_v0  ;;  %v18409_v50 = vld [vmem:[%s16540_s19 + $0x1fd8] sm:$0xff] }
 0x376   : > { %9834 = vmatprep.mubr.bf16.mxu1 %v17703_v52  ;;  %12838 = vst [vmem:[%s18241_s20 + $0x180] sm:$0xff] %v14680_v11  ;;  %v14688_v45 = vpack.c.bf16 %v11879_v49, %v11878_v26  ;;  %v8563_v63 = vpop.f32.mrb[80].mxu0  ;;  %9419 = vmatprep.subr.bf16.mxu0 %v14438_v35  ;;  %v14453_v48 = vcombine.low %v18374_v13, %v18379_v58 }
 0x377   : > { %12839 = vst [vmem:[%s18241_s20 + $0x188] sm:$0xff] %v14681_v61  ;;  %v14689_v46 = vpack.c.bf16 %v11881_v17, %v11880_v32  ;;  %v9015_v14 = vpop.f32.mrb[80].mxu1  ;;  %9871 = vmatprep.subr.bf16.mxu1 %v14440_v38  ;;  %v14780_v2 = vadd.f32 %v8563_v63, %v18156_v43  ;;  %v8565_v51 = vpop.f32.mrb[81].mxu0  ;;  %v14455_v11 = vcombine.low %v18382_v60, %v18385_v0 }
 0x378   : > { %v14812_v30 = vadd.f32 %v9015_v14, %v18159_v25  ;;  %v9017_v4 = vpop.f32.mrb[81].mxu1  ;;  %v14470_v26 = vcombine.high %v18394_v55, %v18397_v34  ;;  %12846 = vst [vmem:[%s18241_s20 + $0x1c0] sm:$0xff] %v14688_v45  ;;  %v14781_v35 = vadd.f32 %v8565_v51, %v18162_v24  ;;  %9420 = vmatpush1.bf16.msra.mxu0 %v14437_v21  ;;  %v8567_v13 = vpop.f32.mrb[82].mxu0  ;;  %v18430_v21 = vld [vmem:[%s16540_s19 + $0x20] sm:$0xff] }
 0x379   : > { %12847 = vst [vmem:[%s18241_s20 + $0x1c8] sm:$0xff] %v14689_v46  ;;  %v14813_v38 = vadd.f32 %v9017_v4, %v18165_v19  ;;  %9872 = vmatpush1.bf16.msra.mxu1 %v14439_v10  ;;  %v9019_v58 = vpop.f32.mrb[82].mxu1  ;;  %v14472_v32 = vcombine.high %v18406_v27, %v18409_v50  ;;  %v11894_v60 = vmax.f32 %v14780_v2, 0.0  ;;  %v14782_v61 = vadd.f32 %v8567_v13, %v18156_v43  ;;  %v8569_v17 = vpop.f32.mrb[83].mxu0  ;;  %v18435_v51 = vld [vmem:[%s16540_s19 + $0x60] sm:$0xff]  ;;  %v18438_v2 = vld [vmem:[%s16540_s19 + $0x28] sm:$0xff] }
 0x37a   : > { %v11896_v0 = vmax.f32 %v14812_v30, 0.0  ;;  %v14814_v49 = vadd.f32 %v9019_v58, %v18159_v25  ;;  %v9021_v45 = vpop.f32.mrb[83].mxu1  ;;  %9421 = vmatprep.subr.bf16.mxu0 %v14454_v5  ;;  %9873 = vmatprep.subr.bf16.mxu1 %v14456_v47  ;;  %v11895_v10 = vmax.f32 %v14781_v35, 0.0  ;;  %v14783_v63 = vadd.f32 %v8569_v17, %v18162_v24  ;;  %v18441_v30 = vld [vmem:[%s16540_s19 + $0x68] sm:$0xff] }
 0x37b   : > { %v11897_v46 = vmax.f32 %v14813_v38, 0.0  ;;  %v14815_v14 = vadd.f32 %v9021_v45, %v18165_v19  ;;  %v11910_v4 = vmax.f32 %v14782_v61, 0.0  ;;  %9383 = vmatmul.mubr.bf16.gmra.mrb[124].mxu0 %v17700_v6  ;;  %v14469_v5 = vcombine.low %v18394_v55, %v18397_v34  ;;  %v18450_v61 = vld [vmem:[%s16540_s19 + $0xa0] sm:$0xff] }
 0x37c   : > { %v11912_v13 = vmax.f32 %v14814_v49, 0.0  ;;  %9835 = vmatmul.mubr.bf16.gmra.mrb[124].mxu1 %v17700_v6  ;;  %v14471_v47 = vcombine.low %v18406_v27, %v18409_v50  ;;  %v14696_v35 = vpack.c.bf16 %v11895_v10, %v11894_v60  ;;  %v11911_v58 = vmax.f32 %v14783_v63, 0.0  ;;  %9422 = vmatpush1.bf16.msra.mxu0 %v14453_v48  ;;  %v18453_v49 = vld [vmem:[%s16540_s19 + $0xe0] sm:$0xff]  ;;  %v18462_v27 = vld [vmem:[%s16540_s19 + $0xa8] sm:$0xff] }
 0x37d   : > { %v14697_v38 = vpack.c.bf16 %v11897_v46, %v11896_v0  ;;  %v11913_v17 = vmax.f32 %v14815_v14, 0.0  ;;  %9874 = vmatpush1.bf16.msra.mxu1 %v14455_v11  ;;  %9425 = vmatprep.mubr.bf16.mxu0 %v17386_v8  ;;  %v13466_v55 = vcombine.high %v18430_v21, %v18435_v51  ;;  %v13468_v34 = vcombine.high %v18438_v2, %v18441_v30  ;;  %v18465_v50 = vld [vmem:[%s16540_s19 + $0xe8] sm:$0xff] }
 0x37e   : > { %9877 = vmatprep.mubr.bf16.mxu1 %v17386_v8  ;;  %12854 = vst [vmem:[%s18241_s20 + $0x200] sm:$0xff] %v14696_v35  ;;  %v14704_v48 = vpack.c.bf16 %v11911_v58, %v11910_v4  ;;  %v8573_v60 = vpop.f32.mrb[84].mxu0  ;;  %9423 = vmatprep.subr.bf16.mxu0 %v14470_v26  ;;  %v13465_v45 = vcombine.low %v18430_v21, %v18435_v51 }
 0x37f   : > { %12855 = vst [vmem:[%s18241_s20 + $0x208] sm:$0xff] %v14697_v38  ;;  %v14705_v11 = vpack.c.bf16 %v11913_v17, %v11912_v13  ;;  %v9025_v0 = vpop.f32.mrb[84].mxu1  ;;  %9875 = vmatprep.subr.bf16.mxu1 %v14472_v32  ;;  %v14784_v10 = vadd.f32 %v8573_v60, %v18156_v43  ;;  %v8575_v63 = vpop.f32.mrb[85].mxu0  ;;  %v13467_v35 = vcombine.low %v18438_v2, %v18441_v30 }
 0x380   : > { %v14816_v46 = vadd.f32 %v9025_v0, %v18159_v25  ;;  %v9027_v14 = vpop.f32.mrb[85].mxu1  ;;  %v13482_v4 = vcombine.high %v18450_v61, %v18453_v49  ;;  %12862 = vst [vmem:[%s18241_s20 + $0x240] sm:$0xff] %v14704_v48  ;;  %v14785_v26 = vadd.f32 %v8575_v63, %v18162_v24  ;;  %9424 = vmatpush1.bf16.msra.mxu0 %v14469_v5  ;;  %v8577_v21 = vpop.f32.mrb[86].mxu0  ;;  %v18486_v5 = vld [vmem:[%s16540_s19 + $0x120] sm:$0xff] }
 0x381   : > { %12863 = vst [vmem:[%s18241_s20 + $0x248] sm:$0xff] %v14705_v11  ;;  %v14817_v32 = vadd.f32 %v9027_v14, %v18165_v19  ;;  %9876 = vmatpush1.bf16.msra.mxu1 %v14471_v47  ;;  %v9029_v51 = vpop.f32.mrb[86].mxu1  ;;  %v13484_v13 = vcombine.high %v18462_v27, %v18465_v50  ;;  %v11926_v2 = vmax.f32 %v14784_v10, 0.0  ;;  %v14786_v38 = vadd.f32 %v8577_v21, %v18156_v43  ;;  %v8579_v17 = vpop.f32.mrb[87].mxu0  ;;  %v18491_v63 = vld [vmem:[%s16540_s19 + $0x160] sm:$0xff]  ;;  %v18494_v10 = vld [vmem:[%s16540_s19 + $0x128] sm:$0xff] }
 0x382   : > { %v11928_v30 = vmax.f32 %v14816_v46, 0.0  ;;  %v14818_v58 = vadd.f32 %v9029_v51, %v18159_v25  ;;  %v9031_v48 = vpop.f32.mrb[87].mxu1  ;;  %9958 = vmatprep.subr.bf16.mxu0 %v13466_v55  ;;  %10410 = vmatprep.subr.bf16.mxu1 %v13468_v34  ;;  %v11927_v47 = vmax.f32 %v14785_v26, 0.0  ;;  %v14787_v60 = vadd.f32 %v8579_v17, %v18162_v24  ;;  %v18497_v46 = vld [vmem:[%s16540_s19 + $0x168] sm:$0xff] }
 0x383   : > { %v11929_v11 = vmax.f32 %v14817_v32, 0.0  ;;  %v14819_v0 = vadd.f32 %v9031_v48, %v18165_v19  ;;  %v11942_v14 = vmax.f32 %v14786_v38, 0.0  ;;  %9426 = vmatmul.mubr.bf16.vlgmr.msra.gmra.mrb[96].mxu0 %v17379_v40  ;;  %v13481_v55 = vcombine.low %v18450_v61, %v18453_v49  ;;  %v18506_v38 = vld [vmem:[%s16540_s19 + $0x1a0] sm:$0xff] }
 0x384   : > { %v11944_v21 = vmax.f32 %v14818_v58, 0.0  ;;  %9878 = vmatmul.mubr.bf16.vlgmr.msra.gmra.mrb[96].mxu1 %v17379_v40  ;;  %v13483_v34 = vcombine.low %v18462_v27, %v18465_v50  ;;  %v14712_v26 = vpack.c.bf16 %v11927_v47, %v11926_v2  ;;  %v11943_v51 = vmax.f32 %v14787_v60, 0.0  ;;  %9959 = vmatpush1.bf16.msra.mxu0 %v13465_v45  ;;  %v18509_v58 = vld [vmem:[%s16540_s19 + $0x1e0] sm:$0xff]  ;;  %v18518_v27 = vld [vmem:[%s16540_s19 + $0x1a8] sm:$0xff] }
 0x385   : > { %v14713_v32 = vpack.c.bf16 %v11929_v11, %v11928_v30  ;;  %v11945_v17 = vmax.f32 %v14819_v0, 0.0  ;;  %10411 = vmatpush1.bf16.msra.mxu1 %v13467_v35  ;;  %9435 = vmatprep.mubr.bf16.mxu0 %v17446_v56  ;;  %v13498_v61 = vcombine.high %v18486_v5, %v18491_v63  ;;  %v13500_v49 = vcombine.high %v18494_v10, %v18497_v46  ;;  %v18521_v50 = vld [vmem:[%s16540_s19 + $0x1e8] sm:$0xff] }
 0x386   : > { %9887 = vmatprep.mubr.bf16.mxu1 %v17446_v56  ;;  %12870 = vst [vmem:[%s18241_s20 + $0x280] sm:$0xff] %v14712_v26  ;;  %v14720_v45 = vpack.c.bf16 %v11943_v51, %v11942_v14  ;;  %v8583_v2 = vpop.f32.mrb[88].mxu0  ;;  %9960 = vmatprep.subr.bf16.mxu0 %v13482_v4  ;;  %v13497_v48 = vcombine.low %v18486_v5, %v18491_v63 }
 0x387   : > { %12871 = vst [vmem:[%s18241_s20 + $0x288] sm:$0xff] %v14713_v32  ;;  %v14721_v35 = vpack.c.bf16 %v11945_v17, %v11944_v21  ;;  %v9035_v30 = vpop.f32.mrb[88].mxu1  ;;  %10412 = vmatprep.subr.bf16.mxu1 %v13484_v13  ;;  %v14788_v47 = vadd.f32 %v8583_v2, %v18156_v43  ;;  %v8585_v60 = vpop.f32.mrb[89].mxu0  ;;  %v13499_v26 = vcombine.low %v18494_v10, %v18497_v46 }
 0x388   : > { %v14820_v11 = vadd.f32 %v9035_v30, %v18159_v25  ;;  %v9037_v0 = vpop.f32.mrb[89].mxu1  ;;  %v13514_v14 = vcombine.high %v18506_v38, %v18509_v58  ;;  %12878 = vst [vmem:[%s18241_s20 + $0x2c0] sm:$0xff] %v14720_v45  ;;  %v14789_v4 = vadd.f32 %v8585_v60, %v18162_v24  ;;  %9961 = vmatpush1.bf16.msra.mxu0 %v13481_v55  ;;  %v8587_v5 = vpop.f32.mrb[90].mxu0  ;;  %v18542_v55 = vld [vmem:[%s16540_s19 + $0x220] sm:$0xff] }
 0x389   : > { %12879 = vst [vmem:[%s18241_s20 + $0x2c8] sm:$0xff] %v14721_v35  ;;  %v14821_v13 = vadd.f32 %v9037_v0, %v18165_v19  ;;  %10413 = vmatpush1.bf16.msra.mxu1 %v13483_v34  ;;  %v9039_v63 = vpop.f32.mrb[90].mxu1  ;;  %v13516_v21 = vcombine.high %v18518_v27, %v18521_v50  ;;  %v11958_v10 = vmax.f32 %v14788_v47, 0.0  ;;  %v14790_v32 = vadd.f32 %v8587_v5, %v18156_v43  ;;  %v8589_v17 = vpop.f32.mrb[91].mxu0  ;;  %v18547_v60 = vld [vmem:[%s16540_s19 + $0x260] sm:$0xff]  ;;  %v18550_v47 = vld [vmem:[%s16540_s19 + $0x228] sm:$0xff] }
 0x38a   : > { %v11960_v46 = vmax.f32 %v14820_v11, 0.0  ;;  %v14822_v51 = vadd.f32 %v9039_v63, %v18159_v25  ;;  %v9041_v45 = vpop.f32.mrb[91].mxu1  ;;  %9962 = vmatprep.subr.bf16.mxu0 %v13498_v61  ;;  %10414 = vmatprep.subr.bf16.mxu1 %v13500_v49  ;;  %v11959_v34 = vmax.f32 %v14789_v4, 0.0  ;;  %v14791_v2 = vadd.f32 %v8589_v17, %v18162_v24  ;;  %v18553_v11 = vld [vmem:[%s16540_s19 + $0x268] sm:$0xff] }
 0x38b   : > { %v11961_v35 = vmax.f32 %v14821_v13, 0.0  ;;  %v14823_v30 = vadd.f32 %v9041_v45, %v18165_v19  ;;  %v11974_v0 = vmax.f32 %v14790_v32, 0.0  ;;  %9436 = vmatmul.mubr.bf16.gmra.mrb[100].mxu0 %v17439_v15  ;;  %v13513_v61 = vcombine.low %v18506_v38, %v18509_v58  ;;  %v18562_v32 = vld [vmem:[%s16540_s19 + $0x2a0] sm:$0xff] }
 0x38c   : > { %v11976_v5 = vmax.f32 %v14822_v51, 0.0  ;;  %9888 = vmatmul.mubr.bf16.gmra.mrb[100].mxu1 %v17439_v15  ;;  %v13515_v49 = vcombine.low %v18518_v27, %v18521_v50  ;;  %v14728_v4 = vpack.c.bf16 %v11959_v34, %v11958_v10  ;;  %v11975_v63 = vmax.f32 %v14791_v2, 0.0  ;;  %9963 = vmatpush1.bf16.msra.mxu0 %v13497_v48  ;;  %v18565_v51 = vld [vmem:[%s16540_s19 + $0x2e0] sm:$0xff]  ;;  %v18574_v27 = vld [vmem:[%s16540_s19 + $0x2a8] sm:$0xff] }
 0x38d   : > { %v14729_v13 = vpack.c.bf16 %v11961_v35, %v11960_v46  ;;  %v11977_v17 = vmax.f32 %v14823_v30, 0.0  ;;  %10415 = vmatpush1.bf16.msra.mxu1 %v13499_v26  ;;  %9445 = vmatprep.mubr.bf16.mxu0 %v17506_v23  ;;  %v13530_v38 = vcombine.high %v18542_v55, %v18547_v60  ;;  %v13532_v58 = vcombine.high %v18550_v47, %v18553_v11  ;;  %v18577_v50 = vld [vmem:[%s16540_s19 + $0x2e8] sm:$0xff] }
 0x38e   : > { %9897 = vmatprep.mubr.bf16.mxu1 %v17506_v23  ;;  %12886 = vst [vmem:[%s18241_s20 + $0x300] sm:$0xff] %v14728_v4  ;;  %v14736_v48 = vpack.c.bf16 %v11975_v63, %v11974_v0  ;;  %v8593_v10 = vpop.f32.mrb[92].mxu0  ;;  %9964 = vmatprep.subr.bf16.mxu0 %v13514_v14  ;;  %v13529_v45 = vcombine.low %v18542_v55, %v18547_v60  ;;  %v2031_v23 = vld [vmem:[%s16540_s19 + $0x368] sm:$0xff] }
 0x38f   : > { %12887 = vst [vmem:[%s18241_s20 + $0x308] sm:$0xff] %v14729_v13  ;;  %v14737_v26 = vpack.c.bf16 %v11977_v17, %v11976_v5  ;;  %v9045_v46 = vpop.f32.mrb[92].mxu1  ;;  %10416 = vmatprep.subr.bf16.mxu1 %v13516_v21  ;;  %v14792_v34 = vadd.f32 %v8593_v10, %v18156_v43  ;;  %v8595_v2 = vpop.f32.mrb[93].mxu0  ;;  %v13531_v4 = vcombine.low %v18550_v47, %v18553_v11 }
 0x390   : > { %v14824_v35 = vadd.f32 %v9045_v46, %v18159_v25  ;;  %v9047_v30 = vpop.f32.mrb[93].mxu1  ;;  %v13546_v0 = vcombine.high %v18562_v32, %v18565_v51  ;;  %12894 = vst [vmem:[%s18241_s20 + $0x340] sm:$0xff] %v14736_v48  ;;  %v14793_v14 = vadd.f32 %v8595_v2, %v18162_v24  ;;  %9965 = vmatpush1.bf16.msra.mxu0 %v13513_v61  ;;  %v8597_v55 = vpop.f32.mrb[94].mxu0  ;;  %v2022_v61 = vld [vmem:[%s16540_s19 + $0x320] sm:$0xff] }
 0x391   : > { %12895 = vst [vmem:[%s18241_s20 + $0x348] sm:$0xff] %v14737_v26  ;;  %v14825_v21 = vadd.f32 %v9047_v30, %v18165_v19  ;;  %10417 = vmatpush1.bf16.msra.mxu1 %v13515_v49  ;;  %v9049_v60 = vpop.f32.mrb[94].mxu1  ;;  %v13548_v5 = vcombine.high %v18574_v27, %v18577_v50  ;;  %v11990_v47 = vmax.f32 %v14792_v34, 0.0  ;;  %v14794_v13 = vadd.f32 %v8597_v55, %v18156_v43  ;;  %v8599_v17 = vpop.f32.mrb[95].mxu0  ;;  %v2030_v2 = vld [vmem:[%s16540_s19 + $0x360] sm:$0xff]  ;;  %v2023_v30 = vld [vmem:[%s16540_s19 + $0x328] sm:$0xff] }
 0x392   : > { %v11992_v11 = vmax.f32 %v14824_v35, 0.0  ;;  %v14826_v63 = vadd.f32 %v9049_v60, %v18159_v25  ;;  %v9051_v48 = vpop.f32.mrb[95].mxu1  ;;  %9966 = vmatprep.subr.bf16.mxu0 %v13530_v38  ;;  %10418 = vmatprep.subr.bf16.mxu1 %v13532_v58  ;;  %v11991_v49 = vmax.f32 %v14793_v14, 0.0  ;;  %v14795_v10 = vadd.f32 %v8599_v17, %v18162_v24  ;;  %v2038_v14 = vld [vmem:[%s16540_s19 + $0x3a0] sm:$0xff] }
 0x393   : > { %v11993_v26 = vmax.f32 %v14825_v21, 0.0  ;;  %v14827_v46 = vadd.f32 %v9051_v48, %v18165_v19  ;;  %v12006_v34 = vmax.f32 %v14794_v13, 0.0  ;;  %9446 = vmatmul.mubr.bf16.gmra.mrb[104].mxu0 %v17499_v59  ;;  %v13545_v43 = vcombine.low %v18562_v32, %v18565_v51  ;;  %v2047_v21 = vld [vmem:[%s16540_s19 + $0x3e8] sm:$0xff] }
 0x394   : > { %v12008_v35 = vmax.f32 %v14826_v63, 0.0  ;;  %9898 = vmatmul.mubr.bf16.gmra.mrb[104].mxu1 %v17499_v59  ;;  %v13547_v25 = vcombine.low %v18574_v27, %v18577_v50  ;;  %v14744_v24 = vpack.c.bf16 %v11991_v49, %v11990_v47  ;;  %v12007_v38 = vmax.f32 %v14795_v10, 0.0  ;;  %9967 = vmatpush1.bf16.msra.mxu0 %v13529_v45  ;;  %v2046_v45 = vld [vmem:[%s16540_s19 + $0x3e0] sm:$0xff]  ;;  %v2063_v63 = vld [vmem:[%s16540_s19 + $0x468] sm:$0xff] }
 0x395   : > { %v14745_v19 = vpack.c.bf16 %v11993_v26, %v11992_v11  ;;  %v12009_v58 = vmax.f32 %v14827_v46, 0.0  ;;  %10419 = vmatpush1.bf16.msra.mxu1 %v13531_v4  ;;  %9455 = vmatprep.mubr.bf16.mxu0 %v17566_v16  ;;  %v13562_v32 = vcombine.high %v2022_v61, %v2030_v2  ;;  %v13564_v51 = vcombine.high %v2023_v30, %v2031_v23  ;;  %v2039_v4 = vld [vmem:[%s16540_s19 + $0x3a8] sm:$0xff]  ;;  %v2054_v47 = vld [vmem:[%s16540_s19 + $0x420] sm:$0xff] }
 0x396   : > { %9907 = vmatprep.mubr.bf16.mxu1 %v17566_v16  ;;  %12902 = vst [vmem:[%s18241_s20 + $0x380] sm:$0xff] %v14744_v24  ;;  %v14752_v27 = vpack.c.bf16 %v12007_v38, %v12006_v34  ;;  %9968 = vmatprep.subr.bf16.mxu0 %v13546_v0  ;;  %v13561_v55 = vcombine.low %v2022_v61, %v2030_v2  ;;  %v2062_v0 = vld [vmem:[%s16540_s19 + $0x460] sm:$0xff]  ;;  %v2071_v10 = vld [vmem:[%s16540_s19 + $0x4a8] sm:$0xff] }
 0x397   : > { %12903 = vst [vmem:[%s18241_s20 + $0x388] sm:$0xff] %v14745_v19  ;;  %v14753_v50 = vpack.c.bf16 %v12009_v58, %v12008_v35  ;;  %10420 = vmatprep.subr.bf16.mxu1 %v13548_v5  ;;  %v13563_v60 = vcombine.low %v2023_v30, %v2031_v23  ;;  %v13578_v11 = vcombine.high %v2038_v14, %v2046_v45  ;;  %v2055_v5 = vld [vmem:[%s16540_s19 + $0x428] sm:$0xff]  ;;  %v2070_v49 = vld [vmem:[%s16540_s19 + $0x4a0] sm:$0xff] }
 0x398   : > { %12910 = vst [vmem:[%s18241_s20 + $0x3c0] sm:$0xff] %v14752_v27  ;;  %9969 = vmatpush1.bf16.msra.mxu0 %v13545_v43  ;;  %v13580_v13 = vcombine.high %v2039_v4, %v2047_v21  ;;  %v13577_v17 = vcombine.low %v2038_v14, %v2046_v45  ;;  %v13579_v23 = vcombine.low %v2039_v4, %v2047_v21  ;;  %v2078_v26 = vld [vmem:[%s16540_s19 + $0x4e0] sm:$0xff]  ;;  %v2079_v46 = vld [vmem:[%s16540_s19 + $0x4e8] sm:$0xff] }
 0x399   : > { %12911 = vst [vmem:[%s18241_s20 + $0x3c8] sm:$0xff] %v14753_v50  ;;  %10421 = vmatpush1.bf16.msra.mxu1 %v13547_v25  ;;  %9970 = vmatprep.subr.bf16.mxu0 %v13562_v32  ;;  %v13594_v48 = vcombine.high %v2054_v47, %v2062_v0  ;;  %v13596_v61 = vcombine.high %v2055_v5, %v2063_v63  ;;  %v2086_v34 = vld [vmem:[%s16540_s19 + $0x520] sm:$0xff]  ;;  %v2087_v24 = vld [vmem:[%s16540_s19 + $0x528] sm:$0xff] }
 0x39a   : > { %10422 = vmatprep.subr.bf16.mxu1 %v13564_v51  ;;  %v13593_v2 = vcombine.low %v2054_v47, %v2062_v0  ;;  %v13595_v30 = vcombine.low %v2055_v5, %v2063_v63  ;;  %v13610_v35 = vcombine.high %v2070_v49, %v2078_v26  ;;  %v13612_v43 = vcombine.high %v2071_v10, %v2079_v46  ;;  %v2094_v25 = vld [vmem:[%s16540_s19 + $0x560] sm:$0xff]  ;;  %v2095_v19 = vld [vmem:[%s16540_s19 + $0x568] sm:$0xff] }
 0x39b   : > { %9456 = vmatmul.mubr.bf16.gmra.mrb[108].mxu0 %v17559_v41  ;;  %v13609_v38 = vcombine.low %v2070_v49, %v2078_v26  ;;  %v13611_v58 = vcombine.low %v2071_v10, %v2079_v46  ;;  %v13626_v32 = vcombine.high %v2086_v34, %v2094_v25  ;;  %v13628_v51 = vcombine.high %v2087_v24, %v2095_v19  ;;  %v2102_v27 = vld [vmem:[%s16540_s19 + $0x5a0] sm:$0xff]  ;;  %v2103_v14 = vld [vmem:[%s16540_s19 + $0x5a8] sm:$0xff] }
 0x39c   : > { %9908 = vmatmul.mubr.bf16.gmra.mrb[108].mxu1 %v17559_v41  ;;  %9971 = vmatpush1.bf16.msra.mxu0 %v13561_v55  ;;  %v2110_v50 = vld [vmem:[%s16540_s19 + $0x5e0] sm:$0xff]  ;;  %v2111_v45 = vld [vmem:[%s16540_s19 + $0x5e8] sm:$0xff]  ;;  %v13625_v4 = vcombine.low %v2086_v34, %v2094_v25  ;;  %v13627_v21 = vcombine.low %v2087_v24, %v2095_v19 }
 0x39d   : > { %10423 = vmatpush1.bf16.msra.mxu1 %v13563_v60  ;;  %9465 = vmatprep.mubr.bf16.mxu0 %v17626_v36  ;;  %v2118_v55 = vld [vmem:[%s16540_s19 + $0x620] sm:$0xff]  ;;  %v13642_v60 = vcombine.high %v2102_v27, %v2110_v50  ;;  %v13644_v47 = vcombine.high %v2103_v14, %v2111_v45  ;;  %v2127_v0 = vld [vmem:[%s16540_s19 + $0x668] sm:$0xff]  ;;  %v13641_v5 = vcombine.low %v2102_v27, %v2110_v50 }
 0x39e   : > { %9917 = vmatprep.mubr.bf16.mxu1 %v17626_v36  ;;  %9972 = vmatprep.subr.bf16.mxu0 %v13578_v11  ;;  %v2126_v11 = vld [vmem:[%s16540_s19 + $0x660] sm:$0xff]  ;;  %v13643_v63 = vcombine.low %v2103_v14, %v2111_v45  ;;  %v2135_v49 = vld [vmem:[%s16540_s19 + $0x6a8] sm:$0xff] }
 0x39f   : > { %10424 = vmatprep.subr.bf16.mxu1 %v13580_v13  ;;  %v2119_v13 = vld [vmem:[%s16540_s19 + $0x628] sm:$0xff]  ;;  %v13657_v10 = vcombine.low %v2118_v55, %v2126_v11 }
 0x3a0   : > { %9973 = vmatpush1.bf16.msra.mxu0 %v13577_v17  ;;  %v13658_v17 = vcombine.high %v2118_v55, %v2126_v11  ;;  %v2143_v26 = vld [vmem:[%s16540_s19 + $0x6e8] sm:$0xff]  ;;  %v13659_v46 = vcombine.low %v2119_v13, %v2127_v0 }
 0x3a1   : > { %10425 = vmatpush1.bf16.msra.mxu1 %v13579_v23  ;;  %9974 = vmatprep.subr.bf16.mxu0 %v13594_v48  ;;  %v13660_v23 = vcombine.high %v2119_v13, %v2127_v0  ;;  %v2134_v48 = vld [vmem:[%s16540_s19 + $0x6a0] sm:$0xff]  ;;  %v13676_v34 = vcombine.high %v2135_v49, %v2143_v26  ;;  %v2159_v25 = vld [vmem:[%s16540_s19 + $0x768] sm:$0xff]  ;;  %v13675_v19 = vcombine.low %v2135_v49, %v2143_v26 }
 0x3a2   : > { %10426 = vmatprep.subr.bf16.mxu1 %v13596_v61  ;;  %v2142_v61 = vld [vmem:[%s16540_s19 + $0x6e0] sm:$0xff]  ;;  %v2167_v27 = vld [vmem:[%s16540_s19 + $0x7a8] sm:$0xff] }
 0x3a3   : > { %9466 = vmatmul.mubr.bf16.gmra.mrb[112].mxu0 %v17619_v7  ;;  %v13673_v24 = vcombine.low %v2134_v48, %v2142_v61  ;;  %v2175_v50 = vld [vmem:[%s16540_s19 + $0x7e8] sm:$0xff] }
 0x3a4   : > { %9918 = vmatmul.mubr.bf16.gmra.mrb[112].mxu1 %v17619_v7  ;;  %9975 = vmatpush1.bf16.msra.mxu0 %v13593_v2  ;;  %v2150_v2 = vld [vmem:[%s16540_s19 + $0x720] sm:$0xff]  ;;  %v13708_v55 = vcombine.high %v2167_v27, %v2175_v50  ;;  %v2191_v11 = vld [vmem:[%s16540_s19 + $0x868] sm:$0xff]  ;;  %v13707_v0 = vcombine.low %v2167_v27, %v2175_v50 }
 0x3a5   : > { %10427 = vmatpush1.bf16.msra.mxu1 %v13595_v30  ;;  %9475 = vmatprep.mubr.bf16.mxu0 %v17682_v62  ;;  %v13674_v30 = vcombine.high %v2134_v48, %v2142_v61  ;;  %v2199_v48 = vld [vmem:[%s16540_s19 + $0x8a8] sm:$0xff] }
 0x3a6   : > { %9927 = vmatprep.mubr.bf16.mxu1 %v17682_v62  ;;  %9976 = vmatprep.subr.bf16.mxu0 %v13610_v35  ;;  %v2158_v35 = vld [vmem:[%s16540_s19 + $0x760] sm:$0xff]  ;;  %v2207_v61 = vld [vmem:[%s16540_s19 + $0x8e8] sm:$0xff] }
 0x3a7   : > { %10428 = vmatprep.subr.bf16.mxu1 %v13612_v43  ;;  %v2151_v43 = vld [vmem:[%s16540_s19 + $0x728] sm:$0xff]  ;;  %v13689_v14 = vcombine.low %v2150_v2, %v2158_v35 }
 0x3a8   : > { %9977 = vmatpush1.bf16.msra.mxu0 %v13609_v38  ;;  %v13690_v38 = vcombine.high %v2150_v2, %v2158_v35  ;;  %v13691_v45 = vcombine.low %v2151_v43, %v2159_v25  ;;  %v13740_v2 = vcombine.high %v2199_v48, %v2207_v61  ;;  %v2223_v35 = vld [vmem:[%s16540_s19 + $0x968] sm:$0xff] }
 0x3a9   : > { %10429 = vmatpush1.bf16.msra.mxu1 %v13611_v58  ;;  %9978 = vmatprep.subr.bf16.mxu0 %v13626_v32  ;;  %v13692_v58 = vcombine.high %v2151_v43, %v2159_v25  ;;  %v2166_v32 = vld [vmem:[%s16540_s19 + $0x7a0] sm:$0xff]  ;;  %v13739_v25 = vcombine.low %v2199_v48, %v2207_v61 }
 0x3aa   : > { %10430 = vmatprep.subr.bf16.mxu1 %v13628_v51  ;;  %v2174_v51 = vld [vmem:[%s16540_s19 + $0x7e0] sm:$0xff] }
 0x3ab   : > { %9476 = vmatmul.mubr.bf16.gmra.mrb[116].mxu0 %v17675_v9  ;;  %v13705_v13 = vcombine.low %v2166_v32, %v2174_v51 }
 0x3ac   : > { %9928 = vmatmul.mubr.bf16.gmra.mrb[116].mxu1 %v17675_v9  ;;  %9979 = vmatpush1.bf16.msra.mxu0 %v13625_v4  ;;  %v2182_v4 = vld [vmem:[%s16540_s19 + $0x820] sm:$0xff] }
 0x3ad   : > { %10431 = vmatpush1.bf16.msra.mxu1 %v13627_v21  ;;  %9485 = vmatprep.mubr.bf16.mxu0 %v17712_v37  ;;  %v13706_v21 = vcombine.high %v2166_v32, %v2174_v51  ;;  %v2231_v32 = vld [vmem:[%s16540_s19 + $0x9a8] sm:$0xff] }
 0x3ae   : > { %9937 = vmatprep.mubr.bf16.mxu1 %v17712_v37  ;;  %9980 = vmatprep.subr.bf16.mxu0 %v13642_v60  ;;  %v2190_v60 = vld [vmem:[%s16540_s19 + $0x860] sm:$0xff]  ;;  %v2239_v51 = vld [vmem:[%s16540_s19 + $0x9e8] sm:$0xff] }
 0x3af   : > { %10432 = vmatprep.subr.bf16.mxu1 %v13644_v47  ;;  %v2183_v47 = vld [vmem:[%s16540_s19 + $0x828] sm:$0xff]  ;;  %v13721_v49 = vcombine.low %v2182_v4, %v2190_v60 }
 0x3b0   : > { %9981 = vmatpush1.bf16.msra.mxu0 %v13641_v5  ;;  %v13722_v5 = vcombine.high %v2182_v4, %v2190_v60  ;;  %v13723_v26 = vcombine.low %v2183_v47, %v2191_v11  ;;  %v13772_v4 = vcombine.high %v2231_v32, %v2239_v51  ;;  %v2255_v60 = vld [vmem:[%s16540_s19 + $0xa68] sm:$0xff] }
 0x3b1   : > { %10433 = vmatpush1.bf16.msra.mxu1 %v13643_v63  ;;  %9982 = vmatprep.subr.bf16.mxu0 %v13658_v17  ;;  %v13724_v63 = vcombine.high %v2183_v47, %v2191_v11  ;;  %v2198_v17 = vld [vmem:[%s16540_s19 + $0x8a0] sm:$0xff]  ;;  %v13771_v11 = vcombine.low %v2231_v32, %v2239_v51 }
 0x3b2   : > { %10434 = vmatprep.subr.bf16.mxu1 %v13660_v23  ;;  %v2206_v23 = vld [vmem:[%s16540_s19 + $0x8e0] sm:$0xff] }
 0x3b3   : > { %9486 = vmatmul.mubr.bf16.gmra.mrb[120].mxu0 %v17708_v42  ;;  %v13737_v43 = vcombine.low %v2198_v17, %v2206_v23 }
 0x3b4   : > { %9938 = vmatmul.mubr.bf16.gmra.mrb[120].mxu1 %v17708_v42  ;;  %9983 = vmatpush1.bf16.msra.mxu0 %v13657_v10  ;;  %v2214_v10 = vld [vmem:[%s16540_s19 + $0x920] sm:$0xff] }
 0x3b5   : > { %10435 = vmatpush1.bf16.msra.mxu1 %v13659_v46  ;;  %9495 = vmatprep.mubr.bf16.mxu0 %v17732_v3  ;;  %v13738_v46 = vcombine.high %v2198_v17, %v2206_v23  ;;  %v2263_v17 = vld [vmem:[%s16540_s19 + $0xaa8] sm:$0xff] }
 0x3b6   : > { %9947 = vmatprep.mubr.bf16.mxu1 %v17732_v3  ;;  %9984 = vmatprep.subr.bf16.mxu0 %v13674_v30  ;;  %v2222_v30 = vld [vmem:[%s16540_s19 + $0x960] sm:$0xff]  ;;  %v2271_v23 = vld [vmem:[%s16540_s19 + $0xae8] sm:$0xff] }
 0x3b7   : > { %10436 = vmatprep.subr.bf16.mxu1 %v13676_v34  ;;  %v2215_v34 = vld [vmem:[%s16540_s19 + $0x928] sm:$0xff]  ;;  %v13753_v27 = vcombine.low %v2214_v10, %v2222_v30 }
 0x3b8   : > { %9985 = vmatpush1.bf16.msra.mxu0 %v13673_v24  ;;  %v13754_v24 = vcombine.high %v2214_v10, %v2222_v30  ;;  %v13755_v50 = vcombine.low %v2215_v34, %v2223_v35  ;;  %v13804_v10 = vcombine.high %v2263_v17, %v2271_v23  ;;  %v2287_v30 = vld [vmem:[%s16540_s19 + $0xb68] sm:$0xff] }
 0x3b9   : > { %10437 = vmatpush1.bf16.msra.mxu1 %v13675_v19  ;;  %9986 = vmatprep.subr.bf16.mxu0 %v13690_v38  ;;  %v13756_v19 = vcombine.high %v2215_v34, %v2223_v35  ;;  %v2230_v38 = vld [vmem:[%s16540_s19 + $0x9a0] sm:$0xff]  ;;  %v13803_v35 = vcombine.low %v2263_v17, %v2271_v23  ;;  %v2327_v17 = vld [vmem:[%s16540_s19 + $0xca8] sm:$0xff] }
 0x3ba   : > { %10438 = vmatprep.subr.bf16.mxu1 %v13692_v58  ;;  %v2238_v58 = vld [vmem:[%s16540_s19 + $0x9e0] sm:$0xff]  ;;  %v2335_v23 = vld [vmem:[%s16540_s19 + $0xce8] sm:$0xff] }
 0x3bb   : > { %9496 = vmatmul.mubr.bf16.gmra.mrb[124].mxu0 %v17728_v33  ;;  %v13769_v47 = vcombine.low %v2230_v38, %v2238_v58 }
 0x3bc   : > { %9948 = vmatmul.mubr.bf16.gmra.mrb[124].mxu1 %v17728_v33  ;;  %9987 = vmatpush1.bf16.msra.mxu0 %v13689_v14  ;;  %v2246_v14 = vld [vmem:[%s16540_s19 + $0xa20] sm:$0xff] }
 0x3bd   : > { %10439 = vmatpush1.bf16.msra.mxu1 %v13691_v45  ;;  %9990 = vmatprep.mubr.bf16.mxu0 %v16786_v31  ;;  %v13770_v45 = vcombine.high %v2230_v38, %v2238_v58  ;;  %v2295_v38 = vld [vmem:[%s16540_s19 + $0xba8] sm:$0xff] }
 0x3be   : > { %10442 = vmatprep.mubr.bf16.mxu1 %v16786_v31  ;;  %9988 = vmatprep.subr.bf16.mxu0 %v13706_v21  ;;  %v2254_v21 = vld [vmem:[%s16540_s19 + $0xa60] sm:$0xff]  ;;  %v2303_v58 = vld [vmem:[%s16540_s19 + $0xbe8] sm:$0xff] }
 0x3bf   : > { %10440 = vmatprep.subr.bf16.mxu1 %v13708_v55  ;;  %v2247_v55 = vld [vmem:[%s16540_s19 + $0xa28] sm:$0xff]  ;;  %v13785_v48 = vcombine.low %v2246_v14, %v2254_v21 }
 0x3c0   : > { %9989 = vmatpush1.bf16.msra.mxu0 %v13705_v13  ;;  %v13786_v13 = vcombine.high %v2246_v14, %v2254_v21  ;;  %v13787_v61 = vcombine.low %v2247_v55, %v2255_v60  ;;  %v13836_v14 = vcombine.high %v2295_v38, %v2303_v58  ;;  %v2319_v21 = vld [vmem:[%s16540_s19 + $0xc68] sm:$0xff] }
 0x3c1   : > { %10441 = vmatpush1.bf16.msra.mxu1 %v13707_v0  ;;  %10071 = vmatprep.subr.bf16.mxu0 %v13722_v5  ;;  %v13788_v0 = vcombine.high %v2247_v55, %v2255_v60  ;;  %v2262_v5 = vld [vmem:[%s16540_s19 + $0xaa0] sm:$0xff]  ;;  %v20670_v55 = vld [vmem:[#allocation31_spill] sm:$0xff] }
 0x3c2   : > { %10523 = vmatprep.subr.bf16.mxu1 %v13724_v63  ;;  %v2270_v63 = vld [vmem:[%s16540_s19 + $0xae0] sm:$0xff] }
 0x3c3   : > { %9991 = vmatmul.mubr.bf16.vlgmr.msra.gmra.mrb[128].mxu0 %v16784_v29  ;;  %v13801_v34 = vcombine.low %v2262_v5, %v2270_v63 }
 0x3c4   : > { %10443 = vmatmul.mubr.bf16.vlgmr.msra.gmra.mrb[128].mxu1 %v16784_v29  ;;  %10072 = vmatpush1.bf16.msra.mxu0 %v13721_v49  ;;  %v2278_v49 = vld [vmem:[%s16540_s19 + $0xb20] sm:$0xff] }
 0x3c5   : > { %10524 = vmatpush1.bf16.msra.mxu1 %v13723_v26  ;;  %10000 = vmatprep.mubr.bf16.mxu0 %v16844_v12  ;;  %v13802_v26 = vcombine.high %v2262_v5, %v2270_v63  ;;  %v2326_v5 = vld [vmem:[%s16540_s19 + $0xca0] sm:$0xff] }
 0x3c6   : > { %10452 = vmatprep.mubr.bf16.mxu1 %v16844_v12  ;;  %10073 = vmatprep.subr.bf16.mxu0 %v13738_v46  ;;  %v2286_v46 = vld [vmem:[%s16540_s19 + $0xb60] sm:$0xff] }
 0x3c7   : > { %10525 = vmatprep.subr.bf16.mxu1 %v13740_v2  ;;  %v2279_v2 = vld [vmem:[%s16540_s19 + $0xb28] sm:$0xff]  ;;  %v13817_v32 = vcombine.low %v2278_v49, %v2286_v46  ;;  %v2334_v63 = vld [vmem:[%s16540_s19 + $0xce0] sm:$0xff] }
 0x3c8   : > { %10074 = vmatpush1.bf16.msra.mxu0 %v13737_v43  ;;  %v13818_v43 = vcombine.high %v2278_v49, %v2286_v46  ;;  %v13819_v51 = vcombine.low %v2279_v2, %v2287_v30  ;;  %v2342_v49 = vld [vmem:[%s16540_s19 + $0xd20] sm:$0xff] }
 0x3c9   : > { %10526 = vmatpush1.bf16.msra.mxu1 %v13739_v25  ;;  %10075 = vmatprep.subr.bf16.mxu0 %v13754_v24  ;;  %v13820_v25 = vcombine.high %v2279_v2, %v2287_v30  ;;  %v2294_v24 = vld [vmem:[%s16540_s19 + $0xba0] sm:$0xff]  ;;  %v2343_v2 = vld [vmem:[%s16540_s19 + $0xd28] sm:$0xff] }
 0x3ca   : > { %10527 = vmatprep.subr.bf16.mxu1 %v13756_v19  ;;  %v2302_v19 = vld [vmem:[%s16540_s19 + $0xbe0] sm:$0xff]  ;;  %v2351_v30 = vld [vmem:[%s16540_s19 + $0xd68] sm:$0xff] }
 0x3cb   : > { %10001 = vmatmul.mubr.bf16.gmra.mrb[132].mxu0 %v20638_v18  ;;  %v13833_v60 = vcombine.low %v2294_v24, %v2302_v19  ;;  %v2350_v46 = vld [vmem:[%s16540_s19 + $0xd60] sm:$0xff] }
 0x3cc   : > { %10453 = vmatmul.mubr.bf16.gmra.mrb[132].mxu1 %v20638_v18  ;;  %10076 = vmatpush1.bf16.msra.mxu0 %v13753_v27  ;;  %v2310_v27 = vld [vmem:[%s16540_s19 + $0xc20] sm:$0xff] }
 0x3cd   : > { %10528 = vmatpush1.bf16.msra.mxu1 %v13755_v50  ;;  %10010 = vmatprep.mubr.bf16.mxu0 %v20639_v44  ;;  %v13834_v50 = vcombine.high %v2294_v24, %v2302_v19  ;;  %v13882_v24 = vcombine.high %v2342_v49, %v2350_v46  ;;  %v13884_v19 = vcombine.high %v2343_v2, %v2351_v30 }
 0x3ce   : > { %10462 = vmatprep.mubr.bf16.mxu1 %v20639_v44  ;;  %10077 = vmatprep.subr.bf16.mxu0 %v13770_v45  ;;  %v2318_v45 = vld [vmem:[%s16540_s19 + $0xc60] sm:$0xff] }
 0x3cf   : > { %10529 = vmatprep.subr.bf16.mxu1 %v13772_v4  ;;  %v2311_v4 = vld [vmem:[%s16540_s19 + $0xc28] sm:$0xff] }
 0x3d0   : > { %10078 = vmatpush1.bf16.msra.mxu0 %v13769_v47  ;;  %v13835_v47 = vcombine.low %v2295_v38, %v2303_v58  ;;  %v2358_v38 = vld [vmem:[%s16540_s19 + $0xda0] sm:$0xff] }
 0x3d1   : > { %10530 = vmatpush1.bf16.msra.mxu1 %v13771_v11  ;;  %10079 = vmatprep.subr.bf16.mxu0 %v13786_v13  ;;  %v20671_v11 = vld [vmem:[#allocation36_spill] sm:$0xff]  ;;  %v13850_v13 = vcombine.high %v2310_v27, %v2318_v45 }
 0x3d2   : > { %10531 = vmatprep.subr.bf16.mxu1 %v13788_v0  ;;  %v13852_v0 = vcombine.high %v2311_v4, %v2319_v21  ;;  %v2366_v58 = vld [vmem:[%s16540_s19 + $0xde0] sm:$0xff] }
 0x3d3   : > { %10011 = vmatmul.mubr.bf16.gmra.mrb[136].mxu0 %v20640_v53 }
 0x3d4   : > { %10463 = vmatmul.mubr.bf16.gmra.mrb[136].mxu1 %v20640_v53  ;;  %10080 = vmatpush1.bf16.msra.mxu0 %v13785_v48  ;;  %v13849_v48 = vcombine.low %v2310_v27, %v2318_v45  ;;  %v13881_v27 = vcombine.low %v2342_v49, %v2350_v46  ;;  %v13898_v45 = vcombine.high %v2358_v38, %v2366_v58  ;;  %v2391_v49 = vld [vmem:[%s16540_s19 + $0xea8] sm:$0xff] }
 0x3d5   : > { %10532 = vmatpush1.bf16.msra.mxu1 %v13787_v61  ;;  %10020 = vmatprep.mubr.bf16.mxu0 %v20641_v39  ;;  %v13851_v61 = vcombine.low %v2311_v4, %v2319_v21  ;;  %v2382_v21 = vld [vmem:[%s16540_s19 + $0xe60] sm:$0xff] }
 0x3d6   : > { %10472 = vmatprep.mubr.bf16.mxu1 %v20641_v39  ;;  %10081 = vmatprep.subr.bf16.mxu0 %v13802_v26  ;;  %v13866_v26 = vcombine.high %v2326_v5, %v2334_v63 }
 0x3d7   : > { %10533 = vmatprep.subr.bf16.mxu1 %v13804_v10  ;;  %v13868_v10 = vcombine.high %v2327_v17, %v2335_v23 }
 0x3d8   : > { %10082 = vmatpush1.bf16.msra.mxu0 %v13801_v34  ;;  %v20672_v34 = vld [vmem:[#allocation35_spill] sm:$0xff] }
 0x3d9   : > { %10534 = vmatpush1.bf16.msra.mxu1 %v13803_v35  ;;  %10083 = vmatprep.subr.bf16.mxu0 %v13818_v43  ;;  %v13865_v35 = vcombine.low %v2326_v5, %v2334_v63  ;;  %v13867_v43 = vcombine.low %v2327_v17, %v2335_v23  ;;  %v20675_v63 = vld [vmem:[#allocation44_spill] sm:$0xff] }
 0x3da   : > { %10535 = vmatprep.subr.bf16.mxu1 %v13820_v25  ;;  %v20673_v25 = vld [vmem:[#allocation40_spill] sm:$0xff] }
 0x3db   : > { %10021 = vmatmul.mubr.bf16.gmra.mrb[140].mxu0 %v20670_v55 }
 0x3dc   : > { %10473 = vmatmul.mubr.bf16.gmra.mrb[140].mxu1 %v20670_v55  ;;  %10084 = vmatpush1.bf16.msra.mxu0 %v13817_v32  ;;  %v2359_v32 = vld [vmem:[%s16540_s19 + $0xda8] sm:$0xff] }
 0x3dd   : > { %10536 = vmatpush1.bf16.msra.mxu1 %v13819_v51  ;;  %10030 = vmatprep.mubr.bf16.mxu0 %v20671_v11  ;;  %v2367_v51 = vld [vmem:[%s16540_s19 + $0xde8] sm:$0xff] }
 0x3de   : > { %10482 = vmatprep.mubr.bf16.mxu1 %v20671_v11  ;;  %10085 = vmatprep.subr.bf16.mxu0 %v13834_v50  ;;  %v13883_v50 = vcombine.low %v2343_v2, %v2351_v30  ;;  %v13900_v4 = vcombine.high %v2359_v32, %v2367_v51  ;;  %v13899_v5 = vcombine.low %v2359_v32, %v2367_v51  ;;  %v2406_v2 = vld [vmem:[%s16540_s19 + $0xf20] sm:$0xff]  ;;  %v20677_v51 = vld [vmem:[#allocation50_spill] sm:$0xff] }
 0x3df   : > { %10537 = vmatprep.subr.bf16.mxu1 %v13836_v14  ;;  %v2374_v14 = vld [vmem:[%s16540_s19 + $0xe20] sm:$0xff] }
 0x3e0   : > { %10086 = vmatpush1.bf16.msra.mxu0 %v13833_v60  ;;  %v2375_v60 = vld [vmem:[%s16540_s19 + $0xe28] sm:$0xff]  ;;  %v13914_v17 = vcombine.high %v2374_v14, %v2382_v21 }
 0x3e1   : > { %10538 = vmatpush1.bf16.msra.mxu1 %v13835_v47  ;;  %10087 = vmatprep.subr.bf16.mxu0 %v13850_v13  ;;  %v2383_v47 = vld [vmem:[%s16540_s19 + $0xe68] sm:$0xff]  ;;  %v20674_v13 = vld [vmem:[#allocation39_spill] sm:$0xff] }
 0x3e2   : > { %10539 = vmatprep.subr.bf16.mxu1 %v13852_v0  ;;  %v13897_v0 = vcombine.low %v2358_v38, %v2366_v58  ;;  %v13916_v23 = vcombine.high %v2375_v60, %v2383_v47  ;;  %v13915_v46 = vcombine.low %v2375_v60, %v2383_v47  ;;  %v20676_v38 = vld [vmem:[#allocation43_spill] sm:$0xff] }
 0x3e3   : > { %10031 = vmatmul.mubr.bf16.gmra.mrb[144].mxu0 %v20672_v34 }
 0x3e4   : > { %10483 = vmatmul.mubr.bf16.gmra.mrb[144].mxu1 %v20672_v34  ;;  %10088 = vmatpush1.bf16.msra.mxu0 %v13849_v48  ;;  %v2390_v48 = vld [vmem:[%s16540_s19 + $0xea0] sm:$0xff] }
 0x3e5   : > { %10540 = vmatpush1.bf16.msra.mxu1 %v13851_v61  ;;  %10040 = vmatprep.mubr.bf16.mxu0 %v20673_v25  ;;  %v2398_v61 = vld [vmem:[%s16540_s19 + $0xee0] sm:$0xff] }
 0x3e6   : > { %10492 = vmatprep.mubr.bf16.mxu1 %v20673_v25  ;;  %10089 = vmatprep.subr.bf16.mxu0 %v13866_v26  ;;  %v2399_v26 = vld [vmem:[%s16540_s19 + $0xee8] sm:$0xff]  ;;  %v13930_v30 = vcombine.high %v2390_v48, %v2398_v61  ;;  %v13929_v58 = vcombine.low %v2390_v48, %v2398_v61  ;;  %v18960_v34 = vld [vmem:[%s16540_s19 + $0x1c60] sm:$0xff] }
 0x3e7   : > { %10541 = vmatprep.subr.bf16.mxu1 %v13868_v10  ;;  %v13913_v10 = vcombine.low %v2374_v14, %v2382_v21  ;;  %v13931_v32 = vcombine.low %v2391_v49, %v2399_v26  ;;  %v2422_v14 = vld [vmem:[%s16540_s19 + $0xfa0] sm:$0xff]  ;;  %v2431_v21 = vld [vmem:[%s16540_s19 + $0xfe8] sm:$0xff] }
 0x3e8   : > { %10090 = vmatpush1.bf16.msra.mxu0 %v13865_v35  ;;  %v13932_v35 = vcombine.high %v2391_v49, %v2399_v26  ;;  %v2439_v48 = vld [vmem:[%s16540_s19 + $0x1028] sm:$0xff] }
 0x3e9   : > { %10542 = vmatpush1.bf16.msra.mxu1 %v13867_v43  ;;  %10091 = vmatprep.subr.bf16.mxu0 %v13882_v24  ;;  %v2414_v43 = vld [vmem:[%s16540_s19 + $0xf60] sm:$0xff]  ;;  %v2407_v24 = vld [vmem:[%s16540_s19 + $0xf28] sm:$0xff] }
 0x3ea   : > { %10543 = vmatprep.subr.bf16.mxu1 %v13884_v19  ;;  %v2415_v19 = vld [vmem:[%s16540_s19 + $0xf68] sm:$0xff]  ;;  %v13945_v60 = vcombine.low %v2406_v2, %v2414_v43 }
 0x3eb   : > { %10041 = vmatmul.mubr.bf16.gmra.mrb[148].mxu0 %v20674_v13  ;;  %v13947_v47 = vcombine.low %v2407_v24, %v2415_v19  ;;  %v2447_v61 = vld [vmem:[%s16540_s19 + $0x1068] sm:$0xff] }
 0x3ec   : > { %10493 = vmatmul.mubr.bf16.gmra.mrb[148].mxu1 %v20674_v13  ;;  %10092 = vmatpush1.bf16.msra.mxu0 %v13881_v27  ;;  %v13946_v27 = vcombine.high %v2406_v2, %v2414_v43  ;;  %v20678_v49 = vld [vmem:[#allocation49_spill] sm:$0xff]  ;;  %v2462_v43 = vld [vmem:[%s16540_s19 + $0x10e0] sm:$0xff] }
 0x3ed   : > { %10544 = vmatpush1.bf16.msra.mxu1 %v13883_v50  ;;  %10050 = vmatprep.mubr.bf16.mxu0 %v20675_v63  ;;  %v13948_v50 = vcombine.high %v2407_v24, %v2415_v19  ;;  %v2455_v24 = vld [vmem:[%s16540_s19 + $0x10a8] sm:$0xff] }
 0x3ee   : > { %10502 = vmatprep.mubr.bf16.mxu1 %v20675_v63  ;;  %10093 = vmatprep.subr.bf16.mxu0 %v13898_v45  ;;  %v2430_v45 = vld [vmem:[%s16540_s19 + $0xfe0] sm:$0xff]  ;;  %v2463_v19 = vld [vmem:[%s16540_s19 + $0x10e8] sm:$0xff] }
 0x3ef   : > { %10545 = vmatprep.subr.bf16.mxu1 %v13900_v4  ;;  %v2423_v4 = vld [vmem:[%s16540_s19 + $0xfa8] sm:$0xff]  ;;  %v13961_v26 = vcombine.low %v2422_v14, %v2430_v45 }
 0x3f0   : > { %10094 = vmatpush1.bf16.msra.mxu0 %v13897_v0  ;;  %v2438_v0 = vld [vmem:[%s16540_s19 + $0x1020] sm:$0xff] }
 0x3f1   : > { %10546 = vmatpush1.bf16.msra.mxu1 %v13899_v5  ;;  %10095 = vmatprep.subr.bf16.mxu0 %v13914_v17  ;;  %v13962_v5 = vcombine.high %v2422_v14, %v2430_v45  ;;  %v13964_v17 = vcombine.high %v2423_v4, %v2431_v21  ;;  %v13996_v14 = vcombine.high %v2455_v24, %v2463_v19  ;;  %v2478_v45 = vld [vmem:[%s16540_s19 + $0x1160] sm:$0xff] }
 0x3f2   : > { %10547 = vmatprep.subr.bf16.mxu1 %v13916_v23  ;;  %v2446_v23 = vld [vmem:[%s16540_s19 + $0x1060] sm:$0xff] }
 0x3f3   : > { %10051 = vmatmul.mubr.bf16.gmra.mrb[152].mxu0 %v20676_v38  ;;  %v13978_v2 = vcombine.high %v2438_v0, %v2446_v23 }
 0x3f4   : > { %10503 = vmatmul.mubr.bf16.gmra.mrb[152].mxu1 %v20676_v38  ;;  %10096 = vmatpush1.bf16.msra.mxu0 %v13913_v10  ;;  %v13963_v10 = vcombine.low %v2423_v4, %v2431_v21  ;;  %v2471_v4 = vld [vmem:[%s16540_s19 + $0x1128] sm:$0xff] }
 0x3f5   : > { %10548 = vmatpush1.bf16.msra.mxu1 %v13915_v46  ;;  %10060 = vmatprep.mubr.bf16.mxu0 %v20677_v51  ;;  %v20679_v46 = vld [vmem:[#allocation26_spill] sm:$0xff]  ;;  %v2479_v21 = vld [vmem:[%s16540_s19 + $0x1168] sm:$0xff] }
 0x3f6   : > { %10512 = vmatprep.mubr.bf16.mxu1 %v20677_v51  ;;  %10097 = vmatprep.subr.bf16.mxu0 %v13930_v30  ;;  %v13980_v30 = vcombine.high %v2439_v48, %v2447_v61 }
 0x3f7   : > { %10549 = vmatprep.subr.bf16.mxu1 %v13932_v35  ;;  %v2454_v35 = vld [vmem:[%s16540_s19 + $0x10a0] sm:$0xff] }
 0x3f8   : > { %10098 = vmatpush1.bf16.msra.mxu0 %v13929_v58  ;;  %v13977_v58 = vcombine.low %v2438_v0, %v2446_v23  ;;  %v13995_v0 = vcombine.low %v2455_v24, %v2463_v19  ;;  %v14012_v23 = vcombine.high %v2471_v4, %v2479_v21  ;;  %v2510_v19 = vld [vmem:[%s16540_s19 + $0x1260] sm:$0xff] }
 0x3f9   : > { %10550 = vmatpush1.bf16.msra.mxu1 %v13931_v32  ;;  %10099 = vmatprep.subr.bf16.mxu0 %v13946_v27  ;;  %v13979_v32 = vcombine.low %v2439_v48, %v2447_v61  ;;  %v2470_v27 = vld [vmem:[%s16540_s19 + $0x1120] sm:$0xff] }
 0x3fa   : > { %10551 = vmatprep.subr.bf16.mxu1 %v13948_v50  ;;  %v13994_v50 = vcombine.high %v2454_v35, %v2462_v43  ;;  %v2486_v48 = vld [vmem:[%s16540_s19 + $0x11a0] sm:$0xff] }
 0x3fb   : > { %10061 = vmatmul.mubr.bf16.gmra.mrb[156].mxu0 %v20678_v49  ;;  %v2494_v61 = vld [vmem:[%s16540_s19 + $0x11e0] sm:$0xff] }
 0x3fc   : > { %10513 = vmatmul.mubr.bf16.gmra.mrb[156].mxu1 %v20678_v49  ;;  %10100 = vmatpush1.bf16.msra.mxu0 %v13945_v60  ;;  %v20680_v60 = vld [vmem:[#allocation25_spill] sm:$0xff] }
 0x3fd   : > { %10552 = vmatpush1.bf16.msra.mxu1 %v13947_v47  ;;  %10103 = vmatprep.mubr.bf16.mxu0 %v20679_v46  ;;  %v13993_v47 = vcombine.low %v2454_v35, %v2462_v43  ;;  %v2502_v35 = vld [vmem:[%s16540_s19 + $0x1220] sm:$0xff]  ;;  %v14026_v43 = vcombine.high %v2486_v48, %v2494_v61  ;;  %v20705_v49 = vld [vmem:[#allocation65_spill] sm:$0xff] }
 0x3fe   : > { %10555 = vmatprep.mubr.bf16.mxu1 %v20679_v46  ;;  %10101 = vmatprep.subr.bf16.mxu0 %v13962_v5  ;;  %v20681_v5 = vld [vmem:[#allocation30_spill] sm:$0xff]  ;;  %v18926_v46 = vld [vmem:[%s16540_s19 + $0x1be0] sm:$0xff] }
 0x3ff   : > { %10553 = vmatprep.subr.bf16.mxu1 %v13964_v17  ;;  %v14010_v17 = vcombine.high %v2470_v27, %v2478_v45 }
 0x400   : > { %10102 = vmatpush1.bf16.msra.mxu0 %v13961_v26  ;;  %v2487_v26 = vld [vmem:[%s16540_s19 + $0x11a8] sm:$0xff] }
 0x401   : > { %10554 = vmatpush1.bf16.msra.mxu1 %v13963_v10  ;;  %10184 = vmatprep.subr.bf16.mxu0 %v13978_v2  ;;  %v2495_v10 = vld [vmem:[%s16540_s19 + $0x11e8] sm:$0xff]  ;;  %v14009_v2 = vcombine.low %v2470_v27, %v2478_v45  ;;  %v14025_v27 = vcombine.low %v2486_v48, %v2494_v61  ;;  %v20683_v45 = vld [vmem:[#allocation34_spill] sm:$0xff]  ;;  %v14041_v48 = vcombine.low %v2502_v35, %v2510_v19 }
 0x402   : > { %10636 = vmatprep.subr.bf16.mxu1 %v13980_v30  ;;  %v14011_v30 = vcombine.low %v2471_v4, %v2479_v21  ;;  %v14028_v24 = vcombine.high %v2487_v26, %v2495_v10  ;;  %v14042_v4 = vcombine.high %v2502_v35, %v2510_v19 }
 0x403   : > { %10104 = vmatmul.mubr.bf16.vlgmr.msra.gmra.mrb[128].mxu0 %v20680_v60 }
 0x404   : > { %10556 = vmatmul.mubr.bf16.vlgmr.msra.gmra.mrb[128].mxu1 %v20680_v60  ;;  %10185 = vmatpush1.bf16.msra.mxu0 %v13977_v58  ;;  %v2503_v58 = vld [vmem:[%s16540_s19 + $0x1228] sm:$0xff] }
 0x405   : > { %10637 = vmatpush1.bf16.msra.mxu1 %v13979_v32  ;;  %10113 = vmatprep.mubr.bf16.mxu0 %v20681_v5  ;;  %v2511_v32 = vld [vmem:[%s16540_s19 + $0x1268] sm:$0xff] }
 0x406   : > { %10565 = vmatprep.mubr.bf16.mxu1 %v20681_v5  ;;  %10186 = vmatprep.subr.bf16.mxu0 %v13994_v50  ;;  %v20682_v50 = vld [vmem:[#allocation29_spill] sm:$0xff]  ;;  %v14044_v21 = vcombine.high %v2503_v58, %v2511_v32  ;;  %v14043_v61 = vcombine.low %v2503_v58, %v2511_v32  ;;  %v20685_v58 = vld [vmem:[#allocation38_spill] sm:$0xff] }
 0x407   : > { %10638 = vmatprep.subr.bf16.mxu1 %v13996_v14  ;;  %v14027_v14 = vcombine.low %v2487_v26, %v2495_v10  ;;  %v2534_v26 = vld [vmem:[%s16540_s19 + $0x1320] sm:$0xff]  ;;  %v20704_v5 = vld [vmem:[#allocation54_spill] sm:$0xff] }
 0x408   : > { %10187 = vmatpush1.bf16.msra.mxu0 %v13993_v47  ;;  %v2518_v47 = vld [vmem:[%s16540_s19 + $0x12a0] sm:$0xff] }
 0x409   : > { %10639 = vmatpush1.bf16.msra.mxu1 %v13995_v0  ;;  %10188 = vmatprep.subr.bf16.mxu0 %v14010_v17  ;;  %v2526_v0 = vld [vmem:[%s16540_s19 + $0x12e0] sm:$0xff]  ;;  %v2519_v17 = vld [vmem:[%s16540_s19 + $0x12a8] sm:$0xff] }
 0x40a   : > { %10640 = vmatprep.subr.bf16.mxu1 %v14012_v23  ;;  %v2527_v23 = vld [vmem:[%s16540_s19 + $0x12e8] sm:$0xff]  ;;  %v14058_v10 = vcombine.high %v2518_v47, %v2526_v0  ;;  %v14057_v35 = vcombine.low %v2518_v47, %v2526_v0 }
 0x40b   : > { %10114 = vmatmul.mubr.bf16.gmra.mrb[132].mxu0 %v20682_v50  ;;  %v14059_v19 = vcombine.low %v2519_v17, %v2527_v23 }
 0x40c   : > { %10566 = vmatmul.mubr.bf16.gmra.mrb[132].mxu1 %v20682_v50  ;;  %10189 = vmatpush1.bf16.msra.mxu0 %v14009_v2  ;;  %v14060_v2 = vcombine.high %v2519_v17, %v2527_v23  ;;  %v2566_v17 = vld [vmem:[%s16540_s19 + $0x1420] sm:$0xff] }
 0x40d   : > { %10641 = vmatpush1.bf16.msra.mxu1 %v14011_v30  ;;  %10123 = vmatprep.mubr.bf16.mxu0 %v20683_v45  ;;  %v2542_v30 = vld [vmem:[%s16540_s19 + $0x1360] sm:$0xff] }
 0x40e   : > { %10575 = vmatprep.mubr.bf16.mxu1 %v20683_v45  ;;  %10190 = vmatprep.subr.bf16.mxu0 %v14026_v43  ;;  %v2535_v43 = vld [vmem:[%s16540_s19 + $0x1328] sm:$0xff]  ;;  %v14074_v32 = vcombine.high %v2534_v26, %v2542_v30  ;;  %v14073_v47 = vcombine.low %v2534_v26, %v2542_v30 }
 0x40f   : > { %10642 = vmatprep.subr.bf16.mxu1 %v14028_v24  ;;  %v2543_v24 = vld [vmem:[%s16540_s19 + $0x1368] sm:$0xff] }
 0x410   : > { %10191 = vmatpush1.bf16.msra.mxu0 %v14025_v27  ;;  %v20684_v45 = vld [vmem:[#allocation33_spill] sm:$0xff]  ;;  %v14076_v27 = vcombine.high %v2535_v43, %v2543_v24  ;;  %v14075_v0 = vcombine.low %v2535_v43, %v2543_v24  ;;  %v20687_v43 = vld [vmem:[#allocation42_spill] sm:$0xff] }
 0x411   : > { %10643 = vmatpush1.bf16.msra.mxu1 %v14027_v14  ;;  %10192 = vmatprep.subr.bf16.mxu0 %v14042_v4  ;;  %v2550_v14 = vld [vmem:[%s16540_s19 + $0x13a0] sm:$0xff] }
 0x412   : > { %10644 = vmatprep.subr.bf16.mxu1 %v14044_v21  ;;  %v2558_v4 = vld [vmem:[%s16540_s19 + $0x13e0] sm:$0xff]  ;;  %v2551_v21 = vld [vmem:[%s16540_s19 + $0x13a8] sm:$0xff] }
 0x413   : > { %10124 = vmatmul.mubr.bf16.gmra.mrb[136].mxu0 %v20684_v45  ;;  %v14090_v23 = vcombine.high %v2550_v14, %v2558_v4  ;;  %v14089_v26 = vcombine.low %v2550_v14, %v2558_v4  ;;  %v2598_v4 = vld [vmem:[%s16540_s19 + $0x1520] sm:$0xff] }
 0x414   : > { %10576 = vmatmul.mubr.bf16.gmra.mrb[136].mxu1 %v20684_v45  ;;  %10193 = vmatpush1.bf16.msra.mxu0 %v14041_v48  ;;  %v2559_v45 = vld [vmem:[%s16540_s19 + $0x13e8] sm:$0xff] }
 0x415   : > { %10645 = vmatpush1.bf16.msra.mxu1 %v14043_v61  ;;  %10133 = vmatprep.mubr.bf16.mxu0 %v20685_v58  ;;  %v14092_v48 = vcombine.high %v2551_v21, %v2559_v45  ;;  %v2574_v61 = vld [vmem:[%s16540_s19 + $0x1460] sm:$0xff]  ;;  %v14091_v30 = vcombine.low %v2551_v21, %v2559_v45 }
 0x416   : > { %10585 = vmatprep.mubr.bf16.mxu1 %v20685_v58  ;;  %10194 = vmatprep.subr.bf16.mxu0 %v14058_v10  ;;  %v2567_v10 = vld [vmem:[%s16540_s19 + $0x1428] sm:$0xff]  ;;  %v14106_v24 = vcombine.high %v2566_v17, %v2574_v61  ;;  %v14105_v14 = vcombine.low %v2566_v17, %v2574_v61 }
 0x417   : > { %10646 = vmatprep.subr.bf16.mxu1 %v14060_v2  ;;  %v2575_v2 = vld [vmem:[%s16540_s19 + $0x1468] sm:$0xff] }
 0x418   : > { %10195 = vmatpush1.bf16.msra.mxu0 %v14057_v35  ;;  %v20686_v58 = vld [vmem:[#allocation37_spill] sm:$0xff]  ;;  %v14108_v35 = vcombine.high %v2567_v10, %v2575_v2  ;;  %v14107_v45 = vcombine.low %v2567_v10, %v2575_v2  ;;  %v20689_v10 = vld [vmem:[#allocation47_spill] sm:$0xff] }
 0x419   : > { %10647 = vmatpush1.bf16.msra.mxu1 %v14059_v19  ;;  %10196 = vmatprep.subr.bf16.mxu0 %v14074_v32  ;;  %v2582_v19 = vld [vmem:[%s16540_s19 + $0x14a0] sm:$0xff] }
 0x41a   : > { %10648 = vmatprep.subr.bf16.mxu1 %v14076_v27  ;;  %v2590_v32 = vld [vmem:[%s16540_s19 + $0x14e0] sm:$0xff]  ;;  %v2583_v27 = vld [vmem:[%s16540_s19 + $0x14a8] sm:$0xff] }
 0x41b   : > { %10134 = vmatmul.mubr.bf16.gmra.mrb[140].mxu0 %v20686_v58  ;;  %v14122_v21 = vcombine.high %v2582_v19, %v2590_v32  ;;  %v14121_v17 = vcombine.low %v2582_v19, %v2590_v32  ;;  %v2630_v32 = vld [vmem:[%s16540_s19 + $0x1620] sm:$0xff] }
 0x41c   : > { %10586 = vmatmul.mubr.bf16.gmra.mrb[140].mxu1 %v20686_v58  ;;  %10197 = vmatpush1.bf16.msra.mxu0 %v14073_v47  ;;  %v2591_v58 = vld [vmem:[%s16540_s19 + $0x14e8] sm:$0xff] }
 0x41d   : > { %10649 = vmatpush1.bf16.msra.mxu1 %v14075_v0  ;;  %10143 = vmatprep.mubr.bf16.mxu0 %v20687_v43  ;;  %v14124_v47 = vcombine.high %v2583_v27, %v2591_v58  ;;  %v2606_v0 = vld [vmem:[%s16540_s19 + $0x1560] sm:$0xff]  ;;  %v14123_v61 = vcombine.low %v2583_v27, %v2591_v58 }
 0x41e   : > { %10595 = vmatprep.mubr.bf16.mxu1 %v20687_v43  ;;  %10198 = vmatprep.subr.bf16.mxu0 %v14090_v23  ;;  %v2599_v23 = vld [vmem:[%s16540_s19 + $0x1528] sm:$0xff]  ;;  %v14138_v2 = vcombine.high %v2598_v4, %v2606_v0  ;;  %v14137_v19 = vcombine.low %v2598_v4, %v2606_v0 }
 0x41f   : > { %10650 = vmatprep.subr.bf16.mxu1 %v14092_v48  ;;  %v2607_v48 = vld [vmem:[%s16540_s19 + $0x1568] sm:$0xff] }
 0x420   : > { %10199 = vmatpush1.bf16.msra.mxu0 %v14089_v26  ;;  %v20688_v43 = vld [vmem:[#allocation41_spill] sm:$0xff]  ;;  %v14140_v26 = vcombine.high %v2599_v23, %v2607_v48  ;;  %v14139_v58 = vcombine.low %v2599_v23, %v2607_v48  ;;  %v20691_v23 = vld [vmem:[#allocation52_spill] sm:$0xff] }
 0x421   : > { %10651 = vmatpush1.bf16.msra.mxu1 %v14091_v30  ;;  %10200 = vmatprep.subr.bf16.mxu0 %v14106_v24  ;;  %v2614_v30 = vld [vmem:[%s16540_s19 + $0x15a0] sm:$0xff] }
 0x422   : > { %10652 = vmatprep.subr.bf16.mxu1 %v14108_v35  ;;  %v2622_v24 = vld [vmem:[%s16540_s19 + $0x15e0] sm:$0xff]  ;;  %v2615_v35 = vld [vmem:[%s16540_s19 + $0x15a8] sm:$0xff] }
 0x423   : > { %10144 = vmatmul.mubr.bf16.gmra.mrb[144].mxu0 %v20688_v43  ;;  %v14154_v27 = vcombine.high %v2614_v30, %v2622_v24  ;;  %v14153_v4 = vcombine.low %v2614_v30, %v2622_v24  ;;  %v2662_v24 = vld [vmem:[%s16540_s19 + $0x1720] sm:$0xff] }
 0x424   : > { %10596 = vmatmul.mubr.bf16.gmra.mrb[144].mxu1 %v20688_v43  ;;  %10201 = vmatpush1.bf16.msra.mxu0 %v14105_v14  ;;  %v2623_v43 = vld [vmem:[%s16540_s19 + $0x15e8] sm:$0xff] }
 0x425   : > { %10653 = vmatpush1.bf16.msra.mxu1 %v14107_v45  ;;  %10153 = vmatprep.mubr.bf16.mxu0 %v20689_v10  ;;  %v14156_v14 = vcombine.high %v2615_v35, %v2623_v43  ;;  %v2638_v45 = vld [vmem:[%s16540_s19 + $0x1660] sm:$0xff]  ;;  %v14155_v0 = vcombine.low %v2615_v35, %v2623_v43 }
 0x426   : > { %10605 = vmatprep.mubr.bf16.mxu1 %v20689_v10  ;;  %10202 = vmatprep.subr.bf16.mxu0 %v14122_v21  ;;  %v2631_v21 = vld [vmem:[%s16540_s19 + $0x1628] sm:$0xff]  ;;  %v20690_v10 = vld [vmem:[#allocation46_spill] sm:$0xff]  ;;  %v14170_v48 = vcombine.high %v2630_v32, %v2638_v45  ;;  %v14169_v30 = vcombine.low %v2630_v32, %v2638_v45 }
 0x427   : > { %10654 = vmatprep.subr.bf16.mxu1 %v14124_v47  ;;  %v2639_v47 = vld [vmem:[%s16540_s19 + $0x1668] sm:$0xff] }
 0x428   : > { %10203 = vmatpush1.bf16.msra.mxu0 %v14121_v17  ;;  %v14172_v17 = vcombine.high %v2631_v21, %v2639_v47  ;;  %v14171_v43 = vcombine.low %v2631_v21, %v2639_v47  ;;  %v20693_v21 = vld [vmem:[#allocation58_spill] sm:$0xff] }
 0x429   : > { %10655 = vmatpush1.bf16.msra.mxu1 %v14123_v61  ;;  %10204 = vmatprep.subr.bf16.mxu0 %v14138_v2  ;;  %v2646_v61 = vld [vmem:[%s16540_s19 + $0x16a0] sm:$0xff] }
 0x42a   : > { %10656 = vmatprep.subr.bf16.mxu1 %v14140_v26  ;;  %v2654_v2 = vld [vmem:[%s16540_s19 + $0x16e0] sm:$0xff]  ;;  %v2647_v26 = vld [vmem:[%s16540_s19 + $0x16a8] sm:$0xff] }
 0x42b   : > { %10154 = vmatmul.mubr.bf16.gmra.mrb[148].mxu0 %v20690_v10  ;;  %v14186_v35 = vcombine.high %v2646_v61, %v2654_v2  ;;  %v14185_v32 = vcombine.low %v2646_v61, %v2654_v2  ;;  %v2694_v2 = vld [vmem:[%s16540_s19 + $0x1820] sm:$0xff] }
 0x42c   : > { %10606 = vmatmul.mubr.bf16.gmra.mrb[148].mxu1 %v20690_v10  ;;  %10205 = vmatpush1.bf16.msra.mxu0 %v14137_v19  ;;  %v2655_v10 = vld [vmem:[%s16540_s19 + $0x16e8] sm:$0xff] }
 0x42d   : > { %10657 = vmatpush1.bf16.msra.mxu1 %v14139_v58  ;;  %10163 = vmatprep.mubr.bf16.mxu0 %v20691_v23  ;;  %v14188_v19 = vcombine.high %v2647_v26, %v2655_v10  ;;  %v2670_v58 = vld [vmem:[%s16540_s19 + $0x1760] sm:$0xff]  ;;  %v14187_v45 = vcombine.low %v2647_v26, %v2655_v10 }
 0x42e   : > { %10615 = vmatprep.mubr.bf16.mxu1 %v20691_v23  ;;  %10206 = vmatprep.subr.bf16.mxu0 %v14154_v27  ;;  %v2663_v27 = vld [vmem:[%s16540_s19 + $0x1728] sm:$0xff]  ;;  %v20692_v23 = vld [vmem:[#allocation51_spill] sm:$0xff]  ;;  %v14202_v47 = vcombine.high %v2662_v24, %v2670_v58  ;;  %v14201_v61 = vcombine.low %v2662_v24, %v2670_v58 }
 0x42f   : > { %10658 = vmatprep.subr.bf16.mxu1 %v14156_v14  ;;  %v2671_v14 = vld [vmem:[%s16540_s19 + $0x1768] sm:$0xff] }
 0x430   : > { %10207 = vmatpush1.bf16.msra.mxu0 %v14153_v4  ;;  %v14204_v4 = vcombine.high %v2663_v27, %v2671_v14  ;;  %v14203_v10 = vcombine.low %v2663_v27, %v2671_v14  ;;  %v20695_v27 = vld [vmem:[#allocation56_spill] sm:$0xff] }
 0x431   : > { %10659 = vmatpush1.bf16.msra.mxu1 %v14155_v0  ;;  %10208 = vmatprep.subr.bf16.mxu0 %v14170_v48  ;;  %v2678_v0 = vld [vmem:[%s16540_s19 + $0x17a0] sm:$0xff] }
 0x432   : > { %10660 = vmatprep.subr.bf16.mxu1 %v14172_v17  ;;  %v2686_v48 = vld [vmem:[%s16540_s19 + $0x17e0] sm:$0xff]  ;;  %v2679_v17 = vld [vmem:[%s16540_s19 + $0x17a8] sm:$0xff] }
 0x433   : > { %10164 = vmatmul.mubr.bf16.gmra.mrb[152].mxu0 %v20692_v23  ;;  %v14218_v26 = vcombine.high %v2678_v0, %v2686_v48  ;;  %v14217_v24 = vcombine.low %v2678_v0, %v2686_v48  ;;  %v2726_v48 = vld [vmem:[%s16540_s19 + $0x1920] sm:$0xff] }
 0x434   : > { %10616 = vmatmul.mubr.bf16.gmra.mrb[152].mxu1 %v20692_v23  ;;  %10209 = vmatpush1.bf16.msra.mxu0 %v14169_v30  ;;  %v2687_v23 = vld [vmem:[%s16540_s19 + $0x17e8] sm:$0xff] }
 0x435   : > { %10661 = vmatpush1.bf16.msra.mxu1 %v14171_v43  ;;  %10173 = vmatprep.mubr.bf16.mxu0 %v20693_v21  ;;  %v14220_v30 = vcombine.high %v2679_v17, %v2687_v23  ;;  %v2702_v43 = vld [vmem:[%s16540_s19 + $0x1860] sm:$0xff]  ;;  %v14219_v58 = vcombine.low %v2679_v17, %v2687_v23 }
 0x436   : > { %10625 = vmatprep.mubr.bf16.mxu1 %v20693_v21  ;;  %10210 = vmatprep.subr.bf16.mxu0 %v14186_v35  ;;  %v2695_v35 = vld [vmem:[%s16540_s19 + $0x1828] sm:$0xff]  ;;  %v14234_v14 = vcombine.high %v2694_v2, %v2702_v43  ;;  %v14233_v0 = vcombine.low %v2694_v2, %v2702_v43 }
 0x437   : > { %10662 = vmatprep.subr.bf16.mxu1 %v14188_v19  ;;  %v2703_v19 = vld [vmem:[%s16540_s19 + $0x1868] sm:$0xff] }
 0x438   : > { %10211 = vmatpush1.bf16.msra.mxu0 %v14185_v32  ;;  %v20694_v21 = vld [vmem:[#allocation57_spill] sm:$0xff]  ;;  %v14236_v32 = vcombine.high %v2695_v35, %v2703_v19  ;;  %v14235_v23 = vcombine.low %v2695_v35, %v2703_v19  ;;  %v20697_v35 = vld [vmem:[#allocation60_spill] sm:$0xff] }
 0x439   : > { %10663 = vmatpush1.bf16.msra.mxu1 %v14187_v45  ;;  %10212 = vmatprep.subr.bf16.mxu0 %v14202_v47  ;;  %v2710_v45 = vld [vmem:[%s16540_s19 + $0x18a0] sm:$0xff] }
 0x43a   : > { %10664 = vmatprep.subr.bf16.mxu1 %v14204_v4  ;;  %v2718_v47 = vld [vmem:[%s16540_s19 + $0x18e0] sm:$0xff]  ;;  %v2711_v4 = vld [vmem:[%s16540_s19 + $0x18a8] sm:$0xff] }
 0x43b   : > { %10174 = vmatmul.mubr.bf16.gmra.mrb[156].mxu0 %v20694_v21  ;;  %v14250_v17 = vcombine.high %v2710_v45, %v2718_v47  ;;  %v14249_v2 = vcombine.low %v2710_v45, %v2718_v47  ;;  %v2758_v47 = vld [vmem:[%s16540_s19 + $0x1a20] sm:$0xff] }
 0x43c   : > { %10626 = vmatmul.mubr.bf16.gmra.mrb[156].mxu1 %v20694_v21  ;;  %10213 = vmatpush1.bf16.msra.mxu0 %v14201_v61  ;;  %v2719_v21 = vld [vmem:[%s16540_s19 + $0x18e8] sm:$0xff] }
 0x43d   : > { %10665 = vmatpush1.bf16.msra.mxu1 %v14203_v10  ;;  %10216 = vmatprep.mubr.bf16.mxu0 %v20695_v27  ;;  %v14252_v61 = vcombine.high %v2711_v4, %v2719_v21  ;;  %v2734_v10 = vld [vmem:[%s16540_s19 + $0x1960] sm:$0xff]  ;;  %v14251_v43 = vcombine.low %v2711_v4, %v2719_v21 }
 0x43e   : > { %10668 = vmatprep.mubr.bf16.mxu1 %v20695_v27  ;;  %10214 = vmatprep.subr.bf16.mxu0 %v14218_v26  ;;  %v2727_v26 = vld [vmem:[%s16540_s19 + $0x1928] sm:$0xff]  ;;  %v20696_v27 = vld [vmem:[#allocation55_spill] sm:$0xff]  ;;  %v14266_v19 = vcombine.high %v2726_v48, %v2734_v10  ;;  %v14265_v45 = vcombine.low %v2726_v48, %v2734_v10 }
 0x43f   : > { %10666 = vmatprep.subr.bf16.mxu1 %v14220_v30  ;;  %v2735_v30 = vld [vmem:[%s16540_s19 + $0x1968] sm:$0xff] }
 0x440   : > { %10215 = vmatpush1.bf16.msra.mxu0 %v14217_v24  ;;  %v14268_v24 = vcombine.high %v2727_v26, %v2735_v30  ;;  %v14267_v21 = vcombine.low %v2727_v26, %v2735_v30  ;;  %v20699_v26 = vld [vmem:[#allocation62_spill] sm:$0xff] }
 0x441   : > { %10667 = vmatpush1.bf16.msra.mxu1 %v14219_v58  ;;  %10297 = vmatprep.subr.bf16.mxu0 %v14234_v14  ;;  %v2742_v58 = vld [vmem:[%s16540_s19 + $0x19a0] sm:$0xff] }
 0x442   : > { %10749 = vmatprep.subr.bf16.mxu1 %v14236_v32  ;;  %v2750_v14 = vld [vmem:[%s16540_s19 + $0x19e0] sm:$0xff]  ;;  %v2743_v32 = vld [vmem:[%s16540_s19 + $0x19a8] sm:$0xff] }
 0x443   : > { %10217 = vmatmul.mubr.bf16.vlgmr.msra.gmra.mrb[128].mxu0 %v20696_v27  ;;  %v14282_v4 = vcombine.high %v2742_v58, %v2750_v14  ;;  %v14281_v48 = vcombine.low %v2742_v58, %v2750_v14  ;;  %v18896_v14 = vld [vmem:[%s16540_s19 + $0x1b20] sm:$0xff] }
 0x444   : > { %10669 = vmatmul.mubr.bf16.vlgmr.msra.gmra.mrb[128].mxu1 %v20696_v27  ;;  %10298 = vmatpush1.bf16.msra.mxu0 %v14233_v0  ;;  %v2751_v27 = vld [vmem:[%s16540_s19 + $0x19e8] sm:$0xff] }
 0x445   : > { %10750 = vmatpush1.bf16.msra.mxu1 %v14235_v23  ;;  %10226 = vmatprep.mubr.bf16.mxu0 %v20697_v35  ;;  %v14284_v0 = vcombine.high %v2743_v32, %v2751_v27  ;;  %v2766_v23 = vld [vmem:[%s16540_s19 + $0x1a60] sm:$0xff]  ;;  %v14283_v10 = vcombine.low %v2743_v32, %v2751_v27 }
 0x446   : > { %10678 = vmatprep.mubr.bf16.mxu1 %v20697_v35  ;;  %10299 = vmatprep.subr.bf16.mxu0 %v14250_v17  ;;  %v2759_v17 = vld [vmem:[%s16540_s19 + $0x1a28] sm:$0xff]  ;;  %v20698_v35 = vld [vmem:[#allocation59_spill] sm:$0xff]  ;;  %v14298_v30 = vcombine.high %v2758_v47, %v2766_v23  ;;  %v14297_v27 = vcombine.low %v2758_v47, %v2766_v23  ;;  %v15994_v47 = vld [vmem:[%s18138_s6] sm:$0xff] }
 0x447   : > { %10751 = vmatprep.subr.bf16.mxu1 %v14252_v61  ;;  %v2767_v61 = vld [vmem:[%s16540_s19 + $0x1a68] sm:$0xff]  ;;  %v18920_v60 = vrot.slane %v15994_v47, %v20704_v5 }
 0x448   : > { %10300 = vmatpush1.bf16.msra.mxu0 %v14249_v2  ;;  %v14300_v2 = vcombine.high %v2759_v17, %v2767_v61  ;;  %v14299_v58 = vcombine.low %v2759_v17, %v2767_v61  ;;  %v20701_v23 = vld [vmem:[#allocation45_spill] sm:$0xff] }
 0x449   : > { %10752 = vmatpush1.bf16.msra.mxu1 %v14251_v43  ;;  %10301 = vmatprep.subr.bf16.mxu0 %v14266_v19  ;;  %v2774_v43 = vld [vmem:[%s16540_s19 + $0x1aa0] sm:$0xff]  ;;  %v18911_v17 = vrot.slane %v15994_v47, %v20701_v23  ;;  %v20702_v61 = vld [vmem:[#allocation53_spill] sm:$0xff] }
 0x44a   : > { %10753 = vmatprep.subr.bf16.mxu1 %v14268_v24  ;;  %v2782_v19 = vld [vmem:[%s16540_s19 + $0x1ae0] sm:$0xff]  ;;  %v2775_v24 = vld [vmem:[%s16540_s19 + $0x1aa8] sm:$0xff] }
 0x44b   : > { %10227 = vmatmul.mubr.bf16.gmra.mrb[132].mxu0 %v20698_v35  ;;  %v14314_v32 = vcombine.high %v2774_v43, %v2782_v19 }
 0x44c   : > { %10679 = vmatmul.mubr.bf16.gmra.mrb[132].mxu1 %v20698_v35  ;;  %10302 = vmatpush1.bf16.msra.mxu0 %v14265_v45  ;;  %v2783_v45 = vld [vmem:[%s16540_s19 + $0x1ae8] sm:$0xff] }
 0x44d   : > { %10754 = vmatpush1.bf16.msra.mxu1 %v14267_v21  ;;  %10236 = vmatprep.mubr.bf16.mxu0 %v20699_v26  ;;  %v14316_v21 = vcombine.high %v2775_v24, %v2783_v45  ;;  %v20700_v35 = vld [vmem:[#allocation61_spill] sm:$0xff] }
 0x44e   : > { %10688 = vmatprep.mubr.bf16.mxu1 %v20699_v26  ;;  %10303 = vmatprep.subr.bf16.mxu0 %v14282_v4  ;;  %v18899_v4 = vld [vmem:[%s16540_s19 + $0x1b60] sm:$0xff]  ;;  %v18905_v26 = vld [vmem:[%s16540_s19 + $0x1b68] sm:$0xff] }
 0x44f   : > { %10755 = vmatprep.subr.bf16.mxu1 %v14284_v0  ;;  %v18902_v0 = vld [vmem:[%s16540_s19 + $0x1b28] sm:$0xff] }
 0x450   : > { %10304 = vmatpush1.bf16.msra.mxu0 %v14281_v48  ;;  %v18914_v48 = vrot.slane %v15994_v47, %v20702_v61 }
 0x451   : > { %10756 = vmatpush1.bf16.msra.mxu1 %v14283_v10  ;;  %10305 = vmatprep.subr.bf16.mxu0 %v14298_v30  ;;  %v14313_v10 = vcombine.low %v2774_v43, %v2782_v19  ;;  %v14315_v30 = vcombine.low %v2775_v24, %v2783_v45  ;;  %v14330_v43 = vcombine.high %v18896_v14, %v18899_v4  ;;  %v18935_v24 = vld [vmem:[%s16540_s19 + $0x1ba8] sm:$0xff] }
 0x452   : > { %10757 = vmatprep.subr.bf16.mxu1 %v14300_v2  ;;  %v20703_v2 = vld [vmem:[#allocation48_spill] sm:$0xff]  ;;  %v14332_v19 = vcombine.high %v18902_v0, %v18905_v26  ;;  %v18938_v45 = vld [vmem:[%s16540_s19 + $0x1be8] sm:$0xff] }
 0x453   : > { %10237 = vmatmul.mubr.bf16.gmra.mrb[136].mxu0 %v20700_v35  ;;  %v18917_v50 = vrot.slane %v15994_v47, %v20703_v2  ;;  %v14329_v47 = vcombine.low %v18896_v14, %v18899_v4  ;;  %v14348_v4 = vcombine.high %v18935_v24, %v18938_v45 }
 0x454   : > { %10689 = vmatmul.mubr.bf16.gmra.mrb[136].mxu1 %v20700_v35  ;;  %10306 = vmatpush1.bf16.msra.mxu0 %v14297_v27  ;;  %v18923_v35 = vld [vmem:[%s16540_s19 + $0x1ba0] sm:$0xff] }
 0x455   : > { %10758 = vmatpush1.bf16.msra.mxu1 %v14299_v58  ;;  %10246 = vmatprep.mubr.bf16.mxu0 %v20705_v49  ;;  %v14346_v51 = vcombine.high %v18923_v35, %v18926_v46 }
 0x456   : > { %10698 = vmatprep.mubr.bf16.mxu1 %v20705_v49  ;;  %v9427_v27 = vpop.f32.mrb[96].mxu0  ;;  %10307 = vmatprep.subr.bf16.mxu0 %v14314_v32  ;;  %v14331_v49 = vcombine.low %v18902_v0, %v18905_v26 }
 0x457   : > { %v9879_v58 = vpop.f32.mrb[96].mxu1  ;;  %10759 = vmatprep.subr.bf16.mxu1 %v14316_v21  ;;  %v14828_v5 = vadd.f32 %v9427_v27, %v18911_v17  ;;  %v9429_v61 = vpop.f32.mrb[97].mxu0 }
 0x458   : > { %v14860_v2 = vadd.f32 %v9879_v58, %v18914_v48  ;;  %v9881_v23 = vpop.f32.mrb[97].mxu1  ;;  %v14829_v38 = vadd.f32 %v9429_v61, %v18917_v50  ;;  %10308 = vmatpush1.bf16.msra.mxu0 %v14313_v10  ;;  %v9431_v14 = vpop.f32.mrb[98].mxu0 }
 0x459   : > { %v14861_v32 = vadd.f32 %v9881_v23, %v18920_v60  ;;  %10760 = vmatpush1.bf16.msra.mxu1 %v14315_v30  ;;  %v9883_v21 = vpop.f32.mrb[98].mxu1  ;;  %v11770_v27 = vmax.f32 %v14828_v5, 0.0  ;;  %v14830_v0 = vadd.f32 %v9431_v14, %v18911_v17  ;;  %v9433_v63 = vpop.f32.mrb[99].mxu0  ;;  %10309 = vmatprep.subr.bf16.mxu0 %v14330_v43  ;;  %v18955_v23 = vld [vmem:[%s16540_s19 + $0x1c20] sm:$0xff]  ;;  %v18963_v5 = vld [vmem:[%s16540_s19 + $0x1c28] sm:$0xff] }
 0x45a   : > { %v11772_v26 = vmax.f32 %v14860_v2, 0.0  ;;  %v14862_v58 = vadd.f32 %v9883_v21, %v18914_v48  ;;  %v9885_v61 = vpop.f32.mrb[99].mxu1  ;;  %10761 = vmatprep.subr.bf16.mxu1 %v14332_v19  ;;  %v11771_v10 = vmax.f32 %v14829_v38, 0.0  ;;  %v14831_v13 = vadd.f32 %v9433_v63, %v18917_v50  ;;  %v18966_v2 = vld [vmem:[%s16540_s19 + $0x1c68] sm:$0xff] }
 0x45b   : > { %v11773_v30 = vmax.f32 %v14861_v32, 0.0  ;;  %v14863_v25 = vadd.f32 %v9885_v61, %v18920_v60  ;;  %v11786_v14 = vmax.f32 %v14830_v0, 0.0  ;;  %10247 = vmatmul.mubr.bf16.gmra.mrb[140].mxu0 %v17476_v54  ;;  %v14345_v63 = vcombine.low %v18923_v35, %v18926_v46  ;;  %v18975_v0 = vld [vmem:[%s16540_s19 + $0x1ca0] sm:$0xff] }
 0x45c   : > { %v11788_v21 = vmax.f32 %v14862_v58, 0.0  ;;  %10699 = vmatmul.mubr.bf16.gmra.mrb[140].mxu1 %v17476_v54  ;;  %v14347_v38 = vcombine.low %v18935_v24, %v18938_v45  ;;  %v14634_v43 = vpack.c.bf16 %v11771_v10, %v11770_v27  ;;  %v11787_v32 = vmax.f32 %v14831_v13, 0.0  ;;  %10310 = vmatpush1.bf16.msra.mxu0 %v14329_v47  ;;  %v18978_v58 = vld [vmem:[%s16540_s19 + $0x1ce0] sm:$0xff]  ;;  %v20706_v54 = vld [vmem:[#allocation67_spill] sm:$0xff]  ;;  %v18987_v24 = vld [vmem:[%s16540_s19 + $0x1ca8] sm:$0xff] }
 0x45d   : > { %v14635_v19 = vpack.c.bf16 %v11773_v30, %v11772_v26  ;;  %v11789_v61 = vmax.f32 %v14863_v25, 0.0  ;;  %10762 = vmatpush1.bf16.msra.mxu1 %v14331_v49  ;;  %10256 = vmatprep.mubr.bf16.mxu0 %v20706_v54  ;;  %v14362_v46 = vcombine.high %v18955_v23, %v18960_v34  ;;  %v14364_v35 = vcombine.high %v18963_v5, %v18966_v2  ;;  %v18990_v13 = vld [vmem:[%s16540_s19 + $0x1ce8] sm:$0xff] }
 0x45e   : > { %10708 = vmatprep.mubr.bf16.mxu1 %v20706_v54  ;;  %12792 = vst [vmem:[%s18241_s20 + $0x10] sm:$0xff] %v14634_v43  ;;  %v14642_v25 = vpack.c.bf16 %v11787_v32, %v11786_v14  ;;  %v9437_v45 = vpop.f32.mrb[100].mxu0  ;;  %10311 = vmatprep.subr.bf16.mxu0 %v14346_v51  ;;  %v14361_v27 = vcombine.low %v18955_v23, %v18960_v34 }
 0x45f   : > { %12793 = vst [vmem:[%s18241_s20 + $0x18] sm:$0xff] %v14635_v19  ;;  %v14643_v49 = vpack.c.bf16 %v11789_v61, %v11788_v21  ;;  %v9889_v47 = vpop.f32.mrb[100].mxu1  ;;  %10763 = vmatprep.subr.bf16.mxu1 %v14348_v4  ;;  %v14832_v26 = vadd.f32 %v9437_v45, %v18911_v17  ;;  %v9439_v30 = vpop.f32.mrb[101].mxu0  ;;  %v14363_v43 = vcombine.low %v18963_v5, %v18966_v2 }
 0x460   : > { %v14864_v10 = vadd.f32 %v9889_v47, %v18914_v48  ;;  %v9891_v54 = vpop.f32.mrb[101].mxu1  ;;  %v14378_v14 = vcombine.high %v18975_v0, %v18978_v58  ;;  %12800 = vst [vmem:[%s18241_s20 + $0x50] sm:$0xff] %v14642_v25  ;;  %v14833_v51 = vadd.f32 %v9439_v30, %v18917_v50  ;;  %10312 = vmatpush1.bf16.msra.mxu0 %v14345_v63  ;;  %v9441_v34 = vpop.f32.mrb[102].mxu0  ;;  %v19016_v47 = vld [vmem:[%s16540_s19 + $0x1d60] sm:$0xff] }
 0x461   : > { %12801 = vst [vmem:[%s18241_s20 + $0x58] sm:$0xff] %v14643_v49  ;;  %v14865_v4 = vadd.f32 %v9891_v54, %v18920_v60  ;;  %10764 = vmatpush1.bf16.msra.mxu1 %v14347_v38  ;;  %v9893_v23 = vpop.f32.mrb[102].mxu1  ;;  %v14380_v21 = vcombine.high %v18987_v24, %v18990_v13  ;;  %v11802_v5 = vmax.f32 %v14832_v26, 0.0  ;;  %v14834_v19 = vadd.f32 %v9441_v34, %v18911_v17  ;;  %v9443_v61 = vpop.f32.mrb[103].mxu0  ;;  %v19011_v54 = vld [vmem:[%s16540_s19 + $0x1d20] sm:$0xff]  ;;  %v19019_v26 = vld [vmem:[%s16540_s19 + $0x1d28] sm:$0xff] }
 0x462   : > { %v11804_v2 = vmax.f32 %v14864_v10, 0.0  ;;  %v14866_v32 = vadd.f32 %v9893_v23, %v18914_v48  ;;  %v9895_v25 = vpop.f32.mrb[103].mxu1  ;;  %10313 = vmatprep.subr.bf16.mxu0 %v14362_v46  ;;  %10765 = vmatprep.subr.bf16.mxu1 %v14364_v35  ;;  %v11803_v63 = vmax.f32 %v14833_v51, 0.0  ;;  %v14835_v49 = vadd.f32 %v9443_v61, %v18917_v50  ;;  %v19022_v10 = vld [vmem:[%s16540_s19 + $0x1d68] sm:$0xff] }
 0x463   : > { %v11805_v38 = vmax.f32 %v14865_v4, 0.0  ;;  %v14867_v45 = vadd.f32 %v9895_v25, %v18920_v60  ;;  %v11818_v30 = vmax.f32 %v14834_v19, 0.0  ;;  %10257 = vmatmul.mubr.bf16.gmra.mrb[144].mxu0 %v17536_v22  ;;  %v14377_v46 = vcombine.low %v18975_v0, %v18978_v58  ;;  %v19031_v19 = vld [vmem:[%s16540_s19 + $0x1da0] sm:$0xff] }
 0x464   : > { %v11820_v34 = vmax.f32 %v14866_v32, 0.0  ;;  %10709 = vmatmul.mubr.bf16.gmra.mrb[144].mxu1 %v17536_v22  ;;  %v14379_v35 = vcombine.low %v18987_v24, %v18990_v13  ;;  %v14650_v51 = vpack.c.bf16 %v11803_v63, %v11802_v5  ;;  %v11819_v23 = vmax.f32 %v14835_v49, 0.0  ;;  %10314 = vmatpush1.bf16.msra.mxu0 %v14361_v27  ;;  %v19034_v32 = vld [vmem:[%s16540_s19 + $0x1de0] sm:$0xff]  ;;  %v19043_v24 = vld [vmem:[%s16540_s19 + $0x1da8] sm:$0xff] }
 0x465   : > { %v14651_v4 = vpack.c.bf16 %v11805_v38, %v11804_v2  ;;  %v11821_v61 = vmax.f32 %v14867_v45, 0.0  ;;  %10766 = vmatpush1.bf16.msra.mxu1 %v14363_v43  ;;  %10266 = vmatprep.mubr.bf16.mxu0 %v17608_v1  ;;  %v14394_v0 = vcombine.high %v19011_v54, %v19016_v47  ;;  %v14396_v58 = vcombine.high %v19019_v26, %v19022_v10  ;;  %v19046_v13 = vld [vmem:[%s16540_s19 + $0x1de8] sm:$0xff] }
 0x466   : > { %10718 = vmatprep.mubr.bf16.mxu1 %v17608_v1  ;;  %12808 = vst [vmem:[%s18241_s20 + $0x90] sm:$0xff] %v14650_v51  ;;  %v14658_v27 = vpack.c.bf16 %v11819_v23, %v11818_v30  ;;  %v9447_v5 = vpop.f32.mrb[104].mxu0  ;;  %10315 = vmatprep.subr.bf16.mxu0 %v14378_v14  ;;  %v14393_v25 = vcombine.low %v19011_v54, %v19016_v47 }
 0x467   : > { %12809 = vst [vmem:[%s18241_s20 + $0x98] sm:$0xff] %v14651_v4  ;;  %v14659_v43 = vpack.c.bf16 %v11821_v61, %v11820_v34  ;;  %v9899_v2 = vpop.f32.mrb[104].mxu1  ;;  %10767 = vmatprep.subr.bf16.mxu1 %v14380_v21  ;;  %v14836_v63 = vadd.f32 %v9447_v5, %v18911_v17  ;;  %v9449_v49 = vpop.f32.mrb[105].mxu0  ;;  %v14395_v51 = vcombine.low %v19019_v26, %v19022_v10 }
 0x468   : > { %v14868_v38 = vadd.f32 %v9899_v2, %v18914_v48  ;;  %v9901_v45 = vpop.f32.mrb[105].mxu1  ;;  %v14410_v30 = vcombine.high %v19031_v19, %v19034_v32  ;;  %12816 = vst [vmem:[%s18241_s20 + $0xd0] sm:$0xff] %v14658_v27  ;;  %v14837_v14 = vadd.f32 %v9449_v49, %v18917_v50  ;;  %10316 = vmatpush1.bf16.msra.mxu0 %v14377_v46  ;;  %v9451_v54 = vpop.f32.mrb[106].mxu0  ;;  %v19067_v46 = vld [vmem:[%s16540_s19 + $0x1e20] sm:$0xff] }
 0x469   : > { %12817 = vst [vmem:[%s18241_s20 + $0xd8] sm:$0xff] %v14659_v43  ;;  %v14869_v21 = vadd.f32 %v9901_v45, %v18920_v60  ;;  %10768 = vmatpush1.bf16.msra.mxu1 %v14379_v35  ;;  %v9903_v47 = vpop.f32.mrb[106].mxu1  ;;  %v14412_v34 = vcombine.high %v19043_v24, %v19046_v13  ;;  %v11834_v26 = vmax.f32 %v14836_v63, 0.0  ;;  %v14838_v4 = vadd.f32 %v9451_v54, %v18911_v17  ;;  %v9453_v61 = vpop.f32.mrb[107].mxu0  ;;  %v19072_v49 = vld [vmem:[%s16540_s19 + $0x1e60] sm:$0xff]  ;;  %v19075_v63 = vld [vmem:[%s16540_s19 + $0x1e28] sm:$0xff] }
 0x46a   : > { %v11836_v10 = vmax.f32 %v14868_v38, 0.0  ;;  %v14870_v23 = vadd.f32 %v9903_v47, %v18914_v48  ;;  %v9905_v27 = vpop.f32.mrb[107].mxu1  ;;  %10317 = vmatprep.subr.bf16.mxu0 %v14394_v0  ;;  %10769 = vmatprep.subr.bf16.mxu1 %v14396_v58  ;;  %v11835_v35 = vmax.f32 %v14837_v14, 0.0  ;;  %v14839_v5 = vadd.f32 %v9453_v61, %v18917_v50  ;;  %v19078_v38 = vld [vmem:[%s16540_s19 + $0x1e68] sm:$0xff] }
 0x46b   : > { %v11837_v43 = vmax.f32 %v14869_v21, 0.0  ;;  %v14871_v2 = vadd.f32 %v9905_v27, %v18920_v60  ;;  %v11850_v45 = vmax.f32 %v14838_v4, 0.0  ;;  %10267 = vmatmul.mubr.bf16.gmra.mrb[148].mxu0 %v17596_v28  ;;  %v14409_v0 = vcombine.low %v19031_v19, %v19034_v32  ;;  %v19087_v4 = vld [vmem:[%s16540_s19 + $0x1ea0] sm:$0xff] }
 0x46c   : > { %v11852_v54 = vmax.f32 %v14870_v23, 0.0  ;;  %10719 = vmatmul.mubr.bf16.gmra.mrb[148].mxu1 %v17596_v28  ;;  %v14411_v58 = vcombine.low %v19043_v24, %v19046_v13  ;;  %v14666_v14 = vpack.c.bf16 %v11835_v35, %v11834_v26  ;;  %v11851_v47 = vmax.f32 %v14839_v5, 0.0  ;;  %10318 = vmatpush1.bf16.msra.mxu0 %v14393_v25  ;;  %v19090_v23 = vld [vmem:[%s16540_s19 + $0x1ee0] sm:$0xff]  ;;  %v19099_v24 = vld [vmem:[%s16540_s19 + $0x1ea8] sm:$0xff] }
 0x46d   : > { %v14667_v21 = vpack.c.bf16 %v11837_v43, %v11836_v10  ;;  %v11853_v61 = vmax.f32 %v14871_v2, 0.0  ;;  %10770 = vmatpush1.bf16.msra.mxu1 %v14395_v51  ;;  %10276 = vmatprep.mubr.bf16.mxu0 %v17668_v57  ;;  %v14426_v19 = vcombine.high %v19067_v46, %v19072_v49  ;;  %v14428_v32 = vcombine.high %v19075_v63, %v19078_v38  ;;  %v19102_v13 = vld [vmem:[%s16540_s19 + $0x1ee8] sm:$0xff] }
 0x46e   : > { %10728 = vmatprep.mubr.bf16.mxu1 %v17668_v57  ;;  %12824 = vst [vmem:[%s18241_s20 + $0x110] sm:$0xff] %v14666_v14  ;;  %v14674_v25 = vpack.c.bf16 %v11851_v47, %v11850_v45  ;;  %v9457_v26 = vpop.f32.mrb[108].mxu0  ;;  %10319 = vmatprep.subr.bf16.mxu0 %v14410_v30  ;;  %v14425_v27 = vcombine.low %v19067_v46, %v19072_v49 }
 0x46f   : > { %12825 = vst [vmem:[%s18241_s20 + $0x118] sm:$0xff] %v14667_v21  ;;  %v14675_v51 = vpack.c.bf16 %v11853_v61, %v11852_v54  ;;  %v9909_v10 = vpop.f32.mrb[108].mxu1  ;;  %10771 = vmatprep.subr.bf16.mxu1 %v14412_v34  ;;  %v14840_v35 = vadd.f32 %v9457_v26, %v18911_v17  ;;  %v9459_v5 = vpop.f32.mrb[109].mxu0  ;;  %v14427_v14 = vcombine.low %v19075_v63, %v19078_v38 }
 0x470   : > { %v14872_v43 = vadd.f32 %v9909_v10, %v18914_v48  ;;  %v9911_v2 = vpop.f32.mrb[109].mxu1  ;;  %v14442_v45 = vcombine.high %v19087_v4, %v19090_v23  ;;  %12832 = vst [vmem:[%s18241_s20 + $0x150] sm:$0xff] %v14674_v25  ;;  %v14841_v30 = vadd.f32 %v9459_v5, %v18917_v50  ;;  %10320 = vmatpush1.bf16.msra.mxu0 %v14409_v0  ;;  %v9461_v46 = vpop.f32.mrb[110].mxu0  ;;  %v19123_v0 = vld [vmem:[%s16540_s19 + $0x1f20] sm:$0xff] }
 0x471   : > { %12833 = vst [vmem:[%s18241_s20 + $0x158] sm:$0xff] %v14675_v51  ;;  %v14873_v34 = vadd.f32 %v9911_v2, %v18920_v60  ;;  %10772 = vmatpush1.bf16.msra.mxu1 %v14411_v58  ;;  %v9913_v49 = vpop.f32.mrb[110].mxu1  ;;  %v14444_v54 = vcombine.high %v19099_v24, %v19102_v13  ;;  %v11866_v63 = vmax.f32 %v14840_v35, 0.0  ;;  %v14842_v21 = vadd.f32 %v9461_v46, %v18911_v17  ;;  %v9463_v61 = vpop.f32.mrb[111].mxu0  ;;  %v19128_v5 = vld [vmem:[%s16540_s19 + $0x1f60] sm:$0xff]  ;;  %v19131_v35 = vld [vmem:[%s16540_s19 + $0x1f28] sm:$0xff] }
 0x472   : > { %v11868_v38 = vmax.f32 %v14872_v43, 0.0  ;;  %v14874_v47 = vadd.f32 %v9913_v49, %v18914_v48  ;;  %v9915_v25 = vpop.f32.mrb[111].mxu1  ;;  %10321 = vmatprep.subr.bf16.mxu0 %v14426_v19  ;;  %10773 = vmatprep.subr.bf16.mxu1 %v14428_v32  ;;  %v11867_v58 = vmax.f32 %v14841_v30, 0.0  ;;  %v14843_v26 = vadd.f32 %v9463_v61, %v18917_v50  ;;  %v19134_v43 = vld [vmem:[%s16540_s19 + $0x1f68] sm:$0xff] }
 0x473   : > { %v11869_v51 = vmax.f32 %v14873_v34, 0.0  ;;  %v14875_v10 = vadd.f32 %v9915_v25, %v18920_v60  ;;  %v11882_v2 = vmax.f32 %v14842_v21, 0.0  ;;  %10277 = vmatmul.mubr.bf16.gmra.mrb[152].mxu0 %v17656_v20  ;;  %v14441_v19 = vcombine.low %v19087_v4, %v19090_v23  ;;  %v19143_v21 = vld [vmem:[%s16540_s19 + $0x1fa0] sm:$0xff] }
 0x474   : > { %v11884_v46 = vmax.f32 %v14874_v47, 0.0  ;;  %10729 = vmatmul.mubr.bf16.gmra.mrb[152].mxu1 %v17656_v20  ;;  %v14443_v32 = vcombine.low %v19099_v24, %v19102_v13  ;;  %v14682_v30 = vpack.c.bf16 %v11867_v58, %v11866_v63  ;;  %v11883_v49 = vmax.f32 %v14843_v26, 0.0  ;;  %10322 = vmatpush1.bf16.msra.mxu0 %v14425_v27  ;;  %v19146_v47 = vld [vmem:[%s16540_s19 + $0x1fe0] sm:$0xff]  ;;  %v19155_v24 = vld [vmem:[%s16540_s19 + $0x1fa8] sm:$0xff] }
 0x475   : > { %v14683_v34 = vpack.c.bf16 %v11869_v51, %v11868_v38  ;;  %v11885_v61 = vmax.f32 %v14875_v10, 0.0  ;;  %10774 = vmatpush1.bf16.msra.mxu1 %v14427_v14  ;;  %10286 = vmatprep.mubr.bf16.mxu0 %v17703_v52  ;;  %v14458_v4 = vcombine.high %v19123_v0, %v19128_v5  ;;  %v14460_v23 = vcombine.high %v19131_v35, %v19134_v43  ;;  %v19158_v13 = vld [vmem:[%s16540_s19 + $0x1fe8] sm:$0xff] }
 0x476   : > { %10738 = vmatprep.mubr.bf16.mxu1 %v17703_v52  ;;  %12840 = vst [vmem:[%s18241_s20 + $0x190] sm:$0xff] %v14682_v30  ;;  %v14690_v27 = vpack.c.bf16 %v11883_v49, %v11882_v2  ;;  %v9467_v63 = vpop.f32.mrb[112].mxu0  ;;  %10323 = vmatprep.subr.bf16.mxu0 %v14442_v45  ;;  %v14457_v25 = vcombine.low %v19123_v0, %v19128_v5 }
 0x477   : > { %12841 = vst [vmem:[%s18241_s20 + $0x198] sm:$0xff] %v14683_v34  ;;  %v14691_v14 = vpack.c.bf16 %v11885_v61, %v11884_v46  ;;  %v9919_v38 = vpop.f32.mrb[112].mxu1  ;;  %10775 = vmatprep.subr.bf16.mxu1 %v14444_v54  ;;  %v14844_v58 = vadd.f32 %v9467_v63, %v18911_v17  ;;  %v9469_v26 = vpop.f32.mrb[113].mxu0  ;;  %v14459_v30 = vcombine.low %v19131_v35, %v19134_v43 }
 0x478   : > { %v14876_v51 = vadd.f32 %v9919_v38, %v18914_v48  ;;  %v9921_v10 = vpop.f32.mrb[113].mxu1  ;;  %v14474_v2 = vcombine.high %v19143_v21, %v19146_v47  ;;  %12848 = vst [vmem:[%s18241_s20 + $0x1d0] sm:$0xff] %v14690_v27  ;;  %v14845_v45 = vadd.f32 %v9469_v26, %v18917_v50  ;;  %10324 = vmatpush1.bf16.msra.mxu0 %v14441_v19  ;;  %v9471_v0 = vpop.f32.mrb[114].mxu0  ;;  %v19179_v19 = vld [vmem:[%s16540_s19 + $0x30] sm:$0xff] }
 0x479   : > { %12849 = vst [vmem:[%s18241_s20 + $0x1d8] sm:$0xff] %v14691_v14  ;;  %v14877_v54 = vadd.f32 %v9921_v10, %v18920_v60  ;;  %10776 = vmatpush1.bf16.msra.mxu1 %v14443_v32  ;;  %v9923_v5 = vpop.f32.mrb[114].mxu1  ;;  %v14476_v46 = vcombine.high %v19155_v24, %v19158_v13  ;;  %v11898_v35 = vmax.f32 %v14844_v58, 0.0  ;;  %v14846_v34 = vadd.f32 %v9471_v0, %v18911_v17  ;;  %v9473_v61 = vpop.f32.mrb[115].mxu0  ;;  %v19184_v26 = vld [vmem:[%s16540_s19 + $0x70] sm:$0xff]  ;;  %v19187_v58 = vld [vmem:[%s16540_s19 + $0x38] sm:$0xff] }
 0x47a   : > { %v11900_v43 = vmax.f32 %v14876_v51, 0.0  ;;  %v14878_v49 = vadd.f32 %v9923_v5, %v18914_v48  ;;  %v9925_v27 = vpop.f32.mrb[115].mxu1  ;;  %10325 = vmatprep.subr.bf16.mxu0 %v14458_v4  ;;  %10777 = vmatprep.subr.bf16.mxu1 %v14460_v23  ;;  %v11899_v32 = vmax.f32 %v14845_v45, 0.0  ;;  %v14847_v63 = vadd.f32 %v9473_v61, %v18917_v50  ;;  %v19190_v51 = vld [vmem:[%s16540_s19 + $0x78] sm:$0xff] }
 0x47b   : > { %v11901_v14 = vmax.f32 %v14877_v54, 0.0  ;;  %v14879_v38 = vadd.f32 %v9925_v27, %v18920_v60  ;;  %v11914_v10 = vmax.f32 %v14846_v34, 0.0  ;;  %10287 = vmatmul.mubr.bf16.gmra.mrb[156].mxu0 %v17700_v6  ;;  %v14473_v4 = vcombine.low %v19143_v21, %v19146_v47  ;;  %v19199_v34 = vld [vmem:[%s16540_s19 + $0xb0] sm:$0xff] }
 0x47c   : > { %v11916_v0 = vmax.f32 %v14878_v49, 0.0  ;;  %10739 = vmatmul.mubr.bf16.gmra.mrb[156].mxu1 %v17700_v6  ;;  %v14475_v23 = vcombine.low %v19155_v24, %v19158_v13  ;;  %v14698_v45 = vpack.c.bf16 %v11899_v32, %v11898_v35  ;;  %v11915_v5 = vmax.f32 %v14847_v63, 0.0  ;;  %10326 = vmatpush1.bf16.msra.mxu0 %v14457_v25  ;;  %v19202_v49 = vld [vmem:[%s16540_s19 + $0xf0] sm:$0xff]  ;;  %v19211_v24 = vld [vmem:[%s16540_s19 + $0xb8] sm:$0xff] }
 0x47d   : > { %v14699_v54 = vpack.c.bf16 %v11901_v14, %v11900_v43  ;;  %v11917_v61 = vmax.f32 %v14879_v38, 0.0  ;;  %10778 = vmatpush1.bf16.msra.mxu1 %v14459_v30  ;;  %10329 = vmatprep.mubr.bf16.mxu0 %v17386_v8  ;;  %v13470_v21 = vcombine.high %v19179_v19, %v19184_v26  ;;  %v13472_v47 = vcombine.high %v19187_v58, %v19190_v51  ;;  %v19214_v13 = vld [vmem:[%s16540_s19 + $0xf8] sm:$0xff] }
 0x47e   : > { %10781 = vmatprep.mubr.bf16.mxu1 %v17386_v8  ;;  %12856 = vst [vmem:[%s18241_s20 + $0x210] sm:$0xff] %v14698_v45  ;;  %v14706_v25 = vpack.c.bf16 %v11915_v5, %v11914_v10  ;;  %v9477_v35 = vpop.f32.mrb[116].mxu0  ;;  %10327 = vmatprep.subr.bf16.mxu0 %v14474_v2  ;;  %v13469_v27 = vcombine.low %v19179_v19, %v19184_v26 }
 0x47f   : > { %12857 = vst [vmem:[%s18241_s20 + $0x218] sm:$0xff] %v14699_v54  ;;  %v14707_v30 = vpack.c.bf16 %v11917_v61, %v11916_v0  ;;  %v9929_v43 = vpop.f32.mrb[116].mxu1  ;;  %10779 = vmatprep.subr.bf16.mxu1 %v14476_v46  ;;  %v14848_v32 = vadd.f32 %v9477_v35, %v18911_v17  ;;  %v9479_v63 = vpop.f32.mrb[117].mxu0  ;;  %v13471_v45 = vcombine.low %v19187_v58, %v19190_v51 }
 0x480   : > { %v14880_v14 = vadd.f32 %v9929_v43, %v18914_v48  ;;  %v9931_v38 = vpop.f32.mrb[117].mxu1  ;;  %v13486_v10 = vcombine.high %v19199_v34, %v19202_v49  ;;  %12864 = vst [vmem:[%s18241_s20 + $0x250] sm:$0xff] %v14706_v25  ;;  %v14849_v2 = vadd.f32 %v9479_v63, %v18917_v50  ;;  %10328 = vmatpush1.bf16.msra.mxu0 %v14473_v4  ;;  %v9481_v19 = vpop.f32.mrb[118].mxu0  ;;  %v19235_v4 = vld [vmem:[%s16540_s19 + $0x130] sm:$0xff] }
 0x481   : > { %12865 = vst [vmem:[%s18241_s20 + $0x258] sm:$0xff] %v14707_v30  ;;  %v14881_v46 = vadd.f32 %v9931_v38, %v18920_v60  ;;  %10780 = vmatpush1.bf16.msra.mxu1 %v14475_v23  ;;  %v9933_v26 = vpop.f32.mrb[118].mxu1  ;;  %v13488_v0 = vcombine.high %v19211_v24, %v19214_v13  ;;  %v11930_v58 = vmax.f32 %v14848_v32, 0.0  ;;  %v14850_v54 = vadd.f32 %v9481_v19, %v18911_v17  ;;  %v9483_v61 = vpop.f32.mrb[119].mxu0  ;;  %v19240_v63 = vld [vmem:[%s16540_s19 + $0x170] sm:$0xff]  ;;  %v19243_v32 = vld [vmem:[%s16540_s19 + $0x138] sm:$0xff] }
 0x482   : > { %v11932_v51 = vmax.f32 %v14880_v14, 0.0  ;;  %v14882_v5 = vadd.f32 %v9933_v26, %v18914_v48  ;;  %v9935_v25 = vpop.f32.mrb[119].mxu1  ;;  %10862 = vmatprep.subr.bf16.mxu0 %v13470_v21  ;;  %11314 = vmatprep.subr.bf16.mxu1 %v13472_v47  ;;  %v11931_v23 = vmax.f32 %v14849_v2, 0.0  ;;  %v14851_v35 = vadd.f32 %v9483_v61, %v18917_v50  ;;  %v19246_v14 = vld [vmem:[%s16540_s19 + $0x178] sm:$0xff] }
 0x483   : > { %v11933_v30 = vmax.f32 %v14881_v46, 0.0  ;;  %v14883_v43 = vadd.f32 %v9935_v25, %v18920_v60  ;;  %v11946_v38 = vmax.f32 %v14850_v54, 0.0  ;;  %10330 = vmatmul.mubr.bf16.vlgmr.msra.gmra.mrb[128].mxu0 %v17379_v40  ;;  %v13485_v21 = vcombine.low %v19199_v34, %v19202_v49  ;;  %v19255_v54 = vld [vmem:[%s16540_s19 + $0x1b0] sm:$0xff] }
 0x484   : > { %v11948_v19 = vmax.f32 %v14882_v5, 0.0  ;;  %10782 = vmatmul.mubr.bf16.vlgmr.msra.gmra.mrb[128].mxu1 %v17379_v40  ;;  %v13487_v47 = vcombine.low %v19211_v24, %v19214_v13  ;;  %v14714_v2 = vpack.c.bf16 %v11931_v23, %v11930_v58  ;;  %v11947_v26 = vmax.f32 %v14851_v35, 0.0  ;;  %10863 = vmatpush1.bf16.msra.mxu0 %v13469_v27  ;;  %v19258_v5 = vld [vmem:[%s16540_s19 + $0x1f0] sm:$0xff]  ;;  %v19267_v24 = vld [vmem:[%s16540_s19 + $0x1b8] sm:$0xff] }
 0x485   : > { %v14715_v46 = vpack.c.bf16 %v11933_v30, %v11932_v51  ;;  %v11949_v61 = vmax.f32 %v14883_v43, 0.0  ;;  %11315 = vmatpush1.bf16.msra.mxu1 %v13471_v45  ;;  %10339 = vmatprep.mubr.bf16.mxu0 %v17446_v56  ;;  %v13502_v34 = vcombine.high %v19235_v4, %v19240_v63  ;;  %v13504_v49 = vcombine.high %v19243_v32, %v19246_v14  ;;  %v19270_v13 = vld [vmem:[%s16540_s19 + $0x1f8] sm:$0xff] }
 0x486   : > { %10791 = vmatprep.mubr.bf16.mxu1 %v17446_v56  ;;  %12872 = vst [vmem:[%s18241_s20 + $0x290] sm:$0xff] %v14714_v2  ;;  %v14722_v27 = vpack.c.bf16 %v11947_v26, %v11946_v38  ;;  %v9487_v58 = vpop.f32.mrb[120].mxu0  ;;  %10864 = vmatprep.subr.bf16.mxu0 %v13486_v10  ;;  %v13501_v25 = vcombine.low %v19235_v4, %v19240_v63 }
 0x487   : > { %12873 = vst [vmem:[%s18241_s20 + $0x298] sm:$0xff] %v14715_v46  ;;  %v14723_v45 = vpack.c.bf16 %v11949_v61, %v11948_v19  ;;  %v9939_v51 = vpop.f32.mrb[120].mxu1  ;;  %11316 = vmatprep.subr.bf16.mxu1 %v13488_v0  ;;  %v14852_v23 = vadd.f32 %v9487_v58, %v18911_v17  ;;  %v9489_v35 = vpop.f32.mrb[121].mxu0  ;;  %v13503_v2 = vcombine.low %v19243_v32, %v19246_v14 }
 0x488   : > { %v14884_v30 = vadd.f32 %v9939_v51, %v18914_v48  ;;  %v9941_v43 = vpop.f32.mrb[121].mxu1  ;;  %v13518_v38 = vcombine.high %v19255_v54, %v19258_v5  ;;  %12880 = vst [vmem:[%s18241_s20 + $0x2d0] sm:$0xff] %v14722_v27  ;;  %v14853_v10 = vadd.f32 %v9489_v35, %v18917_v50  ;;  %10865 = vmatpush1.bf16.msra.mxu0 %v13485_v21  ;;  %v9491_v4 = vpop.f32.mrb[122].mxu0  ;;  %v19291_v21 = vld [vmem:[%s16540_s19 + $0x230] sm:$0xff] }
 0x489   : > { %12881 = vst [vmem:[%s18241_s20 + $0x2d8] sm:$0xff] %v14723_v45  ;;  %v14885_v0 = vadd.f32 %v9941_v43, %v18920_v60  ;;  %11317 = vmatpush1.bf16.msra.mxu1 %v13487_v47  ;;  %v9943_v63 = vpop.f32.mrb[122].mxu1  ;;  %v13520_v19 = vcombine.high %v19267_v24, %v19270_v13  ;;  %v11962_v32 = vmax.f32 %v14852_v23, 0.0  ;;  %v14854_v46 = vadd.f32 %v9491_v4, %v18911_v17  ;;  %v9493_v61 = vpop.f32.mrb[123].mxu0  ;;  %v19296_v35 = vld [vmem:[%s16540_s19 + $0x270] sm:$0xff]  ;;  %v19299_v23 = vld [vmem:[%s16540_s19 + $0x238] sm:$0xff] }
 0x48a   : > { %v11964_v14 = vmax.f32 %v14884_v30, 0.0  ;;  %v14886_v26 = vadd.f32 %v9943_v63, %v18914_v48  ;;  %v9945_v27 = vpop.f32.mrb[123].mxu1  ;;  %10866 = vmatprep.subr.bf16.mxu0 %v13502_v34  ;;  %11318 = vmatprep.subr.bf16.mxu1 %v13504_v49  ;;  %v11963_v47 = vmax.f32 %v14853_v10, 0.0  ;;  %v14855_v58 = vadd.f32 %v9493_v61, %v18917_v50  ;;  %v19302_v30 = vld [vmem:[%s16540_s19 + $0x278] sm:$0xff] }
 0x48b   : > { %v11965_v45 = vmax.f32 %v14885_v0, 0.0  ;;  %v14887_v51 = vadd.f32 %v9945_v27, %v18920_v60  ;;  %v11978_v43 = vmax.f32 %v14854_v46, 0.0  ;;  %10340 = vmatmul.mubr.bf16.gmra.mrb[132].mxu0 %v17439_v15  ;;  %v13517_v34 = vcombine.low %v19255_v54, %v19258_v5  ;;  %v19311_v46 = vld [vmem:[%s16540_s19 + $0x2b0] sm:$0xff] }
 0x48c   : > { %v11980_v4 = vmax.f32 %v14886_v26, 0.0  ;;  %10792 = vmatmul.mubr.bf16.gmra.mrb[132].mxu1 %v17439_v15  ;;  %v13519_v49 = vcombine.low %v19267_v24, %v19270_v13  ;;  %v14730_v10 = vpack.c.bf16 %v11963_v47, %v11962_v32  ;;  %v11979_v63 = vmax.f32 %v14855_v58, 0.0  ;;  %10867 = vmatpush1.bf16.msra.mxu0 %v13501_v25  ;;  %v19314_v26 = vld [vmem:[%s16540_s19 + $0x2f0] sm:$0xff]  ;;  %v19323_v24 = vld [vmem:[%s16540_s19 + $0x2b8] sm:$0xff] }
 0x48d   : > { %v14731_v0 = vpack.c.bf16 %v11965_v45, %v11964_v14  ;;  %v11981_v61 = vmax.f32 %v14887_v51, 0.0  ;;  %11319 = vmatpush1.bf16.msra.mxu1 %v13503_v2  ;;  %v20707_v27 = vld [vmem:[#allocation66_spill] sm:$0xff]  ;;  %v13534_v54 = vcombine.high %v19291_v21, %v19296_v35  ;;  %v13536_v5 = vcombine.high %v19299_v23, %v19302_v30  ;;  %v19326_v13 = vld [vmem:[%s16540_s19 + $0x2f8] sm:$0xff]  ;;  %10868 = vmatprep.subr.bf16.mxu0 %v13518_v38 }
 0x48e   : > { %10349 = vmatprep.mubr.bf16.mxu0 %v20707_v27  ;;  %10801 = vmatprep.mubr.bf16.mxu1 %v20707_v27  ;;  %12888 = vst [vmem:[%s18241_s20 + $0x310] sm:$0xff] %v14730_v10  ;;  %v14738_v25 = vpack.c.bf16 %v11979_v63, %v11978_v43  ;;  %v9497_v32 = vpop.f32.mrb[124].mxu0  ;;  %v13533_v47 = vcombine.low %v19291_v21, %v19296_v35  ;;  %v2033_v15 = vld [vmem:[%s16540_s19 + $0x378] sm:$0xff] }
 0x48f   : > { %12889 = vst [vmem:[%s18241_s20 + $0x318] sm:$0xff] %v14731_v0  ;;  %v14739_v2 = vpack.c.bf16 %v11981_v61, %v11980_v4  ;;  %v9949_v14 = vpop.f32.mrb[124].mxu1  ;;  %11320 = vmatprep.subr.bf16.mxu1 %v13520_v19  ;;  %v14856_v45 = vadd.f32 %v9497_v32, %v18911_v17  ;;  %v9499_v51 = vpop.f32.mrb[125].mxu0  ;;  %v13535_v10 = vcombine.low %v19299_v23, %v19302_v30 }
 0x490   : > { %v14888_v58 = vadd.f32 %v9949_v14, %v18914_v48  ;;  %v9951_v27 = vpop.f32.mrb[125].mxu1  ;;  %v13550_v43 = vcombine.high %v19311_v46, %v19314_v26  ;;  %12896 = vst [vmem:[%s18241_s20 + $0x350] sm:$0xff] %v14738_v25  ;;  %v14857_v38 = vadd.f32 %v9499_v51, %v18917_v50  ;;  %10869 = vmatpush1.bf16.msra.mxu0 %v13517_v34  ;;  %v9501_v21 = vpop.f32.mrb[126].mxu0  ;;  %v2024_v34 = vld [vmem:[%s16540_s19 + $0x330] sm:$0xff]  ;;  %v2025_v51 = vld [vmem:[%s16540_s19 + $0x338] sm:$0xff] }
 0x491   : > { %12897 = vst [vmem:[%s18241_s20 + $0x358] sm:$0xff] %v14739_v2  ;;  %v14889_v19 = vadd.f32 %v9951_v27, %v18920_v60  ;;  %11321 = vmatpush1.bf16.msra.mxu1 %v13519_v49  ;;  %v9953_v35 = vpop.f32.mrb[126].mxu1  ;;  %v13552_v4 = vcombine.high %v19323_v24, %v19326_v13  ;;  %v11994_v23 = vmax.f32 %v14856_v45, 0.0  ;;  %v14858_v0 = vadd.f32 %v9501_v21, %v18911_v17  ;;  %v9503_v61 = vpop.f32.mrb[127].mxu0  ;;  %v2032_v14 = vld [vmem:[%s16540_s19 + $0x370] sm:$0xff] }
 0x492   : > { %v11996_v30 = vmax.f32 %v14888_v58, 0.0  ;;  %v14890_v63 = vadd.f32 %v9953_v35, %v18914_v48  ;;  %v9955_v25 = vpop.f32.mrb[127].mxu1  ;;  %10870 = vmatprep.subr.bf16.mxu0 %v13534_v54  ;;  %11322 = vmatprep.subr.bf16.mxu1 %v13536_v5  ;;  %v11995_v49 = vmax.f32 %v14857_v38, 0.0  ;;  %v14859_v2 = vadd.f32 %v9503_v61, %v18917_v50  ;;  %v2040_v38 = vld [vmem:[%s16540_s19 + $0x3b0] sm:$0xff] }
 0x493   : > { %v11997_v27 = vmax.f32 %v14889_v19, 0.0  ;;  %v14891_v32 = vadd.f32 %v9955_v25, %v18920_v60  ;;  %v12010_v45 = vmax.f32 %v14858_v0, 0.0  ;;  %10350 = vmatmul.mubr.bf16.gmra.mrb[136].mxu0 %v17499_v59  ;;  %v13549_v17 = vcombine.low %v19311_v46, %v19314_v26  ;;  %v2049_v19 = vld [vmem:[%s16540_s19 + $0x3f8] sm:$0xff] }
 0x494   : > { %v12012_v58 = vmax.f32 %v14890_v63, 0.0  ;;  %10802 = vmatmul.mubr.bf16.gmra.mrb[136].mxu1 %v17499_v59  ;;  %v13551_v48 = vcombine.low %v19323_v24, %v19326_v13  ;;  %v14746_v50 = vpack.c.bf16 %v11995_v49, %v11994_v23  ;;  %v12011_v54 = vmax.f32 %v14859_v2, 0.0  ;;  %10871 = vmatpush1.bf16.msra.mxu0 %v13533_v47  ;;  %v2048_v47 = vld [vmem:[%s16540_s19 + $0x3f0] sm:$0xff]  ;;  %v2065_v63 = vld [vmem:[%s16540_s19 + $0x478] sm:$0xff] }
 0x495   : > { %v14747_v60 = vpack.c.bf16 %v11997_v27, %v11996_v30  ;;  %v12013_v5 = vmax.f32 %v14891_v32, 0.0  ;;  %11323 = vmatpush1.bf16.msra.mxu1 %v13535_v10  ;;  %10359 = vmatprep.mubr.bf16.mxu0 %v17566_v16  ;;  %v13566_v46 = vcombine.high %v2024_v34, %v2032_v14  ;;  %v13568_v26 = vcombine.high %v2025_v51, %v2033_v15  ;;  %v2041_v10 = vld [vmem:[%s16540_s19 + $0x3b8] sm:$0xff]  ;;  %v2056_v23 = vld [vmem:[%s16540_s19 + $0x430] sm:$0xff] }
 0x496   : > { %10811 = vmatprep.mubr.bf16.mxu1 %v17566_v16  ;;  %12904 = vst [vmem:[%s18241_s20 + $0x390] sm:$0xff] %v14746_v50  ;;  %v14754_v24 = vpack.c.bf16 %v12011_v54, %v12010_v45  ;;  %10872 = vmatprep.subr.bf16.mxu0 %v13550_v43  ;;  %v13565_v21 = vcombine.low %v2024_v34, %v2032_v14  ;;  %v2064_v43 = vld [vmem:[%s16540_s19 + $0x470] sm:$0xff]  ;;  %v2073_v2 = vld [vmem:[%s16540_s19 + $0x4b8] sm:$0xff] }
 0x497   : > { %12905 = vst [vmem:[%s18241_s20 + $0x398] sm:$0xff] %v14747_v60  ;;  %v14755_v13 = vpack.c.bf16 %v12013_v5, %v12012_v58  ;;  %11324 = vmatprep.subr.bf16.mxu1 %v13552_v4  ;;  %v13567_v35 = vcombine.low %v2025_v51, %v2033_v15  ;;  %v13582_v30 = vcombine.high %v2040_v38, %v2048_v47  ;;  %v2057_v4 = vld [vmem:[%s16540_s19 + $0x438] sm:$0xff]  ;;  %v2072_v49 = vld [vmem:[%s16540_s19 + $0x4b0] sm:$0xff] }
 0x498   : > { %12912 = vst [vmem:[%s18241_s20 + $0x3d0] sm:$0xff] %v14754_v24  ;;  %10873 = vmatpush1.bf16.msra.mxu0 %v13549_v17  ;;  %v13584_v0 = vcombine.high %v2041_v10, %v2049_v19  ;;  %v13581_v61 = vcombine.low %v2040_v38, %v2048_v47  ;;  %v13583_v15 = vcombine.low %v2041_v10, %v2049_v19  ;;  %v2080_v27 = vld [vmem:[%s16540_s19 + $0x4f0] sm:$0xff]  ;;  %v2081_v32 = vld [vmem:[%s16540_s19 + $0x4f8] sm:$0xff] }
 0x499   : > { %12913 = vst [vmem:[%s18241_s20 + $0x3d8] sm:$0xff] %v14755_v13  ;;  %11325 = vmatpush1.bf16.msra.mxu1 %v13551_v48  ;;  %10874 = vmatprep.subr.bf16.mxu0 %v13566_v46  ;;  %v13598_v25 = vcombine.high %v2056_v23, %v2064_v43  ;;  %v13600_v34 = vcombine.high %v2057_v4, %v2065_v63  ;;  %v2088_v45 = vld [vmem:[%s16540_s19 + $0x530] sm:$0xff]  ;;  %v2089_v50 = vld [vmem:[%s16540_s19 + $0x538] sm:$0xff] }
 0x49a   : > { %11326 = vmatprep.subr.bf16.mxu1 %v13568_v26  ;;  %v13597_v14 = vcombine.low %v2056_v23, %v2064_v43  ;;  %v13599_v51 = vcombine.low %v2057_v4, %v2065_v63  ;;  %v13614_v58 = vcombine.high %v2072_v49, %v2080_v27  ;;  %v13616_v17 = vcombine.high %v2073_v2, %v2081_v32  ;;  %v2096_v48 = vld [vmem:[%s16540_s19 + $0x570] sm:$0xff]  ;;  %v2097_v60 = vld [vmem:[%s16540_s19 + $0x578] sm:$0xff] }
 0x49b   : > { %10360 = vmatmul.mubr.bf16.gmra.mrb[140].mxu0 %v17559_v41  ;;  %v13613_v54 = vcombine.low %v2072_v49, %v2080_v27  ;;  %v13615_v5 = vcombine.low %v2073_v2, %v2081_v32  ;;  %v13630_v46 = vcombine.high %v2088_v45, %v2096_v48  ;;  %v13632_v26 = vcombine.high %v2089_v50, %v2097_v60  ;;  %v2104_v24 = vld [vmem:[%s16540_s19 + $0x5b0] sm:$0xff]  ;;  %v2105_v38 = vld [vmem:[%s16540_s19 + $0x5b8] sm:$0xff] }
 0x49c   : > { %10812 = vmatmul.mubr.bf16.gmra.mrb[140].mxu1 %v17559_v41  ;;  %10875 = vmatpush1.bf16.msra.mxu0 %v13565_v21  ;;  %v2112_v13 = vld [vmem:[%s16540_s19 + $0x5f0] sm:$0xff]  ;;  %v2113_v47 = vld [vmem:[%s16540_s19 + $0x5f8] sm:$0xff]  ;;  %v13629_v10 = vcombine.low %v2088_v45, %v2096_v48  ;;  %v13631_v19 = vcombine.low %v2089_v50, %v2097_v60 }
 0x49d   : > { %11327 = vmatpush1.bf16.msra.mxu1 %v13567_v35  ;;  %10369 = vmatprep.mubr.bf16.mxu0 %v17626_v36  ;;  %v2120_v21 = vld [vmem:[%s16540_s19 + $0x630] sm:$0xff]  ;;  %v13646_v35 = vcombine.high %v2104_v24, %v2112_v13  ;;  %v13648_v23 = vcombine.high %v2105_v38, %v2113_v47  ;;  %v2129_v43 = vld [vmem:[%s16540_s19 + $0x678] sm:$0xff]  ;;  %v13645_v4 = vcombine.low %v2104_v24, %v2112_v13 }
 0x49e   : > { %10821 = vmatprep.mubr.bf16.mxu1 %v17626_v36  ;;  %10876 = vmatprep.subr.bf16.mxu0 %v13582_v30  ;;  %v2128_v30 = vld [vmem:[%s16540_s19 + $0x670] sm:$0xff]  ;;  %v13647_v63 = vcombine.low %v2105_v38, %v2113_v47  ;;  %v2137_v49 = vld [vmem:[%s16540_s19 + $0x6b8] sm:$0xff] }
 0x49f   : > { %11328 = vmatprep.subr.bf16.mxu1 %v13584_v0  ;;  %v2121_v0 = vld [vmem:[%s16540_s19 + $0x638] sm:$0xff]  ;;  %v13661_v2 = vcombine.low %v2120_v21, %v2128_v30 }
 0x4a0   : > { %10877 = vmatpush1.bf16.msra.mxu0 %v13581_v61  ;;  %v13662_v61 = vcombine.high %v2120_v21, %v2128_v30  ;;  %v2145_v27 = vld [vmem:[%s16540_s19 + $0x6f8] sm:$0xff]  ;;  %v13663_v32 = vcombine.low %v2121_v0, %v2129_v43 }
 0x4a1   : > { %11329 = vmatpush1.bf16.msra.mxu1 %v13583_v15  ;;  %10878 = vmatprep.subr.bf16.mxu0 %v13598_v25  ;;  %v13664_v15 = vcombine.high %v2121_v0, %v2129_v43  ;;  %v2136_v25 = vld [vmem:[%s16540_s19 + $0x6b0] sm:$0xff]  ;;  %v13680_v45 = vcombine.high %v2137_v49, %v2145_v27  ;;  %v2161_v48 = vld [vmem:[%s16540_s19 + $0x778] sm:$0xff]  ;;  %v13679_v60 = vcombine.low %v2137_v49, %v2145_v27 }
 0x4a2   : > { %11330 = vmatprep.subr.bf16.mxu1 %v13600_v34  ;;  %v2144_v34 = vld [vmem:[%s16540_s19 + $0x6f0] sm:$0xff]  ;;  %v2169_v24 = vld [vmem:[%s16540_s19 + $0x7b8] sm:$0xff] }
 0x4a3   : > { %10370 = vmatmul.mubr.bf16.gmra.mrb[144].mxu0 %v17619_v7  ;;  %v13677_v50 = vcombine.low %v2136_v25, %v2144_v34  ;;  %v2177_v13 = vld [vmem:[%s16540_s19 + $0x7f8] sm:$0xff] }
 0x4a4   : > { %10822 = vmatmul.mubr.bf16.gmra.mrb[144].mxu1 %v17619_v7  ;;  %10879 = vmatpush1.bf16.msra.mxu0 %v13597_v14  ;;  %v2152_v14 = vld [vmem:[%s16540_s19 + $0x730] sm:$0xff]  ;;  %v13712_v21 = vcombine.high %v2169_v24, %v2177_v13  ;;  %v2193_v30 = vld [vmem:[%s16540_s19 + $0x878] sm:$0xff]  ;;  %v13711_v43 = vcombine.low %v2169_v24, %v2177_v13 }
 0x4a5   : > { %11331 = vmatpush1.bf16.msra.mxu1 %v13599_v51  ;;  %10379 = vmatprep.mubr.bf16.mxu0 %v17682_v62  ;;  %v13678_v51 = vcombine.high %v2136_v25, %v2144_v34  ;;  %v2201_v25 = vld [vmem:[%s16540_s19 + $0x8b8] sm:$0xff]  ;;  %v2248_v24 = vld [vmem:[%s16540_s19 + $0xa30] sm:$0xff] }
 0x4a6   : > { %10831 = vmatprep.mubr.bf16.mxu1 %v17682_v62  ;;  %10880 = vmatprep.subr.bf16.mxu0 %v13614_v58  ;;  %v2160_v58 = vld [vmem:[%s16540_s19 + $0x770] sm:$0xff]  ;;  %v2209_v34 = vld [vmem:[%s16540_s19 + $0x8f8] sm:$0xff] }
 0x4a7   : > { %11332 = vmatprep.subr.bf16.mxu1 %v13616_v17  ;;  %v2153_v17 = vld [vmem:[%s16540_s19 + $0x738] sm:$0xff]  ;;  %v13693_v38 = vcombine.low %v2152_v14, %v2160_v58 }
 0x4a8   : > { %10881 = vmatpush1.bf16.msra.mxu0 %v13613_v54  ;;  %v13694_v54 = vcombine.high %v2152_v14, %v2160_v58  ;;  %v13695_v47 = vcombine.low %v2153_v17, %v2161_v48  ;;  %v2224_v14 = vld [vmem:[%s16540_s19 + $0x970] sm:$0xff] }
 0x4a9   : > { %11333 = vmatpush1.bf16.msra.mxu1 %v13615_v5  ;;  %10882 = vmatprep.subr.bf16.mxu0 %v13630_v46  ;;  %v13696_v5 = vcombine.high %v2153_v17, %v2161_v48  ;;  %v2168_v46 = vld [vmem:[%s16540_s19 + $0x7b0] sm:$0xff]  ;;  %v13743_v17 = vcombine.low %v2201_v25, %v2209_v34 }
 0x4aa   : > { %11334 = vmatprep.subr.bf16.mxu1 %v13632_v26  ;;  %v2176_v26 = vld [vmem:[%s16540_s19 + $0x7f0] sm:$0xff] }
 0x4ab   : > { %10380 = vmatmul.mubr.bf16.gmra.mrb[148].mxu0 %v17675_v9  ;;  %v13709_v0 = vcombine.low %v2168_v46, %v2176_v26 }
 0x4ac   : > { %10832 = vmatmul.mubr.bf16.gmra.mrb[148].mxu1 %v17675_v9  ;;  %10883 = vmatpush1.bf16.msra.mxu0 %v13629_v10  ;;  %v2184_v10 = vld [vmem:[%s16540_s19 + $0x830] sm:$0xff] }
 0x4ad   : > { %11335 = vmatpush1.bf16.msra.mxu1 %v13631_v19  ;;  %10389 = vmatprep.mubr.bf16.mxu0 %v17712_v37  ;;  %v13710_v19 = vcombine.high %v2168_v46, %v2176_v26 }
 0x4ae   : > { %10841 = vmatprep.mubr.bf16.mxu1 %v17712_v37  ;;  %10884 = vmatprep.subr.bf16.mxu0 %v13646_v35  ;;  %v2192_v35 = vld [vmem:[%s16540_s19 + $0x870] sm:$0xff] }
 0x4af   : > { %11336 = vmatprep.subr.bf16.mxu1 %v13648_v23  ;;  %v2185_v23 = vld [vmem:[%s16540_s19 + $0x838] sm:$0xff]  ;;  %v13725_v49 = vcombine.low %v2184_v10, %v2192_v35 }
 0x4b0   : > { %10885 = vmatpush1.bf16.msra.mxu0 %v13645_v4  ;;  %v13726_v4 = vcombine.high %v2184_v10, %v2192_v35  ;;  %v13727_v27 = vcombine.low %v2185_v23, %v2193_v30  ;;  %v2257_v10 = vld [vmem:[%s16540_s19 + $0xa78] sm:$0xff] }
 0x4b1   : > { %11337 = vmatpush1.bf16.msra.mxu1 %v13647_v63  ;;  %10886 = vmatprep.subr.bf16.mxu0 %v13662_v61  ;;  %v13728_v63 = vcombine.high %v2185_v23, %v2193_v30  ;;  %v2200_v61 = vld [vmem:[%s16540_s19 + $0x8b0] sm:$0xff] }
 0x4b2   : > { %11338 = vmatprep.subr.bf16.mxu1 %v13664_v15  ;;  %v2208_v15 = vld [vmem:[%s16540_s19 + $0x8f0] sm:$0xff] }
 0x4b3   : > { %10390 = vmatmul.mubr.bf16.gmra.mrb[152].mxu0 %v17708_v42  ;;  %v13741_v58 = vcombine.low %v2200_v61, %v2208_v15  ;;  %v2264_v30 = vld [vmem:[%s16540_s19 + $0xab0] sm:$0xff] }
 0x4b4   : > { %10842 = vmatmul.mubr.bf16.gmra.mrb[152].mxu1 %v17708_v42  ;;  %10887 = vmatpush1.bf16.msra.mxu0 %v13661_v2  ;;  %v2216_v2 = vld [vmem:[%s16540_s19 + $0x930] sm:$0xff] }
 0x4b5   : > { %11339 = vmatpush1.bf16.msra.mxu1 %v13663_v32  ;;  %10399 = vmatprep.mubr.bf16.mxu0 %v17732_v3  ;;  %v13742_v32 = vcombine.high %v2200_v61, %v2208_v15  ;;  %v13758_v48 = vcombine.high %v2216_v2, %v2224_v14  ;;  %v13757_v46 = vcombine.low %v2216_v2, %v2224_v14  ;;  %v2280_v61 = vld [vmem:[%s16540_s19 + $0xb30] sm:$0xff] }
 0x4b6   : > { %10851 = vmatprep.mubr.bf16.mxu1 %v17732_v3  ;;  %10888 = vmatprep.subr.bf16.mxu0 %v13678_v51  ;;  %v2217_v51 = vld [vmem:[%s16540_s19 + $0x938] sm:$0xff]  ;;  %v2296_v14 = vld [vmem:[%s16540_s19 + $0xbb0] sm:$0xff] }
 0x4b7   : > { %11340 = vmatprep.subr.bf16.mxu1 %v13680_v45  ;;  %v2225_v45 = vld [vmem:[%s16540_s19 + $0x978] sm:$0xff] }
 0x4b8   : > { %10889 = vmatpush1.bf16.msra.mxu0 %v13677_v50  ;;  %v13760_v50 = vcombine.high %v2217_v51, %v2225_v45  ;;  %v13759_v26 = vcombine.low %v2217_v51, %v2225_v45  ;;  %v2304_v51 = vld [vmem:[%s16540_s19 + $0xbf0] sm:$0xff]  ;;  %v2297_v45 = vld [vmem:[%s16540_s19 + $0xbb8] sm:$0xff] }
 0x4b9   : > { %11341 = vmatpush1.bf16.msra.mxu1 %v13679_v60  ;;  %10890 = vmatprep.subr.bf16.mxu0 %v13694_v54  ;;  %v2232_v60 = vld [vmem:[%s16540_s19 + $0x9b0] sm:$0xff] }
 0x4ba   : > { %11342 = vmatprep.subr.bf16.mxu1 %v13696_v5  ;;  %v2240_v54 = vld [vmem:[%s16540_s19 + $0x9f0] sm:$0xff]  ;;  %v2233_v5 = vld [vmem:[%s16540_s19 + $0x9b8] sm:$0xff] }
 0x4bb   : > { %10400 = vmatmul.mubr.bf16.gmra.mrb[156].mxu0 %v17728_v33  ;;  %v13774_v13 = vcombine.high %v2232_v60, %v2240_v54 }
 0x4bc   : > { %10852 = vmatmul.mubr.bf16.gmra.mrb[156].mxu1 %v17728_v33  ;;  %10891 = vmatpush1.bf16.msra.mxu0 %v13693_v38  ;;  %v2256_v38 = vld [vmem:[%s16540_s19 + $0xa70] sm:$0xff] }
 0x4bd   : > { %11343 = vmatpush1.bf16.msra.mxu1 %v13695_v47  ;;  %10894 = vmatprep.mubr.bf16.mxu0 %v16786_v31  ;;  %v2249_v47 = vld [vmem:[%s16540_s19 + $0xa38] sm:$0xff]  ;;  %v13790_v35 = vcombine.high %v2248_v24, %v2256_v38 }
 0x4be   : > { %11346 = vmatprep.mubr.bf16.mxu1 %v16786_v31  ;;  %10892 = vmatprep.subr.bf16.mxu0 %v13710_v19  ;;  %v13744_v31 = vcombine.high %v2201_v25, %v2209_v34  ;;  %v13773_v19 = vcombine.low %v2232_v60, %v2240_v54  ;;  %v13792_v23 = vcombine.high %v2249_v47, %v2257_v10  ;;  %v2288_v25 = vld [vmem:[%s16540_s19 + $0xb70] sm:$0xff]  ;;  %v2281_v34 = vld [vmem:[%s16540_s19 + $0xb38] sm:$0xff] }
 0x4bf   : > { %11344 = vmatprep.subr.bf16.mxu1 %v13712_v21  ;;  %v2320_v60 = vld [vmem:[%s16540_s19 + $0xc70] sm:$0xff]  ;;  %v2313_v54 = vld [vmem:[%s16540_s19 + $0xc38] sm:$0xff] }
 0x4c0   : > { %10893 = vmatpush1.bf16.msra.mxu0 %v13709_v0  ;;  %v2272_v0 = vld [vmem:[%s16540_s19 + $0xaf0] sm:$0xff] }
 0x4c1   : > { %11345 = vmatpush1.bf16.msra.mxu1 %v13711_v43  ;;  %10975 = vmatprep.subr.bf16.mxu0 %v13726_v4  ;;  %v2265_v43 = vld [vmem:[%s16540_s19 + $0xab8] sm:$0xff]  ;;  %v13789_v4 = vcombine.low %v2248_v24, %v2256_v38  ;;  %v13806_v15 = vcombine.high %v2264_v30, %v2272_v0 }
 0x4c2   : > { %11427 = vmatprep.subr.bf16.mxu1 %v13728_v63  ;;  %v13791_v63 = vcombine.low %v2249_v47, %v2257_v10  ;;  %v2329_v38 = vld [vmem:[%s16540_s19 + $0xcb8] sm:$0xff] }
 0x4c3   : > { %10895 = vmatmul.mubr.bf16.vlgmr.msra.gmra.mrb[160].mxu0 %v16784_v29 }
 0x4c4   : > { %11347 = vmatmul.mubr.bf16.vlgmr.msra.gmra.mrb[160].mxu1 %v16784_v29  ;;  %10976 = vmatpush1.bf16.msra.mxu0 %v13725_v49  ;;  %v2241_v29 = vld [vmem:[%s16540_s19 + $0x9f8] sm:$0xff] }
 0x4c5   : > { %11428 = vmatpush1.bf16.msra.mxu1 %v13727_v27  ;;  %10904 = vmatprep.mubr.bf16.mxu0 %v16844_v12  ;;  %v13775_v21 = vcombine.low %v2233_v5, %v2241_v29  ;;  %v2289_v49 = vld [vmem:[%s16540_s19 + $0xb78] sm:$0xff]  ;;  %v13805_v27 = vcombine.low %v2264_v30, %v2272_v0 }
 0x4c6   : > { %11356 = vmatprep.mubr.bf16.mxu1 %v16844_v12  ;;  %10977 = vmatprep.subr.bf16.mxu0 %v13742_v32  ;;  %v13776_v12 = vcombine.high %v2233_v5, %v2241_v29  ;;  %v13822_v32 = vcombine.high %v2280_v61, %v2288_v25  ;;  %v2321_v5 = vld [vmem:[%s16540_s19 + $0xc78] sm:$0xff]  ;;  %v13837_v29 = vcombine.low %v2296_v14, %v2304_v51 }
 0x4c7   : > { %11429 = vmatprep.subr.bf16.mxu1 %v13744_v31  ;;  %v13824_v31 = vcombine.high %v2281_v34, %v2289_v49  ;;  %v13856_v24 = vcombine.high %v2313_v54, %v2321_v5  ;;  %v13855_v10 = vcombine.low %v2313_v54, %v2321_v5  ;;  %v2353_v30 = vld [vmem:[%s16540_s19 + $0xd78] sm:$0xff]  ;;  %v2400_v54 = vld [vmem:[%s16540_s19 + $0xef0] sm:$0xff] }
 0x4c8   : > { %10978 = vmatpush1.bf16.msra.mxu0 %v13741_v58  ;;  %v13821_v58 = vcombine.low %v2280_v61, %v2288_v25  ;;  %v20708_v0 = vld [vmem:[#allocation35_spill] sm:$0xff] }
 0x4c9   : > { %11430 = vmatpush1.bf16.msra.mxu1 %v13743_v17  ;;  %10979 = vmatprep.subr.bf16.mxu0 %v13758_v48  ;;  %v13823_v17 = vcombine.low %v2281_v34, %v2289_v49  ;;  %v2312_v48 = vld [vmem:[%s16540_s19 + $0xc30] sm:$0xff]  ;;  %v2361_v25 = vld [vmem:[%s16540_s19 + $0xdb8] sm:$0xff] }
 0x4ca   : > { %11431 = vmatprep.subr.bf16.mxu1 %v13760_v50  ;;  %v13838_v50 = vcombine.high %v2296_v14, %v2304_v51  ;;  %v13853_v47 = vcombine.low %v2312_v48, %v2320_v60  ;;  %v2369_v34 = vld [vmem:[%s16540_s19 + $0xdf8] sm:$0xff]  ;;  %v2384_v14 = vld [vmem:[%s16540_s19 + $0xe70] sm:$0xff] }
 0x4cb   : > { %10905 = vmatmul.mubr.bf16.gmra.mrb[164].mxu0 %v20638_v18  ;;  %v2377_v51 = vld [vmem:[%s16540_s19 + $0xe38] sm:$0xff] }
 0x4cc   : > { %11357 = vmatmul.mubr.bf16.gmra.mrb[164].mxu1 %v20638_v18  ;;  %10980 = vmatpush1.bf16.msra.mxu0 %v13757_v46  ;;  %v2273_v18 = vld [vmem:[%s16540_s19 + $0xaf8] sm:$0xff] }
 0x4cd   : > { %11432 = vmatpush1.bf16.msra.mxu1 %v13759_v26  ;;  %10914 = vmatprep.mubr.bf16.mxu0 %v20639_v44  ;;  %v13807_v2 = vcombine.low %v2265_v43, %v2273_v18  ;;  %v13854_v26 = vcombine.high %v2312_v48, %v2320_v60  ;;  %v20711_v48 = vld [vmem:[#allocation44_spill] sm:$0xff]  ;;  %v2392_v60 = vld [vmem:[%s16540_s19 + $0xeb0] sm:$0xff]  ;;  %v2393_v5 = vld [vmem:[%s16540_s19 + $0xeb8] sm:$0xff] }
 0x4ce   : > { %11366 = vmatprep.mubr.bf16.mxu1 %v20639_v44  ;;  %10981 = vmatprep.subr.bf16.mxu0 %v13774_v13  ;;  %v13808_v44 = vcombine.high %v2265_v43, %v2273_v18  ;;  %v2328_v13 = vld [vmem:[%s16540_s19 + $0xcb0] sm:$0xff] }
 0x4cf   : > { %11433 = vmatprep.subr.bf16.mxu1 %v13776_v12  ;;  %v2336_v12 = vld [vmem:[%s16540_s19 + $0xcf0] sm:$0xff] }
 0x4d0   : > { %10982 = vmatpush1.bf16.msra.mxu0 %v13773_v19  ;;  %v2344_v19 = vld [vmem:[%s16540_s19 + $0xd30] sm:$0xff]  ;;  %v13869_v43 = vcombine.low %v2328_v13, %v2336_v12 }
 0x4d1   : > { %11434 = vmatpush1.bf16.msra.mxu1 %v13775_v21  ;;  %10983 = vmatprep.subr.bf16.mxu0 %v13790_v35  ;;  %v13870_v21 = vcombine.high %v2328_v13, %v2336_v12  ;;  %v2352_v35 = vld [vmem:[%s16540_s19 + $0xd70] sm:$0xff]  ;;  %v13934_v13 = vcombine.high %v2392_v60, %v2400_v54 }
 0x4d2   : > { %11435 = vmatprep.subr.bf16.mxu1 %v13792_v23  ;;  %v2345_v23 = vld [vmem:[%s16540_s19 + $0xd38] sm:$0xff]  ;;  %v13885_v49 = vcombine.low %v2344_v19, %v2352_v35 }
 0x4d3   : > { %10915 = vmatmul.mubr.bf16.gmra.mrb[168].mxu0 %v20640_v53  ;;  %v13888_v61 = vcombine.high %v2345_v23, %v2353_v30 }
 0x4d4   : > { %11367 = vmatmul.mubr.bf16.gmra.mrb[168].mxu1 %v20640_v53  ;;  %10984 = vmatpush1.bf16.msra.mxu0 %v13789_v4  ;;  %v2305_v53 = vld [vmem:[%s16540_s19 + $0xbf8] sm:$0xff]  ;;  %v20709_v4 = vld [vmem:[#allocation40_spill] sm:$0xff] }
 0x4d5   : > { %11436 = vmatpush1.bf16.msra.mxu1 %v13791_v63  ;;  %10924 = vmatprep.mubr.bf16.mxu0 %v20641_v39  ;;  %v13839_v46 = vcombine.low %v2297_v45, %v2305_v53  ;;  %v13886_v63 = vcombine.high %v2344_v19, %v2352_v35  ;;  %v13933_v19 = vcombine.low %v2392_v60, %v2400_v54 }
 0x4d6   : > { %11376 = vmatprep.mubr.bf16.mxu1 %v20641_v39  ;;  %10985 = vmatprep.subr.bf16.mxu0 %v13806_v15  ;;  %v13840_v39 = vcombine.high %v2297_v45, %v2305_v53  ;;  %v2360_v15 = vld [vmem:[%s16540_s19 + $0xdb0] sm:$0xff]  ;;  %v2385_v45 = vld [vmem:[%s16540_s19 + $0xe78] sm:$0xff] }
 0x4d7   : > { %11437 = vmatprep.subr.bf16.mxu1 %v13808_v44  ;;  %v2368_v44 = vld [vmem:[%s16540_s19 + $0xdf0] sm:$0xff]  ;;  %v20710_v53 = vld [vmem:[#allocation39_spill] sm:$0xff] }
 0x4d8   : > { %10986 = vmatpush1.bf16.msra.mxu0 %v13805_v27  ;;  %v13887_v27 = vcombine.low %v2345_v23, %v2353_v30  ;;  %v2424_v30 = vld [vmem:[%s16540_s19 + $0xfb0] sm:$0xff] }
 0x4d9   : > { %11438 = vmatpush1.bf16.msra.mxu1 %v13807_v2  ;;  %10987 = vmatprep.subr.bf16.mxu0 %v13822_v32  ;;  %v2376_v2 = vld [vmem:[%s16540_s19 + $0xe30] sm:$0xff]  ;;  %v13902_v32 = vcombine.high %v2360_v15, %v2368_v44 }
 0x4da   : > { %11439 = vmatprep.subr.bf16.mxu1 %v13824_v31  ;;  %v13904_v31 = vcombine.high %v2361_v25, %v2369_v34 }
 0x4db   : > { %10925 = vmatmul.mubr.bf16.gmra.mrb[172].mxu0 %v20670_v55 }
 0x4dc   : > { %11377 = vmatmul.mubr.bf16.gmra.mrb[172].mxu1 %v20670_v55  ;;  %10988 = vmatpush1.bf16.msra.mxu0 %v13821_v58  ;;  %v2337_v55 = vld [vmem:[%s16540_s19 + $0xcf8] sm:$0xff]  ;;  %v13901_v58 = vcombine.low %v2360_v15, %v2368_v44 }
 0x4dd   : > { %11440 = vmatpush1.bf16.msra.mxu1 %v13823_v17  ;;  %10934 = vmatprep.mubr.bf16.mxu0 %v20671_v11  ;;  %v13871_v18 = vcombine.low %v2329_v38, %v2337_v55  ;;  %v13903_v17 = vcombine.low %v2361_v25, %v2369_v34  ;;  %v2448_v25 = vld [vmem:[%s16540_s19 + $0x1070] sm:$0xff]  ;;  %v2441_v34 = vld [vmem:[%s16540_s19 + $0x1038] sm:$0xff] }
 0x4de   : > { %11386 = vmatprep.mubr.bf16.mxu1 %v20671_v11  ;;  %10989 = vmatprep.subr.bf16.mxu0 %v13838_v50  ;;  %v13872_v11 = vcombine.high %v2329_v38, %v2337_v55  ;;  %v13918_v50 = vcombine.high %v2376_v2, %v2384_v14  ;;  %v2416_v38 = vld [vmem:[%s16540_s19 + $0xf70] sm:$0xff]  ;;  %v2409_v55 = vld [vmem:[%s16540_s19 + $0xf38] sm:$0xff] }
 0x4df   : > { %11441 = vmatprep.subr.bf16.mxu1 %v13840_v39  ;;  %v13920_v39 = vcombine.high %v2377_v51, %v2385_v45 }
 0x4e0   : > { %10990 = vmatpush1.bf16.msra.mxu0 %v13837_v29  ;;  %v2401_v29 = vld [vmem:[%s16540_s19 + $0xef8] sm:$0xff] }
 0x4e1   : > { %11442 = vmatpush1.bf16.msra.mxu1 %v13839_v46  ;;  %10991 = vmatprep.subr.bf16.mxu0 %v13854_v26  ;;  %v13917_v46 = vcombine.low %v2376_v2, %v2384_v14  ;;  %v13919_v26 = vcombine.low %v2377_v51, %v2385_v45  ;;  %v13936_v12 = vcombine.high %v2393_v5, %v2401_v29  ;;  %v2456_v45 = vld [vmem:[%s16540_s19 + $0x10b0] sm:$0xff] }
 0x4e2   : > { %11443 = vmatprep.subr.bf16.mxu1 %v13856_v24  ;;  %v2408_v24 = vld [vmem:[%s16540_s19 + $0xf30] sm:$0xff] }
 0x4e3   : > { %10935 = vmatmul.mubr.bf16.gmra.mrb[176].mxu0 %v20708_v0  ;;  %v13950_v35 = vcombine.high %v2408_v24, %v2416_v38 }
 0x4e4   : > { %11387 = vmatmul.mubr.bf16.gmra.mrb[176].mxu1 %v20708_v0  ;;  %10992 = vmatpush1.bf16.msra.mxu0 %v13853_v47  ;;  %v2417_v47 = vld [vmem:[%s16540_s19 + $0xf78] sm:$0xff]  ;;  %v2432_v0 = vld [vmem:[%s16540_s19 + $0xff0] sm:$0xff] }
 0x4e5   : > { %11444 = vmatpush1.bf16.msra.mxu1 %v13855_v10  ;;  %10944 = vmatprep.mubr.bf16.mxu0 %v20709_v4  ;;  %v20712_v10 = vld [vmem:[#allocation43_spill] sm:$0xff]  ;;  %v13952_v23 = vcombine.high %v2409_v55, %v2417_v47  ;;  %v13966_v15 = vcombine.high %v2424_v30, %v2432_v0  ;;  %v13965_v2 = vcombine.low %v2424_v30, %v2432_v0 }
 0x4e6   : > { %11396 = vmatprep.mubr.bf16.mxu1 %v20709_v4  ;;  %10993 = vmatprep.subr.bf16.mxu0 %v13870_v21  ;;  %v13935_v21 = vcombine.low %v2393_v5, %v2401_v29  ;;  %v13949_v4 = vcombine.low %v2408_v24, %v2416_v38  ;;  %v2480_v5 = vld [vmem:[%s16540_s19 + $0x1170] sm:$0xff]  ;;  %v2473_v29 = vld [vmem:[%s16540_s19 + $0x1138] sm:$0xff] }
 0x4e7   : > { %11445 = vmatprep.subr.bf16.mxu1 %v13872_v11  ;;  %v20713_v11 = vld [vmem:[#allocation50_spill] sm:$0xff] }
 0x4e8   : > { %10994 = vmatpush1.bf16.msra.mxu0 %v13869_v43  ;;  %v2425_v43 = vld [vmem:[%s16540_s19 + $0xfb8] sm:$0xff] }
 0x4e9   : > { %11446 = vmatpush1.bf16.msra.mxu1 %v13871_v18  ;;  %10995 = vmatprep.subr.bf16.mxu0 %v13886_v63  ;;  %v2433_v18 = vld [vmem:[%s16540_s19 + $0xff8] sm:$0xff]  ;;  %v13951_v63 = vcombine.low %v2409_v55, %v2417_v47  ;;  %v2488_v47 = vld [vmem:[%s16540_s19 + $0x11b0] sm:$0xff] }
 0x4ea   : > { %11447 = vmatprep.subr.bf16.mxu1 %v13888_v61  ;;  %v2440_v61 = vld [vmem:[%s16540_s19 + $0x1030] sm:$0xff]  ;;  %v13968_v44 = vcombine.high %v2425_v43, %v2433_v18 }
 0x4eb   : > { %10945 = vmatmul.mubr.bf16.gmra.mrb[180].mxu0 %v20710_v53  ;;  %v13982_v14 = vcombine.high %v2440_v61, %v2448_v25 }
 0x4ec   : > { %11397 = vmatmul.mubr.bf16.gmra.mrb[180].mxu1 %v20710_v53  ;;  %10996 = vmatpush1.bf16.msra.mxu0 %v13885_v49  ;;  %v2449_v49 = vld [vmem:[%s16540_s19 + $0x1078] sm:$0xff]  ;;  %v2464_v53 = vld [vmem:[%s16540_s19 + $0x10f0] sm:$0xff] }
 0x4ed   : > { %11448 = vmatpush1.bf16.msra.mxu1 %v13887_v27  ;;  %10954 = vmatprep.mubr.bf16.mxu0 %v20711_v48  ;;  %v20714_v27 = vld [vmem:[#allocation49_spill] sm:$0xff]  ;;  %v13984_v51 = vcombine.high %v2441_v34, %v2449_v49  ;;  %v13998_v60 = vcombine.high %v2456_v45, %v2464_v53  ;;  %v13997_v24 = vcombine.low %v2456_v45, %v2464_v53 }
 0x4ee   : > { %11406 = vmatprep.mubr.bf16.mxu1 %v20711_v48  ;;  %10997 = vmatprep.subr.bf16.mxu0 %v13902_v32  ;;  %v13967_v32 = vcombine.low %v2425_v43, %v2433_v18  ;;  %v13981_v48 = vcombine.low %v2440_v61, %v2448_v25  ;;  %v2512_v43 = vld [vmem:[%s16540_s19 + $0x1270] sm:$0xff]  ;;  %v2505_v18 = vld [vmem:[%s16540_s19 + $0x1238] sm:$0xff] }
 0x4ef   : > { %11449 = vmatprep.subr.bf16.mxu1 %v13904_v31  ;;  %v20715_v31 = vld [vmem:[#allocation26_spill] sm:$0xff] }
 0x4f0   : > { %10998 = vmatpush1.bf16.msra.mxu0 %v13901_v58  ;;  %v2457_v58 = vld [vmem:[%s16540_s19 + $0x10b8] sm:$0xff] }
 0x4f1   : > { %11450 = vmatpush1.bf16.msra.mxu1 %v13903_v17  ;;  %10999 = vmatprep.subr.bf16.mxu0 %v13918_v50  ;;  %v2465_v17 = vld [vmem:[%s16540_s19 + $0x10f8] sm:$0xff]  ;;  %v13983_v50 = vcombine.low %v2441_v34, %v2449_v49  ;;  %v2520_v49 = vld [vmem:[%s16540_s19 + $0x12b0] sm:$0xff] }
 0x4f2   : > { %11451 = vmatprep.subr.bf16.mxu1 %v13920_v39  ;;  %v2472_v39 = vld [vmem:[%s16540_s19 + $0x1130] sm:$0xff]  ;;  %v14000_v54 = vcombine.high %v2457_v58, %v2465_v17 }
 0x4f3   : > { %10955 = vmatmul.mubr.bf16.gmra.mrb[184].mxu0 %v20712_v10  ;;  %v14014_v38 = vcombine.high %v2472_v39, %v2480_v5 }
 0x4f4   : > { %11407 = vmatmul.mubr.bf16.gmra.mrb[184].mxu1 %v20712_v10  ;;  %11000 = vmatpush1.bf16.msra.mxu0 %v13917_v46  ;;  %v2481_v46 = vld [vmem:[%s16540_s19 + $0x1178] sm:$0xff]  ;;  %v2496_v10 = vld [vmem:[%s16540_s19 + $0x11f0] sm:$0xff] }
 0x4f5   : > { %11452 = vmatpush1.bf16.msra.mxu1 %v13919_v26  ;;  %10964 = vmatprep.mubr.bf16.mxu0 %v20713_v11  ;;  %v20716_v26 = vld [vmem:[#allocation25_spill] sm:$0xff]  ;;  %v14016_v55 = vcombine.high %v2473_v29, %v2481_v46  ;;  %v14030_v30 = vcombine.high %v2488_v47, %v2496_v10  ;;  %v14029_v61 = vcombine.low %v2488_v47, %v2496_v10 }
 0x4f6   : > { %11416 = vmatprep.mubr.bf16.mxu1 %v20713_v11  ;;  %11001 = vmatprep.subr.bf16.mxu0 %v13934_v13  ;;  %v13999_v13 = vcombine.low %v2457_v58, %v2465_v17  ;;  %v14013_v11 = vcombine.low %v2472_v39, %v2480_v5  ;;  %v2544_v58 = vld [vmem:[%s16540_s19 + $0x1370] sm:$0xff]  ;;  %v2537_v17 = vld [vmem:[%s16540_s19 + $0x1338] sm:$0xff] }
 0x4f7   : > { %11453 = vmatprep.subr.bf16.mxu1 %v13936_v12  ;;  %v20717_v12 = vld [vmem:[#allocation30_spill] sm:$0xff] }
 0x4f8   : > { %11002 = vmatpush1.bf16.msra.mxu0 %v13933_v19  ;;  %v2489_v19 = vld [vmem:[%s16540_s19 + $0x11b8] sm:$0xff] }
 0x4f9   : > { %11454 = vmatpush1.bf16.msra.mxu1 %v13935_v21  ;;  %11003 = vmatprep.subr.bf16.mxu0 %v13950_v35  ;;  %v2497_v21 = vld [vmem:[%s16540_s19 + $0x11f8] sm:$0xff]  ;;  %v14015_v35 = vcombine.low %v2473_v29, %v2481_v46  ;;  %v2552_v46 = vld [vmem:[%s16540_s19 + $0x13b0] sm:$0xff] }
 0x4fa   : > { %11455 = vmatprep.subr.bf16.mxu1 %v13952_v23  ;;  %v2504_v23 = vld [vmem:[%s16540_s19 + $0x1230] sm:$0xff]  ;;  %v14032_v0 = vcombine.high %v2489_v19, %v2497_v21 }
 0x4fb   : > { %10965 = vmatmul.mubr.bf16.gmra.mrb[188].mxu0 %v20714_v27  ;;  %v14046_v25 = vcombine.high %v2504_v23, %v2512_v43 }
 0x4fc   : > { %11417 = vmatmul.mubr.bf16.gmra.mrb[188].mxu1 %v20714_v27  ;;  %11004 = vmatpush1.bf16.msra.mxu0 %v13949_v4  ;;  %v2513_v4 = vld [vmem:[%s16540_s19 + $0x1278] sm:$0xff]  ;;  %v2528_v27 = vld [vmem:[%s16540_s19 + $0x12f0] sm:$0xff] }
 0x4fd   : > { %11456 = vmatpush1.bf16.msra.mxu1 %v13951_v63  ;;  %11007 = vmatprep.mubr.bf16.mxu0 %v20715_v31  ;;  %v20718_v63 = vld [vmem:[#allocation29_spill] sm:$0xff]  ;;  %v14048_v34 = vcombine.high %v2505_v18, %v2513_v4  ;;  %v14062_v45 = vcombine.high %v2520_v49, %v2528_v27  ;;  %v14061_v39 = vcombine.low %v2520_v49, %v2528_v27 }
 0x4fe   : > { %11459 = vmatprep.mubr.bf16.mxu1 %v20715_v31  ;;  %11005 = vmatprep.subr.bf16.mxu0 %v13966_v15  ;;  %v14031_v15 = vcombine.low %v2489_v19, %v2497_v21  ;;  %v14045_v31 = vcombine.low %v2504_v23, %v2512_v43  ;;  %v2576_v19 = vld [vmem:[%s16540_s19 + $0x1470] sm:$0xff]  ;;  %v2569_v21 = vld [vmem:[%s16540_s19 + $0x1438] sm:$0xff] }
 0x4ff   : > { %11457 = vmatprep.subr.bf16.mxu1 %v13968_v44  ;;  %v20719_v44 = vld [vmem:[#allocation34_spill] sm:$0xff] }
 0x500   : > { %11006 = vmatpush1.bf16.msra.mxu0 %v13965_v2  ;;  %v2521_v2 = vld [vmem:[%s16540_s19 + $0x12b8] sm:$0xff] }
 0x501   : > { %11458 = vmatpush1.bf16.msra.mxu1 %v13967_v32  ;;  %11088 = vmatprep.subr.bf16.mxu0 %v13982_v14  ;;  %v2529_v32 = vld [vmem:[%s16540_s19 + $0x12f8] sm:$0xff]  ;;  %v14047_v14 = vcombine.low %v2505_v18, %v2513_v4  ;;  %v2584_v4 = vld [vmem:[%s16540_s19 + $0x14b0] sm:$0xff] }
 0x502   : > { %11540 = vmatprep.subr.bf16.mxu1 %v13984_v51  ;;  %v2536_v51 = vld [vmem:[%s16540_s19 + $0x1330] sm:$0xff]  ;;  %v14064_v53 = vcombine.high %v2521_v2, %v2529_v32 }
 0x503   : > { %11008 = vmatmul.mubr.bf16.vlgmr.msra.gmra.mrb[160].mxu0 %v20716_v26  ;;  %v14078_v5 = vcombine.high %v2536_v51, %v2544_v58 }
 0x504   : > { %11460 = vmatmul.mubr.bf16.vlgmr.msra.gmra.mrb[160].mxu1 %v20716_v26  ;;  %11089 = vmatpush1.bf16.msra.mxu0 %v13981_v48  ;;  %v2545_v48 = vld [vmem:[%s16540_s19 + $0x1378] sm:$0xff]  ;;  %v2560_v26 = vld [vmem:[%s16540_s19 + $0x13f0] sm:$0xff] }
 0x505   : > { %11541 = vmatpush1.bf16.msra.mxu1 %v13983_v50  ;;  %11017 = vmatprep.mubr.bf16.mxu0 %v20717_v12  ;;  %v20720_v50 = vld [vmem:[#allocation33_spill] sm:$0xff]  ;;  %v14080_v29 = vcombine.high %v2537_v17, %v2545_v48  ;;  %v14094_v47 = vcombine.high %v2552_v46, %v2560_v26  ;;  %v14093_v23 = vcombine.low %v2552_v46, %v2560_v26 }
 0x506   : > { %11469 = vmatprep.mubr.bf16.mxu1 %v20717_v12  ;;  %11090 = vmatprep.subr.bf16.mxu0 %v13998_v60  ;;  %v14063_v60 = vcombine.low %v2521_v2, %v2529_v32  ;;  %v14077_v12 = vcombine.low %v2536_v51, %v2544_v58  ;;  %v2608_v2 = vld [vmem:[%s16540_s19 + $0x1570] sm:$0xff]  ;;  %v2601_v32 = vld [vmem:[%s16540_s19 + $0x1538] sm:$0xff] }
 0x507   : > { %11542 = vmatprep.subr.bf16.mxu1 %v14000_v54  ;;  %v20721_v54 = vld [vmem:[#allocation38_spill] sm:$0xff] }
 0x508   : > { %11091 = vmatpush1.bf16.msra.mxu0 %v13997_v24  ;;  %v2553_v24 = vld [vmem:[%s16540_s19 + $0x13b8] sm:$0xff] }
 0x509   : > { %11543 = vmatpush1.bf16.msra.mxu1 %v13999_v13  ;;  %11092 = vmatprep.subr.bf16.mxu0 %v14014_v38  ;;  %v2561_v13 = vld [vmem:[%s16540_s19 + $0x13f8] sm:$0xff]  ;;  %v14079_v38 = vcombine.low %v2537_v17, %v2545_v48  ;;  %v2616_v48 = vld [vmem:[%s16540_s19 + $0x15b0] sm:$0xff] }
 0x50a   : > { %11544 = vmatprep.subr.bf16.mxu1 %v14016_v55  ;;  %v2568_v55 = vld [vmem:[%s16540_s19 + $0x1430] sm:$0xff]  ;;  %v14096_v10 = vcombine.high %v2553_v24, %v2561_v13 }
 0x50b   : > { %11018 = vmatmul.mubr.bf16.gmra.mrb[164].mxu0 %v20718_v63  ;;  %v14110_v43 = vcombine.high %v2568_v55, %v2576_v19 }
 0x50c   : > { %11470 = vmatmul.mubr.bf16.gmra.mrb[164].mxu1 %v20718_v63  ;;  %11093 = vmatpush1.bf16.msra.mxu0 %v14013_v11  ;;  %v2577_v11 = vld [vmem:[%s16540_s19 + $0x1478] sm:$0xff]  ;;  %v2592_v63 = vld [vmem:[%s16540_s19 + $0x14f0] sm:$0xff] }
 0x50d   : > { %11545 = vmatpush1.bf16.msra.mxu1 %v14015_v35  ;;  %11027 = vmatprep.mubr.bf16.mxu0 %v20719_v44  ;;  %v20722_v35 = vld [vmem:[#allocation37_spill] sm:$0xff]  ;;  %v14112_v18 = vcombine.high %v2569_v21, %v2577_v11  ;;  %v14126_v49 = vcombine.high %v2584_v4, %v2592_v63  ;;  %v14125_v51 = vcombine.low %v2584_v4, %v2592_v63 }
 0x50e   : > { %11479 = vmatprep.mubr.bf16.mxu1 %v20719_v44  ;;  %11094 = vmatprep.subr.bf16.mxu0 %v14030_v30  ;;  %v14095_v30 = vcombine.low %v2553_v24, %v2561_v13  ;;  %v14109_v44 = vcombine.low %v2568_v55, %v2576_v19  ;;  %v2640_v24 = vld [vmem:[%s16540_s19 + $0x1670] sm:$0xff]  ;;  %v2633_v13 = vld [vmem:[%s16540_s19 + $0x1638] sm:$0xff] }
 0x50f   : > { %11546 = vmatprep.subr.bf16.mxu1 %v14032_v0  ;;  %v20723_v0 = vld [vmem:[#allocation42_spill] sm:$0xff] }
 0x510   : > { %11095 = vmatpush1.bf16.msra.mxu0 %v14029_v61  ;;  %v2585_v61 = vld [vmem:[%s16540_s19 + $0x14b8] sm:$0xff] }
 0x511   : > { %11547 = vmatpush1.bf16.msra.mxu1 %v14031_v15  ;;  %11096 = vmatprep.subr.bf16.mxu0 %v14046_v25  ;;  %v2593_v15 = vld [vmem:[%s16540_s19 + $0x14f8] sm:$0xff]  ;;  %v14111_v25 = vcombine.low %v2569_v21, %v2577_v11  ;;  %v2648_v11 = vld [vmem:[%s16540_s19 + $0x16b0] sm:$0xff] }
 0x512   : > { %11548 = vmatprep.subr.bf16.mxu1 %v14048_v34  ;;  %v2600_v34 = vld [vmem:[%s16540_s19 + $0x1530] sm:$0xff]  ;;  %v14128_v27 = vcombine.high %v2585_v61, %v2593_v15 }
 0x513   : > { %11028 = vmatmul.mubr.bf16.gmra.mrb[168].mxu0 %v20720_v50  ;;  %v14142_v58 = vcombine.high %v2600_v34, %v2608_v2 }
 0x514   : > { %11480 = vmatmul.mubr.bf16.gmra.mrb[168].mxu1 %v20720_v50  ;;  %11097 = vmatpush1.bf16.msra.mxu0 %v14045_v31  ;;  %v2609_v31 = vld [vmem:[%s16540_s19 + $0x1578] sm:$0xff]  ;;  %v2624_v50 = vld [vmem:[%s16540_s19 + $0x15f0] sm:$0xff] }
 0x515   : > { %11549 = vmatpush1.bf16.msra.mxu1 %v14047_v14  ;;  %11037 = vmatprep.mubr.bf16.mxu0 %v20721_v54  ;;  %v20724_v14 = vld [vmem:[#allocation41_spill] sm:$0xff]  ;;  %v14144_v17 = vcombine.high %v2601_v32, %v2609_v31  ;;  %v14158_v46 = vcombine.high %v2616_v48, %v2624_v50  ;;  %v14157_v55 = vcombine.low %v2616_v48, %v2624_v50 }
 0x516   : > { %11489 = vmatprep.mubr.bf16.mxu1 %v20721_v54  ;;  %11098 = vmatprep.subr.bf16.mxu0 %v14062_v45  ;;  %v14127_v45 = vcombine.low %v2585_v61, %v2593_v15  ;;  %v14141_v54 = vcombine.low %v2600_v34, %v2608_v2  ;;  %v2672_v61 = vld [vmem:[%s16540_s19 + $0x1770] sm:$0xff]  ;;  %v2665_v15 = vld [vmem:[%s16540_s19 + $0x1738] sm:$0xff] }
 0x517   : > { %11550 = vmatprep.subr.bf16.mxu1 %v14064_v53  ;;  %v20725_v53 = vld [vmem:[#allocation47_spill] sm:$0xff] }
 0x518   : > { %11099 = vmatpush1.bf16.msra.mxu0 %v14061_v39  ;;  %v2617_v39 = vld [vmem:[%s16540_s19 + $0x15b8] sm:$0xff] }
 0x519   : > { %11551 = vmatpush1.bf16.msra.mxu1 %v14063_v60  ;;  %11100 = vmatprep.subr.bf16.mxu0 %v14078_v5  ;;  %v2625_v60 = vld [vmem:[%s16540_s19 + $0x15f8] sm:$0xff]  ;;  %v14143_v5 = vcombine.low %v2601_v32, %v2609_v31  ;;  %v2680_v31 = vld [vmem:[%s16540_s19 + $0x17b0] sm:$0xff] }
 0x51a   : > { %11552 = vmatprep.subr.bf16.mxu1 %v14080_v29  ;;  %v2632_v29 = vld [vmem:[%s16540_s19 + $0x1630] sm:$0xff]  ;;  %v14160_v26 = vcombine.high %v2617_v39, %v2625_v60 }
 0x51b   : > { %11038 = vmatmul.mubr.bf16.gmra.mrb[172].mxu0 %v20722_v35  ;;  %v14174_v19 = vcombine.high %v2632_v29, %v2640_v24 }
 0x51c   : > { %11490 = vmatmul.mubr.bf16.gmra.mrb[172].mxu1 %v20722_v35  ;;  %11101 = vmatpush1.bf16.msra.mxu0 %v14077_v12  ;;  %v2641_v12 = vld [vmem:[%s16540_s19 + $0x1678] sm:$0xff]  ;;  %v2656_v35 = vld [vmem:[%s16540_s19 + $0x16f0] sm:$0xff] }
 0x51d   : > { %11553 = vmatpush1.bf16.msra.mxu1 %v14079_v38  ;;  %11047 = vmatprep.mubr.bf16.mxu0 %v20723_v0  ;;  %v20726_v38 = vld [vmem:[#allocation46_spill] sm:$0xff]  ;;  %v14176_v21 = vcombine.high %v2633_v13, %v2641_v12  ;;  %v14190_v4 = vcombine.high %v2648_v11, %v2656_v35  ;;  %v14189_v34 = vcombine.low %v2648_v11, %v2656_v35 }
 0x51e   : > { %11499 = vmatprep.mubr.bf16.mxu1 %v20723_v0  ;;  %11102 = vmatprep.subr.bf16.mxu0 %v14094_v47  ;;  %v14159_v47 = vcombine.low %v2617_v39, %v2625_v60  ;;  %v14173_v0 = vcombine.low %v2632_v29, %v2640_v24  ;;  %v2704_v39 = vld [vmem:[%s16540_s19 + $0x1870] sm:$0xff]  ;;  %v2697_v60 = vld [vmem:[%s16540_s19 + $0x1838] sm:$0xff] }
 0x51f   : > { %11554 = vmatprep.subr.bf16.mxu1 %v14096_v10  ;;  %v20727_v10 = vld [vmem:[#allocation52_spill] sm:$0xff] }
 0x520   : > { %11103 = vmatpush1.bf16.msra.mxu0 %v14093_v23  ;;  %v2649_v23 = vld [vmem:[%s16540_s19 + $0x16b8] sm:$0xff] }
 0x521   : > { %11555 = vmatpush1.bf16.msra.mxu1 %v14095_v30  ;;  %11104 = vmatprep.subr.bf16.mxu0 %v14110_v43  ;;  %v2657_v30 = vld [vmem:[%s16540_s19 + $0x16f8] sm:$0xff]  ;;  %v14175_v43 = vcombine.low %v2633_v13, %v2641_v12  ;;  %v2712_v12 = vld [vmem:[%s16540_s19 + $0x18b0] sm:$0xff] }
 0x522   : > { %11556 = vmatprep.subr.bf16.mxu1 %v14112_v18  ;;  %v2664_v18 = vld [vmem:[%s16540_s19 + $0x1730] sm:$0xff]  ;;  %v14192_v63 = vcombine.high %v2649_v23, %v2657_v30 }
 0x523   : > { %11048 = vmatmul.mubr.bf16.gmra.mrb[176].mxu0 %v20724_v14  ;;  %v14206_v2 = vcombine.high %v2664_v18, %v2672_v61 }
 0x524   : > { %11500 = vmatmul.mubr.bf16.gmra.mrb[176].mxu1 %v20724_v14  ;;  %11105 = vmatpush1.bf16.msra.mxu0 %v14109_v44  ;;  %v2673_v44 = vld [vmem:[%s16540_s19 + $0x1778] sm:$0xff]  ;;  %v2688_v14 = vld [vmem:[%s16540_s19 + $0x17f0] sm:$0xff] }
 0x525   : > { %11557 = vmatpush1.bf16.msra.mxu1 %v14111_v25  ;;  %11057 = vmatprep.mubr.bf16.mxu0 %v20725_v53  ;;  %v20728_v25 = vld [vmem:[#allocation51_spill] sm:$0xff]  ;;  %v14208_v32 = vcombine.high %v2665_v15, %v2673_v44  ;;  %v14222_v48 = vcombine.high %v2680_v31, %v2688_v14  ;;  %v14221_v29 = vcombine.low %v2680_v31, %v2688_v14 }
 0x526   : > { %11509 = vmatprep.mubr.bf16.mxu1 %v20725_v53  ;;  %11106 = vmatprep.subr.bf16.mxu0 %v14126_v49  ;;  %v14191_v49 = vcombine.low %v2649_v23, %v2657_v30  ;;  %v14205_v53 = vcombine.low %v2664_v18, %v2672_v61  ;;  %v2736_v23 = vld [vmem:[%s16540_s19 + $0x1970] sm:$0xff]  ;;  %v2729_v30 = vld [vmem:[%s16540_s19 + $0x1938] sm:$0xff] }
 0x527   : > { %11558 = vmatprep.subr.bf16.mxu1 %v14128_v27  ;;  %v20729_v27 = vld [vmem:[#allocation58_spill] sm:$0xff] }
 0x528   : > { %11107 = vmatpush1.bf16.msra.mxu0 %v14125_v51  ;;  %v2681_v51 = vld [vmem:[%s16540_s19 + $0x17b8] sm:$0xff] }
 0x529   : > { %11559 = vmatpush1.bf16.msra.mxu1 %v14127_v45  ;;  %11108 = vmatprep.subr.bf16.mxu0 %v14142_v58  ;;  %v2689_v45 = vld [vmem:[%s16540_s19 + $0x17f8] sm:$0xff]  ;;  %v14207_v58 = vcombine.low %v2665_v15, %v2673_v44  ;;  %v2744_v44 = vld [vmem:[%s16540_s19 + $0x19b0] sm:$0xff] }
 0x52a   : > { %11560 = vmatprep.subr.bf16.mxu1 %v14144_v17  ;;  %v2696_v17 = vld [vmem:[%s16540_s19 + $0x1830] sm:$0xff]  ;;  %v14224_v50 = vcombine.high %v2681_v51, %v2689_v45 }
 0x52b   : > { %11058 = vmatmul.mubr.bf16.gmra.mrb[180].mxu0 %v20726_v38  ;;  %v14238_v24 = vcombine.high %v2696_v17, %v2704_v39 }
 0x52c   : > { %11510 = vmatmul.mubr.bf16.gmra.mrb[180].mxu1 %v20726_v38  ;;  %11109 = vmatpush1.bf16.msra.mxu0 %v14141_v54  ;;  %v2705_v54 = vld [vmem:[%s16540_s19 + $0x1878] sm:$0xff]  ;;  %v2720_v38 = vld [vmem:[%s16540_s19 + $0x18f0] sm:$0xff] }
 0x52d   : > { %11561 = vmatpush1.bf16.msra.mxu1 %v14143_v5  ;;  %11067 = vmatprep.mubr.bf16.mxu0 %v20727_v10  ;;  %v20730_v5 = vld [vmem:[#allocation57_spill] sm:$0xff]  ;;  %v14240_v13 = vcombine.high %v2697_v60, %v2705_v54  ;;  %v14254_v11 = vcombine.high %v2712_v12, %v2720_v38  ;;  %v14253_v18 = vcombine.low %v2712_v12, %v2720_v38  ;;  %v19648_v12 = vld [vmem:[%s16540_s19 + $0x1b30] sm:$0xff] }
 0x52e   : > { %11519 = vmatprep.mubr.bf16.mxu1 %v20727_v10  ;;  %11110 = vmatprep.subr.bf16.mxu0 %v14158_v46  ;;  %v14223_v46 = vcombine.low %v2681_v51, %v2689_v45  ;;  %v14237_v10 = vcombine.low %v2696_v17, %v2704_v39  ;;  %v2768_v51 = vld [vmem:[%s16540_s19 + $0x1a70] sm:$0xff]  ;;  %v2761_v45 = vld [vmem:[%s16540_s19 + $0x1a38] sm:$0xff] }
 0x52f   : > { %11562 = vmatprep.subr.bf16.mxu1 %v14160_v26  ;;  %v20731_v26 = vld [vmem:[#allocation56_spill] sm:$0xff] }
 0x530   : > { %11111 = vmatpush1.bf16.msra.mxu0 %v14157_v55  ;;  %v2713_v55 = vld [vmem:[%s16540_s19 + $0x18b8] sm:$0xff] }
 0x531   : > { %11563 = vmatpush1.bf16.msra.mxu1 %v14159_v47  ;;  %11112 = vmatprep.subr.bf16.mxu0 %v14174_v19  ;;  %v2721_v47 = vld [vmem:[%s16540_s19 + $0x18f8] sm:$0xff]  ;;  %v14239_v19 = vcombine.low %v2697_v60, %v2705_v54  ;;  %v2776_v54 = vld [vmem:[%s16540_s19 + $0x1ab0] sm:$0xff] }
 0x532   : > { %11564 = vmatprep.subr.bf16.mxu1 %v14176_v21  ;;  %v2728_v21 = vld [vmem:[%s16540_s19 + $0x1930] sm:$0xff]  ;;  %v14256_v35 = vcombine.high %v2713_v55, %v2721_v47 }
 0x533   : > { %11068 = vmatmul.mubr.bf16.gmra.mrb[184].mxu0 %v20728_v25  ;;  %v14270_v61 = vcombine.high %v2728_v21, %v2736_v23 }
 0x534   : > { %11520 = vmatmul.mubr.bf16.gmra.mrb[184].mxu1 %v20728_v25  ;;  %11113 = vmatpush1.bf16.msra.mxu0 %v14173_v0  ;;  %v2737_v0 = vld [vmem:[%s16540_s19 + $0x1978] sm:$0xff]  ;;  %v2752_v25 = vld [vmem:[%s16540_s19 + $0x19f0] sm:$0xff] }
 0x535   : > { %11565 = vmatpush1.bf16.msra.mxu1 %v14175_v43  ;;  %11077 = vmatprep.mubr.bf16.mxu0 %v20729_v27  ;;  %v20732_v43 = vld [vmem:[#allocation55_spill] sm:$0xff]  ;;  %v14272_v15 = vcombine.high %v2729_v30, %v2737_v0  ;;  %v14286_v31 = vcombine.high %v2744_v44, %v2752_v25  ;;  %v14285_v17 = vcombine.low %v2744_v44, %v2752_v25  ;;  %v19681_v44 = vld [vmem:[%s16540_s19 + $0x1bf0] sm:$0xff]  ;;  %v20741_v25 = vld [vmem:[#allocation65_spill] sm:$0xff] }
 0x536   : > { %11529 = vmatprep.mubr.bf16.mxu1 %v20729_v27  ;;  %11114 = vmatprep.subr.bf16.mxu0 %v14190_v4  ;;  %v14255_v4 = vcombine.low %v2713_v55, %v2721_v47  ;;  %v14269_v27 = vcombine.low %v2728_v21, %v2736_v23  ;;  %v19651_v47 = vld [vmem:[%s16540_s19 + $0x1b70] sm:$0xff]  ;;  %v20736_v21 = vld [vmem:[#allocation61_spill] sm:$0xff] }
 0x537   : > { %11566 = vmatprep.subr.bf16.mxu1 %v14192_v63  ;;  %v20733_v63 = vld [vmem:[#allocation60_spill] sm:$0xff]  ;;  %v20738_v23 = vld [vmem:[#allocation22_spill] sm:$0xff] }
 0x538   : > { %11115 = vmatpush1.bf16.msra.mxu0 %v14189_v34  ;;  %v2745_v34 = vld [vmem:[%s16540_s19 + $0x19b8] sm:$0xff] }
 0x539   : > { %11567 = vmatpush1.bf16.msra.mxu1 %v14191_v49  ;;  %11116 = vmatprep.subr.bf16.mxu0 %v14206_v2  ;;  %v2753_v49 = vld [vmem:[%s16540_s19 + $0x19f8] sm:$0xff]  ;;  %v14271_v2 = vcombine.low %v2729_v30, %v2737_v0 }
 0x53a   : > { %11568 = vmatprep.subr.bf16.mxu1 %v14208_v32  ;;  %v2760_v32 = vld [vmem:[%s16540_s19 + $0x1a30] sm:$0xff]  ;;  %v14288_v14 = vcombine.high %v2745_v34, %v2753_v49 }
 0x53b   : > { %11078 = vmatmul.mubr.bf16.gmra.mrb[188].mxu0 %v20730_v5  ;;  %v14302_v39 = vcombine.high %v2760_v32, %v2768_v51 }
 0x53c   : > { %11530 = vmatmul.mubr.bf16.gmra.mrb[188].mxu1 %v20730_v5  ;;  %11117 = vmatpush1.bf16.msra.mxu0 %v14205_v53  ;;  %v2769_v53 = vld [vmem:[%s16540_s19 + $0x1a78] sm:$0xff]  ;;  %v2784_v5 = vld [vmem:[%s16540_s19 + $0x1af0] sm:$0xff] }
 0x53d   : > { %11569 = vmatpush1.bf16.msra.mxu1 %v14207_v58  ;;  %11120 = vmatprep.mubr.bf16.mxu0 %v20731_v26  ;;  %v20734_v58 = vld [vmem:[#allocation59_spill] sm:$0xff]  ;;  %v14304_v60 = vcombine.high %v2761_v45, %v2769_v53  ;;  %v14318_v38 = vcombine.high %v2776_v54, %v2784_v5  ;;  %v14317_v0 = vcombine.low %v2776_v54, %v2784_v5 }
 0x53e   : > { %11572 = vmatprep.mubr.bf16.mxu1 %v20731_v26  ;;  %11118 = vmatprep.subr.bf16.mxu0 %v14222_v48  ;;  %v14287_v48 = vcombine.low %v2745_v34, %v2753_v49  ;;  %v14301_v26 = vcombine.low %v2760_v32, %v2768_v51  ;;  %v14334_v34 = vcombine.high %v19648_v12, %v19651_v47 }
 0x53f   : > { %11570 = vmatprep.subr.bf16.mxu1 %v14224_v50  ;;  %v20735_v50 = vld [vmem:[#allocation62_spill] sm:$0xff] }
 0x540   : > { %11119 = vmatpush1.bf16.msra.mxu0 %v14221_v29  ;;  %v2777_v29 = vld [vmem:[%s16540_s19 + $0x1ab8] sm:$0xff] }
 0x541   : > { %11571 = vmatpush1.bf16.msra.mxu1 %v14223_v46  ;;  %11201 = vmatprep.subr.bf16.mxu0 %v14238_v24  ;;  %v2785_v46 = vld [vmem:[%s16540_s19 + $0x1af8] sm:$0xff]  ;;  %v14303_v24 = vcombine.low %v2761_v45, %v2769_v53 }
 0x542   : > { %11653 = vmatprep.subr.bf16.mxu1 %v14240_v13  ;;  %v19645_v13 = vld [vmem:[%s18138_s6 + $0x8] sm:$0xff]  ;;  %v14320_v55 = vcombine.high %v2777_v29, %v2785_v46 }
 0x543   : > { %11121 = vmatmul.mubr.bf16.vlgmr.msra.gmra.mrb[160].mxu0 %v20732_v43  ;;  %v19667_v30 = vrot.slane %v19645_v13, %v20738_v23  ;;  %v19718_v23 = vld [vmem:[%s16540_s19 + $0x1c38] sm:$0xff] }
 0x544   : > { %11573 = vmatmul.mubr.bf16.vlgmr.msra.gmra.mrb[160].mxu1 %v20732_v43  ;;  %11202 = vmatpush1.bf16.msra.mxu0 %v14237_v10  ;;  %v19654_v10 = vld [vmem:[%s16540_s19 + $0x1b38] sm:$0xff]  ;;  %v14319_v43 = vcombine.low %v2777_v29, %v2785_v46 }
 0x545   : > { %11654 = vmatpush1.bf16.msra.mxu1 %v14239_v19  ;;  %11130 = vmatprep.mubr.bf16.mxu0 %v20733_v63  ;;  %v19657_v19 = vld [vmem:[%s16540_s19 + $0x1b78] sm:$0xff] }
 0x546   : > { %11582 = vmatprep.mubr.bf16.mxu1 %v20733_v63  ;;  %11203 = vmatprep.subr.bf16.mxu0 %v14254_v11  ;;  %v20737_v11 = vld [vmem:[#allocation20_spill] sm:$0xff]  ;;  %v20740_v63 = vld [vmem:[#allocation23_spill] sm:$0xff]  ;;  %v14336_v49 = vcombine.high %v19654_v10, %v19657_v19 }
 0x547   : > { %11655 = vmatprep.subr.bf16.mxu1 %v14256_v35  ;;  %v19663_v35 = vrot.slane %v19645_v13, %v20737_v11  ;;  %v19715_v11 = vld [vmem:[%s16540_s19 + $0x1c70] sm:$0xff] }
 0x548   : > { %11204 = vmatpush1.bf16.msra.mxu0 %v14253_v18  ;;  %v20739_v18 = vld [vmem:[#allocation21_spill] sm:$0xff] }
 0x549   : > { %11656 = vmatpush1.bf16.msra.mxu1 %v14255_v4  ;;  %11205 = vmatprep.subr.bf16.mxu0 %v14270_v61  ;;  %v19671_v4 = vrot.slane %v19645_v13, %v20739_v18  ;;  %v19675_v61 = vrot.slane %v19645_v13, %v20740_v63  ;;  %v20742_v63 = vld [vmem:[#allocation64_spill] sm:$0xff] }
 0x54a   : > { %11657 = vmatprep.subr.bf16.mxu1 %v14272_v15  ;;  %v19678_v15 = vld [vmem:[%s16540_s19 + $0x1bb0] sm:$0xff] }
 0x54b   : > { %11131 = vmatmul.mubr.bf16.gmra.mrb[164].mxu0 %v20734_v58 }
 0x54c   : > { %11583 = vmatmul.mubr.bf16.gmra.mrb[164].mxu1 %v20734_v58  ;;  %11206 = vmatpush1.bf16.msra.mxu0 %v14269_v27  ;;  %v19690_v27 = vld [vmem:[%s16540_s19 + $0x1bb8] sm:$0xff] }
 0x54d   : > { %11658 = vmatpush1.bf16.msra.mxu1 %v14271_v2  ;;  %11140 = vmatprep.mubr.bf16.mxu0 %v20735_v50  ;;  %v19693_v2 = vld [vmem:[%s16540_s19 + $0x1bf8] sm:$0xff] }
 0x54e   : > { %11592 = vmatprep.mubr.bf16.mxu1 %v20735_v50  ;;  %11207 = vmatprep.subr.bf16.mxu0 %v14286_v31  ;;  %v14352_v5 = vcombine.high %v19690_v27, %v19693_v2 }
 0x54f   : > { %11659 = vmatprep.subr.bf16.mxu1 %v14288_v14  ;;  %v14333_v14 = vcombine.low %v19648_v12, %v19651_v47 }
 0x550   : > { %11208 = vmatpush1.bf16.msra.mxu0 %v14285_v17  ;;  %v14335_v17 = vcombine.low %v19654_v10, %v19657_v19 }
 0x551   : > { %11660 = vmatpush1.bf16.msra.mxu1 %v14287_v48  ;;  %11209 = vmatprep.subr.bf16.mxu0 %v14302_v39  ;;  %v14350_v48 = vcombine.high %v19678_v15, %v19681_v44 }
 0x552   : > { %11661 = vmatprep.subr.bf16.mxu1 %v14304_v60 }
 0x553   : > { %11141 = vmatmul.mubr.bf16.gmra.mrb[168].mxu0 %v20736_v21 }
 0x554   : > { %11593 = vmatmul.mubr.bf16.gmra.mrb[168].mxu1 %v20736_v21  ;;  %11210 = vmatpush1.bf16.msra.mxu0 %v14301_v26 }
 0x555   : > { %11662 = vmatpush1.bf16.msra.mxu1 %v14303_v24  ;;  %11150 = vmatprep.mubr.bf16.mxu0 %v20741_v25 }
 0x556   : > { %11602 = vmatprep.mubr.bf16.mxu1 %v20741_v25  ;;  %v10331_v32 = vpop.f32.mrb[128].mxu0  ;;  %11211 = vmatprep.subr.bf16.mxu0 %v14318_v38  ;;  %v14349_v25 = vcombine.low %v19678_v15, %v19681_v44 }
 0x557   : > { %v10783_v31 = vpop.f32.mrb[128].mxu1  ;;  %11663 = vmatprep.subr.bf16.mxu1 %v14320_v55  ;;  %v14892_v51 = vadd.f32 %v10331_v32, %v19663_v35  ;;  %v10333_v53 = vpop.f32.mrb[129].mxu0  ;;  %v19710_v55 = vld [vmem:[%s16540_s19 + $0x1c30] sm:$0xff] }
 0x558   : > { %v14924_v45 = vadd.f32 %v10783_v31, %v19667_v30  ;;  %v10785_v58 = vpop.f32.mrb[129].mxu1  ;;  %v14893_v50 = vadd.f32 %v10333_v53, %v19671_v4  ;;  %11212 = vmatpush1.bf16.msra.mxu0 %v14317_v0  ;;  %v10335_v60 = vpop.f32.mrb[130].mxu0  ;;  %v19721_v0 = vld [vmem:[%s16540_s19 + $0x1c78] sm:$0xff]  ;;  %v19733_v53 = vld [vmem:[%s16540_s19 + $0x1cf0] sm:$0xff]  ;;  %v14366_v15 = vcombine.high %v19710_v55, %v19715_v11 }
 0x559   : > { %v14925_v39 = vadd.f32 %v10785_v58, %v19675_v61  ;;  %11664 = vmatpush1.bf16.msra.mxu1 %v14319_v43  ;;  %v10787_v54 = vpop.f32.mrb[130].mxu1  ;;  %v11774_v29 = vmax.f32 %v14892_v51, 0.0  ;;  %v14894_v26 = vadd.f32 %v10335_v60, %v19663_v35  ;;  %v10337_v12 = vpop.f32.mrb[131].mxu0  ;;  %11213 = vmatprep.subr.bf16.mxu0 %v14334_v34  ;;  %v14351_v34 = vcombine.low %v19690_v27, %v19693_v2  ;;  %v20743_v58 = vld [vmem:[#allocation67_spill] sm:$0xff] }
 0x55a   : > { %v11776_v46 = vmax.f32 %v14924_v45, 0.0  ;;  %v14926_v24 = vadd.f32 %v10787_v54, %v19667_v30  ;;  %v10789_v38 = vpop.f32.mrb[131].mxu1  ;;  %11665 = vmatprep.subr.bf16.mxu1 %v14336_v49  ;;  %v11775_v47 = vmax.f32 %v14893_v50, 0.0  ;;  %v14895_v19 = vadd.f32 %v10337_v12, %v19671_v4  ;;  %v19730_v45 = vld [vmem:[%s16540_s19 + $0x1cb0] sm:$0xff]  ;;  %v19742_v27 = vld [vmem:[%s16540_s19 + $0x1cb8] sm:$0xff] }
 0x55b   : > { %v11777_v10 = vmax.f32 %v14925_v39, 0.0  ;;  %v14927_v21 = vadd.f32 %v10789_v38, %v19675_v61  ;;  %v11790_v43 = vmax.f32 %v14894_v26, 0.0  ;;  %11151 = vmatmul.mubr.bf16.gmra.mrb[172].mxu0 %v20742_v63  ;;  %v14368_v44 = vcombine.high %v19718_v23, %v19721_v0  ;;  %v19745_v2 = vld [vmem:[%s16540_s19 + $0x1cf8] sm:$0xff] }
 0x55c   : > { %v11792_v18 = vmax.f32 %v14926_v24, 0.0  ;;  %11603 = vmatmul.mubr.bf16.gmra.mrb[172].mxu1 %v20742_v63  ;;  %v14636_v49 = vpack.c.bf16 %v11775_v47, %v11774_v29  ;;  %v11791_v31 = vmax.f32 %v14895_v19, 0.0  ;;  %11214 = vmatpush1.bf16.msra.mxu0 %v14333_v14  ;;  %v14365_v60 = vcombine.low %v19710_v55, %v19715_v11 }
 0x55d   : > { %v14637_v32 = vpack.c.bf16 %v11777_v10, %v11776_v46  ;;  %v11793_v51 = vmax.f32 %v14927_v21, 0.0  ;;  %11666 = vmatpush1.bf16.msra.mxu1 %v14335_v17  ;;  %11160 = vmatprep.mubr.bf16.mxu0 %v20743_v58  ;;  %v14367_v24 = vcombine.low %v19718_v23, %v19721_v0  ;;  %v14382_v12 = vcombine.high %v19730_v45, %v19733_v53 }
 0x55e   : > { %11612 = vmatprep.mubr.bf16.mxu1 %v20743_v58  ;;  %12794 = vst [vmem:[%s18241_s20 + $0x20] sm:$0xff] %v14636_v49  ;;  %v14644_v14 = vpack.c.bf16 %v11791_v31, %v11790_v43  ;;  %v10341_v50 = vpop.f32.mrb[132].mxu0  ;;  %11215 = vmatprep.subr.bf16.mxu0 %v14350_v48  ;;  %v14384_v47 = vcombine.high %v19742_v27, %v19745_v2  ;;  %v19766_v43 = vld [vmem:[%s16540_s19 + $0x1d30] sm:$0xff]  ;;  %v19777_v31 = vld [vmem:[%s16540_s19 + $0x1d78] sm:$0xff] }
 0x55f   : > { %12795 = vst [vmem:[%s18241_s20 + $0x28] sm:$0xff] %v14637_v32  ;;  %v14645_v17 = vpack.c.bf16 %v11793_v51, %v11792_v18  ;;  %v10793_v39 = vpop.f32.mrb[132].mxu1  ;;  %11667 = vmatprep.subr.bf16.mxu1 %v14352_v5  ;;  %v14896_v54 = vadd.f32 %v10341_v50, %v19663_v35  ;;  %v10343_v46 = vpop.f32.mrb[133].mxu0  ;;  %v19771_v49 = vld [vmem:[%s16540_s19 + $0x1d70] sm:$0xff]  ;;  %v19774_v32 = vld [vmem:[%s16540_s19 + $0x1d38] sm:$0xff] }
 0x560   : > { %v14928_v29 = vadd.f32 %v10793_v39, %v19667_v30  ;;  %v10795_v26 = vpop.f32.mrb[133].mxu1  ;;  %12802 = vst [vmem:[%s18241_s20 + $0x60] sm:$0xff] %v14644_v14  ;;  %v14897_v48 = vadd.f32 %v10343_v46, %v19671_v4  ;;  %11216 = vmatpush1.bf16.msra.mxu0 %v14349_v25  ;;  %v10345_v38 = vpop.f32.mrb[134].mxu0 }
 0x561   : > { %12803 = vst [vmem:[%s18241_s20 + $0x68] sm:$0xff] %v14645_v17  ;;  %v14929_v5 = vadd.f32 %v10795_v26, %v19675_v61  ;;  %11668 = vmatpush1.bf16.msra.mxu1 %v14351_v34  ;;  %v10797_v55 = vpop.f32.mrb[134].mxu1  ;;  %v11806_v10 = vmax.f32 %v14896_v54, 0.0  ;;  %v14898_v21 = vadd.f32 %v10345_v38, %v19663_v35  ;;  %v10347_v23 = vpop.f32.mrb[135].mxu0  ;;  %11217 = vmatprep.subr.bf16.mxu0 %v14366_v15  ;;  %v19786_v54 = vld [vmem:[%s16540_s19 + $0x1db0] sm:$0xff] }
 0x562   : > { %v11808_v19 = vmax.f32 %v14928_v29, 0.0  ;;  %v14930_v11 = vadd.f32 %v10797_v55, %v19667_v30  ;;  %v10799_v0 = vpop.f32.mrb[135].mxu1  ;;  %11669 = vmatprep.subr.bf16.mxu1 %v14368_v44  ;;  %v11807_v18 = vmax.f32 %v14897_v48, 0.0  ;;  %v14899_v25 = vadd.f32 %v10347_v23, %v19671_v4  ;;  %v19789_v29 = vld [vmem:[%s16540_s19 + $0x1df0] sm:$0xff] }
 0x563   : > { %v11809_v63 = vmax.f32 %v14929_v5, 0.0  ;;  %v14931_v34 = vadd.f32 %v10799_v0, %v19675_v61  ;;  %v11822_v51 = vmax.f32 %v14898_v21, 0.0  ;;  %11161 = vmatmul.mubr.bf16.gmra.mrb[176].mxu0 %v17536_v22  ;;  %v14381_v15 = vcombine.low %v19730_v45, %v19733_v53  ;;  %v19798_v53 = vld [vmem:[%s16540_s19 + $0x1db8] sm:$0xff] }
 0x564   : > { %v11824_v58 = vmax.f32 %v14930_v11, 0.0  ;;  %11613 = vmatmul.mubr.bf16.gmra.mrb[176].mxu1 %v17536_v22  ;;  %v14383_v44 = vcombine.low %v19742_v27, %v19745_v2  ;;  %v14652_v14 = vpack.c.bf16 %v11807_v18, %v11806_v10  ;;  %v11823_v50 = vmax.f32 %v14899_v25, 0.0  ;;  %11218 = vmatpush1.bf16.msra.mxu0 %v14365_v60  ;;  %v19801_v27 = vld [vmem:[%s16540_s19 + $0x1df8] sm:$0xff] }
 0x565   : > { %v14653_v17 = vpack.c.bf16 %v11809_v63, %v11808_v19  ;;  %v11825_v39 = vmax.f32 %v14931_v34, 0.0  ;;  %11670 = vmatpush1.bf16.msra.mxu1 %v14367_v24  ;;  %11170 = vmatprep.mubr.bf16.mxu0 %v17608_v1  ;;  %v14398_v22 = vcombine.high %v19766_v43, %v19771_v49  ;;  %v14400_v45 = vcombine.high %v19774_v32, %v19777_v31  ;;  %v19822_v34 = vld [vmem:[%s16540_s19 + $0x1e30] sm:$0xff] }
 0x566   : > { %11622 = vmatprep.mubr.bf16.mxu1 %v17608_v1  ;;  %12810 = vst [vmem:[%s18241_s20 + $0xa0] sm:$0xff] %v14652_v14  ;;  %v14660_v2 = vpack.c.bf16 %v11823_v50, %v11822_v51  ;;  %v10351_v46 = vpop.f32.mrb[136].mxu0  ;;  %11219 = vmatprep.subr.bf16.mxu0 %v14382_v12  ;;  %v14397_v1 = vcombine.low %v19766_v43, %v19771_v49 }
 0x567   : > { %12811 = vst [vmem:[%s18241_s20 + $0xa8] sm:$0xff] %v14653_v17  ;;  %v14661_v60 = vpack.c.bf16 %v11825_v39, %v11824_v58  ;;  %v10803_v26 = vpop.f32.mrb[136].mxu1  ;;  %11671 = vmatprep.subr.bf16.mxu1 %v14384_v47  ;;  %v14900_v24 = vadd.f32 %v10351_v46, %v19663_v35  ;;  %v10353_v5 = vpop.f32.mrb[137].mxu0  ;;  %v14399_v55 = vcombine.low %v19774_v32, %v19777_v31  ;;  %v19827_v58 = vld [vmem:[%s16540_s19 + $0x1e70] sm:$0xff] }
 0x568   : > { %v14932_v48 = vadd.f32 %v10803_v26, %v19667_v30  ;;  %v10805_v38 = vpop.f32.mrb[137].mxu1  ;;  %v14414_v10 = vcombine.high %v19786_v54, %v19789_v29  ;;  %12818 = vst [vmem:[%s18241_s20 + $0xe0] sm:$0xff] %v14660_v2  ;;  %v14901_v12 = vadd.f32 %v10353_v5, %v19671_v4  ;;  %11220 = vmatpush1.bf16.msra.mxu0 %v14381_v15  ;;  %v10355_v19 = vpop.f32.mrb[138].mxu0  ;;  %v19830_v15 = vld [vmem:[%s16540_s19 + $0x1e38] sm:$0xff]  ;;  %v19842_v46 = vld [vmem:[%s16540_s19 + $0x1eb0] sm:$0xff] }
 0x569   : > { %12819 = vst [vmem:[%s18241_s20 + $0xe8] sm:$0xff] %v14661_v60  ;;  %v14933_v47 = vadd.f32 %v10805_v38, %v19675_v61  ;;  %11672 = vmatpush1.bf16.msra.mxu1 %v14383_v44  ;;  %v10807_v21 = vpop.f32.mrb[138].mxu1  ;;  %v14416_v11 = vcombine.high %v19798_v53, %v19801_v27  ;;  %v11838_v23 = vmax.f32 %v14900_v24, 0.0  ;;  %v14902_v43 = vadd.f32 %v10355_v19, %v19663_v35  ;;  %v10357_v63 = vpop.f32.mrb[139].mxu0  ;;  %v19833_v44 = vld [vmem:[%s16540_s19 + $0x1e78] sm:$0xff]  ;;  %v19845_v26 = vld [vmem:[%s16540_s19 + $0x1ef0] sm:$0xff] }
 0x56a   : > { %v11840_v0 = vmax.f32 %v14932_v48, 0.0  ;;  %v14934_v18 = vadd.f32 %v10807_v21, %v19667_v30  ;;  %v10809_v25 = vpop.f32.mrb[139].mxu1  ;;  %11221 = vmatprep.subr.bf16.mxu0 %v14398_v22  ;;  %11673 = vmatprep.subr.bf16.mxu1 %v14400_v45  ;;  %v11839_v49 = vmax.f32 %v14901_v12, 0.0  ;;  %v14903_v31 = vadd.f32 %v10357_v63, %v19671_v4 }
 0x56b   : > { %v11841_v32 = vmax.f32 %v14933_v47, 0.0  ;;  %v14935_v51 = vadd.f32 %v10809_v25, %v19675_v61  ;;  %v11854_v14 = vmax.f32 %v14902_v43, 0.0  ;;  %11171 = vmatmul.mubr.bf16.gmra.mrb[180].mxu0 %v17596_v28  ;;  %v14413_v50 = vcombine.low %v19786_v54, %v19789_v29  ;;  %v19854_v29 = vld [vmem:[%s16540_s19 + $0x1eb8] sm:$0xff] }
 0x56c   : > { %v11856_v17 = vmax.f32 %v14934_v18, 0.0  ;;  %11623 = vmatmul.mubr.bf16.gmra.mrb[180].mxu1 %v17596_v28  ;;  %v14415_v39 = vcombine.low %v19798_v53, %v19801_v27  ;;  %v14668_v22 = vpack.c.bf16 %v11839_v49, %v11838_v23  ;;  %v11855_v2 = vmax.f32 %v14903_v31, 0.0  ;;  %11222 = vmatpush1.bf16.msra.mxu0 %v14397_v1  ;;  %v19857_v53 = vld [vmem:[%s16540_s19 + $0x1ef8] sm:$0xff] }
 0x56d   : > { %v14669_v45 = vpack.c.bf16 %v11841_v32, %v11840_v0  ;;  %v11857_v60 = vmax.f32 %v14935_v51, 0.0  ;;  %11674 = vmatpush1.bf16.msra.mxu1 %v14399_v55  ;;  %11180 = vmatprep.mubr.bf16.mxu0 %v17668_v57  ;;  %v14430_v28 = vcombine.high %v19822_v34, %v19827_v58  ;;  %v14432_v54 = vcombine.high %v19830_v15, %v19833_v44  ;;  %v19878_v32 = vld [vmem:[%s16540_s19 + $0x1f30] sm:$0xff] }
 0x56e   : > { %11632 = vmatprep.mubr.bf16.mxu1 %v17668_v57  ;;  %12826 = vst [vmem:[%s18241_s20 + $0x120] sm:$0xff] %v14668_v22  ;;  %v14676_v27 = vpack.c.bf16 %v11855_v2, %v11854_v14  ;;  %v10361_v24 = vpop.f32.mrb[140].mxu0  ;;  %11223 = vmatprep.subr.bf16.mxu0 %v14414_v10  ;;  %v14429_v57 = vcombine.low %v19822_v34, %v19827_v58  ;;  %v19886_v14 = vld [vmem:[%s16540_s19 + $0x1f38] sm:$0xff] }
 0x56f   : > { %12827 = vst [vmem:[%s18241_s20 + $0x128] sm:$0xff] %v14669_v45  ;;  %v14677_v1 = vpack.c.bf16 %v11857_v60, %v11856_v17  ;;  %v10813_v48 = vpop.f32.mrb[140].mxu1  ;;  %11675 = vmatprep.subr.bf16.mxu1 %v14416_v11  ;;  %v14904_v5 = vadd.f32 %v10361_v24, %v19663_v35  ;;  %v10363_v55 = vpop.f32.mrb[141].mxu0  ;;  %v14431_v47 = vcombine.low %v19830_v15, %v19833_v44  ;;  %v19883_v44 = vld [vmem:[%s16540_s19 + $0x1f70] sm:$0xff]  ;;  %v19889_v17 = vld [vmem:[%s16540_s19 + $0x1f78] sm:$0xff] }
 0x570   : > { %v14936_v38 = vadd.f32 %v10813_v48, %v19667_v30  ;;  %v10815_v12 = vpop.f32.mrb[141].mxu1  ;;  %v14446_v19 = vcombine.high %v19842_v46, %v19845_v26  ;;  %12834 = vst [vmem:[%s18241_s20 + $0x160] sm:$0xff] %v14676_v27  ;;  %v14905_v10 = vadd.f32 %v10363_v55, %v19671_v4  ;;  %11224 = vmatpush1.bf16.msra.mxu0 %v14413_v50  ;;  %v10365_v11 = vpop.f32.mrb[142].mxu0  ;;  %v19898_v27 = vld [vmem:[%s16540_s19 + $0x1fb0] sm:$0xff] }
 0x571   : > { %12835 = vst [vmem:[%s18241_s20 + $0x168] sm:$0xff] %v14677_v1  ;;  %v14937_v21 = vadd.f32 %v10815_v12, %v19675_v61  ;;  %11676 = vmatpush1.bf16.msra.mxu1 %v14415_v39  ;;  %v10817_v23 = vpop.f32.mrb[142].mxu1  ;;  %v14448_v0 = vcombine.high %v19854_v29, %v19857_v53  ;;  %v11870_v43 = vmax.f32 %v14904_v5, 0.0  ;;  %v14906_v63 = vadd.f32 %v10365_v11, %v19663_v35  ;;  %v10367_v34 = vpop.f32.mrb[143].mxu0  ;;  %v19901_v1 = vld [vmem:[%s16540_s19 + $0x1ff0] sm:$0xff] }
 0x572   : > { %v11872_v18 = vmax.f32 %v14936_v38, 0.0  ;;  %v14938_v25 = vadd.f32 %v10817_v23, %v19667_v30  ;;  %v10819_v49 = vpop.f32.mrb[143].mxu1  ;;  %11225 = vmatprep.subr.bf16.mxu0 %v14430_v28  ;;  %11677 = vmatprep.subr.bf16.mxu1 %v14432_v54  ;;  %v11871_v31 = vmax.f32 %v14905_v10, 0.0  ;;  %v14907_v58 = vadd.f32 %v10367_v34, %v19671_v4 }
 0x573   : > { %v11873_v51 = vmax.f32 %v14937_v21, 0.0  ;;  %v14939_v15 = vadd.f32 %v10819_v49, %v19675_v61  ;;  %v11886_v50 = vmax.f32 %v14906_v63, 0.0  ;;  %11181 = vmatmul.mubr.bf16.gmra.mrb[184].mxu0 %v17656_v20  ;;  %v14445_v22 = vcombine.low %v19842_v46, %v19845_v26  ;;  %v19910_v26 = vld [vmem:[%s16540_s19 + $0x1fb8] sm:$0xff] }
 0x574   : > { %v11888_v39 = vmax.f32 %v14938_v25, 0.0  ;;  %11633 = vmatmul.mubr.bf16.gmra.mrb[184].mxu1 %v17656_v20  ;;  %v14447_v45 = vcombine.low %v19854_v29, %v19857_v53  ;;  %v14684_v2 = vpack.c.bf16 %v11871_v31, %v11870_v43  ;;  %v11887_v28 = vmax.f32 %v14907_v58, 0.0  ;;  %11226 = vmatpush1.bf16.msra.mxu0 %v14429_v57  ;;  %v19913_v29 = vld [vmem:[%s16540_s19 + $0x1ff8] sm:$0xff] }
 0x575   : > { %v14685_v60 = vpack.c.bf16 %v11873_v51, %v11872_v18  ;;  %v11889_v54 = vmax.f32 %v14939_v15, 0.0  ;;  %11678 = vmatpush1.bf16.msra.mxu1 %v14431_v47  ;;  %11190 = vmatprep.mubr.bf16.mxu0 %v17703_v52  ;;  %v14462_v20 = vcombine.high %v19878_v32, %v19883_v44  ;;  %v14464_v46 = vcombine.high %v19886_v14, %v19889_v17 }
 0x576   : > { %11642 = vmatprep.mubr.bf16.mxu1 %v17703_v52  ;;  %12842 = vst [vmem:[%s18241_s20 + $0x1a0] sm:$0xff] %v14684_v2  ;;  %v14692_v53 = vpack.c.bf16 %v11887_v28, %v11886_v50  ;;  %v10371_v48 = vpop.f32.mrb[144].mxu0  ;;  %11227 = vmatprep.subr.bf16.mxu0 %v14446_v19  ;;  %v14461_v52 = vcombine.low %v19878_v32, %v19883_v44 }
 0x577   : > { %12843 = vst [vmem:[%s18241_s20 + $0x1a8] sm:$0xff] %v14685_v60  ;;  %v14693_v24 = vpack.c.bf16 %v11889_v54, %v11888_v39  ;;  %v10823_v57 = vpop.f32.mrb[144].mxu1  ;;  %11679 = vmatprep.subr.bf16.mxu1 %v14448_v0  ;;  %v14908_v5 = vadd.f32 %v10371_v48, %v19663_v35  ;;  %v10373_v55 = vpop.f32.mrb[145].mxu0  ;;  %v14463_v47 = vcombine.low %v19886_v14, %v19889_v17 }
 0x578   : > { %v14940_v38 = vadd.f32 %v10823_v57, %v19667_v30  ;;  %v10825_v12 = vpop.f32.mrb[145].mxu1  ;;  %v14478_v10 = vcombine.high %v19898_v27, %v19901_v1  ;;  %12850 = vst [vmem:[%s18241_s20 + $0x1e0] sm:$0xff] %v14692_v53  ;;  %v14909_v19 = vadd.f32 %v10373_v55, %v19671_v4  ;;  %11228 = vmatpush1.bf16.msra.mxu0 %v14445_v22  ;;  %v10375_v11 = vpop.f32.mrb[146].mxu0 }
 0x579   : > { %12851 = vst [vmem:[%s18241_s20 + $0x1e8] sm:$0xff] %v14693_v24  ;;  %v14941_v21 = vadd.f32 %v10825_v12, %v19675_v61  ;;  %11680 = vmatpush1.bf16.msra.mxu1 %v14447_v45  ;;  %v10827_v23 = vpop.f32.mrb[146].mxu1  ;;  %v14480_v0 = vcombine.high %v19910_v26, %v19913_v29  ;;  %v11902_v43 = vmax.f32 %v14908_v5, 0.0  ;;  %v14910_v63 = vadd.f32 %v10375_v11, %v19663_v35  ;;  %v10377_v34 = vpop.f32.mrb[147].mxu0 }
 0x57a   : > { %v11904_v18 = vmax.f32 %v14940_v38, 0.0  ;;  %v14942_v25 = vadd.f32 %v10827_v23, %v19667_v30  ;;  %v10829_v49 = vpop.f32.mrb[147].mxu1  ;;  %11229 = vmatprep.subr.bf16.mxu0 %v14462_v20  ;;  %11681 = vmatprep.subr.bf16.mxu1 %v14464_v46  ;;  %v11903_v32 = vmax.f32 %v14909_v19, 0.0  ;;  %v14911_v51 = vadd.f32 %v10377_v34, %v19671_v4 }
 0x57b   : > { %v11905_v31 = vmax.f32 %v14941_v21, 0.0  ;;  %v14943_v58 = vadd.f32 %v10829_v49, %v19675_v61  ;;  %v11918_v15 = vmax.f32 %v14910_v63, 0.0  ;;  %11191 = vmatmul.mubr.bf16.gmra.mrb[188].mxu0 %v17700_v6  ;;  %v14477_v14 = vcombine.low %v19898_v27, %v19901_v1 }
 0x57c   : > { %v11920_v44 = vmax.f32 %v14942_v25, 0.0  ;;  %11643 = vmatmul.mubr.bf16.gmra.mrb[188].mxu1 %v17700_v6  ;;  %v14479_v17 = vcombine.low %v19910_v26, %v19913_v29  ;;  %v14700_v50 = vpack.c.bf16 %v11903_v32, %v11902_v43  ;;  %v11919_v22 = vmax.f32 %v14911_v51, 0.0  ;;  %11230 = vmatpush1.bf16.msra.mxu0 %v14461_v52 }
 0x57d   : > { %v14701_v39 = vpack.c.bf16 %v11905_v31, %v11904_v18  ;;  %v11921_v45 = vmax.f32 %v14943_v58, 0.0  ;;  %11682 = vmatpush1.bf16.msra.mxu1 %v14463_v47  ;;  %11233 = vmatprep.mubr.bf16.mxu0 %v17386_v8 }
 0x57e   : > { %11685 = vmatprep.mubr.bf16.mxu1 %v17386_v8  ;;  %12858 = vst [vmem:[%s18241_s20 + $0x220] sm:$0xff] %v14700_v50  ;;  %v14708_v6 = vpack.c.bf16 %v11919_v22, %v11918_v15  ;;  %v10381_v60 = vpop.f32.mrb[148].mxu0  ;;  %11231 = vmatprep.subr.bf16.mxu0 %v14478_v10 }
 0x57f   : > { %12859 = vst [vmem:[%s18241_s20 + $0x228] sm:$0xff] %v14701_v39  ;;  %v14709_v2 = vpack.c.bf16 %v11921_v45, %v11920_v44  ;;  %v10833_v28 = vpop.f32.mrb[148].mxu1  ;;  %11683 = vmatprep.subr.bf16.mxu1 %v14480_v0  ;;  %v14912_v54 = vadd.f32 %v10381_v60, %v19663_v35  ;;  %v10383_v1 = vpop.f32.mrb[149].mxu0 }
 0x580   : > { %v14944_v27 = vadd.f32 %v10833_v28, %v19667_v30  ;;  %v10835_v20 = vpop.f32.mrb[149].mxu1  ;;  %12866 = vst [vmem:[%s18241_s20 + $0x260] sm:$0xff] %v14708_v6  ;;  %v14913_v46 = vadd.f32 %v10383_v1, %v19671_v4  ;;  %11232 = vmatpush1.bf16.msra.mxu0 %v14477_v14  ;;  %v10385_v26 = vpop.f32.mrb[150].mxu0 }
 0x581   : > { %12867 = vst [vmem:[%s18241_s20 + $0x268] sm:$0xff] %v14709_v2  ;;  %v14945_v8 = vadd.f32 %v10835_v20, %v19675_v61  ;;  %11684 = vmatpush1.bf16.msra.mxu1 %v14479_v17  ;;  %v10837_v29 = vpop.f32.mrb[150].mxu1  ;;  %v11934_v53 = vmax.f32 %v14912_v54, 0.0  ;;  %v14914_v48 = vadd.f32 %v10385_v26, %v19663_v35  ;;  %v10387_v52 = vpop.f32.mrb[151].mxu0  ;;  %v20744_v54 = vld [vmem:[#allocation63_spill] sm:$0xff] }
 0x582   : > { %v11936_v24 = vmax.f32 %v14944_v27, 0.0  ;;  %v14946_v57 = vadd.f32 %v10837_v29, %v19667_v30  ;;  %v10839_v5 = vpop.f32.mrb[151].mxu1  ;;  %v11935_v38 = vmax.f32 %v14913_v46, 0.0  ;;  %v14915_v12 = vadd.f32 %v10387_v52, %v19671_v4 }
 0x583   : > { %v11937_v55 = vmax.f32 %v14945_v8, 0.0  ;;  %v14947_v47 = vadd.f32 %v10839_v5, %v19675_v61  ;;  %v11950_v10 = vmax.f32 %v14914_v48, 0.0  ;;  %11234 = vmatmul.mubr.bf16.vlgmr.msra.gmra.mrb[160].mxu0 %v17379_v40  ;;  %v20745_v8 = vld [vmem:[#allocation66_spill] sm:$0xff] }
 0x584   : > { %v11952_v19 = vmax.f32 %v14946_v57, 0.0  ;;  %11686 = vmatmul.mubr.bf16.vlgmr.msra.gmra.mrb[160].mxu1 %v17379_v40  ;;  %v14716_v21 = vpack.c.bf16 %v11935_v38, %v11934_v53  ;;  %v11951_v23 = vmax.f32 %v14915_v12, 0.0  ;;  %11243 = vmatprep.mubr.bf16.mxu0 %v17446_v56 }
 0x585   : > { %v14717_v11 = vpack.c.bf16 %v11937_v55, %v11936_v24  ;;  %v11953_v0 = vmax.f32 %v14947_v47, 0.0  ;;  %11695 = vmatprep.mubr.bf16.mxu1 %v17446_v56 }
 0x586   : > { %12874 = vst [vmem:[%s18241_s20 + $0x2a0] sm:$0xff] %v14716_v21  ;;  %v14724_v43 = vpack.c.bf16 %v11951_v23, %v11950_v10  ;;  %v10391_v63 = vpop.f32.mrb[152].mxu0 }
 0x587   : > { %12875 = vst [vmem:[%s18241_s20 + $0x2a8] sm:$0xff] %v14717_v11  ;;  %v14725_v18 = vpack.c.bf16 %v11953_v0, %v11952_v19  ;;  %v10843_v25 = vpop.f32.mrb[152].mxu1  ;;  %v14916_v34 = vadd.f32 %v10391_v63, %v19663_v35  ;;  %v10393_v49 = vpop.f32.mrb[153].mxu0 }
 0x588   : > { %v14948_v40 = vadd.f32 %v10843_v25, %v19667_v30  ;;  %v10845_v32 = vpop.f32.mrb[153].mxu1  ;;  %12882 = vst [vmem:[%s18241_s20 + $0x2e0] sm:$0xff] %v14724_v43  ;;  %v14917_v31 = vadd.f32 %v10393_v49, %v19671_v4  ;;  %v10395_v58 = vpop.f32.mrb[154].mxu0 }
 0x589   : > { %12883 = vst [vmem:[%s18241_s20 + $0x2e8] sm:$0xff] %v14725_v18  ;;  %v14949_v51 = vadd.f32 %v10845_v32, %v19675_v61  ;;  %v10847_v56 = vpop.f32.mrb[154].mxu1  ;;  %v11966_v15 = vmax.f32 %v14916_v34, 0.0  ;;  %v14918_v14 = vadd.f32 %v10395_v58, %v19663_v35  ;;  %v10397_v50 = vpop.f32.mrb[155].mxu0 }
 0x58a   : > { %v11968_v44 = vmax.f32 %v14948_v40, 0.0  ;;  %v14950_v17 = vadd.f32 %v10847_v56, %v19667_v30  ;;  %v10849_v39 = vpop.f32.mrb[155].mxu1  ;;  %v11967_v22 = vmax.f32 %v14917_v31, 0.0  ;;  %v14919_v6 = vadd.f32 %v10397_v50, %v19671_v4 }
 0x58b   : > { %v11969_v45 = vmax.f32 %v14949_v51, 0.0  ;;  %v14951_v2 = vadd.f32 %v10849_v39, %v19675_v61  ;;  %v11982_v60 = vmax.f32 %v14918_v14, 0.0  ;;  %11244 = vmatmul.mubr.bf16.gmra.mrb[164].mxu0 %v20744_v54 }
 0x58c   : > { %v11984_v28 = vmax.f32 %v14950_v17, 0.0  ;;  %11696 = vmatmul.mubr.bf16.gmra.mrb[164].mxu1 %v20744_v54  ;;  %v14732_v27 = vpack.c.bf16 %v11967_v22, %v11966_v15  ;;  %v11983_v20 = vmax.f32 %v14919_v6, 0.0  ;;  %11253 = vmatprep.mubr.bf16.mxu0 %v20745_v8 }
 0x58d   : > { %v14733_v1 = vpack.c.bf16 %v11969_v45, %v11968_v44  ;;  %v11985_v46 = vmax.f32 %v14951_v2, 0.0  ;;  %11705 = vmatprep.mubr.bf16.mxu1 %v20745_v8 }
 0x58e   : > { %12890 = vst [vmem:[%s18241_s20 + $0x320] sm:$0xff] %v14732_v27  ;;  %v14740_v26 = vpack.c.bf16 %v11983_v20, %v11982_v60  ;;  %v10401_v53 = vpop.f32.mrb[156].mxu0 }
 0x58f   : > { %12891 = vst [vmem:[%s18241_s20 + $0x328] sm:$0xff] %v14733_v1  ;;  %v14741_v29 = vpack.c.bf16 %v11985_v46, %v11984_v28  ;;  %v10853_v24 = vpop.f32.mrb[156].mxu1  ;;  %v14920_v48 = vadd.f32 %v10401_v53, %v19663_v35  ;;  %v10403_v52 = vpop.f32.mrb[157].mxu0 }
 0x590   : > { %v14952_v57 = vadd.f32 %v10853_v24, %v19667_v30  ;;  %v10855_v5 = vpop.f32.mrb[157].mxu1  ;;  %12898 = vst [vmem:[%s18241_s20 + $0x360] sm:$0xff] %v14740_v26  ;;  %v14921_v38 = vadd.f32 %v10403_v52, %v19671_v4  ;;  %v10405_v12 = vpop.f32.mrb[158].mxu0 }
 0x591   : > { %12899 = vst [vmem:[%s18241_s20 + $0x368] sm:$0xff] %v14741_v29  ;;  %v14953_v55 = vadd.f32 %v10855_v5, %v19675_v61  ;;  %v10857_v47 = vpop.f32.mrb[158].mxu1  ;;  %v11998_v10 = vmax.f32 %v14920_v48, 0.0  ;;  %v14922_v21 = vadd.f32 %v10405_v12, %v19663_v35  ;;  %v10407_v23 = vpop.f32.mrb[159].mxu0 }
 0x592   : > { %v12000_v19 = vmax.f32 %v14952_v57, 0.0  ;;  %v14954_v11 = vadd.f32 %v10857_v47, %v19667_v30  ;;  %v10859_v0 = vpop.f32.mrb[159].mxu1  ;;  %v11999_v43 = vmax.f32 %v14921_v38, 0.0  ;;  %v14923_v63 = vadd.f32 %v10407_v23, %v19671_v4 }
 0x593   : > { %v12001_v18 = vmax.f32 %v14953_v55, 0.0  ;;  %v14955_v25 = vadd.f32 %v10859_v0, %v19675_v61  ;;  %v12014_v34 = vmax.f32 %v14922_v21, 0.0  ;;  %11254 = vmatmul.mubr.bf16.gmra.mrb[168].mxu0 %v17499_v59 }
 0x594   : > { %v12016_v40 = vmax.f32 %v14954_v11, 0.0  ;;  %11706 = vmatmul.mubr.bf16.gmra.mrb[168].mxu1 %v17499_v59  ;;  %v14748_v35 = vpack.c.bf16 %v11999_v43, %v11998_v10  ;;  %v12015_v49 = vmax.f32 %v14923_v63, 0.0  ;;  %11263 = vmatprep.mubr.bf16.mxu0 %v17566_v16  ;;  %v20746_v59 = vld [vmem:[#allocation45_spill] sm:$0xff] }
 0x595   : > { %v14749_v30 = vpack.c.bf16 %v12001_v18, %v12000_v19  ;;  %v12017_v32 = vmax.f32 %v14955_v25, 0.0  ;;  %11715 = vmatprep.mubr.bf16.mxu1 %v17566_v16  ;;  %v20747_v16 = vld [vmem:[#allocation53_spill] sm:$0xff] }
 0x596   : > { %12906 = vst [vmem:[%s18241_s20 + $0x3a0] sm:$0xff] %v14748_v35  ;;  %v14756_v4 = vpack.c.bf16 %v12015_v49, %v12014_v34 }
 0x597   : > { %12907 = vst [vmem:[%s18241_s20 + $0x3a8] sm:$0xff] %v14749_v30  ;;  %v14757_v31 = vpack.c.bf16 %v12017_v32, %v12016_v40 }
 0x598   : > { %12914 = vst [vmem:[%s18241_s20 + $0x3e0] sm:$0xff] %v14756_v4 }
 0x599   : > { %12915 = vst [vmem:[%s18241_s20 + $0x3e8] sm:$0xff] %v14757_v31 }
 0x59b   : > { %11264 = vmatmul.mubr.bf16.gmra.mrb[172].mxu0 %v17559_v41 }
 0x59c   : > { %11716 = vmatmul.mubr.bf16.gmra.mrb[172].mxu1 %v17559_v41  ;;  %11273 = vmatprep.mubr.bf16.mxu0 %v17626_v36  ;;  %v20015_v41 = vrot.slane %v19645_v13, %v20746_v59 }
 0x59d   : > { %11725 = vmatprep.mubr.bf16.mxu1 %v17626_v36  ;;  %v20748_v36 = vld [vmem:[#allocation48_spill] sm:$0xff] }
 0x5a3   : > { %11274 = vmatmul.mubr.bf16.gmra.mrb[176].mxu0 %v17619_v7 }
 0x5a4   : > { %11726 = vmatmul.mubr.bf16.gmra.mrb[176].mxu1 %v17619_v7  ;;  %11283 = vmatprep.mubr.bf16.mxu0 %v17682_v62  ;;  %v20019_v7 = vrot.slane %v19645_v13, %v20747_v16 }
 0x5a5   : > { %11735 = vmatprep.mubr.bf16.mxu1 %v17682_v62  ;;  %v20749_v62 = vld [vmem:[#allocation54_spill] sm:$0xff] }
 0x5ab   : > { %11284 = vmatmul.mubr.bf16.gmra.mrb[180].mxu0 %v17675_v9 }
 0x5ac   : > { %11736 = vmatmul.mubr.bf16.gmra.mrb[180].mxu1 %v17675_v9  ;;  %11293 = vmatprep.mubr.bf16.mxu0 %v17712_v37  ;;  %v20023_v9 = vrot.slane %v19645_v13, %v20748_v36 }
 0x5ad   : > { %11745 = vmatprep.mubr.bf16.mxu1 %v17712_v37 }
 0x5b3   : > { %11294 = vmatmul.mubr.bf16.gmra.mrb[184].mxu0 %v17708_v42 }
 0x5b4   : > { %11746 = vmatmul.mubr.bf16.gmra.mrb[184].mxu1 %v17708_v42  ;;  %11303 = vmatprep.mubr.bf16.mxu0 %v17732_v3  ;;  %v20027_v42 = vrot.slane %v19645_v13, %v20749_v62 }
 0x5b5   : > { %11755 = vmatprep.mubr.bf16.mxu1 %v17732_v3 }
 0x5bb   : > { %11304 = vmatmul.mubr.bf16.gmra.mrb[188].mxu0 %v17728_v33 }
 0x5bc   : > { %11756 = vmatmul.mubr.bf16.gmra.mrb[188].mxu1 %v17728_v33 }
 0x656   : > { %v11235_v37 = vpop.f32.mrb[160].mxu0 }
 0x657   : > { %v11687_v3 = vpop.f32.mrb[160].mxu1  ;;  %v14956_v33 = vadd.f32 %v11235_v37, %v20015_v41  ;;  %v11237_v51 = vpop.f32.mrb[161].mxu0 }
 0x658   : > { %v14988_v61 = vadd.f32 %v11687_v3, %v20019_v7  ;;  %v11689_v58 = vpop.f32.mrb[161].mxu1  ;;  %v14957_v56 = vadd.f32 %v11237_v51, %v20023_v9  ;;  %v11239_v44 = vpop.f32.mrb[162].mxu0 }
 0x659   : > { %v14989_v15 = vadd.f32 %v11689_v58, %v20027_v42  ;;  %v11691_v14 = vpop.f32.mrb[162].mxu1  ;;  %v11778_v17 = vmax.f32 %v14956_v33, 0.0  ;;  %v14958_v13 = vadd.f32 %v11239_v44, %v20015_v41  ;;  %v11241_v22 = vpop.f32.mrb[163].mxu0 }
 0x65a   : > { %v11780_v50 = vmax.f32 %v14988_v61, 0.0  ;;  %v14990_v39 = vadd.f32 %v11691_v14, %v20019_v7  ;;  %v11693_v45 = vpop.f32.mrb[163].mxu1  ;;  %v11779_v6 = vmax.f32 %v14957_v56, 0.0  ;;  %v14959_v60 = vadd.f32 %v11241_v22, %v20023_v9 }
 0x65b   : > { %v11781_v2 = vmax.f32 %v14989_v15, 0.0  ;;  %v14991_v28 = vadd.f32 %v11693_v45, %v20027_v42  ;;  %v11794_v54 = vmax.f32 %v14958_v13, 0.0 }
 0x65c   : > { %v11796_v27 = vmax.f32 %v14990_v39, 0.0  ;;  %v14638_v1 = vpack.c.bf16 %v11779_v6, %v11778_v17  ;;  %v11795_v46 = vmax.f32 %v14959_v60, 0.0 }
 0x65d   : > { %v14639_v20 = vpack.c.bf16 %v11781_v2, %v11780_v50  ;;  %v11797_v8 = vmax.f32 %v14991_v28, 0.0 }
 0x65e   : > { %12796 = vst [vmem:[%s18241_s20 + $0x30] sm:$0xff] %v14638_v1  ;;  %v14646_v26 = vpack.c.bf16 %v11795_v46, %v11794_v54  ;;  %v11245_v53 = vpop.f32.mrb[164].mxu0 }
 0x65f   : > { %12797 = vst [vmem:[%s18241_s20 + $0x38] sm:$0xff] %v14639_v20  ;;  %v14647_v29 = vpack.c.bf16 %v11797_v8, %v11796_v27  ;;  %v11697_v24 = vpop.f32.mrb[164].mxu1  ;;  %v14960_v48 = vadd.f32 %v11245_v53, %v20015_v41  ;;  %v11247_v52 = vpop.f32.mrb[165].mxu0 }
 0x660   : > { %v14992_v57 = vadd.f32 %v11697_v24, %v20019_v7  ;;  %v11699_v5 = vpop.f32.mrb[165].mxu1  ;;  %12804 = vst [vmem:[%s18241_s20 + $0x70] sm:$0xff] %v14646_v26  ;;  %v14961_v38 = vadd.f32 %v11247_v52, %v20023_v9  ;;  %v11249_v12 = vpop.f32.mrb[166].mxu0 }
 0x661   : > { %12805 = vst [vmem:[%s18241_s20 + $0x78] sm:$0xff] %v14647_v29  ;;  %v14993_v55 = vadd.f32 %v11699_v5, %v20027_v42  ;;  %v11701_v47 = vpop.f32.mrb[166].mxu1  ;;  %v11810_v10 = vmax.f32 %v14960_v48, 0.0  ;;  %v14962_v21 = vadd.f32 %v11249_v12, %v20015_v41  ;;  %v11251_v23 = vpop.f32.mrb[167].mxu0 }
 0x662   : > { %v11812_v19 = vmax.f32 %v14992_v57, 0.0  ;;  %v14994_v11 = vadd.f32 %v11701_v47, %v20019_v7  ;;  %v11703_v0 = vpop.f32.mrb[167].mxu1  ;;  %v11811_v43 = vmax.f32 %v14961_v38, 0.0  ;;  %v14963_v63 = vadd.f32 %v11251_v23, %v20023_v9 }
 0x663   : > { %v11813_v18 = vmax.f32 %v14993_v55, 0.0  ;;  %v14995_v25 = vadd.f32 %v11703_v0, %v20027_v42  ;;  %v11826_v34 = vmax.f32 %v14962_v21, 0.0 }
 0x664   : > { %v11828_v40 = vmax.f32 %v14994_v11, 0.0  ;;  %v14654_v35 = vpack.c.bf16 %v11811_v43, %v11810_v10  ;;  %v11827_v49 = vmax.f32 %v14963_v63, 0.0 }
 0x665   : > { %v14655_v30 = vpack.c.bf16 %v11813_v18, %v11812_v19  ;;  %v11829_v32 = vmax.f32 %v14995_v25, 0.0 }
 0x666   : > { %12812 = vst [vmem:[%s18241_s20 + $0xb0] sm:$0xff] %v14654_v35  ;;  %v14662_v4 = vpack.c.bf16 %v11827_v49, %v11826_v34  ;;  %v11255_v59 = vpop.f32.mrb[168].mxu0 }
 0x667   : > { %12813 = vst [vmem:[%s18241_s20 + $0xb8] sm:$0xff] %v14655_v30  ;;  %v14663_v31 = vpack.c.bf16 %v11829_v32, %v11828_v40  ;;  %v11707_v16 = vpop.f32.mrb[168].mxu1  ;;  %v14964_v36 = vadd.f32 %v11255_v59, %v20015_v41  ;;  %v11257_v37 = vpop.f32.mrb[169].mxu0 }
 0x668   : > { %v14996_v62 = vadd.f32 %v11707_v16, %v20019_v7  ;;  %v11709_v3 = vpop.f32.mrb[169].mxu1  ;;  %12820 = vst [vmem:[%s18241_s20 + $0xf0] sm:$0xff] %v14662_v4  ;;  %v14965_v33 = vadd.f32 %v11257_v37, %v20023_v9  ;;  %v11259_v51 = vpop.f32.mrb[170].mxu0 }
 0x669   : > { %12821 = vst [vmem:[%s18241_s20 + $0xf8] sm:$0xff] %v14663_v31  ;;  %v14997_v61 = vadd.f32 %v11709_v3, %v20027_v42  ;;  %v11711_v58 = vpop.f32.mrb[170].mxu1  ;;  %v11842_v56 = vmax.f32 %v14964_v36, 0.0  ;;  %v14966_v44 = vadd.f32 %v11259_v51, %v20015_v41  ;;  %v11261_v17 = vpop.f32.mrb[171].mxu0 }
 0x66a   : > { %v11844_v15 = vmax.f32 %v14996_v62, 0.0  ;;  %v14998_v14 = vadd.f32 %v11711_v58, %v20019_v7  ;;  %v11713_v50 = vpop.f32.mrb[171].mxu1  ;;  %v11843_v13 = vmax.f32 %v14965_v33, 0.0  ;;  %v14967_v22 = vadd.f32 %v11261_v17, %v20023_v9 }
 0x66b   : > { %v11845_v39 = vmax.f32 %v14997_v61, 0.0  ;;  %v14999_v45 = vadd.f32 %v11713_v50, %v20027_v42  ;;  %v11858_v6 = vmax.f32 %v14966_v44, 0.0 }
 0x66c   : > { %v11860_v2 = vmax.f32 %v14998_v14, 0.0  ;;  %v14670_v60 = vpack.c.bf16 %v11843_v13, %v11842_v56  ;;  %v11859_v54 = vmax.f32 %v14967_v22, 0.0 }
 0x66d   : > { %v14671_v28 = vpack.c.bf16 %v11845_v39, %v11844_v15  ;;  %v11861_v27 = vmax.f32 %v14999_v45, 0.0 }
 0x66e   : > { %12828 = vst [vmem:[%s18241_s20 + $0x130] sm:$0xff] %v14670_v60  ;;  %v14678_v1 = vpack.c.bf16 %v11859_v54, %v11858_v6  ;;  %v11265_v46 = vpop.f32.mrb[172].mxu0 }
 0x66f   : > { %12829 = vst [vmem:[%s18241_s20 + $0x138] sm:$0xff] %v14671_v28  ;;  %v14679_v20 = vpack.c.bf16 %v11861_v27, %v11860_v2  ;;  %v11717_v8 = vpop.f32.mrb[172].mxu1  ;;  %v14968_v26 = vadd.f32 %v11265_v46, %v20015_v41  ;;  %v11267_v53 = vpop.f32.mrb[173].mxu0 }
 0x670   : > { %v15000_v29 = vadd.f32 %v11717_v8, %v20019_v7  ;;  %v11719_v24 = vpop.f32.mrb[173].mxu1  ;;  %12836 = vst [vmem:[%s18241_s20 + $0x170] sm:$0xff] %v14678_v1  ;;  %v14969_v48 = vadd.f32 %v11267_v53, %v20023_v9  ;;  %v11269_v52 = vpop.f32.mrb[174].mxu0 }
 0x671   : > { %12837 = vst [vmem:[%s18241_s20 + $0x178] sm:$0xff] %v14679_v20  ;;  %v15001_v57 = vadd.f32 %v11719_v24, %v20027_v42  ;;  %v11721_v5 = vpop.f32.mrb[174].mxu1  ;;  %v11874_v38 = vmax.f32 %v14968_v26, 0.0  ;;  %v14970_v12 = vadd.f32 %v11269_v52, %v20015_v41  ;;  %v11271_v10 = vpop.f32.mrb[175].mxu0 }
 0x672   : > { %v11876_v55 = vmax.f32 %v15000_v29, 0.0  ;;  %v15002_v47 = vadd.f32 %v11721_v5, %v20019_v7  ;;  %v11723_v19 = vpop.f32.mrb[175].mxu1  ;;  %v11875_v21 = vmax.f32 %v14969_v48, 0.0  ;;  %v14971_v23 = vadd.f32 %v11271_v10, %v20023_v9 }
 0x673   : > { %v11877_v11 = vmax.f32 %v15001_v57, 0.0  ;;  %v15003_v0 = vadd.f32 %v11723_v19, %v20027_v42  ;;  %v11890_v43 = vmax.f32 %v14970_v12, 0.0 }
 0x674   : > { %v11892_v18 = vmax.f32 %v15002_v47, 0.0  ;;  %v14686_v63 = vpack.c.bf16 %v11875_v21, %v11874_v38  ;;  %v11891_v34 = vmax.f32 %v14971_v23, 0.0 }
 0x675   : > { %v14687_v25 = vpack.c.bf16 %v11877_v11, %v11876_v55  ;;  %v11893_v40 = vmax.f32 %v15003_v0, 0.0 }
 0x676   : > { %12844 = vst [vmem:[%s18241_s20 + $0x1b0] sm:$0xff] %v14686_v63  ;;  %v14694_v35 = vpack.c.bf16 %v11891_v34, %v11890_v43  ;;  %v11275_v49 = vpop.f32.mrb[176].mxu0 }
 0x677   : > { %12845 = vst [vmem:[%s18241_s20 + $0x1b8] sm:$0xff] %v14687_v25  ;;  %v14695_v30 = vpack.c.bf16 %v11893_v40, %v11892_v18  ;;  %v11727_v32 = vpop.f32.mrb[176].mxu1  ;;  %v14972_v4 = vadd.f32 %v11275_v49, %v20015_v41  ;;  %v11277_v59 = vpop.f32.mrb[177].mxu0 }
 0x678   : > { %v15004_v31 = vadd.f32 %v11727_v32, %v20019_v7  ;;  %v11729_v16 = vpop.f32.mrb[177].mxu1  ;;  %12852 = vst [vmem:[%s18241_s20 + $0x1f0] sm:$0xff] %v14694_v35  ;;  %v14973_v36 = vadd.f32 %v11277_v59, %v20023_v9  ;;  %v11279_v37 = vpop.f32.mrb[178].mxu0 }
 0x679   : > { %12853 = vst [vmem:[%s18241_s20 + $0x1f8] sm:$0xff] %v14695_v30  ;;  %v15005_v62 = vadd.f32 %v11729_v16, %v20027_v42  ;;  %v11731_v3 = vpop.f32.mrb[178].mxu1  ;;  %v11906_v33 = vmax.f32 %v14972_v4, 0.0  ;;  %v14974_v51 = vadd.f32 %v11279_v37, %v20015_v41  ;;  %v11281_v56 = vpop.f32.mrb[179].mxu0 }
 0x67a   : > { %v11908_v61 = vmax.f32 %v15004_v31, 0.0  ;;  %v15006_v58 = vadd.f32 %v11731_v3, %v20019_v7  ;;  %v11733_v15 = vpop.f32.mrb[179].mxu1  ;;  %v11907_v44 = vmax.f32 %v14973_v36, 0.0  ;;  %v14975_v17 = vadd.f32 %v11281_v56, %v20023_v9 }
 0x67b   : > { %v11909_v14 = vmax.f32 %v15005_v62, 0.0  ;;  %v15007_v50 = vadd.f32 %v11733_v15, %v20027_v42  ;;  %v11922_v13 = vmax.f32 %v14974_v51, 0.0 }
 0x67c   : > { %v11924_v39 = vmax.f32 %v15006_v58, 0.0  ;;  %v14702_v22 = vpack.c.bf16 %v11907_v44, %v11906_v33  ;;  %v11923_v6 = vmax.f32 %v14975_v17, 0.0 }
 0x67d   : > { %v14703_v45 = vpack.c.bf16 %v11909_v14, %v11908_v61  ;;  %v11925_v2 = vmax.f32 %v15007_v50, 0.0 }
 0x67e   : > { %12860 = vst [vmem:[%s18241_s20 + $0x230] sm:$0xff] %v14702_v22  ;;  %v14710_v60 = vpack.c.bf16 %v11923_v6, %v11922_v13  ;;  %v11285_v54 = vpop.f32.mrb[180].mxu0 }
 0x67f   : > { %12861 = vst [vmem:[%s18241_s20 + $0x238] sm:$0xff] %v14703_v45  ;;  %v14711_v28 = vpack.c.bf16 %v11925_v2, %v11924_v39  ;;  %v11737_v27 = vpop.f32.mrb[180].mxu1  ;;  %v14976_v1 = vadd.f32 %v11285_v54, %v20015_v41  ;;  %v11287_v46 = vpop.f32.mrb[181].mxu0 }
 0x680   : > { %v15008_v20 = vadd.f32 %v11737_v27, %v20019_v7  ;;  %v11739_v8 = vpop.f32.mrb[181].mxu1  ;;  %12868 = vst [vmem:[%s18241_s20 + $0x270] sm:$0xff] %v14710_v60  ;;  %v14977_v26 = vadd.f32 %v11287_v46, %v20023_v9  ;;  %v11289_v53 = vpop.f32.mrb[182].mxu0 }
 0x681   : > { %12869 = vst [vmem:[%s18241_s20 + $0x278] sm:$0xff] %v14711_v28  ;;  %v15009_v29 = vadd.f32 %v11739_v8, %v20027_v42  ;;  %v11741_v24 = vpop.f32.mrb[182].mxu1  ;;  %v11938_v48 = vmax.f32 %v14976_v1, 0.0  ;;  %v14978_v52 = vadd.f32 %v11289_v53, %v20015_v41  ;;  %v11291_v38 = vpop.f32.mrb[183].mxu0 }
 0x682   : > { %v11940_v57 = vmax.f32 %v15008_v20, 0.0  ;;  %v15010_v5 = vadd.f32 %v11741_v24, %v20019_v7  ;;  %v11743_v55 = vpop.f32.mrb[183].mxu1  ;;  %v11939_v12 = vmax.f32 %v14977_v26, 0.0  ;;  %v14979_v10 = vadd.f32 %v11291_v38, %v20023_v9 }
 0x683   : > { %v11941_v47 = vmax.f32 %v15009_v29, 0.0  ;;  %v15011_v19 = vadd.f32 %v11743_v55, %v20027_v42  ;;  %v11954_v21 = vmax.f32 %v14978_v52, 0.0 }
 0x684   : > { %v11956_v11 = vmax.f32 %v15010_v5, 0.0  ;;  %v14718_v23 = vpack.c.bf16 %v11939_v12, %v11938_v48  ;;  %v11955_v43 = vmax.f32 %v14979_v10, 0.0 }
 0x685   : > { %v14719_v0 = vpack.c.bf16 %v11941_v47, %v11940_v57  ;;  %v11957_v18 = vmax.f32 %v15011_v19, 0.0 }
 0x686   : > { %12876 = vst [vmem:[%s18241_s20 + $0x2b0] sm:$0xff] %v14718_v23  ;;  %v14726_v63 = vpack.c.bf16 %v11955_v43, %v11954_v21  ;;  %v11295_v34 = vpop.f32.mrb[184].mxu0 }
 0x687   : > { %12877 = vst [vmem:[%s18241_s20 + $0x2b8] sm:$0xff] %v14719_v0  ;;  %v14727_v25 = vpack.c.bf16 %v11957_v18, %v11956_v11  ;;  %v11747_v40 = vpop.f32.mrb[184].mxu1  ;;  %v14980_v35 = vadd.f32 %v11295_v34, %v20015_v41  ;;  %v11297_v49 = vpop.f32.mrb[185].mxu0 }
 0x688   : > { %v15012_v30 = vadd.f32 %v11747_v40, %v20019_v7  ;;  %v11749_v32 = vpop.f32.mrb[185].mxu1  ;;  %12884 = vst [vmem:[%s18241_s20 + $0x2f0] sm:$0xff] %v14726_v63  ;;  %v14981_v4 = vadd.f32 %v11297_v49, %v20023_v9  ;;  %v11299_v59 = vpop.f32.mrb[186].mxu0 }
 0x689   : > { %12885 = vst [vmem:[%s18241_s20 + $0x2f8] sm:$0xff] %v14727_v25  ;;  %v15013_v31 = vadd.f32 %v11749_v32, %v20027_v42  ;;  %v11751_v16 = vpop.f32.mrb[186].mxu1  ;;  %v11970_v36 = vmax.f32 %v14980_v35, 0.0  ;;  %v14982_v37 = vadd.f32 %v11299_v59, %v20015_v41  ;;  %v11301_v33 = vpop.f32.mrb[187].mxu0 }
 0x68a   : > { %v11972_v62 = vmax.f32 %v15012_v30, 0.0  ;;  %v15014_v3 = vadd.f32 %v11751_v16, %v20019_v7  ;;  %v11753_v61 = vpop.f32.mrb[187].mxu1  ;;  %v11971_v51 = vmax.f32 %v14981_v4, 0.0  ;;  %v14983_v56 = vadd.f32 %v11301_v33, %v20023_v9 }
 0x68b   : > { %v11973_v58 = vmax.f32 %v15013_v31, 0.0  ;;  %v15015_v15 = vadd.f32 %v11753_v61, %v20027_v42  ;;  %v11986_v44 = vmax.f32 %v14982_v37, 0.0 }
 0x68c   : > { %v11988_v14 = vmax.f32 %v15014_v3, 0.0  ;;  %v14734_v17 = vpack.c.bf16 %v11971_v51, %v11970_v36  ;;  %v11987_v13 = vmax.f32 %v14983_v56, 0.0 }
 0x68d   : > { %v14735_v50 = vpack.c.bf16 %v11973_v58, %v11972_v62  ;;  %v11989_v39 = vmax.f32 %v15015_v15, 0.0 }
 0x68e   : > { %12892 = vst [vmem:[%s18241_s20 + $0x330] sm:$0xff] %v14734_v17  ;;  %v14742_v22 = vpack.c.bf16 %v11987_v13, %v11986_v44  ;;  %v11305_v6 = vpop.f32.mrb[188].mxu0 }
 0x68f   : > { %12893 = vst [vmem:[%s18241_s20 + $0x338] sm:$0xff] %v14735_v50  ;;  %v14743_v45 = vpack.c.bf16 %v11989_v39, %v11988_v14  ;;  %v11757_v2 = vpop.f32.mrb[188].mxu1  ;;  %v14984_v60 = vadd.f32 %v11305_v6, %v20015_v41  ;;  %v11307_v54 = vpop.f32.mrb[189].mxu0 }
 0x690   : > { %v15016_v28 = vadd.f32 %v11757_v2, %v20019_v7  ;;  %v11759_v27 = vpop.f32.mrb[189].mxu1  ;;  %12900 = vst [vmem:[%s18241_s20 + $0x370] sm:$0xff] %v14742_v22  ;;  %v14985_v1 = vadd.f32 %v11307_v54, %v20023_v9  ;;  %v11309_v46 = vpop.f32.mrb[190].mxu0 }
 0x691   : > { %12901 = vst [vmem:[%s18241_s20 + $0x378] sm:$0xff] %v14743_v45  ;;  %v15017_v20 = vadd.f32 %v11759_v27, %v20027_v42  ;;  %v11761_v8 = vpop.f32.mrb[190].mxu1  ;;  %v12002_v26 = vmax.f32 %v14984_v60, 0.0  ;;  %v14986_v53 = vadd.f32 %v11309_v46, %v20015_v41  ;;  %v11311_v48 = vpop.f32.mrb[191].mxu0 }
 0x692   : > { %v12004_v29 = vmax.f32 %v15016_v28, 0.0  ;;  %v15018_v24 = vadd.f32 %v11761_v8, %v20019_v7  ;;  %v11763_v57 = vpop.f32.mrb[191].mxu1  ;;  %v12003_v52 = vmax.f32 %v14985_v1, 0.0  ;;  %v14987_v38 = vadd.f32 %v11311_v48, %v20023_v9 }
 0x693   : > { %v12005_v5 = vmax.f32 %v15017_v20, 0.0  ;;  %v15019_v55 = vadd.f32 %v11763_v57, %v20027_v42  ;;  %v12018_v12 = vmax.f32 %v14986_v53, 0.0  ;;  %12924 = sbr.rel (!%p20750_p13) target bundleno = 1762 (0x6e2), region = 60 }
 0x694   : > { %v12020_v47 = vmax.f32 %v15018_v24, 0.0  ;;  %v14750_v10 = vpack.c.bf16 %v12003_v52, %v12002_v26  ;;  %v12019_v21 = vmax.f32 %v14987_v38, 0.0 }
 0x695   : > { %v14751_v19 = vpack.c.bf16 %v12005_v5, %v12004_v29  ;;  %v12021_v11 = vmax.f32 %v15019_v55, 0.0 }
 0x696   : > { %12908 = vst [vmem:[%s18241_s20 + $0x3b0] sm:$0xff] %v14750_v10  ;;  %v14758_v41 = vpack.c.bf16 %v12019_v21, %v12018_v12 }
 0x697   : > { %12909 = vst [vmem:[%s18241_s20 + $0x3b8] sm:$0xff] %v14751_v19  ;;  %v14759_v7 = vpack.c.bf16 %v12021_v11, %v12020_v47 }
 0x698   : > { %12916 = vst [vmem:[%s18241_s20 + $0x3f0] sm:$0xff] %v14758_v41 }
 0x699   : > { %12917 = vst [vmem:[%s18241_s20 + $0x3f8] sm:$0xff] %v14759_v7 }
 0x69a   : > { %s20780_s10 = smov (!%p12928_p4, %s12927_s10), 16 }
 0x69b   : > { %s14760_s27 = sshll.u32 %s20780_s10, 10 }
 0x69c   : > { %p14617_p7 = scmp.eq.s32.totalorder %s14760_s27, 0 }
 0x69d   : > { %s20139_s8 = sshrl.u32 (!%p14617_p7), %s20780_s10, 3 }
 0x69e   : > { %12939 = sbr.rel (%p14617_p7) target bundleno = 1762 (0x6e2), region = 64  ;;  %p14618_p6 = scmp.le.s32.totalorder (!%p14617_p7), %s20139_s8, 0 }
 0x6a5   : > { %13201 = sbr.rel (%p14618_p6) target bundleno = 1741 (0x6cd), region = 127  ;;  %s20753_s23 = smov (!%p14618_p6), %s20136_s15 }
 0x6a6   : > { %s20754_s19 = smov (!%p14618_p6), %s18241_s20  ;;  %s20148_s24 = smov (!%p14618_p6), 0  }
 0x6a7   : > { %s20150_s28 = smov (!%p14618_p6), 0  }
 0x6ac LB: >> { %v12952_v9 = vld [vmem:[%s16241_s19] sm:$0xff]  ;;  %s13080_s7 = sadd.s32 1, %s16245_s24  ;;  %v12968_v34 = vld [vmem:[%s16241_s19 + $0x8] sm:$0xff]  ;;  %v12984_v59 = vld [vmem:[%s16241_s19 + $0x10] sm:$0xff]  ;;  %s12946_s28 = sadd.s32 1, %s16249_s28   ;;  %s16249_s28 = sphi %s20150_s28, %s12946_s28   ;;  %s16245_s24 = sphi %s20148_s24, %s20757_s24   ;;  %s16241_s19 = sphi %s20754_s19, %s20756_s19   ;;  %s16237_s23 = sphi %s20753_s23, %s20755_s23  }
 0x6ad   : >> { %v12954_v42 = vld [vmem:[%s16241_s19 + $0x40] sm:$0xff]  ;;  %12953 = vst [vmem:[%s16237_s23] sm:$0xff] %v12952_v9  ;;  %p13081_p3 = scmp.ge.s32.totalorder %s13080_s7, %s20139_s8  ;;  %12969 = vst [vmem:[%s16237_s23 + $0x8] sm:$0xff] %v12968_v34  ;;  %v12970_v40 = vld [vmem:[%s16241_s19 + $0x48] sm:$0xff]  ;;  %p12945_p0 = scmp.ge.s32.totalorder %s12946_s28, %s20139_s8 }
 0x6ae   : >> { %v12956_v23 = vld [vmem:[%s16241_s19 + $0x80] sm:$0xff]  ;;  %12955 = vst [vmem:[%s16237_s23 + $0x80] sm:$0xff] %v12954_v42  ;;  %v12972_v35 = vld [vmem:[%s16241_s19 + $0x88] sm:$0xff]  ;;  %12971 = vst [vmem:[%s16237_s23 + $0x88] sm:$0xff] %v12970_v40 }
 0x6af   : >> { %12957 = vst [vmem:[%s16237_s23 + $0x100] sm:$0xff] %v12956_v23  ;;  %v12958_v0 = vld [vmem:[%s16241_s19 + $0xc0] sm:$0xff]  ;;  %v12974_v30 = vld [vmem:[%s16241_s19 + $0xc8] sm:$0xff]  ;;  %s20782_s7 = smov (%p13081_p3, %s13080_s7), 0  ;;  %12973 = vst [vmem:[%s16237_s23 + $0x108] sm:$0xff] %v12972_v35 }
 0x6b0   : >> { %v12960_v43 = vld [vmem:[%s16241_s19 + $0x100] sm:$0xff]  ;;  %12959 = vst [vmem:[%s16237_s23 + $0x180] sm:$0xff] %v12958_v0  ;;  %12975 = vst [vmem:[%s16237_s23 + $0x188] sm:$0xff] %v12974_v30  ;;  %v12976_v49 = vld [vmem:[%s16241_s19 + $0x108] sm:$0xff]  ;;  %s14619_s14 = sshll.u32 %s20782_s7, 9  ;;  %s14620_s11 = sshll.u32 %s20782_s7, 10 }
 0x6b1   : >> { %v12962_v18 = vld [vmem:[%s16241_s19 + $0x140] sm:$0xff]  ;;  %12961 = vst [vmem:[%s16237_s23 + $0x200] sm:$0xff] %v12960_v43  ;;  %v12978_v32 = vld [vmem:[%s16241_s19 + $0x148] sm:$0xff]  ;;  %12977 = vst [vmem:[%s16237_s23 + $0x208] sm:$0xff] %v12976_v49  ;;  %s20207_s17 = scalar_lea.vmem %s18241_s20, %s14619_s14 [#allocation8]   ;;  %s20210_s29 = scalar_lea.vmem %s20136_s15, %s14620_s11  }
 0x6b2   : >> { %12963 = vst [vmem:[%s16237_s23 + $0x280] sm:$0xff] %v12962_v18  ;;  %v12964_v63 = vld [vmem:[%s16241_s19 + $0x180] sm:$0xff]  ;;  %v12980_v4 = vld [vmem:[%s16241_s19 + $0x188] sm:$0xff]  ;;  %12979 = vst [vmem:[%s16237_s23 + $0x288] sm:$0xff] %v12978_v32  ;;  %s20757_s24 = smov %s20782_s7 }
 0x6b3   : >> { %v12966_v25 = vld [vmem:[%s16241_s19 + $0x1c0] sm:$0xff]  ;;  %12965 = vst [vmem:[%s16237_s23 + $0x300] sm:$0xff] %v12964_v63  ;;  %12981 = vst [vmem:[%s16237_s23 + $0x308] sm:$0xff] %v12980_v4  ;;  %v12982_v31 = vld [vmem:[%s16241_s19 + $0x1c8] sm:$0xff] }
 0x6b4   : >> { %12967 = vst [vmem:[%s16237_s23 + $0x380] sm:$0xff] %v12966_v25  ;;  %v12986_v16 = vld [vmem:[%s16241_s19 + $0x50] sm:$0xff]  ;;  %12983 = vst [vmem:[%s16237_s23 + $0x388] sm:$0xff] %v12982_v31  ;;  %v13000_v51 = vld [vmem:[%s16241_s19 + $0x18] sm:$0xff] }
 0x6b5   : >> { %12985 = vst [vmem:[%s16237_s23 + $0x10] sm:$0xff] %v12984_v59  ;;  %12987 = vst [vmem:[%s16237_s23 + $0x90] sm:$0xff] %v12986_v16  ;;  %v12988_v36 = vld [vmem:[%s16241_s19 + $0x90] sm:$0xff]  ;;  %v13002_v58 = vld [vmem:[%s16241_s19 + $0x58] sm:$0xff] }
 0x6b6   : >> { %v12990_v62 = vld [vmem:[%s16241_s19 + $0xd0] sm:$0xff]  ;;  %12989 = vst [vmem:[%s16237_s23 + $0x110] sm:$0xff] %v12988_v36  ;;  %v13004_v56 = vld [vmem:[%s16241_s19 + $0x98] sm:$0xff]  ;;  %13001 = vst [vmem:[%s16237_s23 + $0x18] sm:$0xff] %v13000_v51 }
 0x6b7   : >> { %v12992_v37 = vld [vmem:[%s16241_s19 + $0x110] sm:$0xff]  ;;  %12991 = vst [vmem:[%s16237_s23 + $0x190] sm:$0xff] %v12990_v62  ;;  %13003 = vst [vmem:[%s16237_s23 + $0x98] sm:$0xff] %v13002_v58  ;;  %v13006_v15 = vld [vmem:[%s16241_s19 + $0xd8] sm:$0xff] }
 0x6b8   : >> { %12993 = vst [vmem:[%s16237_s23 + $0x210] sm:$0xff] %v12992_v37  ;;  %v12994_v3 = vld [vmem:[%s16241_s19 + $0x150] sm:$0xff]  ;;  %13005 = vst [vmem:[%s16237_s23 + $0x118] sm:$0xff] %v13004_v56  ;;  %v13008_v44 = vld [vmem:[%s16241_s19 + $0x118] sm:$0xff] }
 0x6b9   : >> { %v12996_v33 = vld [vmem:[%s16241_s19 + $0x190] sm:$0xff]  ;;  %12995 = vst [vmem:[%s16237_s23 + $0x290] sm:$0xff] %v12994_v3  ;;  %v13010_v14 = vld [vmem:[%s16241_s19 + $0x158] sm:$0xff]  ;;  %13007 = vst [vmem:[%s16237_s23 + $0x198] sm:$0xff] %v13006_v15 }
 0x6ba   : >> { %v12998_v61 = vld [vmem:[%s16241_s19 + $0x1d0] sm:$0xff]  ;;  %12997 = vst [vmem:[%s16237_s23 + $0x310] sm:$0xff] %v12996_v33  ;;  %13009 = vst [vmem:[%s16237_s23 + $0x218] sm:$0xff] %v13008_v44  ;;  %v13012_v17 = vld [vmem:[%s16241_s19 + $0x198] sm:$0xff] }
 0x6bb   : >> { %12999 = vst [vmem:[%s16237_s23 + $0x390] sm:$0xff] %v12998_v61  ;;  %13011 = vst [vmem:[%s16237_s23 + $0x298] sm:$0xff] %v13010_v14  ;;  %v13014_v50 = vld [vmem:[%s16241_s19 + $0x1d8] sm:$0xff]  ;;  %v13016_v13 = vld [vmem:[%s16241_s19 + $0x20] sm:$0xff] }
 0x6bc   : >> { %13013 = vst [vmem:[%s16237_s23 + $0x318] sm:$0xff] %v13012_v17  ;;  %13015 = vst [vmem:[%s16237_s23 + $0x398] sm:$0xff] %v13014_v50  ;;  %v13018_v39 = vld [vmem:[%s16241_s19 + $0x60] sm:$0xff]  ;;  %v13032_v54 = vld [vmem:[%s16241_s19 + $0x28] sm:$0xff] }
 0x6bd   : >> { %13017 = vst [vmem:[%s16237_s23 + $0x20] sm:$0xff] %v13016_v13  ;;  %v13020_v22 = vld [vmem:[%s16241_s19 + $0xa0] sm:$0xff]  ;;  %13019 = vst [vmem:[%s16237_s23 + $0xa0] sm:$0xff] %v13018_v39  ;;  %v13034_v27 = vld [vmem:[%s16241_s19 + $0x68] sm:$0xff] }
 0x6be   : >> { %v13022_v45 = vld [vmem:[%s16241_s19 + $0xe0] sm:$0xff]  ;;  %13021 = vst [vmem:[%s16237_s23 + $0x120] sm:$0xff] %v13020_v22  ;;  %13033 = vst [vmem:[%s16237_s23 + $0x28] sm:$0xff] %v13032_v54  ;;  %v13036_v1 = vld [vmem:[%s16241_s19 + $0xa8] sm:$0xff] }
 0x6bf   : >> { %13023 = vst [vmem:[%s16237_s23 + $0x1a0] sm:$0xff] %v13022_v45  ;;  %v13024_v6 = vld [vmem:[%s16241_s19 + $0x120] sm:$0xff]  ;;  %13035 = vst [vmem:[%s16237_s23 + $0xa8] sm:$0xff] %v13034_v27  ;;  %v13038_v20 = vld [vmem:[%s16241_s19 + $0xe8] sm:$0xff] }
 0x6c0   : >> { %v13026_v2 = vld [vmem:[%s16241_s19 + $0x160] sm:$0xff]  ;;  %13025 = vst [vmem:[%s16237_s23 + $0x220] sm:$0xff] %v13024_v6  ;;  %v13040_v46 = vld [vmem:[%s16241_s19 + $0x128] sm:$0xff]  ;;  %13037 = vst [vmem:[%s16237_s23 + $0x128] sm:$0xff] %v13036_v1 }
 0x6c1   : >> { %v13028_v60 = vld [vmem:[%s16241_s19 + $0x1a0] sm:$0xff]  ;;  %13027 = vst [vmem:[%s16237_s23 + $0x2a0] sm:$0xff] %v13026_v2  ;;  %13039 = vst [vmem:[%s16237_s23 + $0x1a8] sm:$0xff] %v13038_v20  ;;  %v13042_v8 = vld [vmem:[%s16241_s19 + $0x168] sm:$0xff] }
 0x6c2   : >> { %13029 = vst [vmem:[%s16237_s23 + $0x320] sm:$0xff] %v13028_v60  ;;  %v13030_v28 = vld [vmem:[%s16241_s19 + $0x1e0] sm:$0xff]  ;;  %13041 = vst [vmem:[%s16237_s23 + $0x228] sm:$0xff] %v13040_v46  ;;  %v13044_v26 = vld [vmem:[%s16241_s19 + $0x1a8] sm:$0xff] }
 0x6c3   : >> { %13031 = vst [vmem:[%s16237_s23 + $0x3a0] sm:$0xff] %v13030_v28  ;;  %v13046_v29 = vld [vmem:[%s16241_s19 + $0x1e8] sm:$0xff]  ;;  %13043 = vst [vmem:[%s16237_s23 + $0x2a8] sm:$0xff] %v13042_v8  ;;  %v13048_v53 = vld [vmem:[%s16241_s19 + $0x30] sm:$0xff] }
 0x6c4   : >> { %13045 = vst [vmem:[%s16237_s23 + $0x328] sm:$0xff] %v13044_v26  ;;  %13047 = vst [vmem:[%s16237_s23 + $0x3a8] sm:$0xff] %v13046_v29  ;;  %v13050_v24 = vld [vmem:[%s16241_s19 + $0x70] sm:$0xff]  ;;  %v13064_v12 = vld [vmem:[%s16241_s19 + $0x38] sm:$0xff] }
 0x6c5   : >> { %v13052_v48 = vld [vmem:[%s16241_s19 + $0xb0] sm:$0xff]  ;;  %13049 = vst [vmem:[%s16237_s23 + $0x30] sm:$0xff] %v13048_v53  ;;  %13051 = vst [vmem:[%s16237_s23 + $0xb0] sm:$0xff] %v13050_v24  ;;  %v13066_v47 = vld [vmem:[%s16241_s19 + $0x78] sm:$0xff] }
 0x6c6   : >> { %13053 = vst [vmem:[%s16237_s23 + $0x130] sm:$0xff] %v13052_v48  ;;  %v13054_v57 = vld [vmem:[%s16241_s19 + $0xf0] sm:$0xff]  ;;  %13065 = vst [vmem:[%s16237_s23 + $0x38] sm:$0xff] %v13064_v12  ;;  %v13068_v10 = vld [vmem:[%s16241_s19 + $0xb8] sm:$0xff]  ;;  %12948 = sbr.rel (!%p12945_p0) target bundleno = 1708 (0x6ac), region = 133 }
 0x6c7   : >> { %v13056_v52 = vld [vmem:[%s16241_s19 + $0x130] sm:$0xff]  ;;  %13055 = vst [vmem:[%s16237_s23 + $0x1b0] sm:$0xff] %v13054_v57  ;;  %v13070_v19 = vld [vmem:[%s16241_s19 + $0xf8] sm:$0xff]  ;;  %13067 = vst [vmem:[%s16237_s23 + $0xb8] sm:$0xff] %v13066_v47 }
 0x6c8   : >> { %v13058_v5 = vld [vmem:[%s16241_s19 + $0x170] sm:$0xff]  ;;  %13057 = vst [vmem:[%s16237_s23 + $0x230] sm:$0xff] %v13056_v52  ;;  %13069 = vst [vmem:[%s16237_s23 + $0x138] sm:$0xff] %v13068_v10  ;;  %v13072_v21 = vld [vmem:[%s16241_s19 + $0x138] sm:$0xff] }
 0x6c9   : >> { %13059 = vst [vmem:[%s16237_s23 + $0x2b0] sm:$0xff] %v13058_v5  ;;  %v13060_v38 = vld [vmem:[%s16241_s19 + $0x1b0] sm:$0xff]  ;;  %13071 = vst [vmem:[%s16237_s23 + $0x1b8] sm:$0xff] %v13070_v19  ;;  %v13074_v11 = vld [vmem:[%s16241_s19 + $0x178] sm:$0xff] }
 0x6ca   : >> { %v13062_v55 = vld [vmem:[%s16241_s19 + $0x1f0] sm:$0xff]  ;;  %13061 = vst [vmem:[%s16237_s23 + $0x330] sm:$0xff] %v13060_v38  ;;  %v13076_v41 = vld [vmem:[%s16241_s19 + $0x1b8] sm:$0xff]  ;;  %13073 = vst [vmem:[%s16237_s23 + $0x238] sm:$0xff] %v13072_v21 }
 0x6cb   : >> { %13063 = vst [vmem:[%s16237_s23 + $0x3b0] sm:$0xff] %v13062_v55  ;;  %13075 = vst [vmem:[%s16237_s23 + $0x2b8] sm:$0xff] %v13074_v11  ;;  %v13078_v7 = vld [vmem:[%s16241_s19 + $0x1f8] sm:$0xff]  ;;  %s20756_s19 = smov %s20207_s17 }
 0x6cc   : >> { %13077 = vst [vmem:[%s16237_s23 + $0x338] sm:$0xff] %v13076_v41  ;;  %13079 = vst [vmem:[%s16237_s23 + $0x3b8] sm:$0xff] %v13078_v7  ;;  %s20755_s23 = smov %s20210_s29 }
 0x6cd PF: > { %s20315_s6 = sand.u32 7, %s20780_s10   ;;  %s14762_s12 = sshll.u32 %s20139_s8, 9 }
 0x6ce   : > { %s20319_s18 = scalar_lea.vmem %s18241_s20, %s14762_s12 [#allocation8]   ;;  %s14763_s25 = sshll.u32 %s20139_s8, 10 }
 0x6cf   : > { %s20323_s30 = scalar_lea.vmem %s20136_s15, %s14763_s25   ;;  %p14624_p10 = scmp.le.s32.totalorder %s20315_s6, 0 }
 0x6d0   : > { %s20758_s3 = smov (!%p14624_p10), %s20323_s30  ;;  %s20759_s5 = smov (!%p14624_p10), %s20319_s18 }
 0x6d1   : > { %13215 = sbr.rel (%p14624_p10) target bundleno = 1762 (0x6e2), region = 138  ;;  %s20332_s1 = smov (!%p14624_p10), 0  }
 0x6d2   : > { %s20334_s27 = smov (!%p14624_p10), 0  }
 0x6d8 LB: >> { %v13103_v9 = vld [vmem:[%s16257_s5] sm:$0xff]  ;;  %v13105_v42 = vld [vmem:[%s16257_s5 + $0x8] sm:$0xff]  ;;  %v13107_v23 = vld [vmem:[%s16257_s5 + $0x10] sm:$0xff]  ;;  %s13119_s20 = sadd.s32 1, %s16261_s1  ;;  %s13097_s27 = sadd.s32 1, %s16265_s27   ;;  %s16265_s27 = sphi %s20334_s27, %s13097_s27   ;;  %s16261_s1 = sphi %s20332_s1, %s20760_s1   ;;  %s16257_s5 = sphi %s20759_s5, %s13124_s5   ;;  %s16253_s3 = sphi %s20758_s3, %s13125_s3  }
 0x6d9   : >> { %13104 = vst [vmem:[%s16253_s3] sm:$0xff] %v13103_v9  ;;  %13106 = vst [vmem:[%s16253_s3 + $0x8] sm:$0xff] %v13105_v42  ;;  %v13109_v0 = vld [vmem:[%s16257_s5 + $0x18] sm:$0xff]  ;;  %v13111_v43 = vld [vmem:[%s16257_s5 + $0x20] sm:$0xff]  ;;  %p13120_p5 = scmp.ge.s32.totalorder %s13119_s20, %s20315_s6  ;;  %p13096_p11 = scmp.ge.s32.totalorder %s13097_s27, %s20315_s6 }
 0x6da   : >> { %13108 = vst [vmem:[%s16253_s3 + $0x10] sm:$0xff] %v13107_v23  ;;  %v13113_v18 = vld [vmem:[%s16257_s5 + $0x28] sm:$0xff]  ;;  %13110 = vst [vmem:[%s16253_s3 + $0x18] sm:$0xff] %v13109_v0  ;;  %v13115_v63 = vld [vmem:[%s16257_s5 + $0x30] sm:$0xff] }
 0x6db   : >> { %13112 = vst [vmem:[%s16253_s3 + $0x20] sm:$0xff] %v13111_v43  ;;  %13114 = vst [vmem:[%s16253_s3 + $0x28] sm:$0xff] %v13113_v18  ;;  %v13117_v25 = vld [vmem:[%s16257_s5 + $0x38] sm:$0xff]  ;;  %s20784_s20 = smov (%p13120_p5, %s13119_s20), 0  ;;  %13099 = sbr.rel (!%p13096_p11) target bundleno = 1752 (0x6d8), region = 144 }
 0x6dc   : >> { %13116 = vst [vmem:[%s16253_s3 + $0x30] sm:$0xff] %v13115_v63  ;;  %13118 = vst [vmem:[%s16253_s3 + $0x38] sm:$0xff] %v13117_v25  ;;  %s14625_s10 = sshll.u32 %s20784_s20, 6  ;;  %s14626_s13 = sshll.u32 %s20784_s20, 7 }
 0x6dd   : >> { %s13124_s5 = scalar_lea.vmem %s20319_s18, %s14625_s10 [#allocation8]   ;;  %s13125_s3 = scalar_lea.vmem %s20323_s30, %s14626_s13  }
 0x6de   : >> { %s20760_s1 = smov %s20784_s20 }
 0x6e2 PF: > { %s20761_s16 = sld [smem:[#allocation15_spill]]  ;;  %s20762_s18 = sld [smem:[#allocation12_spill]] }
 0x6e3   : > { %s20763_s19 = sld [smem:[#allocation19_spill]]  ;;  %s20764_s9 = sld [smem:[#allocation18_spill]] }
 0x6e4   : > { %s20765_s23 = sld [smem:[#allocation14_spill]]  ;;  %s20766_s25 = sld [smem:[#allocation16_spill]] }
 0x6e5   : > { %s20767_s15 = sld [smem:[#allocation17_spill]]  ;;  %s20768_s20 = smov %s16209_s21 }
 0x6e6   : > { %s20769_s21 = smov %s16213_s22  ;;  %s20771_s24 = smov %s16229_s26 }
 0x6e8   : > { %s17_s27 = sadd.s32 1, %s20761_s16  }
 0x6e9   : > { %p14_p1 = scmp.ge.s32.totalorder %s17_s27, 6   ;;  %s20770_s22 = smov %s20764_s9 }
 0x6eb   : > { %s20772_s26 = smov %s20767_s15  ;;  %16 = sbr.rel (!%p14_p1) target bundleno = 10 (0xa), region = 155 }
 0x6f2   :  { %13141 = vsyncpa [#allocation3], 1 }
 0x6f3   :  { %13143 = vsyncpa [#allocation3 + $0x1], 1 }
 0x6f4   :  { %13144 = vsyncpa [#allocation5], 1 }

</bundles_post_ra>
